<compile_context>
chip_gen: v6e
topology: v6e:2x2x1
jax: 0.10.0
libtpu: 0.0.40
codegen_flags: <defaults>
</compile_context>

<pallas_src>
import functools

import jax
import jax.numpy as jnp
from jax.experimental import pallas as pl
from jax.experimental.pallas import tpu as pltpu

COMPUTE_DTYPE = jnp.bfloat16          # hot-path activation / weight dtype
_VMEM_LIMIT = 32 * 1024 * 1024        # safe scoped-VMEM request on v5e / v6e / v7x


# ----------------------------------------------------------------------------
# Small helpers
# ----------------------------------------------------------------------------
def _round_up(x, m):
    return ((x + m - 1) // m) * m


def _pick_point_tile(n, target=1024):
    """Choose (tile, padded_N): tile is a multiple of 8, <= target, minimal padding."""
    n8 = _round_up(max(n, 8), 8)
    if n8 <= target:
        return n8, n8
    for cand in range(target, 255, -8):          # prefer an exact divisor (no padding)
        if n8 % cand == 0:
            return cand, n8
    best_tn, best_np = None, None                # otherwise accept minimal padding
    for cand in (target, target // 2, max(256, target // 4)):
        cand = max(256, _round_up(cand, 8))
        padded = _round_up(n8, cand)
        if best_np is None or padded < best_np:
            best_tn, best_np = cand, padded
    return best_tn, best_np


def _full_spec(shape):
    # Whole-array block (legal regardless of (8,128) alignment since block == array).
    n = len(shape)
    return pl.BlockSpec(shape, lambda: (0,) * n)


# ----------------------------------------------------------------------------
# Pallas kernels
# ----------------------------------------------------------------------------
def _chain_max_kernel(*refs, num_layers, final_relu):
    """Fused per-point conv chain + max over points.

    refs = (x_ref, w0, off0, ..., w_{L-1}, off_{L-1}, o_ref, acc_ref)
      x_ref  : (tn, 3)          point coordinates, channels-last
      w0     : (3, C0)          first layer -> 3 VPU broadcast FMAs (skips K=3 MXU)
      w_i    : (C_{i-1}, C_i)   mid layers: MXU matmul + folded-BN offset + ReLU
      w_last : (C, Cout)        last layer: RAW MXU matmul; offset (+ReLU) hoisted
                                past the max (both monotone) into the finalize step
      o_ref  : (1, Cout)        per-batch-row output, written only at the last step
      acc_ref: (8, Cout) f32    VMEM-resident running max (elementwise VPU maxima)
    """
    x_ref = refs[0]
    o_ref = refs[1 + 2 * num_layers]
    acc_ref = refs[2 + 2 * num_layers]
    n_idx = pl.program_id(1)

    @pl.when(n_idx == 0)
    def _init():
        acc_ref[...] = jnp.full(acc_ref.shape, -jnp.inf, dtype=jnp.float32)

    # --- layer 0 (Cin == 3): three broadcast multiply-adds on the VPU ---
    x = x_ref[...]                                    # (tn, 3) f32
    w0 = refs[1][...]                                 # (3, C0)
    off0 = refs[2][...]                               # (1, C0)
    h = (x[:, 0:1] * w0[0:1, :]
         + x[:, 1:2] * w0[1:2, :]
         + x[:, 2:3] * w0[2:3, :]) + off0
    h = jnp.maximum(h, 0.0).astype(COMPUTE_DTYPE)

    # --- mid layers: MXU matmul + folded-BN offset + ReLU ---
    for l in range(1, num_layers - 1):
        w = refs[1 + 2 * l][...]
        off = refs[2 + 2 * l][...]
        h = jnp.dot(h, w, preferred_element_type=jnp.float32) + off
        h = jnp.maximum(h, 0.0).astype(COMPUTE_DTYPE)

    # --- last layer: raw matmul, fold into the running max (epilogue hoisted) ---
    w_last = refs[1 + 2 * (num_layers - 1)][...]
    y = jnp.dot(h, w_last, preferred_element_type=jnp.float32)   # (tn, Cout) f32

    tn = y.shape[0]
    acc = acc_ref[...]
    for r in range(tn // 8):                  # pure elementwise (VPU) maxima
        acc = jnp.maximum(acc, y[8 * r:8 * (r + 1), :])
    acc_ref[...] = acc

    @pl.when(n_idx == pl.num_programs(1) - 1)
    def _finalize():
        off_last = refs[2 + 2 * (num_layers - 1)][...]            # (1, Cout)
        g = jnp.max(acc_ref[...], axis=0, keepdims=True) + off_last
        if final_relu:
            g = jnp.maximum(g, 0.0)
        o_ref[...] = g.astype(o_ref.dtype)


def _stn_head_kernel(g_ref, w1_ref, o1_ref, w2_ref, o2_ref, w3_ref, o3_ref, out_ref):
    # fc1+bn4+relu -> fc2+bn5+relu -> fc3 (+identity folded into o3), bf16 MXU,
    # f32 accumulation, all resident in VMEM.
    h = g_ref[...].astype(COMPUTE_DTYPE)
    h = jnp.dot(h, w1_ref[...], preferred_element_type=jnp.float32) + o1_ref[...]
    h = jnp.maximum(h, 0.0).astype(COMPUTE_DTYPE)
    h = jnp.dot(h, w2_ref[...], preferred_element_type=jnp.float32) + o2_ref[...]
    h = jnp.maximum(h, 0.0).astype(COMPUTE_DTYPE)
    h = jnp.dot(h, w3_ref[...], preferred_element_type=jnp.float32) + o3_ref[...]
    out_ref[...] = h


# ----------------------------------------------------------------------------
# pallas_call wrappers
# ----------------------------------------------------------------------------
def fused_chain_max(xt, layers, *, tn, final_relu):
    """Fused conv chain + max-over-points.

    xt: (B, Np, 3) f32 (Np a multiple of tn).
    layers: list of (w, off); w is (Cin, Cout) shared or (B, Cin, Cout) per-batch.
    Returns (B, Cout) float32.
    """
    B, Np, cin = xt.shape
    assert Np % tn == 0 and tn % 8 == 0
    num_layers = len(layers)
    cout = layers[-1][0].shape[-1]

    args = [xt]
    in_specs = [pl.BlockSpec((None, tn, cin), lambda b, n: (b, n, 0))]
    for w, off in layers:
        if w.ndim == 3:                               # per-batch (STN-folded) weight
            in_specs.append(pl.BlockSpec((None,) + w.shape[1:], lambda b, n: (b, 0, 0)))
        else:                                         # shared weight
            in_specs.append(pl.BlockSpec(w.shape, lambda b, n: (0, 0)))
        in_specs.append(pl.BlockSpec(off.shape, lambda b, n: (0, 0)))
        args += [w, off]

    out = pl.pallas_call(
        functools.partial(_chain_max_kernel,
                          num_layers=num_layers, final_relu=final_relu),
        out_shape=jax.ShapeDtypeStruct((B, 1, cout), jnp.float32),
        grid=(B, Np // tn),                           # reduction axis last
        in_specs=in_specs,
        out_specs=pl.BlockSpec((None, 1, cout), lambda b, n: (b, 0, 0)),
        scratch_shapes=[pltpu.VMEM((8, cout), jnp.float32)],
        compiler_params=pltpu.CompilerParams(
            dimension_semantics=("parallel", "arbitrary"),
            vmem_limit_bytes=_VMEM_LIMIT,
        ),
    )(*args)
    return out.reshape(B, cout)


def stn_fc_head(g, p):
    """Fused STN fc head: fc1+bn4+relu -> fc2+bn5+relu -> fc3 (+identity)."""
    B = g.shape[0]
    kk = p["fc3_w"].shape[1]
    args = (g, p["fc1_w"], p["fc1_off"], p["fc2_w"], p["fc2_off"],
            p["fc3_w"], p["fc3_off"])
    return pl.pallas_call(
        _stn_head_kernel,
        out_shape=jax.ShapeDtypeStruct((B, kk), jnp.float32),
        in_specs=[_full_spec(a.shape) for a in args],
        out_specs=_full_spec((B, kk)),
        compiler_params=pltpu.CompilerParams(vmem_limit_bytes=_VMEM_LIMIT),
    )(*args)


# ----------------------------------------------------------------------------
# Parameter construction (deterministic, synthetic) + BN / bias folding
# ----------------------------------------------------------------------------
def _bn_params(key, c, eps=1e-5):
    k1, k2, k3, k4 = jax.random.split(key, 4)
    gamma = 1.0 + 0.1 * jax.random.normal(k1, (c,), jnp.float32)
    beta = 0.1 * jax.random.normal(k2, (c,), jnp.float32)
    running_mean = 0.1 * jax.random.normal(k3, (c,), jnp.float32)
    running_var = 1.0 + 0.1 * jnp.abs(jax.random.normal(k4, (c,), jnp.float32))
    scale = gamma / jnp.sqrt(running_var + eps)
    shift = beta - running_mean * scale
    return scale, shift


def _linear_params(key, cin, cout):
    k1, k2 = jax.random.split(key)
    w = 0.1 * jax.random.normal(k1, (cout, cin), jnp.float32)  # torch (out, in) layout
    b = 0.1 * jax.random.normal(k2, (cout,), jnp.float32)
    return w, b


def _fold_conv_bn(conv, bn, dtype):
    """(w,b) + inference-BN -> pre-transposed (Cin,Cout) weight and (1,Cout) offset."""
    (w, b), (scale, shift) = conv, bn
    w_f = (w.T * scale[None, :]).astype(dtype)
    off = (b * scale + shift).reshape(1, -1).astype(jnp.float32)
    return w_f, off


def init_stn_params(key, k):
    keys = jax.random.split(key, 11)
    conv1 = _linear_params(keys[0], k, 64)
    conv2 = _linear_params(keys[1], 64, 128)
    conv3 = _linear_params(keys[2], 128, 1024)
    fc1 = _linear_params(keys[3], 1024, 512)
    fc2 = _linear_params(keys[4], 512, 256)
    fc3 = _linear_params(keys[5], 256, k * k)
    bn1 = _bn_params(keys[6], 64)
    bn2 = _bn_params(keys[7], 128)
    bn3 = _bn_params(keys[8], 1024)
    bn4 = _bn_params(keys[9], 512)
    bn5 = _bn_params(keys[10], 256)

    p = {}
    # k==3 conv1 is the VPU (broadcast-FMA) layer in the fused chain -> keep f32.
    conv1_dtype = jnp.float32 if k == 3 else COMPUTE_DTYPE
    p["conv1_w"], p["conv1_off"] = _fold_conv_bn(conv1, bn1, conv1_dtype)
    p["conv2_w"], p["conv2_off"] = _fold_conv_bn(conv2, bn2, COMPUTE_DTYPE)
    p["conv3_w"], p["conv3_off"] = _fold_conv_bn(conv3, bn3, COMPUTE_DTYPE)
    # fc head runs bf16 MXU matmuls with f32 accumulation.
    p["fc1_w"], p["fc1_off"] = _fold_conv_bn(fc1, bn4, COMPUTE_DTYPE)
    p["fc2_w"], p["fc2_off"] = _fold_conv_bn(fc2, bn5, COMPUTE_DTYPE)
    w3, b3 = fc3
    p["fc3_w"] = w3.T.astype(COMPUTE_DTYPE)
    # Fold STNkd's "+ identity" into the fc3 offset (same constant for every row).
    p["fc3_off"] = (b3 + jnp.eye(k, dtype=jnp.float32).reshape(-1)).reshape(1, -1)
    return p


def init_encoder_params(key, channel=3):
    keys = jax.random.split(key, 8)
    p = {
        "stn3d": init_stn_params(keys[0], 3),
        "stn_feat": init_stn_params(keys[1], 64),
    }
    conv1 = _linear_params(keys[2], channel, 64)
    conv2 = _linear_params(keys[3], 64, 128)
    conv3 = _linear_params(keys[4], 128, 1024)
    bn1 = _bn_params(keys[5], 64)
    bn2 = _bn_params(keys[6], 128)
    bn3 = _bn_params(keys[7], 1024)
    # conv1 / conv2 stay f32: they are folded with the per-batch STN transforms at
    # forward time ((x @ T) @ W == x @ (T @ W)); conv2 is cast to bf16 after the fold.
    p["conv1_w"], p["conv1_off"] = _fold_conv_bn(conv1, bn1, jnp.float32)
    p["conv2_w"], p["conv2_off"] = _fold_conv_bn(conv2, bn2, jnp.float32)
    p["conv3_w"], p["conv3_off"] = _fold_conv_bn(conv3, bn3, COMPUTE_DTYPE)
    return p


# ----------------------------------------------------------------------------
# Forward pass (glue in JAX, hot path in the fused Pallas chains)
# ----------------------------------------------------------------------------
def _stn_chain_layers(stn):
    return [(stn["conv1_w"], stn["conv1_off"]),
            (stn["conv2_w"], stn["conv2_off"]),
            (stn["conv3_w"], stn["conv3_off"])]


def pointnet_encoder(x_bcn, p, *, tn_target=1024):
    """PointNetEncoder forward (global_feat=True, feature_transform=True, channel=3).

    Input follows the PyTorch layout (B, C, N).
    Returns (global_feature (B,1024), trans_matrix (B,3,3), trans_feature (B,64,64)).
    """
    B, C, N = x_bcn.shape
    if C != 3:
        # TODO(synk): dimension>3 branch (split extra per-point features before the
        #             3x3 alignment and re-concatenate) is not implemented.
        raise NotImplementedError("only channel=3 is supported")

    # One boundary transpose to channels-last (input is tiny vs. activations; the
    # big activation round trips are already fused away).
    xt = jnp.transpose(x_bcn, (0, 2, 1)).astype(jnp.float32)       # (B, N, 3)

    tn, np_ = _pick_point_tile(N, tn_target)
    if np_ != N:
        # Pad by repeating point 0: duplicates never change a max-pooled feature.
        pad = jnp.broadcast_to(xt[:, :1, :], (B, np_ - N, 3))
        xt = jnp.concatenate([xt, pad], axis=1)

    stn3 = p["stn3d"]
    stnf = p["stn_feat"]

    # ---- STN3d: conv1 -> conv2 -> conv3+relu -> max, fully fused ---------------
    g3 = fused_chain_max(xt, _stn_chain_layers(stn3), tn=tn, final_relu=True)
    trans = stn_fc_head(g3, stn3).reshape(B, 3, 3)                 # (B, 3, 3)

    # Fold the 3x3 input alignment into encoder conv1 (tiny einsum left to XLA).
    w1b = jnp.einsum("bij,jk->bik", trans, p["conv1_w"])           # (B, 3, 64) f32

    # ---- STN_feat: recompute h1 = relu(x@w1b+off1) in-kernel, then the 64-STN chain
    # (h1 never touches HBM).
    gf = fused_chain_max(
        xt,
        [(w1b, p["conv1_off"])] + _stn_chain_layers(stnf),
        tn=tn, final_relu=True)
    trans_feat = stn_fc_head(gf, stnf).reshape(B, 64, 64)          # (B, 64, 64)

    # Fold the 64x64 feature alignment into conv2.
    w2b = jnp.einsum("bij,jk->bik", trans_feat, p["conv2_w"]).astype(COMPUTE_DTYPE)

    # ---- Main path: conv1(fold) -> conv2(fold) -> conv3+bn3 (no relu) -> max ----
    g = fused_chain_max(
        xt,
        [(w1b, p["conv1_off"]),
         (w2b, p["conv2_off"]),
         (p["conv3_w"], p["conv3_off"])],
        tn=tn, final_relu=False)                                   # (B, 1024)

    # TODO(synk): global_feat=False branch (repeat g over N and concat with the
    #             per-point features) is not implemented (module default is True).
    return g, trans, trans_feat


# ----------------------------------------------------------------------------
if __name__ == "__main__":
    key = jax.random.PRNGKey(0)
    k_params, k_x = jax.random.split(key)
    params = init_encoder_params(k_params, channel=3)

    B, C, N = 2, 3, 128  # small point cloud: 2 clouds, xyz, 128 points
    x = jax.random.normal(k_x, (B, C, N), jnp.float32)

    fwd = jax.jit(pointnet_encoder)
    g, trans, trans_feat = fwd(x, params)
    jax.block_until_ready((g, trans, trans_feat))

    assert g.shape == (B, 1024) and g.dtype == jnp.float32
    assert trans.shape == (B, 3, 3)
    assert trans_feat.shape == (B, 64, 64)
    assert bool(jnp.all(jnp.isfinite(g)))
    assert bool(jnp.all(jnp.isfinite(trans)))
    assert bool(jnp.all(jnp.isfinite(trans_feat)))

    print("KERNEL_OK")
</pallas_src>

<mosaic_0001>
module attributes {stable_mosaic.version = 11 : i64} {
  func.func @_stn_head_kernel(%arg0: memref<2x1024xf32, #tpu.memory_space<vmem>>, %arg1: memref<1024x512xbf16, #tpu.memory_space<vmem>>, %arg2: memref<1x512xf32, #tpu.memory_space<vmem>>, %arg3: memref<512x256xbf16, #tpu.memory_space<vmem>>, %arg4: memref<1x256xf32, #tpu.memory_space<vmem>>, %arg5: memref<256x9xbf16, #tpu.memory_space<vmem>>, %arg6: memref<1x9xf32, #tpu.memory_space<vmem>>, %arg7: memref<2x9xf32, #tpu.memory_space<vmem>>) attributes {dimension_semantics = [], scalar_prefetch = 0 : i64, scratch_operands = 0 : i64, tpu.core_type = #tpu.core_type<tc>} {
    %c0 = arith.constant 0 : index
    %c0_0 = arith.constant 0 : index
    %0 = vector.load %arg0[%c0, %c0_0] : memref<2x1024xf32, #tpu.memory_space<vmem>>, vector<2x1024xf32>
    %1 = arith.truncf %0 : vector<2x1024xf32> to vector<2x1024xbf16>
    %c0_1 = arith.constant 0 : index
    %c0_2 = arith.constant 0 : index
    %2 = vector.load %arg1[%c0_1, %c0_2] : memref<1024x512xbf16, #tpu.memory_space<vmem>>, vector<1024x512xbf16>
    %cst = arith.constant dense<0.000000e+00> : vector<2x512xf32>
    %3 = tpu.matmul %1, %2, %cst {dimension_numbers = #tpu.dot_dimension_numbers<[1], [0], [0], [1], [0, 0, 1, 1], [], []>} : vector<2x1024xbf16>, vector<1024x512xbf16>, vector<2x512xf32> -> vector<2x512xf32>
    %c0_3 = arith.constant 0 : index
    %c0_4 = arith.constant 0 : index
    %4 = vector.load %arg2[%c0_3, %c0_4] : memref<1x512xf32, #tpu.memory_space<vmem>>, vector<1x512xf32>
    %5 = vector.broadcast %4 : vector<1x512xf32> to vector<2x512xf32>
    %6 = arith.addf %3, %5 : vector<2x512xf32>
    %cst_5 = arith.constant 0.000000e+00 : f32
    %7 = vector.broadcast %cst_5 : f32 to vector<2x512xf32>
    %8 = arith.maximumf %6, %7 : vector<2x512xf32>
    %9 = arith.truncf %8 : vector<2x512xf32> to vector<2x512xbf16>
    %c0_6 = arith.constant 0 : index
    %c0_7 = arith.constant 0 : index
    %10 = vector.load %arg3[%c0_6, %c0_7] : memref<512x256xbf16, #tpu.memory_space<vmem>>, vector<512x256xbf16>
    %cst_8 = arith.constant dense<0.000000e+00> : vector<2x256xf32>
    %11 = tpu.matmul %9, %10, %cst_8 {dimension_numbers = #tpu.dot_dimension_numbers<[1], [0], [0], [1], [0, 0, 1, 1], [], []>} : vector<2x512xbf16>, vector<512x256xbf16>, vector<2x256xf32> -> vector<2x256xf32>
    %c0_9 = arith.constant 0 : index
    %c0_10 = arith.constant 0 : index
    %12 = vector.load %arg4[%c0_9, %c0_10] : memref<1x256xf32, #tpu.memory_space<vmem>>, vector<1x256xf32>
    %13 = vector.broadcast %12 : vector<1x256xf32> to vector<2x256xf32>
    %14 = arith.addf %11, %13 : vector<2x256xf32>
    %cst_11 = arith.constant 0.000000e+00 : f32
    %15 = vector.broadcast %cst_11 : f32 to vector<2x256xf32>
    %16 = arith.maximumf %14, %15 : vector<2x256xf32>
    %17 = arith.truncf %16 : vector<2x256xf32> to vector<2x256xbf16>
    %c0_12 = arith.constant 0 : index
    %c0_13 = arith.constant 0 : index
    %18 = vector.load %arg5[%c0_12, %c0_13] : memref<256x9xbf16, #tpu.memory_space<vmem>>, vector<256x9xbf16>
    %cst_14 = arith.constant dense<0.000000e+00> : vector<2x9xf32>
    %19 = tpu.matmul %17, %18, %cst_14 {dimension_numbers = #tpu.dot_dimension_numbers<[1], [0], [0], [1], [0, 0, 1, 1], [], []>} : vector<2x256xbf16>, vector<256x9xbf16>, vector<2x9xf32> -> vector<2x9xf32>
    %c0_15 = arith.constant 0 : index
    %c0_16 = arith.constant 0 : index
    %20 = vector.load %arg6[%c0_15, %c0_16] : memref<1x9xf32, #tpu.memory_space<vmem>>, vector<1x9xf32>
    %21 = vector.broadcast %20 : vector<1x9xf32> to vector<2x9xf32>
    %22 = arith.addf %19, %21 : vector<2x9xf32>
    %c0_17 = arith.constant 0 : index
    %c0_18 = arith.constant 0 : index
    %23 = vector.load %arg7[%c0_17, %c0_18] : memref<2x9xf32, #tpu.memory_space<vmem>>, vector<2x9xf32>
    tpu.vector_store %arg7[%c0_17, %c0_18], %22 {strides = array<i32>} : memref<2x9xf32, #tpu.memory_space<vmem>>, vector<2x9xf32>,
    return
  }
}

module attributes {stable_mosaic.version = 11 : i64} {
  func.func @_chain_max_kernel(%arg0: i32, %arg1: i32, %arg2: memref<1x128x3xf32, #tpu.memory_space<vmem>>, %arg3: memref<3x64xf32, #tpu.memory_space<vmem>>, %arg4: memref<1x64xf32, #tpu.memory_space<vmem>>, %arg5: memref<64x128xbf16, #tpu.memory_space<vmem>>, %arg6: memref<1x128xf32, #tpu.memory_space<vmem>>, %arg7: memref<128x1024xbf16, #tpu.memory_space<vmem>>, %arg8: memref<1x1024xf32, #tpu.memory_space<vmem>>, %arg9: memref<1x1x1024xf32, #tpu.memory_space<vmem>>, %arg10: memref<8x1024xf32, #tpu.memory_space<vmem>>) attributes {dimension_semantics = [#tpu.dimension_semantics<parallel>, #tpu.dimension_semantics<arbitrary>], iteration_bounds = array<i64: 2, 1>, scalar_prefetch = 0 : i64, scratch_operands = 1 : i64, tpu.core_type = #tpu.core_type<tc>, window_params = [{transform_indices = @transform_0, window_bounds = array<i64: 1, 128, 3>}, {pipeline_mode = #tpu.pipeline_mode<synchronous>, transform_indices = @transform_1, window_bounds = array<i64: 3, 64>}, {pipeline_mode = #tpu.pipeline_mode<synchronous>, transform_indices = @transform_2, window_bounds = array<i64: 1, 64>}, {pipeline_mode = #tpu.pipeline_mode<synchronous>, transform_indices = @transform_3, window_bounds = array<i64: 64, 128>}, {pipeline_mode = #tpu.pipeline_mode<synchronous>, transform_indices = @transform_4, window_bounds = array<i64: 1, 128>}, {pipeline_mode = #tpu.pipeline_mode<synchronous>, transform_indices = @transform_5, window_bounds = array<i64: 128, 1024>}, {pipeline_mode = #tpu.pipeline_mode<synchronous>, transform_indices = @transform_6, window_bounds = array<i64: 1, 1024>}, {transform_indices = @transform_7, window_bounds = array<i64: 1, 1, 1024>}]} {
    %c0_i32 = arith.constant 0 : i32
    %0 = arith.cmpi eq, %arg1, %c0_i32 : i32
    %1 = arith.extui %0 : i1 to i32
    %c0_i32_0 = arith.constant 0 : i32
    %2 = arith.cmpi ne, %1, %c0_i32_0 : i32
    scf.if %2 {
      %cst_22 = arith.constant 0xFF800000 : f32
      %76 = vector.broadcast %cst_22 : f32 to vector<8x1024xf32>
      %c0_23 = arith.constant 0 : index
      %c0_24 = arith.constant 0 : index
      %77 = vector.load %arg10[%c0_23, %c0_24] : memref<8x1024xf32, #tpu.memory_space<vmem>>, vector<8x1024xf32>
      tpu.vector_store %arg10[%c0_23, %c0_24], %76 {strides = array<i32>} : memref<8x1024xf32, #tpu.memory_space<vmem>>, vector<8x1024xf32>,
    } else {
    }
    %c0 = arith.constant 0 : index
    %c0_1 = arith.constant 0 : index
    %c0_2 = arith.constant 0 : index
    %3 = vector.load %arg2[%c0, %c0_1, %c0_2] : memref<1x128x3xf32, #tpu.memory_space<vmem>>, vector<1x128x3xf32>
    %4 = vector.shape_cast %3 : vector<1x128x3xf32> to vector<128x3xf32>
    %c0_3 = arith.constant 0 : index
    %c0_4 = arith.constant 0 : index
    %5 = vector.load %arg3[%c0_3, %c0_4] : memref<3x64xf32, #tpu.memory_space<vmem>>, vector<3x64xf32>
    %c0_5 = arith.constant 0 : index
    %c0_6 = arith.constant 0 : index
    %6 = vector.load %arg4[%c0_5, %c0_6] : memref<1x64xf32, #tpu.memory_space<vmem>>, vector<1x64xf32>
    %7 = vector.extract_strided_slice %4 {offsets = [0, 0], sizes = [128, 1], strides = [1, 1]} : vector<128x3xf32> to vector<128x1xf32>
    %8 = vector.extract_strided_slice %5 {offsets = [0, 0], sizes = [1, 64], strides = [1, 1]} : vector<3x64xf32> to vector<1x64xf32>
    %9 = vector.broadcast %7 : vector<128x1xf32> to vector<128x64xf32>
    %10 = vector.broadcast %8 : vector<1x64xf32> to vector<128x64xf32>
    %11 = arith.mulf %9, %10 : vector<128x64xf32>
    %12 = vector.extract_strided_slice %4 {offsets = [0, 1], sizes = [128, 1], strides = [1, 1]} : vector<128x3xf32> to vector<128x1xf32>
    %13 = vector.extract_strided_slice %5 {offsets = [1, 0], sizes = [1, 64], strides = [1, 1]} : vector<3x64xf32> to vector<1x64xf32>
    %14 = vector.broadcast %12 : vector<128x1xf32> to vector<128x64xf32>
    %15 = vector.broadcast %13 : vector<1x64xf32> to vector<128x64xf32>
    %16 = arith.mulf %14, %15 : vector<128x64xf32>
    %17 = arith.addf %11, %16 : vector<128x64xf32>
    %18 = vector.extract_strided_slice %4 {offsets = [0, 2], sizes = [128, 1], strides = [1, 1]} : vector<128x3xf32> to vector<128x1xf32>
    %19 = vector.extract_strided_slice %5 {offsets = [2, 0], sizes = [1, 64], strides = [1, 1]} : vector<3x64xf32> to vector<1x64xf32>
    %20 = vector.broadcast %18 : vector<128x1xf32> to vector<128x64xf32>
    %21 = vector.broadcast %19 : vector<1x64xf32> to vector<128x64xf32>
    %22 = arith.mulf %20, %21 : vector<128x64xf32>
    %23 = arith.addf %17, %22 : vector<128x64xf32>
    %24 = vector.broadcast %6 : vector<1x64xf32> to vector<128x64xf32>
    %25 = arith.addf %23, %24 : vector<128x64xf32>
    %cst = arith.constant 0.000000e+00 : f32
    %26 = vector.broadcast %cst : f32 to vector<128x64xf32>
    %27 = arith.maximumf %25, %26 : vector<128x64xf32>
    %28 = arith.truncf %27 : vector<128x64xf32> to vector<128x64xbf16>
    %c0_7 = arith.constant 0 : index
    %c0_8 = arith.constant 0 : index
    %29 = vector.load %arg5[%c0_7, %c0_8] : memref<64x128xbf16, #tpu.memory_space<vmem>>, vector<64x128xbf16>
    %c0_9 = arith.constant 0 : index
    %c0_10 = arith.constant 0 : index
    %30 = vector.load %arg6[%c0_9, %c0_10] : memref<1x128xf32, #tpu.memory_space<vmem>>, vector<1x128xf32>
    %cst_11 = arith.constant dense<0.000000e+00> : vector<128x128xf32>
    %31 = tpu.matmul %28, %29, %cst_11 {dimension_numbers = #tpu.dot_dimension_numbers<[1], [0], [0], [1], [0, 0, 1, 1], [], []>} : vector<128x64xbf16>, vector<64x128xbf16>, vector<128x128xf32> -> vector<128x128xf32>
    %32 = vector.broadcast %30 : vector<1x128xf32> to vector<128x128xf32>
    %33 = arith.addf %31, %32 : vector<128x128xf32>
    %cst_12 = arith.constant 0.000000e+00 : f32
    %34 = vector.broadcast %cst_12 : f32 to vector<128x128xf32>
    %35 = arith.maximumf %33, %34 : vector<128x128xf32>
    %36 = arith.truncf %35 : vector<128x128xf32> to vector<128x128xbf16>
    %c0_13 = arith.constant 0 : index
    %c0_14 = arith.constant 0 : index
    %37 = vector.load %arg7[%c0_13, %c0_14] : memref<128x1024xbf16, #tpu.memory_space<vmem>>, vector<128x1024xbf16>
    %cst_15 = arith.constant dense<0.000000e+00> : vector<128x1024xf32>
    %38 = tpu.matmul %36, %37, %cst_15 {dimension_numbers = #tpu.dot_dimension_numbers<[1], [0], [0], [1], [0, 0, 1, 1], [], []>} : vector<128x128xbf16>, vector<128x1024xbf16>, vector<128x1024xf32> -> vector<128x1024xf32>
    %c0_16 = arith.constant 0 : index
    %c0_17 = arith.constant 0 : index
    %39 = vector.load %arg10[%c0_16, %c0_17] : memref<8x1024xf32, #tpu.memory_space<vmem>>, vector<8x1024xf32>
    %40 = vector.extract_strided_slice %38 {offsets = [0, 0], sizes = [8, 1024], strides = [1, 1]} : vector<128x1024xf32> to vector<8x1024xf32>
    %41 = arith.maximumf %39, %40 : vector<8x1024xf32>
    %42 = vector.extract_strided_slice %38 {offsets = [8, 0], sizes = [8, 1024], strides = [1, 1]} : vector<128x1024xf32> to vector<8x1024xf32>
    %43 = arith.maximumf %41, %42 : vector<8x1024xf32>
    %44 = vector.extract_strided_slice %38 {offsets = [16, 0], sizes = [8, 1024], strides = [1, 1]} : vector<128x1024xf32> to vector<8x1024xf32>
    %45 = arith.maximumf %43, %44 : vector<8x1024xf32>
    %46 = vector.extract_strided_slice %38 {offsets = [24, 0], sizes = [8, 1024], strides = [1, 1]} : vector<128x1024xf32> to vector<8x1024xf32>
    %47 = arith.maximumf %45, %46 : vector<8x1024xf32>
    %48 = vector.extract_strided_slice %38 {offsets = [32, 0], sizes = [8, 1024], strides = [1, 1]} : vector<128x1024xf32> to vector<8x1024xf32>
    %49 = arith.maximumf %47, %48 : vector<8x1024xf32>
    %50 = vector.extract_strided_slice %38 {offsets = [40, 0], sizes = [8, 1024], strides = [1, 1]} : vector<128x1024xf32> to vector<8x1024xf32>
    %51 = arith.maximumf %49, %50 : vector<8x1024xf32>
    %52 = vector.extract_strided_slice %38 {offsets = [48, 0], sizes = [8, 1024], strides = [1, 1]} : vector<128x1024xf32> to vector<8x1024xf32>
    %53 = arith.maximumf %51, %52 : vector<8x1024xf32>
    %54 = vector.extract_strided_slice %38 {offsets = [56, 0], sizes = [8, 1024], strides = [1, 1]} : vector<128x1024xf32> to vector<8x1024xf32>
    %55 = arith.maximumf %53, %54 : vector<8x1024xf32>
    %56 = vector.extract_strided_slice %38 {offsets = [64, 0], sizes = [8, 1024], strides = [1, 1]} : vector<128x1024xf32> to vector<8x1024xf32>
    %57 = arith.maximumf %55, %56 : vector<8x1024xf32>
    %58 = vector.extract_strided_slice %38 {offsets = [72, 0], sizes = [8, 1024], strides = [1, 1]} : vector<128x1024xf32> to vector<8x1024xf32>
    %59 = arith.maximumf %57, %58 : vector<8x1024xf32>
    %60 = vector.extract_strided_slice %38 {offsets = [80, 0], sizes = [8, 1024], strides = [1, 1]} : vector<128x1024xf32> to vector<8x1024xf32>
    %61 = arith.maximumf %59, %60 : vector<8x1024xf32>
    %62 = vector.extract_strided_slice %38 {offsets = [88, 0], sizes = [8, 1024], strides = [1, 1]} : vector<128x1024xf32> to vector<8x1024xf32>
    %63 = arith.maximumf %61, %62 : vector<8x1024xf32>
    %64 = vector.extract_strided_slice %38 {offsets = [96, 0], sizes = [8, 1024], strides = [1, 1]} : vector<128x1024xf32> to vector<8x1024xf32>
    %65 = arith.maximumf %63, %64 : vector<8x1024xf32>
    %66 = vector.extract_strided_slice %38 {offsets = [104, 0], sizes = [8, 1024], strides = [1, 1]} : vector<128x1024xf32> to vector<8x1024xf32>
    %67 = arith.maximumf %65, %66 : vector<8x1024xf32>
    %68 = vector.extract_strided_slice %38 {offsets = [112, 0], sizes = [8, 1024], strides = [1, 1]} : vector<128x1024xf32> to vector<8x1024xf32>
    %69 = arith.maximumf %67, %68 : vector<8x1024xf32>
    %70 = vector.extract_strided_slice %38 {offsets = [120, 0], sizes = [8, 1024], strides = [1, 1]} : vector<128x1024xf32> to vector<8x1024xf32>
    %71 = arith.maximumf %69, %70 : vector<8x1024xf32>
    %c0_18 = arith.constant 0 : index
    %c0_19 = arith.constant 0 : index
    %72 = vector.load %arg10[%c0_18, %c0_19] : memref<8x1024xf32, #tpu.memory_space<vmem>>, vector<8x1024xf32>
    tpu.vector_store %arg10[%c0_18, %c0_19], %71 {strides = array<i32>} : memref<8x1024xf32, #tpu.memory_space<vmem>>, vector<8x1024xf32>,
    %c0_i32_20 = arith.constant 0 : i32
    %73 = arith.cmpi eq, %arg1, %c0_i32_20 : i32
    %74 = arith.extui %73 : i1 to i32
    %c0_i32_21 = arith.constant 0 : i32
    %75 = arith.cmpi ne, %74, %c0_i32_21 : i32
    scf.if %75 {
      %c0_22 = arith.constant 0 : index
      %c0_23 = arith.constant 0 : index
      %76 = vector.load %arg8[%c0_22, %c0_23] : memref<1x1024xf32, #tpu.memory_space<vmem>>, vector<1x1024xf32>
      %c0_24 = arith.constant 0 : index
      %c0_25 = arith.constant 0 : index
      %77 = vector.load %arg10[%c0_24, %c0_25] : memref<8x1024xf32, #tpu.memory_space<vmem>>, vector<8x1024xf32>
      %cst_26 = arith.constant dense<0xFF800000> : vector<1024xf32>
      %78 = vector.multi_reduction <maximumf>, %77, %cst_26 [0] : vector<8x1024xf32> to vector<1024xf32>
      %79 = vector.shape_cast %78 : vector<1024xf32> to vector<1x1024xf32>
      %80 = arith.addf %79, %76 : vector<1x1024xf32>
      %cst_27 = arith.constant 0.000000e+00 : f32
      %81 = vector.broadcast %cst_27 : f32 to vector<1x1024xf32>
      %82 = arith.maximumf %80, %81 : vector<1x1024xf32>
      %c0_28 = arith.constant 0 : index
      %c0_29 = arith.constant 0 : index
      %c0_30 = arith.constant 0 : index
      %83 = vector.load %arg9[%c0_28, %c0_29, %c0_30] : memref<1x1x1024xf32, #tpu.memory_space<vmem>>, vector<1x1x1024xf32>
      %84 = vector.shape_cast %83 : vector<1x1x1024xf32> to vector<1x1024xf32>
      %85 = vector.shape_cast %82 : vector<1x1024xf32> to vector<1x1x1024xf32>
      tpu.vector_store %arg9[%c0_28, %c0_29, %c0_30], %85 {strides = array<i32>} : memref<1x1x1024xf32, #tpu.memory_space<vmem>>, vector<1x1x1024xf32>,
    } else {
    }
    return
  }
  func.func @transform_0(%arg0: i32, %arg1: i32) -> (i32, i32, i32) {
    %c0_i32 = arith.constant 0 : i32
    %c0_i32_0 = arith.constant 0 : i32
    return %arg0, %arg1, %c0_i32 : i32, i32, i32
  }
  func.func @transform_1(%arg0: i32, %arg1: i32) -> (i32, i32) {
    %c0_i32 = arith.constant 0 : i32
    %c0_i32_0 = arith.constant 0 : i32
    %c0_i32_1 = arith.constant 0 : i32
    return %c0_i32, %c0_i32_0 : i32, i32
  }
  func.func @transform_2(%arg0: i32, %arg1: i32) -> (i32, i32) {
    %c0_i32 = arith.constant 0 : i32
    %c0_i32_0 = arith.constant 0 : i32
    %c0_i32_1 = arith.constant 0 : i32
    return %c0_i32, %c0_i32_0 : i32, i32
  }
  func.func @transform_3(%arg0: i32, %arg1: i32) -> (i32, i32) {
    %c0_i32 = arith.constant 0 : i32
    %c0_i32_0 = arith.constant 0 : i32
    %c0_i32_1 = arith.constant 0 : i32
    return %c0_i32, %c0_i32_0 : i32, i32
  }
  func.func @transform_4(%arg0: i32, %arg1: i32) -> (i32, i32) {
    %c0_i32 = arith.constant 0 : i32
    %c0_i32_0 = arith.constant 0 : i32
    %c0_i32_1 = arith.constant 0 : i32
    return %c0_i32, %c0_i32_0 : i32, i32
  }
  func.func @transform_5(%arg0: i32, %arg1: i32) -> (i32, i32) {
    %c0_i32 = arith.constant 0 : i32
    %c0_i32_0 = arith.constant 0 : i32
    %c0_i32_1 = arith.constant 0 : i32
    return %c0_i32, %c0_i32_0 : i32, i32
  }
  func.func @transform_6(%arg0: i32, %arg1: i32) -> (i32, i32) {
    %c0_i32 = arith.constant 0 : i32
    %c0_i32_0 = arith.constant 0 : i32
    %c0_i32_1 = arith.constant 0 : i32
    return %c0_i32, %c0_i32_0 : i32, i32
  }
  func.func @transform_7(%arg0: i32, %arg1: i32) -> (i32, i32, i32) {
    %c0_i32 = arith.constant 0 : i32
    %c0_i32_0 = arith.constant 0 : i32
    %c0_i32_1 = arith.constant 0 : i32
    return %arg0, %c0_i32, %c0_i32_0 : i32, i32, i32
  }
}

module attributes {stable_mosaic.version = 11 : i64} {
  func.func @_chain_max_kernel(%arg0: i32, %arg1: i32, %arg2: memref<1x128x3xf32, #tpu.memory_space<vmem>>, %arg3: memref<1x3x64xf32, #tpu.memory_space<vmem>>, %arg4: memref<1x64xf32, #tpu.memory_space<vmem>>, %arg5: memref<64x64xbf16, #tpu.memory_space<vmem>>, %arg6: memref<1x64xf32, #tpu.memory_space<vmem>>, %arg7: memref<64x128xbf16, #tpu.memory_space<vmem>>, %arg8: memref<1x128xf32, #tpu.memory_space<vmem>>, %arg9: memref<128x1024xbf16, #tpu.memory_space<vmem>>, %arg10: memref<1x1024xf32, #tpu.memory_space<vmem>>, %arg11: memref<1x1x1024xf32, #tpu.memory_space<vmem>>, %arg12: memref<8x1024xf32, #tpu.memory_space<vmem>>) attributes {dimension_semantics = [#tpu.dimension_semantics<parallel>, #tpu.dimension_semantics<arbitrary>], iteration_bounds = array<i64: 2, 1>, scalar_prefetch = 0 : i64, scratch_operands = 1 : i64, tpu.core_type = #tpu.core_type<tc>, window_params = [{transform_indices = @transform_0, window_bounds = array<i64: 1, 128, 3>}, {transform_indices = @transform_1, window_bounds = array<i64: 1, 3, 64>}, {pipeline_mode = #tpu.pipeline_mode<synchronous>, transform_indices = @transform_2, window_bounds = array<i64: 1, 64>}, {pipeline_mode = #tpu.pipeline_mode<synchronous>, transform_indices = @transform_3, window_bounds = array<i64: 64, 64>}, {pipeline_mode = #tpu.pipeline_mode<synchronous>, transform_indices = @transform_4, window_bounds = array<i64: 1, 64>}, {pipeline_mode = #tpu.pipeline_mode<synchronous>, transform_indices = @transform_5, window_bounds = array<i64: 64, 128>}, {pipeline_mode = #tpu.pipeline_mode<synchronous>, transform_indices = @transform_6, window_bounds = array<i64: 1, 128>}, {pipeline_mode = #tpu.pipeline_mode<synchronous>, transform_indices = @transform_7, window_bounds = array<i64: 128, 1024>}, {pipeline_mode = #tpu.pipeline_mode<synchronous>, transform_indices = @transform_8, window_bounds = array<i64: 1, 1024>}, {transform_indices = @transform_9, window_bounds = array<i64: 1, 1, 1024>}]} {
    %c0_i32 = arith.constant 0 : i32
    %0 = arith.cmpi eq, %arg1, %c0_i32 : i32
    %1 = arith.extui %0 : i1 to i32
    %c0_i32_0 = arith.constant 0 : i32
    %2 = arith.cmpi ne, %1, %c0_i32_0 : i32
    scf.if %2 {
      %cst_29 = arith.constant 0xFF800000 : f32
      %85 = vector.broadcast %cst_29 : f32 to vector<8x1024xf32>
      %c0_30 = arith.constant 0 : index
      %c0_31 = arith.constant 0 : index
      %86 = vector.load %arg12[%c0_30, %c0_31] : memref<8x1024xf32, #tpu.memory_space<vmem>>, vector<8x1024xf32>
      tpu.vector_store %arg12[%c0_30, %c0_31], %85 {strides = array<i32>} : memref<8x1024xf32, #tpu.memory_space<vmem>>, vector<8x1024xf32>,
    } else {
    }
    %c0 = arith.constant 0 : index
    %c0_1 = arith.constant 0 : index
    %c0_2 = arith.constant 0 : index
    %3 = vector.load %arg2[%c0, %c0_1, %c0_2] : memref<1x128x3xf32, #tpu.memory_space<vmem>>, vector<1x128x3xf32>
    %4 = vector.shape_cast %3 : vector<1x128x3xf32> to vector<128x3xf32>
    %c0_3 = arith.constant 0 : index
    %c0_4 = arith.constant 0 : index
    %c0_5 = arith.constant 0 : index
    %5 = vector.load %arg3[%c0_3, %c0_4, %c0_5] : memref<1x3x64xf32, #tpu.memory_space<vmem>>, vector<1x3x64xf32>
    %6 = vector.shape_cast %5 : vector<1x3x64xf32> to vector<3x64xf32>
    %c0_6 = arith.constant 0 : index
    %c0_7 = arith.constant 0 : index
    %7 = vector.load %arg4[%c0_6, %c0_7] : memref<1x64xf32, #tpu.memory_space<vmem>>, vector<1x64xf32>
    %8 = vector.extract_strided_slice %4 {offsets = [0, 0], sizes = [128, 1], strides = [1, 1]} : vector<128x3xf32> to vector<128x1xf32>
    %9 = vector.extract_strided_slice %6 {offsets = [0, 0], sizes = [1, 64], strides = [1, 1]} : vector<3x64xf32> to vector<1x64xf32>
    %10 = vector.broadcast %8 : vector<128x1xf32> to vector<128x64xf32>
    %11 = vector.broadcast %9 : vector<1x64xf32> to vector<128x64xf32>
    %12 = arith.mulf %10, %11 : vector<128x64xf32>
    %13 = vector.extract_strided_slice %4 {offsets = [0, 1], sizes = [128, 1], strides = [1, 1]} : vector<128x3xf32> to vector<128x1xf32>
    %14 = vector.extract_strided_slice %6 {offsets = [1, 0], sizes = [1, 64], strides = [1, 1]} : vector<3x64xf32> to vector<1x64xf32>
    %15 = vector.broadcast %13 : vector<128x1xf32> to vector<128x64xf32>
    %16 = vector.broadcast %14 : vector<1x64xf32> to vector<128x64xf32>
    %17 = arith.mulf %15, %16 : vector<128x64xf32>
    %18 = arith.addf %12, %17 : vector<128x64xf32>
    %19 = vector.extract_strided_slice %4 {offsets = [0, 2], sizes = [128, 1], strides = [1, 1]} : vector<128x3xf32> to vector<128x1xf32>
    %20 = vector.extract_strided_slice %6 {offsets = [2, 0], sizes = [1, 64], strides = [1, 1]} : vector<3x64xf32> to vector<1x64xf32>
    %21 = vector.broadcast %19 : vector<128x1xf32> to vector<128x64xf32>
    %22 = vector.broadcast %20 : vector<1x64xf32> to vector<128x64xf32>
    %23 = arith.mulf %21, %22 : vector<128x64xf32>
    %24 = arith.addf %18, %23 : vector<128x64xf32>
    %25 = vector.broadcast %7 : vector<1x64xf32> to vector<128x64xf32>
    %26 = arith.addf %24, %25 : vector<128x64xf32>
    %cst = arith.constant 0.000000e+00 : f32
    %27 = vector.broadcast %cst : f32 to vector<128x64xf32>
    %28 = arith.maximumf %26, %27 : vector<128x64xf32>
    %29 = arith.truncf %28 : vector<128x64xf32> to vector<128x64xbf16>
    %c0_8 = arith.constant 0 : index
    %c0_9 = arith.constant 0 : index
    %30 = vector.load %arg5[%c0_8, %c0_9] : memref<64x64xbf16, #tpu.memory_space<vmem>>, vector<64x64xbf16>
    %c0_10 = arith.constant 0 : index
    %c0_11 = arith.constant 0 : index
    %31 = vector.load %arg6[%c0_10, %c0_11] : memref<1x64xf32, #tpu.memory_space<vmem>>, vector<1x64xf32>
    %cst_12 = arith.constant dense<0.000000e+00> : vector<128x64xf32>
    %32 = tpu.matmul %29, %30, %cst_12 {dimension_numbers = #tpu.dot_dimension_numbers<[1], [0], [0], [1], [0, 0, 1, 1], [], []>} : vector<128x64xbf16>, vector<64x64xbf16>, vector<128x64xf32> -> vector<128x64xf32>
    %33 = vector.broadcast %31 : vector<1x64xf32> to vector<128x64xf32>
    %34 = arith.addf %32, %33 : vector<128x64xf32>
    %cst_13 = arith.constant 0.000000e+00 : f32
    %35 = vector.broadcast %cst_13 : f32 to vector<128x64xf32>
    %36 = arith.maximumf %34, %35 : vector<128x64xf32>
    %37 = arith.truncf %36 : vector<128x64xf32> to vector<128x64xbf16>
    %c0_14 = arith.constant 0 : index
    %c0_15 = arith.constant 0 : index
    %38 = vector.load %arg7[%c0_14, %c0_15] : memref<64x128xbf16, #tpu.memory_space<vmem>>, vector<64x128xbf16>
    %c0_16 = arith.constant 0 : index
    %c0_17 = arith.constant 0 : index
    %39 = vector.load %arg8[%c0_16, %c0_17] : memref<1x128xf32, #tpu.memory_space<vmem>>, vector<1x128xf32>
    %cst_18 = arith.constant dense<0.000000e+00> : vector<128x128xf32>
    %40 = tpu.matmul %37, %38, %cst_18 {dimension_numbers = #tpu.dot_dimension_numbers<[1], [0], [0], [1], [0, 0, 1, 1], [], []>} : vector<128x64xbf16>, vector<64x128xbf16>, vector<128x128xf32> -> vector<128x128xf32>
    %41 = vector.broadcast %39 : vector<1x128xf32> to vector<128x128xf32>
    %42 = arith.addf %40, %41 : vector<128x128xf32>
    %cst_19 = arith.constant 0.000000e+00 : f32
    %43 = vector.broadcast %cst_19 : f32 to vector<128x128xf32>
    %44 = arith.maximumf %42, %43 : vector<128x128xf32>
    %45 = arith.truncf %44 : vector<128x128xf32> to vector<128x128xbf16>
    %c0_20 = arith.constant 0 : index
    %c0_21 = arith.constant 0 : index
    %46 = vector.load %arg9[%c0_20, %c0_21] : memref<128x1024xbf16, #tpu.memory_space<vmem>>, vector<128x1024xbf16>
    %cst_22 = arith.constant dense<0.000000e+00> : vector<128x1024xf32>
    %47 = tpu.matmul %45, %46, %cst_22 {dimension_numbers = #tpu.dot_dimension_numbers<[1], [0], [0], [1], [0, 0, 1, 1], [], []>} : vector<128x128xbf16>, vector<128x1024xbf16>, vector<128x1024xf32> -> vector<128x1024xf32>
    %c0_23 = arith.constant 0 : index
    %c0_24 = arith.constant 0 : index
    %48 = vector.load %arg12[%c0_23, %c0_24] : memref<8x1024xf32, #tpu.memory_space<vmem>>, vector<8x1024xf32>
    %49 = vector.extract_strided_slice %47 {offsets = [0, 0], sizes = [8, 1024], strides = [1, 1]} : vector<128x1024xf32> to vector<8x1024xf32>
    %50 = arith.maximumf %48, %49 : vector<8x1024xf32>
    %51 = vector.extract_strided_slice %47 {offsets = [8, 0], sizes = [8, 1024], strides = [1, 1]} : vector<128x1024xf32> to vector<8x1024xf32>
    %52 = arith.maximumf %50, %51 : vector<8x1024xf32>
    %53 = vector.extract_strided_slice %47 {offsets = [16, 0], sizes = [8, 1024], strides = [1, 1]} : vector<128x1024xf32> to vector<8x1024xf32>
    %54 = arith.maximumf %52, %53 : vector<8x1024xf32>
    %55 = vector.extract_strided_slice %47 {offsets = [24, 0], sizes = [8, 1024], strides = [1, 1]} : vector<128x1024xf32> to vector<8x1024xf32>
    %56 = arith.maximumf %54, %55 : vector<8x1024xf32>
    %57 = vector.extract_strided_slice %47 {offsets = [32, 0], sizes = [8, 1024], strides = [1, 1]} : vector<128x1024xf32> to vector<8x1024xf32>
    %58 = arith.maximumf %56, %57 : vector<8x1024xf32>
    %59 = vector.extract_strided_slice %47 {offsets = [40, 0], sizes = [8, 1024], strides = [1, 1]} : vector<128x1024xf32> to vector<8x1024xf32>
    %60 = arith.maximumf %58, %59 : vector<8x1024xf32>
    %61 = vector.extract_strided_slice %47 {offsets = [48, 0], sizes = [8, 1024], strides = [1, 1]} : vector<128x1024xf32> to vector<8x1024xf32>
    %62 = arith.maximumf %60, %61 : vector<8x1024xf32>
    %63 = vector.extract_strided_slice %47 {offsets = [56, 0], sizes = [8, 1024], strides = [1, 1]} : vector<128x1024xf32> to vector<8x1024xf32>
    %64 = arith.maximumf %62, %63 : vector<8x1024xf32>
    %65 = vector.extract_strided_slice %47 {offsets = [64, 0], sizes = [8, 1024], strides = [1, 1]} : vector<128x1024xf32> to vector<8x1024xf32>
    %66 = arith.maximumf %64, %65 : vector<8x1024xf32>
    %67 = vector.extract_strided_slice %47 {offsets = [72, 0], sizes = [8, 1024], strides = [1, 1]} : vector<128x1024xf32> to vector<8x1024xf32>
    %68 = arith.maximumf %66, %67 : vector<8x1024xf32>
    %69 = vector.extract_strided_slice %47 {offsets = [80, 0], sizes = [8, 1024], strides = [1, 1]} : vector<128x1024xf32> to vector<8x1024xf32>
    %70 = arith.maximumf %68, %69 : vector<8x1024xf32>
    %71 = vector.extract_strided_slice %47 {offsets = [88, 0], sizes = [8, 1024], strides = [1, 1]} : vector<128x1024xf32> to vector<8x1024xf32>
    %72 = arith.maximumf %70, %71 : vector<8x1024xf32>
    %73 = vector.extract_strided_slice %47 {offsets = [96, 0], sizes = [8, 1024], strides = [1, 1]} : vector<128x1024xf32> to vector<8x1024xf32>
    %74 = arith.maximumf %72, %73 : vector<8x1024xf32>
    %75 = vector.extract_strided_slice %47 {offsets = [104, 0], sizes = [8, 1024], strides = [1, 1]} : vector<128x1024xf32> to vector<8x1024xf32>
    %76 = arith.maximumf %74, %75 : vector<8x1024xf32>
    %77 = vector.extract_strided_slice %47 {offsets = [112, 0], sizes = [8, 1024], strides = [1, 1]} : vector<128x1024xf32> to vector<8x1024xf32>
    %78 = arith.maximumf %76, %77 : vector<8x1024xf32>
    %79 = vector.extract_strided_slice %47 {offsets = [120, 0], sizes = [8, 1024], strides = [1, 1]} : vector<128x1024xf32> to vector<8x1024xf32>
    %80 = arith.maximumf %78, %79 : vector<8x1024xf32>
    %c0_25 = arith.constant 0 : index
    %c0_26 = arith.constant 0 : index
    %81 = vector.load %arg12[%c0_25, %c0_26] : memref<8x1024xf32, #tpu.memory_space<vmem>>, vector<8x1024xf32>
    tpu.vector_store %arg12[%c0_25, %c0_26], %80 {strides = array<i32>} : memref<8x1024xf32, #tpu.memory_space<vmem>>, vector<8x1024xf32>,
    %c0_i32_27 = arith.constant 0 : i32
    %82 = arith.cmpi eq, %arg1, %c0_i32_27 : i32
    %83 = arith.extui %82 : i1 to i32
    %c0_i32_28 = arith.constant 0 : i32
    %84 = arith.cmpi ne, %83, %c0_i32_28 : i32
    scf.if %84 {
      %c0_29 = arith.constant 0 : index
      %c0_30 = arith.constant 0 : index
      %85 = vector.load %arg10[%c0_29, %c0_30] : memref<1x1024xf32, #tpu.memory_space<vmem>>, vector<1x1024xf32>
      %c0_31 = arith.constant 0 : index
      %c0_32 = arith.constant 0 : index
      %86 = vector.load %arg12[%c0_31, %c0_32] : memref<8x1024xf32, #tpu.memory_space<vmem>>, vector<8x1024xf32>
      %cst_33 = arith.constant dense<0xFF800000> : vector<1024xf32>
      %87 = vector.multi_reduction <maximumf>, %86, %cst_33 [0] : vector<8x1024xf32> to vector<1024xf32>
      %88 = vector.shape_cast %87 : vector<1024xf32> to vector<1x1024xf32>
      %89 = arith.addf %88, %85 : vector<1x1024xf32>
      %cst_34 = arith.constant 0.000000e+00 : f32
      %90 = vector.broadcast %cst_34 : f32 to vector<1x1024xf32>
      %91 = arith.maximumf %89, %90 : vector<1x1024xf32>
      %c0_35 = arith.constant 0 : index
      %c0_36 = arith.constant 0 : index
      %c0_37 = arith.constant 0 : index
      %92 = vector.load %arg11[%c0_35, %c0_36, %c0_37] : memref<1x1x1024xf32, #tpu.memory_space<vmem>>, vector<1x1x1024xf32>
      %93 = vector.shape_cast %92 : vector<1x1x1024xf32> to vector<1x1024xf32>
      %94 = vector.shape_cast %91 : vector<1x1024xf32> to vector<1x1x1024xf32>
      tpu.vector_store %arg11[%c0_35, %c0_36, %c0_37], %94 {strides = array<i32>} : memref<1x1x1024xf32, #tpu.memory_space<vmem>>, vector<1x1x1024xf32>,
    } else {
    }
    return
  }
  func.func @transform_0(%arg0: i32, %arg1: i32) -> (i32, i32, i32) {
    %c0_i32 = arith.constant 0 : i32
    %c0_i32_0 = arith.constant 0 : i32
    return %arg0, %arg1, %c0_i32 : i32, i32, i32
  }
  func.func @transform_1(%arg0: i32, %arg1: i32) -> (i32, i32, i32) {
    %c0_i32 = arith.constant 0 : i32
    %c0_i32_0 = arith.constant 0 : i32
    %c0_i32_1 = arith.constant 0 : i32
    return %arg0, %c0_i32, %c0_i32_0 : i32, i32, i32
  }
  func.func @transform_2(%arg0: i32, %arg1: i32) -> (i32, i32) {
    %c0_i32 = arith.constant 0 : i32
    %c0_i32_0 = arith.constant 0 : i32
    %c0_i32_1 = arith.constant 0 : i32
    return %c0_i32, %c0_i32_0 : i32, i32
  }
  func.func @transform_3(%arg0: i32, %arg1: i32) -> (i32, i32) {
    %c0_i32 = arith.constant 0 : i32
    %c0_i32_0 = arith.constant 0 : i32
    %c0_i32_1 = arith.constant 0 : i32
    return %c0_i32, %c0_i32_0 : i32, i32
  }
  func.func @transform_4(%arg0: i32, %arg1: i32) -> (i32, i32) {
    %c0_i32 = arith.constant 0 : i32
    %c0_i32_0 = arith.constant 0 : i32
    %c0_i32_1 = arith.constant 0 : i32
    return %c0_i32, %c0_i32_0 : i32, i32
  }
  func.func @transform_5(%arg0: i32, %arg1: i32) -> (i32, i32) {
    %c0_i32 = arith.constant 0 : i32
    %c0_i32_0 = arith.constant 0 : i32
    %c0_i32_1 = arith.constant 0 : i32
    return %c0_i32, %c0_i32_0 : i32, i32
  }
  func.func @transform_6(%arg0: i32, %arg1: i32) -> (i32, i32) {
    %c0_i32 = arith.constant 0 : i32
    %c0_i32_0 = arith.constant 0 : i32
    %c0_i32_1 = arith.constant 0 : i32
    return %c0_i32, %c0_i32_0 : i32, i32
  }
  func.func @transform_7(%arg0: i32, %arg1: i32) -> (i32, i32) {
    %c0_i32 = arith.constant 0 : i32
    %c0_i32_0 = arith.constant 0 : i32
    %c0_i32_1 = arith.constant 0 : i32
    return %c0_i32, %c0_i32_0 : i32, i32
  }
  func.func @transform_8(%arg0: i32, %arg1: i32) -> (i32, i32) {
    %c0_i32 = arith.constant 0 : i32
    %c0_i32_0 = arith.constant 0 : i32
    %c0_i32_1 = arith.constant 0 : i32
    return %c0_i32, %c0_i32_0 : i32, i32
  }
  func.func @transform_9(%arg0: i32, %arg1: i32) -> (i32, i32, i32) {
    %c0_i32 = arith.constant 0 : i32
    %c0_i32_0 = arith.constant 0 : i32
    %c0_i32_1 = arith.constant 0 : i32
    return %arg0, %c0_i32, %c0_i32_0 : i32, i32, i32
  }
}

module attributes {stable_mosaic.version = 11 : i64} {
  func.func @_stn_head_kernel(%arg0: memref<2x1024xf32, #tpu.memory_space<vmem>>, %arg1: memref<1024x512xbf16, #tpu.memory_space<vmem>>, %arg2: memref<1x512xf32, #tpu.memory_space<vmem>>, %arg3: memref<512x256xbf16, #tpu.memory_space<vmem>>, %arg4: memref<1x256xf32, #tpu.memory_space<vmem>>, %arg5: memref<256x4096xbf16, #tpu.memory_space<vmem>>, %arg6: memref<1x4096xf32, #tpu.memory_space<vmem>>, %arg7: memref<2x4096xf32, #tpu.memory_space<vmem>>) attributes {dimension_semantics = [], scalar_prefetch = 0 : i64, scratch_operands = 0 : i64, tpu.core_type = #tpu.core_type<tc>} {
    %c0 = arith.constant 0 : index
    %c0_0 = arith.constant 0 : index
    %0 = vector.load %arg0[%c0, %c0_0] : memref<2x1024xf32, #tpu.memory_space<vmem>>, vector<2x1024xf32>
    %1 = arith.truncf %0 : vector<2x1024xf32> to vector<2x1024xbf16>
    %c0_1 = arith.constant 0 : index
    %c0_2 = arith.constant 0 : index
    %2 = vector.load %arg1[%c0_1, %c0_2] : memref<1024x512xbf16, #tpu.memory_space<vmem>>, vector<1024x512xbf16>
    %cst = arith.constant dense<0.000000e+00> : vector<2x512xf32>
    %3 = tpu.matmul %1, %2, %cst {dimension_numbers = #tpu.dot_dimension_numbers<[1], [0], [0], [1], [0, 0, 1, 1], [], []>} : vector<2x1024xbf16>, vector<1024x512xbf16>, vector<2x512xf32> -> vector<2x512xf32>
    %c0_3 = arith.constant 0 : index
    %c0_4 = arith.constant 0 : index
    %4 = vector.load %arg2[%c0_3, %c0_4] : memref<1x512xf32, #tpu.memory_space<vmem>>, vector<1x512xf32>
    %5 = vector.broadcast %4 : vector<1x512xf32> to vector<2x512xf32>
    %6 = arith.addf %3, %5 : vector<2x512xf32>
    %cst_5 = arith.constant 0.000000e+00 : f32
    %7 = vector.broadcast %cst_5 : f32 to vector<2x512xf32>
    %8 = arith.maximumf %6, %7 : vector<2x512xf32>
    %9 = arith.truncf %8 : vector<2x512xf32> to vector<2x512xbf16>
    %c0_6 = arith.constant 0 : index
    %c0_7 = arith.constant 0 : index
    %10 = vector.load %arg3[%c0_6, %c0_7] : memref<512x256xbf16, #tpu.memory_space<vmem>>, vector<512x256xbf16>
    %cst_8 = arith.constant dense<0.000000e+00> : vector<2x256xf32>
    %11 = tpu.matmul %9, %10, %cst_8 {dimension_numbers = #tpu.dot_dimension_numbers<[1], [0], [0], [1], [0, 0, 1, 1], [], []>} : vector<2x512xbf16>, vector<512x256xbf16>, vector<2x256xf32> -> vector<2x256xf32>
    %c0_9 = arith.constant 0 : index
    %c0_10 = arith.constant 0 : index
    %12 = vector.load %arg4[%c0_9, %c0_10] : memref<1x256xf32, #tpu.memory_space<vmem>>, vector<1x256xf32>
    %13 = vector.broadcast %12 : vector<1x256xf32> to vector<2x256xf32>
    %14 = arith.addf %11, %13 : vector<2x256xf32>
    %cst_11 = arith.constant 0.000000e+00 : f32
    %15 = vector.broadcast %cst_11 : f32 to vector<2x256xf32>
    %16 = arith.maximumf %14, %15 : vector<2x256xf32>
    %17 = arith.truncf %16 : vector<2x256xf32> to vector<2x256xbf16>
    %c0_12 = arith.constant 0 : index
    %c0_13 = arith.constant 0 : index
    %18 = vector.load %arg5[%c0_12, %c0_13] : memref<256x4096xbf16, #tpu.memory_space<vmem>>, vector<256x4096xbf16>
    %cst_14 = arith.constant dense<0.000000e+00> : vector<2x4096xf32>
    %19 = tpu.matmul %17, %18, %cst_14 {dimension_numbers = #tpu.dot_dimension_numbers<[1], [0], [0], [1], [0, 0, 1, 1], [], []>} : vector<2x256xbf16>, vector<256x4096xbf16>, vector<2x4096xf32> -> vector<2x4096xf32>
    %c0_15 = arith.constant 0 : index
    %c0_16 = arith.constant 0 : index
    %20 = vector.load %arg6[%c0_15, %c0_16] : memref<1x4096xf32, #tpu.memory_space<vmem>>, vector<1x4096xf32>
    %21 = vector.broadcast %20 : vector<1x4096xf32> to vector<2x4096xf32>
    %22 = arith.addf %19, %21 : vector<2x4096xf32>
    %c0_17 = arith.constant 0 : index
    %c0_18 = arith.constant 0 : index
    %23 = vector.load %arg7[%c0_17, %c0_18] : memref<2x4096xf32, #tpu.memory_space<vmem>>, vector<2x4096xf32>
    tpu.vector_store %arg7[%c0_17, %c0_18], %22 {strides = array<i32>} : memref<2x4096xf32, #tpu.memory_space<vmem>>, vector<2x4096xf32>,
    return
  }
}

module attributes {stable_mosaic.version = 11 : i64} {
  func.func @_chain_max_kernel(%arg0: i32, %arg1: i32, %arg2: memref<1x128x3xf32, #tpu.memory_space<vmem>>, %arg3: memref<1x3x64xf32, #tpu.memory_space<vmem>>, %arg4: memref<1x64xf32, #tpu.memory_space<vmem>>, %arg5: memref<1x64x128xbf16, #tpu.memory_space<vmem>>, %arg6: memref<1x128xf32, #tpu.memory_space<vmem>>, %arg7: memref<128x1024xbf16, #tpu.memory_space<vmem>>, %arg8: memref<1x1024xf32, #tpu.memory_space<vmem>>, %arg9: memref<1x1x1024xf32, #tpu.memory_space<vmem>>, %arg10: memref<8x1024xf32, #tpu.memory_space<vmem>>) attributes {dimension_semantics = [#tpu.dimension_semantics<parallel>, #tpu.dimension_semantics<arbitrary>], iteration_bounds = array<i64: 2, 1>, scalar_prefetch = 0 : i64, scratch_operands = 1 : i64, tpu.core_type = #tpu.core_type<tc>, window_params = [{transform_indices = @transform_0, window_bounds = array<i64: 1, 128, 3>}, {transform_indices = @transform_1, window_bounds = array<i64: 1, 3, 64>}, {pipeline_mode = #tpu.pipeline_mode<synchronous>, transform_indices = @transform_2, window_bounds = array<i64: 1, 64>}, {transform_indices = @transform_3, window_bounds = array<i64: 1, 64, 128>}, {pipeline_mode = #tpu.pipeline_mode<synchronous>, transform_indices = @transform_4, window_bounds = array<i64: 1, 128>}, {pipeline_mode = #tpu.pipeline_mode<synchronous>, transform_indices = @transform_5, window_bounds = array<i64: 128, 1024>}, {pipeline_mode = #tpu.pipeline_mode<synchronous>, transform_indices = @transform_6, window_bounds = array<i64: 1, 1024>}, {transform_indices = @transform_7, window_bounds = array<i64: 1, 1, 1024>}]} {
    %c0_i32 = arith.constant 0 : i32
    %0 = arith.cmpi eq, %arg1, %c0_i32 : i32
    %1 = arith.extui %0 : i1 to i32
    %c0_i32_0 = arith.constant 0 : i32
    %2 = arith.cmpi ne, %1, %c0_i32_0 : i32
    scf.if %2 {
      %cst_24 = arith.constant 0xFF800000 : f32
      %78 = vector.broadcast %cst_24 : f32 to vector<8x1024xf32>
      %c0_25 = arith.constant 0 : index
      %c0_26 = arith.constant 0 : index
      %79 = vector.load %arg10[%c0_25, %c0_26] : memref<8x1024xf32, #tpu.memory_space<vmem>>, vector<8x1024xf32>
      tpu.vector_store %arg10[%c0_25, %c0_26], %78 {strides = array<i32>} : memref<8x1024xf32, #tpu.memory_space<vmem>>, vector<8x1024xf32>,
    } else {
    }
    %c0 = arith.constant 0 : index
    %c0_1 = arith.constant 0 : index
    %c0_2 = arith.constant 0 : index
    %3 = vector.load %arg2[%c0, %c0_1, %c0_2] : memref<1x128x3xf32, #tpu.memory_space<vmem>>, vector<1x128x3xf32>
    %4 = vector.shape_cast %3 : vector<1x128x3xf32> to vector<128x3xf32>
    %c0_3 = arith.constant 0 : index
    %c0_4 = arith.constant 0 : index
    %c0_5 = arith.constant 0 : index
    %5 = vector.load %arg3[%c0_3, %c0_4, %c0_5] : memref<1x3x64xf32, #tpu.memory_space<vmem>>, vector<1x3x64xf32>
    %6 = vector.shape_cast %5 : vector<1x3x64xf32> to vector<3x64xf32>
    %c0_6 = arith.constant 0 : index
    %c0_7 = arith.constant 0 : index
    %7 = vector.load %arg4[%c0_6, %c0_7] : memref<1x64xf32, #tpu.memory_space<vmem>>, vector<1x64xf32>
    %8 = vector.extract_strided_slice %4 {offsets = [0, 0], sizes = [128, 1], strides = [1, 1]} : vector<128x3xf32> to vector<128x1xf32>
    %9 = vector.extract_strided_slice %6 {offsets = [0, 0], sizes = [1, 64], strides = [1, 1]} : vector<3x64xf32> to vector<1x64xf32>
    %10 = vector.broadcast %8 : vector<128x1xf32> to vector<128x64xf32>
    %11 = vector.broadcast %9 : vector<1x64xf32> to vector<128x64xf32>
    %12 = arith.mulf %10, %11 : vector<128x64xf32>
    %13 = vector.extract_strided_slice %4 {offsets = [0, 1], sizes = [128, 1], strides = [1, 1]} : vector<128x3xf32> to vector<128x1xf32>
    %14 = vector.extract_strided_slice %6 {offsets = [1, 0], sizes = [1, 64], strides = [1, 1]} : vector<3x64xf32> to vector<1x64xf32>
    %15 = vector.broadcast %13 : vector<128x1xf32> to vector<128x64xf32>
    %16 = vector.broadcast %14 : vector<1x64xf32> to vector<128x64xf32>
    %17 = arith.mulf %15, %16 : vector<128x64xf32>
    %18 = arith.addf %12, %17 : vector<128x64xf32>
    %19 = vector.extract_strided_slice %4 {offsets = [0, 2], sizes = [128, 1], strides = [1, 1]} : vector<128x3xf32> to vector<128x1xf32>
    %20 = vector.extract_strided_slice %6 {offsets = [2, 0], sizes = [1, 64], strides = [1, 1]} : vector<3x64xf32> to vector<1x64xf32>
    %21 = vector.broadcast %19 : vector<128x1xf32> to vector<128x64xf32>
    %22 = vector.broadcast %20 : vector<1x64xf32> to vector<128x64xf32>
    %23 = arith.mulf %21, %22 : vector<128x64xf32>
    %24 = arith.addf %18, %23 : vector<128x64xf32>
    %25 = vector.broadcast %7 : vector<1x64xf32> to vector<128x64xf32>
    %26 = arith.addf %24, %25 : vector<128x64xf32>
    %cst = arith.constant 0.000000e+00 : f32
    %27 = vector.broadcast %cst : f32 to vector<128x64xf32>
    %28 = arith.maximumf %26, %27 : vector<128x64xf32>
    %29 = arith.truncf %28 : vector<128x64xf32> to vector<128x64xbf16>
    %c0_8 = arith.constant 0 : index
    %c0_9 = arith.constant 0 : index
    %c0_10 = arith.constant 0 : index
    %30 = vector.load %arg5[%c0_8, %c0_9, %c0_10] : memref<1x64x128xbf16, #tpu.memory_space<vmem>>, vector<1x64x128xbf16>
    %31 = vector.shape_cast %30 : vector<1x64x128xbf16> to vector<64x128xbf16>
    %c0_11 = arith.constant 0 : index
    %c0_12 = arith.constant 0 : index
    %32 = vector.load %arg6[%c0_11, %c0_12] : memref<1x128xf32, #tpu.memory_space<vmem>>, vector<1x128xf32>
    %cst_13 = arith.constant dense<0.000000e+00> : vector<128x128xf32>
    %33 = tpu.matmul %29, %31, %cst_13 {dimension_numbers = #tpu.dot_dimension_numbers<[1], [0], [0], [1], [0, 0, 1, 1], [], []>} : vector<128x64xbf16>, vector<64x128xbf16>, vector<128x128xf32> -> vector<128x128xf32>
    %34 = vector.broadcast %32 : vector<1x128xf32> to vector<128x128xf32>
    %35 = arith.addf %33, %34 : vector<128x128xf32>
    %cst_14 = arith.constant 0.000000e+00 : f32
    %36 = vector.broadcast %cst_14 : f32 to vector<128x128xf32>
    %37 = arith.maximumf %35, %36 : vector<128x128xf32>
    %38 = arith.truncf %37 : vector<128x128xf32> to vector<128x128xbf16>
    %c0_15 = arith.constant 0 : index
    %c0_16 = arith.constant 0 : index
    %39 = vector.load %arg7[%c0_15, %c0_16] : memref<128x1024xbf16, #tpu.memory_space<vmem>>, vector<128x1024xbf16>
    %cst_17 = arith.constant dense<0.000000e+00> : vector<128x1024xf32>
    %40 = tpu.matmul %38, %39, %cst_17 {dimension_numbers = #tpu.dot_dimension_numbers<[1], [0], [0], [1], [0, 0, 1, 1], [], []>} : vector<128x128xbf16>, vector<128x1024xbf16>, vector<128x1024xf32> -> vector<128x1024xf32>
    %c0_18 = arith.constant 0 : index
    %c0_19 = arith.constant 0 : index
    %41 = vector.load %arg10[%c0_18, %c0_19] : memref<8x1024xf32, #tpu.memory_space<vmem>>, vector<8x1024xf32>
    %42 = vector.extract_strided_slice %40 {offsets = [0, 0], sizes = [8, 1024], strides = [1, 1]} : vector<128x1024xf32> to vector<8x1024xf32>
    %43 = arith.maximumf %41, %42 : vector<8x1024xf32>
    %44 = vector.extract_strided_slice %40 {offsets = [8, 0], sizes = [8, 1024], strides = [1, 1]} : vector<128x1024xf32> to vector<8x1024xf32>
    %45 = arith.maximumf %43, %44 : vector<8x1024xf32>
    %46 = vector.extract_strided_slice %40 {offsets = [16, 0], sizes = [8, 1024], strides = [1, 1]} : vector<128x1024xf32> to vector<8x1024xf32>
    %47 = arith.maximumf %45, %46 : vector<8x1024xf32>
    %48 = vector.extract_strided_slice %40 {offsets = [24, 0], sizes = [8, 1024], strides = [1, 1]} : vector<128x1024xf32> to vector<8x1024xf32>
    %49 = arith.maximumf %47, %48 : vector<8x1024xf32>
    %50 = vector.extract_strided_slice %40 {offsets = [32, 0], sizes = [8, 1024], strides = [1, 1]} : vector<128x1024xf32> to vector<8x1024xf32>
    %51 = arith.maximumf %49, %50 : vector<8x1024xf32>
    %52 = vector.extract_strided_slice %40 {offsets = [40, 0], sizes = [8, 1024], strides = [1, 1]} : vector<128x1024xf32> to vector<8x1024xf32>
    %53 = arith.maximumf %51, %52 : vector<8x1024xf32>
    %54 = vector.extract_strided_slice %40 {offsets = [48, 0], sizes = [8, 1024], strides = [1, 1]} : vector<128x1024xf32> to vector<8x1024xf32>
    %55 = arith.maximumf %53, %54 : vector<8x1024xf32>
    %56 = vector.extract_strided_slice %40 {offsets = [56, 0], sizes = [8, 1024], strides = [1, 1]} : vector<128x1024xf32> to vector<8x1024xf32>
    %57 = arith.maximumf %55, %56 : vector<8x1024xf32>
    %58 = vector.extract_strided_slice %40 {offsets = [64, 0], sizes = [8, 1024], strides = [1, 1]} : vector<128x1024xf32> to vector<8x1024xf32>
    %59 = arith.maximumf %57, %58 : vector<8x1024xf32>
    %60 = vector.extract_strided_slice %40 {offsets = [72, 0], sizes = [8, 1024], strides = [1, 1]} : vector<128x1024xf32> to vector<8x1024xf32>
    %61 = arith.maximumf %59, %60 : vector<8x1024xf32>
    %62 = vector.extract_strided_slice %40 {offsets = [80, 0], sizes = [8, 1024], strides = [1, 1]} : vector<128x1024xf32> to vector<8x1024xf32>
    %63 = arith.maximumf %61, %62 : vector<8x1024xf32>
    %64 = vector.extract_strided_slice %40 {offsets = [88, 0], sizes = [8, 1024], strides = [1, 1]} : vector<128x1024xf32> to vector<8x1024xf32>
    %65 = arith.maximumf %63, %64 : vector<8x1024xf32>
    %66 = vector.extract_strided_slice %40 {offsets = [96, 0], sizes = [8, 1024], strides = [1, 1]} : vector<128x1024xf32> to vector<8x1024xf32>
    %67 = arith.maximumf %65, %66 : vector<8x1024xf32>
    %68 = vector.extract_strided_slice %40 {offsets = [104, 0], sizes = [8, 1024], strides = [1, 1]} : vector<128x1024xf32> to vector<8x1024xf32>
    %69 = arith.maximumf %67, %68 : vector<8x1024xf32>
    %70 = vector.extract_strided_slice %40 {offsets = [112, 0], sizes = [8, 1024], strides = [1, 1]} : vector<128x1024xf32> to vector<8x1024xf32>
    %71 = arith.maximumf %69, %70 : vector<8x1024xf32>
    %72 = vector.extract_strided_slice %40 {offsets = [120, 0], sizes = [8, 1024], strides = [1, 1]} : vector<128x1024xf32> to vector<8x1024xf32>
    %73 = arith.maximumf %71, %72 : vector<8x1024xf32>
    %c0_20 = arith.constant 0 : index
    %c0_21 = arith.constant 0 : index
    %74 = vector.load %arg10[%c0_20, %c0_21] : memref<8x1024xf32, #tpu.memory_space<vmem>>, vector<8x1024xf32>
    tpu.vector_store %arg10[%c0_20, %c0_21], %73 {strides = array<i32>} : memref<8x1024xf32, #tpu.memory_space<vmem>>, vector<8x1024xf32>,
    %c0_i32_22 = arith.constant 0 : i32
    %75 = arith.cmpi eq, %arg1, %c0_i32_22 : i32
    %76 = arith.extui %75 : i1 to i32
    %c0_i32_23 = arith.constant 0 : i32
    %77 = arith.cmpi ne, %76, %c0_i32_23 : i32
    scf.if %77 {
      %c0_24 = arith.constant 0 : index
      %c0_25 = arith.constant 0 : index
      %78 = vector.load %arg8[%c0_24, %c0_25] : memref<1x1024xf32, #tpu.memory_space<vmem>>, vector<1x1024xf32>
      %c0_26 = arith.constant 0 : index
      %c0_27 = arith.constant 0 : index
      %79 = vector.load %arg10[%c0_26, %c0_27] : memref<8x1024xf32, #tpu.memory_space<vmem>>, vector<8x1024xf32>
      %cst_28 = arith.constant dense<0xFF800000> : vector<1024xf32>
      %80 = vector.multi_reduction <maximumf>, %79, %cst_28 [0] : vector<8x1024xf32> to vector<1024xf32>
      %81 = vector.shape_cast %80 : vector<1024xf32> to vector<1x1024xf32>
      %82 = arith.addf %81, %78 : vector<1x1024xf32>
      %c0_29 = arith.constant 0 : index
      %c0_30 = arith.constant 0 : index
      %c0_31 = arith.constant 0 : index
      %83 = vector.load %arg9[%c0_29, %c0_30, %c0_31] : memref<1x1x1024xf32, #tpu.memory_space<vmem>>, vector<1x1x1024xf32>
      %84 = vector.shape_cast %83 : vector<1x1x1024xf32> to vector<1x1024xf32>
      %85 = vector.shape_cast %82 : vector<1x1024xf32> to vector<1x1x1024xf32>
      tpu.vector_store %arg9[%c0_29, %c0_30, %c0_31], %85 {strides = array<i32>} : memref<1x1x1024xf32, #tpu.memory_space<vmem>>, vector<1x1x1024xf32>,
    } else {
    }
    return
  }
  func.func @transform_0(%arg0: i32, %arg1: i32) -> (i32, i32, i32) {
    %c0_i32 = arith.constant 0 : i32
    %c0_i32_0 = arith.constant 0 : i32
    return %arg0, %arg1, %c0_i32 : i32, i32, i32
  }
  func.func @transform_1(%arg0: i32, %arg1: i32) -> (i32, i32, i32) {
    %c0_i32 = arith.constant 0 : i32
    %c0_i32_0 = arith.constant 0 : i32
    %c0_i32_1 = arith.constant 0 : i32
    return %arg0, %c0_i32, %c0_i32_0 : i32, i32, i32
  }
  func.func @transform_2(%arg0: i32, %arg1: i32) -> (i32, i32) {
    %c0_i32 = arith.constant 0 : i32
    %c0_i32_0 = arith.constant 0 : i32
    %c0_i32_1 = arith.constant 0 : i32
    return %c0_i32, %c0_i32_0 : i32, i32
  }
  func.func @transform_3(%arg0: i32, %arg1: i32) -> (i32, i32, i32) {
    %c0_i32 = arith.constant 0 : i32
    %c0_i32_0 = arith.constant 0 : i32
    %c0_i32_1 = arith.constant 0 : i32
    return %arg0, %c0_i32, %c0_i32_0 : i32, i32, i32
  }
  func.func @transform_4(%arg0: i32, %arg1: i32) -> (i32, i32) {
    %c0_i32 = arith.constant 0 : i32
    %c0_i32_0 = arith.constant 0 : i32
    %c0_i32_1 = arith.constant 0 : i32
    return %c0_i32, %c0_i32_0 : i32, i32
  }
  func.func @transform_5(%arg0: i32, %arg1: i32) -> (i32, i32) {
    %c0_i32 = arith.constant 0 : i32
    %c0_i32_0 = arith.constant 0 : i32
    %c0_i32_1 = arith.constant 0 : i32
    return %c0_i32, %c0_i32_0 : i32, i32
  }
  func.func @transform_6(%arg0: i32, %arg1: i32) -> (i32, i32) {
    %c0_i32 = arith.constant 0 : i32
    %c0_i32_0 = arith.constant 0 : i32
    %c0_i32_1 = arith.constant 0 : i32
    return %c0_i32, %c0_i32_0 : i32, i32
  }
  func.func @transform_7(%arg0: i32, %arg1: i32) -> (i32, i32, i32) {
    %c0_i32 = arith.constant 0 : i32
    %c0_i32_0 = arith.constant 0 : i32
    %c0_i32_1 = arith.constant 0 : i32
    return %arg0, %c0_i32, %c0_i32_0 : i32, i32, i32
  }
}

</mosaic_0001>

<bundles_post_ra>
// kernel: pointnet_encoder.5
= control target key start
LH: loop header
LB: loop body
LE: loop exit
PB: predicated region body
PF: predicated region fallthrough
CT: control target
= control target key end

     0   :  { %12 = vsyncpa [#allocation4], 0  ;;  %s3256_s0 = inlined_call_operand.vmem [shape: f32[2,128,3], index: 0, kind: input, shape index: {}]   ;;  %s3257_s1 = inlined_call_operand.hbm [shape: f32[3,64], index: 1, kind: input, shape index: {}]   ;;  %s3258_s2 = inlined_call_operand.hbm [shape: f32[1,64], index: 2, kind: input, shape index: {}]   ;;  %s3259_s3 = inlined_call_operand.hbm [shape: bf16[64,128], index: 3, kind: input, shape index: {}]   ;;  %s3260_s4 = inlined_call_operand.hbm [shape: f32[1,128], index: 4, kind: input, shape index: {}]   ;;  %s3261_s5 = inlined_call_operand.hbm [shape: bf16[128,1024], index: 5, kind: input, shape index: {}]   ;;  %s3262_s6 = inlined_call_operand.hbm [shape: f32[1,1024], index: 6, kind: input, shape index: {}]   ;;  %s3263_s7 = inlined_call_operand.vmem [shape: f32[2,1,1024], index: 7, kind: output, shape index: {}]  }
   0x1   :  { %13 = vsyncpa [#allocation6], 0 }
   0x2   :  { %14 = vsyncpa [#allocation9], 0 }
   0x3   :  { %15 = vsyncpa [#allocation12], 0  ;;  %s2756_s24 = smov 0   ;;  %s2758_s25 = smov 0  }
   0x4   :  { %s2760_s26 = smov 0  }
   0x5 LB: > { %s2702_s27 = smov [#allocation5]   ;;  %s2231_s29 = sadd.s32 4294967295, %s2700_s26   ;;  %s2700_s26 = sphi %s2760_s26, %s21_s26   ;;  %s2696_s25 = sphi %s2758_s25, %s3276_s25   ;;  %s2692_s24 = sphi %s2756_s24, %s3275_s24  }
   0x6   : > { %s242_s28 = sshll.u32 %s2702_s27, 4  ;;  %p2233_p0 = scmp.ge.s32.totalorder %s2700_s26, 1  ;;  %s243_s28 = int_to_ptr.vmem [resolvable:$true] %s242_s28 }
   0x7   : > { %p218_p1 = scmp.lt.s32.totalorder %s2700_s26, 3  ;;  %p2774_p2 = scmp.eq.s32.totalorder %s2231_s29, 0 }
   0x8   : > { %s2703_s9 = smov [#allocation8]   ;;  %s33_s12 = sadd.s32 1, %s2696_s25 }
   0x9   : > { %s3267_s30 = scalar_select %p2774_p2, 1, 0 }
   0xa   : > { %p2778_p3 = pnand %p2233_p0, %p218_p1  ;;  %s266_s10 = sshll.u32 %s2703_s9, 4  ;;  %s267_s10 = int_to_ptr.vmem [resolvable:$true] %s266_s10 }
   0xb   : > { %p2791_p6 = scmp.ge.s32.totalorder %s33_s12, 2  ;;  %s2517_s15 = scalar_lea.vmem %s243_s28, 16 }
   0xc   : > { %s3268_s8 = scalar_select %p2778_p3, 1, 0 }
   0xd   : > { %p2408_p4 = pneg %p2778_p3  ;;  %p2518_p8 = scmp.ne.s32.totalorder %s243_s28, %s2517_s15 }
   0xe   : > { %s3270_s13 = scalar_select %p2791_p6, 1, 0 }
   0xf   : > { %p2786_p5 = pnand %p2774_p2, %p2408_p4  ;;  %s2524_s16 = scalar_lea.vmem %s243_s28, 32 }
  0x10   : > { %p2525_p11 = scmp.lt.s32.totalorder %s243_s28, %s243_s28  ;;  %p2526_p12 = scmp.lt.s32.totalorder %s2524_s16, %s2517_s15 }
  0x11   : > { %p2797_p7 = pneg %p2786_p5 }
  0x12   : > { %p2527_p13 = por %p2526_p12, %p2525_p11 }
  0x13   : > { %p2520_p9 = pnand %p2518_p8, %p2797_p7 }
  0x15   : > { %p2521_p10 = pneg %p2520_p9 }
  0x17   : > { %p2528_p0 = pnand %p2527_p13, %p2521_p10 }
  0x19   : > { %2531 = shalt.err (!%p2528_p0)
}
  0x1a   : > { %2414 = dma.hbm_to_vmem [thread:$0]  (!%p2786_p5), %s3258_s2, 16, %s243_s28, [#allocation6]  }
  0x1b   : > { %s2543_s19 = scalar_lea.vmem %s267_s10, 16  ;;  %s2550_s20 = scalar_lea.vmem %s267_s10, 32 }
  0x1c   : > { %p2544_p1 = scmp.ne.s32.totalorder %s267_s10, %s2543_s19  ;;  %p2551_p8 = scmp.lt.s32.totalorder %s267_s10, %s267_s10 }
  0x1d   : > { %p2552_p9 = scmp.lt.s32.totalorder %s2550_s20, %s2543_s19 }
  0x1e   : > { %p2546_p4 = pnand %p2544_p1, %p2797_p7 }
  0x1f   : > { %p2553_p3 = por %p2552_p9, %p2551_p8 }
  0x20   : > { %p2547_p2 = pneg %p2546_p4 }
  0x22   : > { %p2554_p6 = pnand %p2553_p3, %p2547_p2 }
  0x24   : > { %2557 = shalt.err (!%p2554_p6)
}
  0x25   : > { %2420 = dma.hbm_to_vmem [thread:$0]  (!%p2786_p5), %s3260_s4, 16, %s267_s10, [#allocation9]  }
  0x26   : > { %p3272_p10 = scmp.ne.s32.totalorder %s3270_s13, 0  ;;  %s2704_s23 = smov [#allocation3]  }
  0x27   : > { %s231_s27 = sshll.u32 %s2704_s23, 4  ;;  %s2705_s28 = smov [#allocation7]   ;;  %s232_s27 = int_to_ptr.vmem [resolvable:$true] %s231_s27 }
  0x28   : > { %s3278_s12 = smov (%p3272_p10, %s33_s12), 0  ;;  %s252_s29 = sshll.u32 %s2705_s28, 4  ;;  %s253_s29 = int_to_ptr.vmem [resolvable:$true] %s252_s29 }
  0x29   : > { %s2569_s9 = scalar_lea.vmem %s232_s27, 64  ;;  %p2577_p6 = scmp.lt.s32.totalorder %s232_s27, %s232_s27 }
  0x2a   : > { %p2570_p11 = scmp.ne.s32.totalorder %s232_s27, %s2569_s9  ;;  %p2578_p12 = scmp.lt.s32.totalorder %s2569_s9, %s2569_s9 }
  0x2c   : > { %p2572_p2 = pnand %p2570_p11, %p2797_p7  ;;  %p2579_p13 = por %p2578_p12, %p2577_p6 }
  0x2e   : > { %p2573_p3 = pneg %p2572_p2 }
  0x30   : > { %p2580_p0 = pnand %p2579_p13, %p2573_p3 }
  0x32   : > { %2583 = shalt.err (!%p2580_p0)
}
  0x33   : > { %2411 = dma.hbm_to_vmem [thread:$0]  (!%p2786_p5), %s3257_s1, 64, %s232_s27, [#allocation4]  }
  0x34   : > { %s2595_s15 = scalar_lea.vmem %s253_s29, 512  ;;  %p2603_p9 = scmp.lt.s32.totalorder %s253_s29, %s253_s29 }
  0x35   : > { %p2596_p1 = scmp.ne.s32.totalorder %s253_s29, %s2595_s15  ;;  %p2604_p10 = scmp.lt.s32.totalorder %s2595_s15, %s2595_s15 }
  0x37   : > { %p2598_p4 = pnand %p2596_p1, %p2797_p7  ;;  %p2605_p11 = por %p2604_p10, %p2603_p9 }
  0x39   : > { %p2599_p8 = pneg %p2598_p4 }
  0x3b   : > { %p2606_p2 = pnand %p2605_p11, %p2599_p8 }
  0x3d   : > { %2609 = shalt.err (!%p2606_p2)
}
  0x3e   : > { %s2706_s16 = smov 64   ;;  %s2707_s17 = smov 4  }
  0x3f   : > { %2417 = dma.hbm_to_vmem [thread:$0]  (!%p2786_p5), %s3259_s3, 512, %s253_s29, [#allocation6], %s2706_s16, %s2706_s16, %s2707_s17  }
  0x40   : > { %s2708_s20 = smov [#allocation10]  }
  0x41   : > { %s276_s21 = sshll.u32 %s2708_s20, 4  ;;  %s277_s21 = int_to_ptr.vmem [resolvable:$true] %s276_s21 }
  0x42   : > { %s2621_s22 = scalar_lea.vmem %s277_s21, 8192  ;;  %p2629_p13 = scmp.lt.s32.totalorder %s277_s21, %s277_s21 }
  0x43   : > { %p2622_p3 = scmp.ne.s32.totalorder %s277_s21, %s2621_s22  ;;  %p2630_p0 = scmp.lt.s32.totalorder %s2621_s22, %s2621_s22 }
  0x45   : > { %p2624_p6 = pnand %p2622_p3, %p2797_p7  ;;  %p2631_p1 = por %p2630_p0, %p2629_p13 }
  0x47   : > { %p2625_p12 = pneg %p2624_p6 }
  0x49   : > { %p2632_p4 = pnand %p2631_p1, %p2625_p12 }
  0x4b   : > { %2635 = shalt.err (!%p2632_p4)
}
  0x4c   : > { %s2709_s23 = smov 512   ;;  %s2710_s27 = smov 32  }
  0x4d   : > { %2423 = dma.hbm_to_vmem [thread:$0]  (!%p2786_p5), %s3261_s5, 8192, %s277_s21, [#allocation9], %s2709_s23, %s2709_s23, %s2710_s27  }
  0x4e   : > { %s2711_s9 = smov [#allocation11]  }
  0x4f   : > { %s290_s10 = sshll.u32 %s2711_s9, 4  ;;  %s291_s10 = int_to_ptr.vmem [resolvable:$true] %s290_s10 }
  0x50   : > { %s2647_s13 = scalar_lea.vmem %s291_s10, 128  ;;  %p2655_p11 = scmp.lt.s32.totalorder %s291_s10, %s291_s10 }
  0x51   : > { %p2648_p8 = scmp.ne.s32.totalorder %s291_s10, %s2647_s13  ;;  %p2656_p2 = scmp.lt.s32.totalorder %s2647_s13, %s2647_s13 }
  0x53   : > { %p2650_p9 = pnand %p2648_p8, %p2797_p7  ;;  %p2657_p3 = por %p2656_p2, %p2655_p11 }
  0x55   : > { %p2651_p10 = pneg %p2650_p9 }
  0x57   : > { %p2658_p6 = pnand %p2657_p3, %p2651_p10 }
  0x59   : > { %2661 = shalt.err (!%p2658_p6)
}
  0x5a   : > { %2426 = dma.hbm_to_vmem [thread:$0]  (!%p2786_p5), %s3262_s6, 128, %s291_s10, [#allocation12]  }
  0x5b   : > { %p3273_p12 = scmp.ne.s32.totalorder %s3268_s8, 0 }
  0x5c   : > { %p3274_p13 = scmp.ne.s32.totalorder (!%p3273_p12), %s3267_s30, 0 }
  0x5d   : > { %316 = sbr.rel (%p3273_p12) target bundleno = 888 (0x378), region = 48 }
  0x62   : > { %2675 = dma.done.wait (%p3274_p13), [#allocation4], 64  }
  0x63   : > { %2677 = vsyncadd (%p3274_p13), [#allocation4], 4294967232 }
  0x64   : > { %2679 = dma.done.wait (%p3274_p13), [#allocation6], 528  }
  0x65   : > { %2681 = vsyncadd (%p3274_p13), [#allocation6], 4294966768 }
  0x66   : > { %2683 = dma.done.wait (%p3274_p13), [#allocation9], 8208  }
  0x67   : > { %2685 = vsyncadd (%p3274_p13), [#allocation9], 4294959088 }
  0x68   : > { %2687 = dma.done.wait (%p3274_p13), [#allocation12], 128  }
  0x69   : > { %2689 = vsyncadd (%p3274_p13), [#allocation12], 4294967168  ;;  %p372_p5 = scmp.lt.s32.totalorder %s2692_s24, 1  ;;  %v2712_v0 = vmov 1   ;;  %v2713_v1 = vmov 0   ;;  %v2502_v7 = vld [vmem:[#allocation7 + $0x18] sm:$0xff]   ;;  %v496_v25 = vlaneseq }
  0x6a   : > { %2478 = vset.pattern.permute.xlu1 %v2712_v0  ;;  %2477 = vset.pattern.permute.xlu0 %v2713_v1  ;;  %v2714_v8 = vmov 2   ;;  %v2503_v10 = vld [vmem:[#allocation7 + $0x10] sm:$0xff]   ;;  %v2504_v11 = vld [vmem:[#allocation7 + $0x8] sm:$0xff]   ;;  %v2505_v13 = vld [vmem:[#allocation7] sm:$0xff]   ;;  %vm801_vm0 = vcmask 523264  }
  0x6b   : > { %s3280_s24 = smov (!%p372_p5, %s2692_s24), 1  ;;  %1363 = vmatprep.mubr.bf16.mxu1 %v2713_v1  ;;  %2344 = vmatprep.subr.bf16.mxu0 %v2502_v7  ;;  %v2917_v28 = vshrl.u32 %v496_v25, 7  ;;  %v414_v33 = vld [vmem:[#allocation3] sm:$0x7]  ;;  %v1003_v36 = vld [vmem:[#allocation10 + $0x1c0] sm:$0xff]  ;;  %v2922_v38 = vld [vmem:[#allocation10 + $0x1c8] sm:$0xff] }
  0x6c   : > { %s2331_s8 = sshll.u32 %s3280_s24, 7  ;;  %2345 = vmatpush3.bf16.msra.mxu0 %v2502_v7  ;;  %v1007_v37 = vld [vmem:[#allocation10 + $0x1e0] sm:$0xff]  ;;  %v2924_v41 = vld [vmem:[#allocation10 + $0x1e8] sm:$0xff]  ;;  %s2250_s17 = sshll.u32 %s3280_s24, 3 }
  0x6d   : > { %s2876_s30 = scalar_lea.vmem %s3256_s0, %s2331_s8  ;;  %2346 = vmatprep.subr.bf16.mxu0 %v2503_v10  ;;  %v582_v31 = vsub.s32 1, %v2917_v28  ;;  %v498_v32 = vsub.s32 0, %v2917_v28  ;;  %v682_v35 = vsub.s32 2, %v2917_v28  ;;  %v2322_v40 = vcombine.high %v1003_v36, %v1007_v37  ;;  %v995_v43 = vld [vmem:[#allocation10 + $0x180] sm:$0xff]  ;;  %s384_s20 = scalar_lea.vmem %s3263_s7, %s2250_s17 }
  0x6e   : > { %v398_v2 = vld [vmem:[%s2876_s30] sm:$0xff]  ;;  %v399_v3 = vld [vmem:[%s2876_s30 + $0x8] sm:$0xff]  ;;  %v400_v4 = vld [vmem:[%s2876_s30 + $0x10] sm:$0xff]  ;;  %v2321_v42 = vcombine.low %v1003_v36, %v1007_v37  ;;  %v2324_v47 = vcombine.high %v2922_v38, %v2924_v41 }
  0x6f   : > { %517 = vperm.xlu1 %2478, %v398_v2   ;;  %418 = vperm.xlu0 %2477, %v398_v2   ;;  %v401_v5 = vld [vmem:[%s2876_s30 + $0x18] sm:$0xff]  ;;  %v403_v6 = vld [vmem:[%s2876_s30 + $0x28] sm:$0xff]  ;;  %v404_v9 = vld [vmem:[%s2876_s30 + $0x30] sm:$0xff]  ;;  %v2928_v45 = vrot.slane %v414_v33, %v582_v31  ;;  %v2932_v46 = vrot.slane %v414_v33, %v498_v32  ;;  %v2940_v52 = vrot.slane %v414_v33, %v682_v35 }
  0x70   : > { %2347 = vmatpush3.bf16.msra.mxu0 %v2503_v10  ;;  %v402_v12 = vld [vmem:[%s2876_s30 + $0x20] sm:$0xff]  ;;  %v405_v14 = vld [vmem:[%s2876_s30 + $0x38] sm:$0xff]  ;;  %v407_v15 = vld [vmem:[%s2876_s30 + $0x48] sm:$0xff]  ;;  %1331 = vmatprep.subr.bf16.mxu1 %v2322_v40 }
  0x71   : > { %2348 = vmatprep.subr.bf16.mxu0 %v2504_v11  ;;  %v408_v16 = vld [vmem:[%s2876_s30 + $0x50] sm:$0xff]  ;;  %v410_v17 = vld [vmem:[%s2876_s30 + $0x60] sm:$0xff]  ;;  %v411_v18 = vld [vmem:[%s2876_s30 + $0x68] sm:$0xff]  ;;  %1332 = vmatpush1.bf16.msra.mxu1 %v2321_v42 }
  0x72   : > { %v406_v19 = vld [vmem:[%s2876_s30 + $0x40] sm:$0xff]  ;;  %v412_v20 = vld [vmem:[%s2876_s30 + $0x70] sm:$0xff]  ;;  %v409_v21 = vld [vmem:[%s2876_s30 + $0x58] sm:$0xff] }
  0x73   : > { %521 = vperm.xlu1 %2478, %v399_v3   ;;  %423 = vperm.xlu0 %2477, %v399_v3   ;;  %v413_v22 = vld [vmem:[%s2876_s30 + $0x78] sm:$0xff]  ;;  %v999_v44 = vld [vmem:[#allocation10 + $0x1a0] sm:$0xff]  ;;  %v996_v40 = vld [vmem:[#allocation10 + $0x188] sm:$0xff] }
  0x74   : > { %2349 = vmatpush3.bf16.msra.mxu0 %v2504_v11  ;;  %v2314_v48 = vcombine.high %v995_v43, %v999_v44  ;;  %v987_v49 = vld [vmem:[#allocation10 + $0x140] sm:$0xff]  ;;  %v2313_v53 = vcombine.low %v995_v43, %v999_v44  ;;  %v1000_v42 = vld [vmem:[#allocation10 + $0x1a8] sm:$0xff] }
  0x75   : > { %2350 = vmatprep.subr.bf16.mxu0 %v2505_v13  ;;  %v991_v50 = vld [vmem:[#allocation10 + $0x160] sm:$0xff] }
  0x76   : > { %1333 = vmatprep.subr.bf16.mxu1 %v2314_v48  ;;  %v2306_v56 = vcombine.high %v987_v49, %v991_v50  ;;  %v979_v60 = vld [vmem:[#allocation10 + $0x100] sm:$0xff] }
  0x77   : > { %2479 = vset.pattern.permute.xlu1 %v2713_v1  ;;  %428 = vperm.xlu0 %2477, %v400_v4   ;;  %v983_v61 = vld [vmem:[#allocation10 + $0x120] sm:$0xff] }
  0x78   : > { %433 = vperm.xlu1 %2479, %v401_v5   ;;  %2351 = vmatpush3.bf16.msra.mxu0 %v2505_v13  ;;  %v2297_v13 = vcombine.low %v979_v60, %v983_v61 }
  0x79   : > { %1444 = vmatprep.subr.bf16.mxu0 %v2324_v47  ;;  %1334 = vmatpush1.bf16.msra.mxu1 %v2313_v53  ;;  %v2316_v53 = vcombine.high %v996_v40, %v1000_v42 }
  0x7a   : > { %1335 = vmatprep.subr.bf16.mxu1 %v2306_v56  ;;  %v992_v56 = vld [vmem:[#allocation10 + $0x168] sm:$0xff] }
  0x7b   : > { %2480 = vset.pattern.permute.xlu0 %v2712_v0 }
  0x7c   : > { %2481 = vset.pattern.permute.xlu1 %v2712_v0  ;;  %525 = vperm.xlu0 %2480, %v400_v4  }
  0x7d   : > { %529 = vperm.xlu1 %2481, %v401_v5  }
  0x80   : > { %537 = vperm.xlu0 %2480, %v403_v6  }
  0x81   : > { %2482 = vset.pattern.permute.xlu1 %v2714_v8 }
  0x82   : > { %617 = vperm.xlu1 %2482, %v398_v2  }
  0x84   : > { %541 = vperm.xlu0 %2480, %v404_v9  }
  0x86   : > { %625 = vperm.xlu1 %2482, %v400_v4  }
  0x88   : > { %2486 = vset.pattern.permute.xlu0 %v2714_v8 }
  0x89   : > { %621 = vperm.xlu0 %2486, %v399_v3   ;;  %v2298_v3 = vcombine.high %v979_v60, %v983_v61  ;;  %v980_v60 = vld [vmem:[#allocation10 + $0x108] sm:$0xff] }
  0x8a   : > { %629 = vperm.xlu1 %2482, %v401_v5   ;;  %v984_v61 = vld [vmem:[#allocation10 + $0x128] sm:$0xff] }
  0x8d   : > { %633 = vperm.xlu0 %2486, %v402_v12  }
  0x8e   : > { %2483 = vset.pattern.permute.xlu1 %v2713_v1 }
  0x8f   : > { %443 = vperm.xlu1 %2483, %v403_v6  }
  0x91   : > { %645 = vperm.xlu0 %2486, %v405_v14  }
  0x93   : > { %2484 = vset.pattern.permute.xlu1 %v2712_v0 }
  0x94   : > { %533 = vperm.xlu1 %2484, %v402_v12  }
  0x95   : > { %653 = vperm.xlu0 %2486, %v407_v15  }
  0x98   : > { %2485 = vset.pattern.permute.xlu1 %v2713_v1 }
  0x99   : > { %448 = vperm.xlu1 %2485, %v404_v9   ;;  %2494 = vset.pattern.permute.xlu0 %v2713_v1 }
  0x9a   : > { %438 = vperm.xlu0 %2494, %v402_v12  }
  0x9d   : > { %453 = vperm.xlu1 %2485, %v405_v14  }
  0x9e   : > { %463 = vperm.xlu0 %2494, %v407_v15  }
  0xa1   : > { %2487 = vset.pattern.permute.xlu1 %v2712_v0 }
  0xa2   : > { %545 = vperm.xlu1 %2487, %v405_v14   ;;  %468 = vperm.xlu0 %2494, %v408_v16  }
  0xa6   : > { %2488 = vset.pattern.permute.xlu1 %v2714_v8  ;;  %478 = vperm.xlu0 %2494, %v410_v17  }
  0xa7   : > { %637 = vperm.xlu1 %2488, %v403_v6  }
  0xaa   : > { %2495 = vset.pattern.permute.xlu0 %v2712_v0 }
  0xab   : > { %641 = vperm.xlu1 %2488, %v404_v9   ;;  %557 = vperm.xlu0 %2495, %v408_v16   ;;  %v975_v9 = vld [vmem:[#allocation10 + $0xe0] sm:$0xff] }
  0xaf   : > { %2489 = vset.pattern.permute.xlu1 %v2713_v1  ;;  %569 = vperm.xlu0 %2495, %v411_v18  }
  0xb0   : > { %458 = vperm.xlu1 %2489, %v406_v19  }
  0xb3   : > { %573 = vperm.xlu0 %2495, %v412_v20  }
  0xb4   : > { %2490 = vset.pattern.permute.xlu1 %v2712_v0 }
  0xb5   : > { %549 = vperm.xlu1 %2490, %v406_v19  }
  0xb7   : > { %2500 = vset.pattern.permute.xlu0 %v2714_v8 }
  0xb8   : > { %665 = vperm.xlu0 %2500, %v410_v17  }
  0xb9   : > { %553 = vperm.xlu1 %2490, %v407_v15   ;;  %v2954_v15 = vld [vmem:[#allocation5] ss:$0 sm:$0xff] }
  0xbc   : > { %677 = vperm.xlu0 %2500, %v413_v22  }
  0xbd   : > { %2491 = vset.pattern.permute.xlu1 %v2713_v1 }
  0xbe   : > { %473 = vperm.xlu1 %2491, %v409_v21  }
  0xc2   : > { %2492 = vset.pattern.permute.xlu1 %v2712_v0 }
  0xc3   : > { %561 = vperm.xlu1 %2492, %v409_v21  }
  0xc7   : > { %2493 = vset.pattern.permute.xlu1 %v2714_v8 }
  0xc8   : > { %649 = vperm.xlu1 %2493, %v406_v19  }
  0xcc   : > { %657 = vperm.xlu1 %2493, %v408_v16  }
  0xd0   : > { %661 = vperm.xlu1 %2493, %v409_v21  }
  0xd4   : > { %2496 = vset.pattern.permute.xlu1 %v2713_v1 }
  0xd5   : > { %483 = vperm.xlu1 %2496, %v411_v18  }
  0xd9   : > { %2497 = vset.pattern.permute.xlu1 %v2712_v0 }
  0xda   : > { %565 = vperm.xlu1 %2497, %v410_v17  }
  0xde   : > { %2498 = vset.pattern.permute.xlu1 %v2713_v1 }
  0xdf   : > { %488 = vperm.xlu1 %2498, %v412_v20  }
  0xe3   : > { %493 = vperm.xlu1 %2498, %v413_v22  }
  0xe7   : > { %2499 = vset.pattern.permute.xlu1 %v2712_v0  ;;  %v2305_v0 = vcombine.low %v987_v49, %v991_v50  ;;  %v2323_v49 = vcombine.low %v2922_v38, %v2924_v41 }
  0xe8   : > { %577 = vperm.xlu1 %2499, %v413_v22  }
  0xe9   : > { %1336 = vmatpush1.bf16.msra.mxu1 %v2305_v0  ;;  %v2300_v0 = vcombine.high %v980_v60, %v984_v61 }
  0xea   : > { %v518_v23 = vpop.permute.xlu1 %517  ;;  %v419_v24 = vpop.permute.xlu0 %418  ;;  %1337 = vmatprep.subr.bf16.mxu1 %v2298_v3  ;;  %v976_v3 = vld [vmem:[#allocation10 + $0xe8] sm:$0xff] }
  0xeb   : > { %v584_v57 = vmul.f32 %v2928_v45, %v518_v23  ;;  %v500_v58 = vmul.f32 %v2932_v46, %v419_v24 }
  0xec   : > { %2501 = vset.pattern.permute.xlu1 %v2714_v8  ;;  %v971_v8 = vld [vmem:[#allocation10 + $0xc0] sm:$0xff] }
  0xed   : > { %669 = vperm.xlu1 %2501, %v411_v18   ;;  %v600_v4 = vadd.f32 %v584_v57, %v500_v58  ;;  %v2290_v18 = vcombine.high %v971_v8, %v975_v9  ;;  %1338 = vmatpush1.bf16.msra.mxu1 %v2297_v13  ;;  %v2315_v58 = vcombine.low %v996_v40, %v1000_v42 }
  0xee   : > { %v522_v26 = vpop.permute.xlu1 %521  ;;  %v424_v27 = vpop.permute.xlu0 %423 }
  0xef   : > { %v585_v5 = vmul.f32 %v2928_v45, %v522_v26  ;;  %v501_v6 = vmul.f32 %v2932_v46, %v424_v27  ;;  %v2289_v26 = vcombine.low %v971_v8, %v975_v9  ;;  %1339 = vmatprep.subr.bf16.mxu1 %v2290_v18 }
  0xf1   : > { %673 = vperm.xlu1 %2501, %v412_v20   ;;  %v601_v19 = vadd.f32 %v585_v5, %v501_v6  ;;  %1340 = vmatpush1.bf16.msra.mxu1 %v2289_v26  ;;  %v2299_v6 = vcombine.low %v980_v60, %v984_v61 }
  0xf2   : > { %v429_v29 = vpop.permute.xlu0 %428 }
  0xf3   : > { %v434_v30 = vpop.permute.xlu1 %433  ;;  %v502_v54 = vmul.f32 %v2932_v46, %v429_v29 }
  0xf4   : > { %v503_v14 = vmul.f32 %v2932_v46, %v434_v30 }
  0xf7   : > { %v526_v34 = vpop.permute.xlu0 %525 }
  0xf8   : > { %v530_v39 = vpop.permute.xlu1 %529  ;;  %v586_v55 = vmul.f32 %v2928_v45, %v526_v34 }
  0xf9   : > { %v587_v10 = vmul.f32 %v2928_v45, %v530_v39 }
  0xfa   : > { %v602_v2 = vadd.f32 %v586_v55, %v502_v54  ;;  %v988_v55 = vld [vmem:[#allocation10 + $0x148] sm:$0xff] }
  0xfb   : > { %v2936_v51 = vpop.permute.xlu0 %537  ;;  %v603_v22 = vadd.f32 %v587_v10, %v503_v14  ;;  %v2307_v38 = vcombine.low %v988_v55, %v992_v56 }
  0xfc   : > { %v589_v14 = vmul.f32 %v2928_v45, %v2936_v51 }
  0xfd   : > { %v618_v59 = vpop.permute.xlu1 %617 }
  0xfe   : > { %v684_v62 = vmul.f32 %v2940_v52, %v618_v59  ;;  %v2308_v59 = vcombine.high %v988_v55, %v992_v56 }
  0xff   : > { %v2947_v63 = vpop.permute.xlu0 %541 }
 0x100   : > { %v700_v12 = vadd.f32 %v684_v62, %v600_v4 }
 0x101   : > { %v626_v7 = vpop.permute.xlu1 %625 }
 0x102   : > { %v686_v11 = vmul.f32 %v2940_v52, %v626_v7  ;;  %v722_v25 = vadd.f32 %v2954_v15, %v700_v12 }
 0x104   : > { %v702_v16 = vadd.f32 %v686_v11, %v602_v2  ;;  %v622_v17 = vpop.permute.xlu0 %621  ;;  %v738_v37 = vmax.f32 %v722_v25, 0.0  ;;  %v972_v2 = vld [vmem:[#allocation10 + $0xc8] sm:$0xff] }
 0x105   : > { %v685_v20 = vmul.f32 %v2940_v52, %v622_v17  ;;  %v630_v21 = vpop.permute.xlu1 %629  ;;  %v2292_v7 = vcombine.high %v972_v2, %v976_v3  ;;  %v2291_v12 = vcombine.low %v972_v2, %v976_v3 }
 0x106   : > { %v687_v23 = vmul.f32 %v2940_v52, %v630_v21  ;;  %v724_v27 = vadd.f32 %v2954_v15, %v702_v16 }
 0x107   : > { %v701_v24 = vadd.f32 %v685_v20, %v601_v19 }
 0x108   : > { %v703_v29 = vadd.f32 %v687_v23, %v603_v22  ;;  %v634_v30 = vpop.permute.xlu0 %633  ;;  %v740_v43 = vmax.f32 %v724_v27, 0.0  ;;  %v590_v22 = vmul.f32 %v2928_v45, %v2947_v63 }
 0x109   : > { %v723_v33 = vadd.f32 %v2954_v15, %v701_v24  ;;  %v688_v9 = vmul.f32 %v2940_v52, %v634_v30 }
 0x10a   : > { %v725_v34 = vadd.f32 %v2954_v15, %v703_v29  ;;  %v444_v36 = vpop.permute.xlu1 %443 }
 0x10b   : > { %v739_v39 = vmax.f32 %v723_v33, 0.0  ;;  %v505_v16 = vmul.f32 %v2932_v46, %v444_v36 }
 0x10c   : > { %v741_v44 = vmax.f32 %v725_v34, 0.0  ;;  %v646_v47 = vpop.permute.xlu0 %645 }
 0x10d   : > { %v754_v48 = vpack.c.bf16 %v739_v39, %v738_v37  ;;  %v691_v18 = vmul.f32 %v2940_v52, %v646_v47  ;;  %v605_v23 = vadd.f32 %v589_v14, %v505_v16 }
 0x10e   : > { %v755_v50 = vpack.c.bf16 %v741_v44, %v740_v43 }
 0x10f   : > { %v534_v54 = vpop.permute.xlu1 %533  ;;  %2352 = vmatprep.mubr.msk.bf16.mxu0 %vm801_vm0, %v754_v48 }
 0x110   : > { %2353 = vmatmul.mubr.msk.bf16.vlgmr.msra.gmra.mxu0 %vm801_vm0, %v755_v50  ;;  %v2966_v57 = vpop.permute.xlu0 %653  ;;  %v588_v8 = vmul.f32 %v2928_v45, %v534_v54 }
 0x111   : > { %1445 = vmatpush1.bf16.msra.mxu0 %v2323_v49  ;;  %v693_v60 = vmul.f32 %v2940_v52, %v2966_v57 }
 0x112   : > { %1446 = vmatprep.subr.bf16.mxu0 %v2316_v53 }
 0x114   : > { %v449_v62 = vpop.permute.xlu1 %448 }
 0x115   : > { %1447 = vmatpush1.bf16.msra.mxu0 %v2315_v58  ;;  %v439_v41 = vpop.permute.xlu0 %438  ;;  %v506_v24 = vmul.f32 %v2932_v46, %v449_v62 }
 0x116   : > { %1448 = vmatprep.subr.bf16.mxu0 %v2308_v59  ;;  %v504_v5 = vmul.f32 %v2932_v46, %v439_v41 }
 0x117   : > { %v606_v30 = vadd.f32 %v590_v22, %v506_v24 }
 0x118   : > { %v454_v4 = vpop.permute.xlu1 %453  ;;  %v604_v10 = vadd.f32 %v588_v8, %v504_v5 }
 0x119   : > { %1449 = vmatpush1.bf16.msra.mxu0 %v2307_v38  ;;  %v507_v17 = vmul.f32 %v2932_v46, %v454_v4  ;;  %v464_v49 = vpop.permute.xlu0 %463 }
 0x11a   : > { %1450 = vmatprep.subr.bf16.mxu0 %v2300_v0  ;;  %v704_v19 = vadd.f32 %v688_v9, %v604_v10  ;;  %v509_v59 = vmul.f32 %v2932_v46, %v464_v49 }
 0x11c   : > { %v726_v51 = vadd.f32 %v2954_v15, %v704_v19 }
 0x11d   : > { %v546_v11 = vpop.permute.xlu1 %545  ;;  %1451 = vmatpush1.bf16.msra.mxu0 %v2299_v6  ;;  %v469_v53 = vpop.permute.xlu0 %468 }
 0x11e   : > { %v591_v13 = vmul.f32 %v2928_v45, %v546_v11  ;;  %1452 = vmatprep.subr.bf16.mxu0 %v2292_v7  ;;  %v742_v36 = vmax.f32 %v726_v51, 0.0  ;;  %v510_v3 = vmul.f32 %v2932_v46, %v469_v53  ;;  %v967_v51 = vld [vmem:[#allocation10 + $0xa0] sm:$0xff] }
 0x120   : > { %v607_v20 = vadd.f32 %v591_v13, %v507_v17 }
 0x121   : > { %1453 = vmatpush1.bf16.msra.mxu0 %v2291_v12  ;;  %v2988_v56 = vpop.permute.xlu0 %478 }
 0x122   : > { %v638_v21 = vpop.permute.xlu1 %637  ;;  %v707_v26 = vadd.f32 %v691_v18, %v607_v20 }
 0x123   : > { %v689_v25 = vmul.f32 %v2940_v52, %v638_v21 }
 0x124   : > { %v729_v37 = vadd.f32 %v2954_v15, %v707_v26  ;;  %v964_v26 = vld [vmem:[#allocation10 + $0x88] sm:$0xff] }
 0x125   : > { %v705_v27 = vadd.f32 %v689_v25, %v605_v23  ;;  %v963_v25 = vld [vmem:[#allocation10 + $0x80] sm:$0xff] }
 0x126   : > { %v642_v29 = vpop.permute.xlu1 %641  ;;  %v745_v44 = vmax.f32 %v729_v37, 0.0  ;;  %v558_v38 = vpop.permute.xlu0 %557  ;;  %v2281_v37 = vcombine.low %v963_v25, %v967_v51 }
 0x127   : > { %v727_v33 = vadd.f32 %v2954_v15, %v705_v27  ;;  %v690_v34 = vmul.f32 %v2940_v52, %v642_v29  ;;  %v594_v4 = vmul.f32 %v2928_v45, %v558_v38  ;;  %v2282_v27 = vcombine.high %v963_v25, %v967_v51  ;;  %v968_v29 = vld [vmem:[#allocation10 + $0xa8] sm:$0xff] }
 0x129   : > { %v743_v39 = vmax.f32 %v727_v33, 0.0  ;;  %v706_v63 = vadd.f32 %v690_v34, %v606_v30  ;;  %v610_v57 = vadd.f32 %v594_v4, %v510_v3  ;;  %v2283_v34 = vcombine.low %v964_v26, %v968_v29  ;;  %1341 = vmatprep.subr.bf16.mxu1 %v2282_v27 }
 0x12a   : > { %1342 = vmatpush1.bf16.msra.mxu1 %v2281_v37  ;;  %v570_v49 = vpop.permute.xlu0 %569 }
 0x12b   : > { %v756_v40 = vpack.c.bf16 %v743_v39, %v742_v36  ;;  %v728_v42 = vadd.f32 %v2954_v15, %v706_v63  ;;  %v459_v43 = vpop.permute.xlu1 %458  ;;  %v2284_v36 = vcombine.high %v964_v26, %v968_v29 }
 0x12c   : > { %v508_v0 = vmul.f32 %v2932_v46, %v459_v43  ;;  %v956_v43 = vld [vmem:[#allocation10 + $0x48] sm:$0xff] }
 0x12d   : > { %v744_v47 = vmax.f32 %v728_v42, 0.0  ;;  %2356 = vmatprep.mubr.msk.bf16.mxu0 %vm801_vm0, %v756_v40  ;;  %1454 = vmatprep.subr.bf16.mxu0 %v2284_v36  ;;  %v955_v40 = vld [vmem:[#allocation10 + $0x40] sm:$0xff] }
 0x12e   : > { %v959_v42 = vld [vmem:[#allocation10 + $0x60] sm:$0xff]  ;;  %1455 = vmatpush1.bf16.msra.mxu0 %v2283_v34 }
 0x12f   : > { %v757_v48 = vpack.c.bf16 %v745_v44, %v744_v47  ;;  %v2274_v44 = vcombine.high %v955_v40, %v959_v42  ;;  %v960_v47 = vld [vmem:[#allocation10 + $0x68] sm:$0xff] }
 0x130   : > { %v550_v50 = vpop.permute.xlu1 %549  ;;  %v2276_v53 = vcombine.high %v956_v43, %v960_v47 }
 0x131   : > { %2357 = vmatmul.mubr.msk.bf16.gmra.mxu0 %vm801_vm0, %v757_v48  ;;  %v592_v41 = vmul.f32 %v2928_v45, %v550_v50  ;;  %v2275_v50 = vcombine.low %v956_v43, %v960_v47  ;;  %1343 = vmatprep.subr.bf16.mxu1 %v2274_v44  ;;  %v1006_v44 = vld [vmem:[#allocation10 + $0x1d8] sm:$0xff] }
 0x132   : > { %1456 = vmatprep.subr.bf16.mxu0 %v2276_v53  ;;  %v1010_v47 = vld [vmem:[#allocation10 + $0x1f8] sm:$0xff] }
 0x133   : > { %v608_v6 = vadd.f32 %v592_v41, %v508_v0  ;;  %1457 = vmatpush1.bf16.msra.mxu0 %v2275_v50  ;;  %v3032_v50 = vld [vmem:[#allocation8] ss:$0 sm:$0xff] }
 0x134   : > { %v554_v54 = vpop.permute.xlu1 %553 }
 0x135   : > { %v593_v58 = vmul.f32 %v2928_v45, %v554_v54  ;;  %v2273_v54 = vcombine.low %v955_v40, %v959_v42  ;;  %v1005_v40 = vld [vmem:[#allocation10 + $0x1d0] sm:$0xff] }
 0x136   : > { %v1009_v42 = vld [vmem:[#allocation10 + $0x1f0] sm:$0xff] }
 0x137   : > { %v609_v61 = vadd.f32 %v593_v58, %v509_v59  ;;  %v947_v58 = vld [vmem:[#allocation10] sm:$0xff]  ;;  %1344 = vmatpush1.bf16.msra.mxu1 %v2273_v54  ;;  %v2326_v43 = vcombine.high %v1005_v40, %v1009_v42 }
 0x138   : > { %v951_v59 = vld [vmem:[#allocation10 + $0x20] sm:$0xff] }
 0x139   : > { %v474_v55 = vpop.permute.xlu1 %473  ;;  %v709_v2 = vadd.f32 %v693_v60, %v609_v61  ;;  %v948_v60 = vld [vmem:[#allocation10 + $0x8] sm:$0xff]  ;;  %v2266_v61 = vcombine.high %v947_v58, %v951_v59  ;;  %v2265_v0 = vcombine.low %v947_v58, %v951_v59  ;;  %v997_v59 = vld [vmem:[#allocation10 + $0x190] sm:$0xff] }
 0x13a   : > { %v511_v16 = vmul.f32 %v2932_v46, %v474_v55 }
 0x13b   : > { %v731_v8 = vadd.f32 %v2954_v15, %v709_v2  ;;  %1345 = vmatprep.subr.bf16.mxu1 %v2266_v61  ;;  %v574_v2 = vpop.permute.xlu0 %573 }
 0x13c   : > { %1346 = vmatpush1.bf16.msra.mxu1 %v2265_v0 }
 0x13d   : > { %v747_v14 = vmax.f32 %v731_v8, 0.0  ;;  %1557 = vmatprep.subr.bf16.mxu1 %v2326_v43  ;;  %v961_v43 = vld [vmem:[#allocation10 + $0x70] sm:$0xff] }
 0x13e   : > { %v562_v62 = vpop.permute.xlu1 %561 }
 0x13f   : > { %v595_v11 = vmul.f32 %v2928_v45, %v562_v62  ;;  %v952_v62 = vld [vmem:[#allocation10 + $0x28] sm:$0xff] }
 0x140   : > { %v2267_v38 = vcombine.low %v948_v60, %v952_v62  ;;  %v2268_v41 = vcombine.high %v948_v60, %v952_v62  ;;  %v1001_v62 = vld [vmem:[#allocation10 + $0x1b0] sm:$0xff] }
 0x141   : > { %v611_v20 = vadd.f32 %v595_v11, %v511_v16 }
 0x142   : > { %1458 = vmatprep.subr.bf16.mxu0 %v2268_v41  ;;  %v1002_v41 = vld [vmem:[#allocation10 + $0x1b8] sm:$0xff] }
 0x143   : > { %v650_v5 = vpop.permute.xlu1 %649  ;;  %1459 = vmatpush1.bf16.msra.mxu0 %v2267_v38  ;;  %v998_v38 = vld [vmem:[#allocation10 + $0x198] sm:$0xff] }
 0x144   : > { %v692_v7 = vmul.f32 %v2940_v52, %v650_v5 }
 0x146   : > { %v708_v9 = vadd.f32 %v692_v7, %v608_v6  ;;  %v666_v6 = vpop.permute.xlu0 %665  ;;  %v512_v7 = vmul.f32 %v2932_v46, %v2988_v56  ;;  %v598_v56 = vmul.f32 %v2928_v45, %v574_v2 }
 0x147   : > { %v658_v10 = vpop.permute.xlu1 %657 }
 0x148   : > { %v730_v12 = vadd.f32 %v2954_v15, %v708_v9  ;;  %v694_v13 = vmul.f32 %v2940_v52, %v658_v10  ;;  %v696_v9 = vmul.f32 %v2940_v52, %v666_v6  ;;  %v3041_v6 = vcombine.high %v998_v38, %v1002_v41 }
 0x14a   : > { %v746_v17 = vmax.f32 %v730_v12, 0.0  ;;  %v710_v18 = vadd.f32 %v694_v13, %v610_v57  ;;  %v678_v11 = vpop.permute.xlu0 %677  ;;  %v597_v12 = vmul.f32 %v2928_v45, %v570_v49 }
 0x14b   : > { %v662_v19 = vpop.permute.xlu1 %661 }
 0x14c   : > { %v758_v21 = vpack.c.bf16 %v747_v14, %v746_v17  ;;  %v695_v22 = vmul.f32 %v2940_v52, %v662_v19  ;;  %v732_v23 = vadd.f32 %v2954_v15, %v710_v18  ;;  %v699_v18 = vmul.f32 %v2940_v52, %v678_v11 }
 0x14d   : > { %v2317_v11 = vcombine.low %v997_v59, %v1001_v62 }
 0x14e   : > { %v711_v24 = vadd.f32 %v695_v22, %v611_v20  ;;  %2360 = vmatprep.mubr.msk.bf16.mxu0 %vm801_vm0, %v758_v21  ;;  %v748_v39 = vmax.f32 %v732_v23, 0.0 }
 0x150   : > { %v733_v30 = vadd.f32 %v2954_v15, %v711_v24  ;;  %v484_v33 = vpop.permute.xlu1 %483 }
 0x151   : > { %v513_v13 = vmul.f32 %v2932_v46, %v484_v33 }
 0x152   : > { %v749_v63 = vmax.f32 %v733_v30, 0.0 }
 0x153   : > { %v613_v20 = vadd.f32 %v597_v12, %v513_v13  ;;  %v3049_v12 = vcombine.low %v998_v38, %v1002_v41 }
 0x154   : > { %v759_v48 = vpack.c.bf16 %v749_v63, %v748_v39 }
 0x155   : > { %v566_v55 = vpop.permute.xlu1 %565 }
 0x156   : > { %2361 = vmatmul.mubr.msk.bf16.gmra.mxu0 %vm801_vm0, %v759_v48  ;;  %v596_v5 = vmul.f32 %v2928_v45, %v566_v55  ;;  %v3029_v48 = vcombine.high %v1006_v44, %v1010_v47 }
 0x158   : > { %v612_v8 = vadd.f32 %v596_v5, %v512_v7  ;;  %1670 = vmatprep.subr.bf16.mxu0 %v3029_v48  ;;  %v989_v5 = vld [vmem:[#allocation10 + $0x150] sm:$0xff] }
 0x15a   : > { %v489_v3 = vpop.permute.xlu1 %488  ;;  %v712_v16 = vadd.f32 %v696_v9, %v612_v8  ;;  %v993_v8 = vld [vmem:[#allocation10 + $0x170] sm:$0xff]  ;;  %v990_v9 = vld [vmem:[#allocation10 + $0x158] sm:$0xff] }
 0x15b   : > { %v514_v21 = vmul.f32 %v2932_v46, %v489_v3  ;;  %v3039_v3 = vcombine.low %v1006_v44, %v1010_v47  ;;  %v2310_v13 = vcombine.high %v989_v5, %v993_v8  ;;  %v958_v44 = vld [vmem:[#allocation10 + $0x58] sm:$0xff] }
 0x15c   : > { %v734_v23 = vadd.f32 %v2954_v15, %v712_v16  ;;  %v962_v47 = vld [vmem:[#allocation10 + $0x78] sm:$0xff] }
 0x15d   : > { %v614_v26 = vadd.f32 %v598_v56, %v514_v21  ;;  %v2309_v21 = vcombine.low %v989_v5, %v993_v8  ;;  %v3085_v41 = vcombine.low %v958_v44, %v962_v47 }
 0x15e   : > { %v494_v4 = vpop.permute.xlu1 %493  ;;  %v750_v30 = vmax.f32 %v734_v23, 0.0 }
 0x15f   : > { %v515_v14 = vmul.f32 %v2932_v46, %v494_v4  ;;  %v2318_v4 = vcombine.high %v997_v59, %v1001_v62  ;;  %v953_v59 = vld [vmem:[#allocation10 + $0x30] sm:$0xff] }
 0x163   : > { %v578_v57 = vpop.permute.xlu1 %577 }
 0x164   : > { %v599_v10 = vmul.f32 %v2928_v45, %v578_v57  ;;  %v994_v57 = vld [vmem:[#allocation10 + $0x178] sm:$0xff] }
 0x165   : > { %v3052_v16 = vcombine.high %v990_v9, %v994_v57 }
 0x166   : > { %v615_v17 = vadd.f32 %v599_v10, %v515_v14  ;;  %v981_v14 = vld [vmem:[#allocation10 + $0x110] sm:$0xff] }
 0x168   : > { %v670_v19 = vpop.permute.xlu1 %669  ;;  %v715_v24 = vadd.f32 %v699_v18, %v615_v17  ;;  %v985_v18 = vld [vmem:[#allocation10 + $0x130] sm:$0xff] }
 0x169   : > { %v697_v22 = vmul.f32 %v2940_v52, %v670_v19  ;;  %v982_v19 = vld [vmem:[#allocation10 + $0x118] sm:$0xff]  ;;  %v2302_v23 = vcombine.high %v981_v14, %v985_v18 }
 0x16a   : > { %v737_v33 = vadd.f32 %v2954_v15, %v715_v24  ;;  %v973_v24 = vld [vmem:[#allocation10 + $0xd0] sm:$0xff] }
 0x16b   : > { %v713_v25 = vadd.f32 %v697_v22, %v613_v20  ;;  %v986_v20 = vld [vmem:[#allocation10 + $0x138] sm:$0xff]  ;;  %v3057_v22 = vcombine.low %v990_v9, %v994_v57 }
 0x16c   : > { %v674_v51 = vpop.permute.xlu1 %673  ;;  %v753_v37 = vmax.f32 %v737_v33, 0.0 }
 0x16d   : > { %v735_v27 = vadd.f32 %v2954_v15, %v713_v25  ;;  %v698_v29 = vmul.f32 %v2940_v52, %v674_v51  ;;  %v2325_v52 = vcombine.low %v1005_v40, %v1009_v42  ;;  %v3060_v25 = vcombine.high %v982_v19, %v986_v20  ;;  %v977_v51 = vld [vmem:[#allocation10 + $0xf0] sm:$0xff] }
 0x16e   : > { %v2294_v33 = vcombine.high %v973_v24, %v977_v51  ;;  %v957_v42 = vld [vmem:[#allocation10 + $0x50] sm:$0xff] }
 0x16f   : > { %v751_v34 = vmax.f32 %v735_v27, 0.0  ;;  %v714_v36 = vadd.f32 %v698_v29, %v614_v26  ;;  %v974_v26 = vld [vmem:[#allocation10 + $0xd8] sm:$0xff]  ;;  %v2301_v29 = vcombine.low %v981_v14, %v985_v18  ;;  %v2277_v38 = vcombine.low %v957_v42, %v961_v43 }
 0x170   : > { %v978_v27 = vld [vmem:[#allocation10 + $0xf8] sm:$0xff] }
 0x171   : > { %v760_v45 = vpack.c.bf16 %v751_v34, %v750_v30  ;;  %v736_v46 = vadd.f32 %v2954_v15, %v714_v36  ;;  %v3067_v30 = vcombine.low %v982_v19, %v986_v20  ;;  %v965_v34 = vld [vmem:[#allocation10 + $0x90] sm:$0xff]  ;;  %v3070_v36 = vcombine.high %v974_v26, %v978_v27 }
 0x173   : > { %v752_v39 = vmax.f32 %v736_v46, 0.0  ;;  %2364 = vmatprep.mubr.msk.bf16.mxu0 %vm801_vm0, %v760_v45  ;;  %v969_v45 = vld [vmem:[#allocation10 + $0xb0] sm:$0xff]  ;;  %v966_v46 = vld [vmem:[#allocation10 + $0x98] sm:$0xff] }
 0x174   : > { %v2286_v40 = vcombine.high %v965_v34, %v969_v45 }
 0x175   : > { %v761_v63 = vpack.c.bf16 %v753_v37, %v752_v39  ;;  %v970_v37 = vld [vmem:[#allocation10 + $0xb8] sm:$0xff]  ;;  %v2293_v39 = vcombine.low %v973_v24, %v977_v51 }
 0x177   : > { %2365 = vmatmul.mubr.msk.bf16.gmra.mxu0 %vm801_vm0, %v761_v63  ;;  %v3073_v63 = vcombine.low %v974_v26, %v978_v27 }
 0x178   : > { %1476 = vmatprep.mubr.bf16.mxu0 %v2713_v1 }
 0x1d0   : > { %v2354_v15 = vpop.f32.mrf.mxu0 }
 0x1d1   : > { %v869_v7 = vadd.f32 %v2354_v15, %v3032_v50  ;;  %v2285_v15 = vcombine.low %v965_v34, %v969_v45 }
 0x1d2   : > { %v860_v49 = vpop.f32.mrf.mxu0 }
 0x1d3   : > { %v861_v54 = vadd.f32 %v3032_v50, %v860_v49  ;;  %v925_v17 = vmax.f32 %v869_v7, 0.0  ;;  %v3079_v49 = vcombine.low %v966_v46, %v970_v37 }
 0x1d4   : > { %v2355_v53 = vpop.f32.mrf.mxu0 }
 0x1d5   : > { %v923_v60 = vmax.f32 %v861_v54, 0.0  ;;  %v872_v0 = vadd.f32 %v2355_v53, %v3032_v50  ;;  %v2278_v53 = vcombine.high %v957_v42, %v961_v43  ;;  %v949_v54 = vld [vmem:[#allocation10 + $0x10] sm:$0xff] }
 0x1d6   : > { %v863_v55 = vpop.f32.mrf.mxu0  ;;  %v2269_v9 = vcombine.low %v949_v54, %v953_v59 }
 0x1d7   : > { %v864_v58 = vadd.f32 %v3032_v50, %v863_v55  ;;  %v926_v10 = vmax.f32 %v872_v0, 0.0  ;;  %v3082_v55 = vcombine.high %v958_v44, %v962_v47  ;;  %v2270_v0 = vcombine.high %v949_v54, %v953_v59 }
 0x1d9   : > { %v924_v61 = vmax.f32 %v864_v58, 0.0  ;;  %v3054_v56 = vpack.c.bf16 %v926_v10, %v925_v17 }
 0x1db   : > { %v3037_v2 = vpack.c.bf16 %v924_v61, %v923_v60  ;;  %v950_v60 = vld [vmem:[#allocation10 + $0x18] sm:$0xff] }
 0x1dc   : > { %v954_v61 = vld [vmem:[#allocation10 + $0x38] sm:$0xff] }
 0x1dd   : > { %1364 = vmatmul.mubr.bf16.vlgmr.msra.gmra.mxu1 %v3037_v2  ;;  %1477 = vmatmul.mubr.bf16.vlgmr.msra.gmra.mxu0 %v3037_v2  ;;  %v3092_v57 = vcombine.low %v950_v60, %v954_v61 }
 0x1de   : > { %1373 = vmatprep.mubr.bf16.mxu1 %v2713_v1  ;;  %1486 = vmatprep.mubr.bf16.mxu0 %v2713_v1 }
 0x1df   : > { %1558 = vmatpush1.bf16.msra.mxu1 %v2325_v52  ;;  %1671 = vmatpush1.bf16.msra.mxu0 %v3039_v3  ;;  %v3076_v52 = vcombine.high %v966_v46, %v970_v37 }
 0x1e0   : > { %1559 = vmatprep.subr.bf16.mxu1 %v2318_v4  ;;  %1672 = vmatprep.subr.bf16.mxu0 %v3041_v6  ;;  %v3088_v4 = vcombine.high %v950_v60, %v954_v61 }
 0x1e3   : > { %1560 = vmatpush1.bf16.msra.mxu1 %v2317_v11  ;;  %1673 = vmatpush1.bf16.msra.mxu0 %v3049_v12 }
 0x1e4   : > { %1561 = vmatprep.subr.bf16.mxu1 %v2310_v13  ;;  %1674 = vmatprep.subr.bf16.mxu0 %v3052_v16 }
 0x1e5   : > { %1374 = vmatmul.mubr.bf16.gmra.mxu1 %v3054_v56  ;;  %1487 = vmatmul.mubr.bf16.gmra.mxu0 %v3054_v56 }
 0x1e6   : > { %1383 = vmatprep.mubr.bf16.mxu1 %v2713_v1  ;;  %1496 = vmatprep.mubr.bf16.mxu0 %v2713_v1 }
 0x1e7   : > { %1562 = vmatpush1.bf16.msra.mxu1 %v2309_v21  ;;  %1675 = vmatpush1.bf16.msra.mxu0 %v3057_v22 }
 0x1e8   : > { %1563 = vmatprep.subr.bf16.mxu1 %v2302_v23  ;;  %1676 = vmatprep.subr.bf16.mxu0 %v3060_v25 }
 0x1eb   : > { %1564 = vmatpush1.bf16.msra.mxu1 %v2301_v29  ;;  %1677 = vmatpush1.bf16.msra.mxu0 %v3067_v30 }
 0x1ec   : > { %1565 = vmatprep.subr.bf16.mxu1 %v2294_v33  ;;  %1678 = vmatprep.subr.bf16.mxu0 %v3070_v36 }
 0x1ef   : > { %1566 = vmatpush1.bf16.msra.mxu1 %v2293_v39  ;;  %1679 = vmatpush1.bf16.msra.mxu0 %v3073_v63 }
 0x1f0   : > { %1567 = vmatprep.subr.bf16.mxu1 %v2286_v40  ;;  %1680 = vmatprep.subr.bf16.mxu0 %v3076_v52 }
 0x1f1   : > { %v2358_v58 = vpop.f32.mrf.mxu0 }
 0x1f2   : > { %v885_v18 = vadd.f32 %v2358_v58, %v3032_v50 }
 0x1f3   : > { %v876_v62 = vpop.f32.mrf.mxu0  ;;  %1568 = vmatpush1.bf16.msra.mxu1 %v2285_v15  ;;  %1681 = vmatpush1.bf16.msra.mxu0 %v3079_v49 }
 0x1f4   : > { %1569 = vmatprep.subr.bf16.mxu1 %v2278_v53  ;;  %1682 = vmatprep.subr.bf16.mxu0 %v3082_v55  ;;  %v877_v7 = vadd.f32 %v3032_v50, %v876_v62  ;;  %v929_v20 = vmax.f32 %v885_v18, 0.0 }
 0x1f5   : > { %v2359_v5 = vpop.f32.mrf.mxu0 }
 0x1f6   : > { %v927_v11 = vmax.f32 %v877_v7, 0.0  ;;  %v888_v14 = vadd.f32 %v2359_v5, %v3032_v50 }
 0x1f7   : > { %v879_v8 = vpop.f32.mrf.mxu0  ;;  %1570 = vmatpush1.bf16.msra.mxu1 %v2277_v38  ;;  %1683 = vmatpush1.bf16.msra.mxu0 %v3085_v41 }
 0x1f8   : > { %v880_v10 = vadd.f32 %v3032_v50, %v879_v8  ;;  %1571 = vmatprep.subr.bf16.mxu1 %v2270_v0  ;;  %1684 = vmatprep.subr.bf16.mxu0 %v3088_v4  ;;  %v930_v19 = vmax.f32 %v888_v14, 0.0 }
 0x1fa   : > { %v928_v13 = vmax.f32 %v880_v10, 0.0  ;;  %v3106_v21 = vpack.c.bf16 %v930_v19, %v929_v20 }
 0x1fb   : > { %1572 = vmatpush1.bf16.msra.mxu1 %v2269_v9  ;;  %1685 = vmatpush1.bf16.msra.mxu0 %v3092_v57 }
 0x1fc   : > { %v3098_v17 = vpack.c.bf16 %v928_v13, %v927_v11  ;;  %2368 = vmatprep.subr.bf16.mxu1 %v3029_v48 }
 0x1fe   : > { %1384 = vmatmul.mubr.bf16.gmra.mxu1 %v3098_v17  ;;  %1497 = vmatmul.mubr.bf16.gmra.mxu0 %v3098_v17 }
 0x1ff   : > { %1393 = vmatprep.mubr.bf16.mxu1 %v2713_v1  ;;  %1506 = vmatprep.mubr.bf16.mxu0 %v2713_v1 }
 0x206   : > { %1394 = vmatmul.mubr.bf16.gmra.mxu1 %v3106_v21  ;;  %1507 = vmatmul.mubr.bf16.gmra.mxu0 %v3106_v21 }
 0x207   : > { %1403 = vmatprep.mubr.bf16.mxu1 %v2713_v1  ;;  %1516 = vmatprep.mubr.bf16.mxu0 %v2713_v1 }
 0x216   : > { %v2362_v48 = vpop.f32.mrf.mxu0 }
 0x217   : > { %v901_v46 = vadd.f32 %v2362_v48, %v3032_v50 }
 0x218   : > { %v892_v23 = vpop.f32.mrf.mxu0 }
 0x219   : > { %v893_v51 = vadd.f32 %v3032_v50, %v892_v23  ;;  %v933_v39 = vmax.f32 %v901_v46, 0.0 }
 0x21a   : > { %v2363_v24 = vpop.f32.mrf.mxu0 }
 0x21b   : > { %v931_v29 = vmax.f32 %v893_v51, 0.0  ;;  %v904_v34 = vadd.f32 %v2363_v24, %v3032_v50 }
 0x21c   : > { %v895_v26 = vpop.f32.mrf.mxu0 }
 0x21d   : > { %v896_v27 = vadd.f32 %v3032_v50, %v895_v26  ;;  %v934_v37 = vmax.f32 %v904_v34, 0.0 }
 0x21f   : > { %v932_v33 = vmax.f32 %v896_v27, 0.0  ;;  %v944_v40 = vpack.c.bf16 %v934_v37, %v933_v39 }
 0x221   : > { %v3115_v45 = vpack.c.bf16 %v932_v33, %v931_v29 }
 0x223   : > { %1404 = vmatmul.mubr.bf16.gmra.mxu1 %v3115_v45  ;;  %1517 = vmatmul.mubr.bf16.gmra.mxu0 %v3115_v45 }
 0x224   : > { %1413 = vmatprep.mubr.bf16.mxu1 %v2713_v1  ;;  %1526 = vmatprep.mubr.bf16.mxu0 %v2713_v1 }
 0x22b   : > { %1414 = vmatmul.mubr.bf16.gmra.mxu1 %v944_v40  ;;  %1527 = vmatmul.mubr.bf16.gmra.mxu0 %v944_v40 }
 0x22c   : > { %1423 = vmatprep.mubr.bf16.mxu1 %v2713_v1  ;;  %1536 = vmatprep.mubr.bf16.mxu0 %v2713_v1 }
 0x237   : > { %v2366_v42 = vpop.f32.mrf.mxu0 }
 0x238   : > { %v917_v61 = vadd.f32 %v2366_v42, %v3032_v50 }
 0x239   : > { %v908_v43 = vpop.f32.mrf.mxu0 }
 0x23a   : > { %v909_v47 = vadd.f32 %v3032_v50, %v908_v43  ;;  %v937_v38 = vmax.f32 %v917_v61, 0.0 }
 0x23b   : > { %v2367_v44 = vpop.f32.mrf.mxu0 }
 0x23c   : > { %v935_v54 = vmax.f32 %v909_v47, 0.0  ;;  %v920_v59 = vadd.f32 %v2367_v44, %v3032_v50 }
 0x23d   : > { %v911_v15 = vpop.f32.mrf.mxu0 }
 0x23e   : > { %v912_v53 = vadd.f32 %v3032_v50, %v911_v15  ;;  %v938_v62 = vmax.f32 %v920_v59, 0.0 }
 0x240   : > { %v936_v58 = vmax.f32 %v912_v53, 0.0  ;;  %v946_v0 = vpack.c.bf16 %v938_v62, %v937_v38 }
 0x242   : > { %v945_v60 = vpack.c.bf16 %v936_v58, %v935_v54 }
 0x244   : > { %1424 = vmatmul.mubr.bf16.gmra.mxu1 %v945_v60  ;;  %1537 = vmatmul.mubr.bf16.gmra.mxu0 %v945_v60 }
 0x245   : > { %1433 = vmatprep.mubr.bf16.mxu1 %v2713_v1  ;;  %1546 = vmatprep.mubr.bf16.mxu0 %v2713_v1 }
 0x24c   : > { %1434 = vmatmul.mubr.bf16.gmra.mxu1 %v946_v0  ;;  %1547 = vmatmul.mubr.bf16.gmra.mxu0 %v946_v0 }
 0x24d   : > { %1589 = vmatprep.mubr.bf16.mxu1 %v2713_v1  ;;  %1702 = vmatprep.mubr.bf16.mxu0 %v2713_v1 }
 0x254   : > { %1590 = vmatmul.mubr.bf16.vlgmr.msra.gmra.mxu1 %v3037_v2  ;;  %1703 = vmatmul.mubr.bf16.vlgmr.msra.gmra.mxu0 %v3037_v2 }
 0x255   : > { %2376 = vmatpush1.bf16.msra.mxu1 %v3039_v3  ;;  %1599 = vmatprep.mubr.bf16.mxu1 %v2713_v1 }
 0x256   : > { %2369 = vmatprep.subr.bf16.mxu1 %v3041_v6  ;;  %1712 = vmatprep.mubr.bf16.mxu0 %v2713_v1 }
 0x259   : > { %2377 = vmatpush1.bf16.msra.mxu1 %v3049_v12 }
 0x25a   : > { %2370 = vmatprep.subr.bf16.mxu1 %v3052_v16 }
 0x25c   : > { %1600 = vmatmul.mubr.bf16.gmra.mxu1 %v3054_v56  ;;  %1713 = vmatmul.mubr.bf16.gmra.mxu0 %v3054_v56 }
 0x25d   : > { %1609 = vmatprep.mubr.bf16.mxu1 %v2713_v1  ;;  %1722 = vmatprep.mubr.bf16.mxu0 %v2713_v1 }
 0x25e   : > { %2378 = vmatpush1.bf16.msra.mxu1 %v3057_v22 }
 0x25f   : > { %2371 = vmatprep.subr.bf16.mxu1 %v3060_v25 }
 0x262   : > { %2379 = vmatpush1.bf16.msra.mxu1 %v3067_v30 }
 0x263   : > { %2372 = vmatprep.subr.bf16.mxu1 %v3070_v36 }
 0x264   : > { %1610 = vmatmul.mubr.bf16.gmra.mxu1 %v3098_v17  ;;  %1723 = vmatmul.mubr.bf16.gmra.mxu0 %v3098_v17 }
 0x265   : > { %1619 = vmatprep.mubr.bf16.mxu1 %v2713_v1  ;;  %1732 = vmatprep.mubr.bf16.mxu0 %v2713_v1 }
 0x266   : > { %2380 = vmatpush1.bf16.msra.mxu1 %v3073_v63 }
 0x267   : > { %2373 = vmatprep.subr.bf16.mxu1 %v3076_v52 }
 0x26a   : > { %2381 = vmatpush1.bf16.msra.mxu1 %v3079_v49 }
 0x26b   : > { %2374 = vmatprep.subr.bf16.mxu1 %v3082_v55 }
 0x26c   : > { %1620 = vmatmul.mubr.bf16.gmra.mxu1 %v3106_v21  ;;  %1733 = vmatmul.mubr.bf16.gmra.mxu0 %v3106_v21 }
 0x26d   : > { %1629 = vmatprep.mubr.bf16.mxu1 %v2713_v1  ;;  %1742 = vmatprep.mubr.bf16.mxu0 %v2713_v1 }
 0x26e   : > { %2382 = vmatpush1.bf16.msra.mxu1 %v3085_v41 }
 0x26f   : > { %2375 = vmatprep.subr.bf16.mxu1 %v3088_v4 }
 0x272   : > { %2383 = vmatpush1.bf16.msra.mxu1 %v3092_v57 }
 0x274   : > { %1630 = vmatmul.mubr.bf16.gmra.mxu1 %v3115_v45  ;;  %1743 = vmatmul.mubr.bf16.gmra.mxu0 %v3115_v45 }
 0x275   : > { %1639 = vmatprep.mubr.bf16.mxu1 %v2713_v1  ;;  %1752 = vmatprep.mubr.bf16.mxu0 %v2713_v1 }
 0x27c   : > { %1640 = vmatmul.mubr.bf16.gmra.mxu1 %v944_v40  ;;  %1753 = vmatmul.mubr.bf16.gmra.mxu0 %v944_v40 }
 0x27d   : > { %1649 = vmatprep.mubr.bf16.mxu1 %v2713_v1  ;;  %1762 = vmatprep.mubr.bf16.mxu0 %v2713_v1 }
 0x284   : > { %1650 = vmatmul.mubr.bf16.gmra.mxu1 %v945_v60  ;;  %1763 = vmatmul.mubr.bf16.gmra.mxu0 %v945_v60 }
 0x285   : > { %1659 = vmatprep.mubr.bf16.mxu1 %v2713_v1 }
 0x28c   : > { %1660 = vmatmul.mubr.bf16.gmra.mxu1 %v946_v0 }
 0x28d   : > { %1772 = vmatprep.mubr.bf16.mxu1 %v2713_v1 }
 0x294   : > { %1773 = vmatmul.mubr.bf16.vlgmr.msra.gmra.mxu1 %v946_v0 }
 0x29d   : > { %v1365_v50 = vpop.f32.mrf.mxu1  ;;  %v1478_v2 = vpop.f32.mrf.mxu0 }
 0x29f   : > { %v1367_v3 = vpop.f32.mrf.mxu1  ;;  %v1480_v6 = vpop.f32.mrf.mxu0 }
 0x2a1   : > { %v1369_v12 = vpop.f32.mrf.mxu1  ;;  %v1482_v16 = vpop.f32.mrf.mxu0 }
 0x2a2   : > { %v1799_v56 = vmax.f32 %v1365_v50, %v1369_v12  ;;  %v1801_v22 = vmax.f32 %v1478_v2, %v1482_v16 }
 0x2a3   : > { %v1371_v25 = vpop.f32.mrf.mxu1  ;;  %v1484_v30 = vpop.f32.mrf.mxu0 }
 0x2a4   : > { %v1800_v36 = vmax.f32 %v1367_v3, %v1371_v25  ;;  %v1802_v63 = vmax.f32 %v1480_v6, %v1484_v30 }
 0x2a5   : > { %v1375_v52 = vpop.f32.mrf.mxu1  ;;  %v1488_v49 = vpop.f32.mrf.mxu0 }
 0x2a6   : > { %v1807_v55 = vmax.f32 %v1799_v56, %v1375_v52  ;;  %v1809_v41 = vmax.f32 %v1801_v22, %v1488_v49 }
 0x2a7   : > { %v1377_v4 = vpop.f32.mrf.mxu1  ;;  %v1490_v5 = vpop.f32.mrf.mxu0 }
 0x2a8   : > { %v1808_v1 = vmax.f32 %v1800_v36, %v1377_v4  ;;  %v1810_v7 = vmax.f32 %v1802_v63, %v1490_v5 }
 0x2a9   : > { %v1379_v8 = vpop.f32.mrf.mxu1  ;;  %v1492_v9 = vpop.f32.mrf.mxu0 }
 0x2aa   : > { %v1815_v57 = vmax.f32 %v1807_v55, %v1379_v8  ;;  %v1817_v10 = vmax.f32 %v1809_v41, %v1492_v9 }
 0x2ab   : > { %v1381_v11 = vpop.f32.mrf.mxu1  ;;  %v1494_v13 = vpop.f32.mrf.mxu0 }
 0x2ac   : > { %v1816_v14 = vmax.f32 %v1808_v1, %v1381_v11  ;;  %v1818_v17 = vmax.f32 %v1810_v7, %v1494_v13 }
 0x2be   : > { %v1385_v18 = vpop.f32.mrf.mxu1  ;;  %v1498_v19 = vpop.f32.mrf.mxu0 }
 0x2bf   : > { %v1823_v20 = vmax.f32 %v1815_v57, %v1385_v18  ;;  %v1825_v21 = vmax.f32 %v1817_v10, %v1498_v19 }
 0x2c0   : > { %v1387_v48 = vpop.f32.mrf.mxu1  ;;  %v1500_v23 = vpop.f32.mrf.mxu0 }
 0x2c1   : > { %v1824_v24 = vmax.f32 %v1816_v14, %v1387_v48  ;;  %v1826_v51 = vmax.f32 %v1818_v17, %v1500_v23 }
 0x2c2   : > { %v1389_v26 = vpop.f32.mrf.mxu1  ;;  %v1502_v27 = vpop.f32.mrf.mxu0 }
 0x2c3   : > { %v1831_v29 = vmax.f32 %v1823_v20, %v1389_v26  ;;  %v1833_v33 = vmax.f32 %v1825_v21, %v1502_v27 }
 0x2c4   : > { %v1391_v34 = vpop.f32.mrf.mxu1  ;;  %v1504_v45 = vpop.f32.mrf.mxu0 }
 0x2c5   : > { %v1832_v46 = vmax.f32 %v1824_v24, %v1391_v34  ;;  %v1834_v37 = vmax.f32 %v1826_v51, %v1504_v45 }
 0x2c6   : > { %v1395_v39 = vpop.f32.mrf.mxu1  ;;  %v1508_v40 = vpop.f32.mrf.mxu0 }
 0x2c7   : > { %v1839_v42 = vmax.f32 %v1831_v29, %v1395_v39  ;;  %v1841_v43 = vmax.f32 %v1833_v33, %v1508_v40 }
 0x2c8   : > { %v1397_v44 = vpop.f32.mrf.mxu1  ;;  %v1510_v47 = vpop.f32.mrf.mxu0 }
 0x2c9   : > { %v1840_v15 = vmax.f32 %v1832_v46, %v1397_v44  ;;  %v1842_v53 = vmax.f32 %v1834_v37, %v1510_v47 }
 0x2ca   : > { %v1399_v54 = vpop.f32.mrf.mxu1  ;;  %v1512_v58 = vpop.f32.mrf.mxu0 }
 0x2cb   : > { %v1847_v59 = vmax.f32 %v1839_v42, %v1399_v54  ;;  %v1849_v60 = vmax.f32 %v1841_v43, %v1512_v58 }
 0x2cc   : > { %v1401_v61 = vpop.f32.mrf.mxu1  ;;  %v1514_v62 = vpop.f32.mrf.mxu0 }
 0x2cd   : > { %v1848_v38 = vmax.f32 %v1840_v15, %v1401_v61  ;;  %v1850_v0 = vmax.f32 %v1842_v53, %v1514_v62 }
 0x2e3   : > { %v1405_v50 = vpop.f32.mrf.mxu1  ;;  %v1518_v2 = vpop.f32.mrf.mxu0 }
 0x2e4   : > { %v1855_v3 = vmax.f32 %v1847_v59, %v1405_v50  ;;  %v1857_v6 = vmax.f32 %v1849_v60, %v1518_v2 }
 0x2e5   : > { %v1407_v12 = vpop.f32.mrf.mxu1  ;;  %v1520_v16 = vpop.f32.mrf.mxu0 }
 0x2e6   : > { %v1856_v56 = vmax.f32 %v1848_v38, %v1407_v12  ;;  %v1858_v22 = vmax.f32 %v1850_v0, %v1520_v16 }
 0x2e7   : > { %v1409_v25 = vpop.f32.mrf.mxu1  ;;  %v1522_v30 = vpop.f32.mrf.mxu0 }
 0x2e8   : > { %v1863_v36 = vmax.f32 %v1855_v3, %v1409_v25  ;;  %v1865_v63 = vmax.f32 %v1857_v6, %v1522_v30 }
 0x2e9   : > { %v1411_v52 = vpop.f32.mrf.mxu1  ;;  %v1524_v49 = vpop.f32.mrf.mxu0 }
 0x2ea   : > { %v1864_v55 = vmax.f32 %v1856_v56, %v1411_v52  ;;  %v1866_v41 = vmax.f32 %v1858_v22, %v1524_v49 }
 0x2eb   : > { %v1415_v4 = vpop.f32.mrf.mxu1  ;;  %v1528_v5 = vpop.f32.mrf.mxu0 }
 0x2ec   : > { %v1871_v1 = vmax.f32 %v1863_v36, %v1415_v4  ;;  %v1873_v7 = vmax.f32 %v1865_v63, %v1528_v5 }
 0x2ed   : > { %v1417_v8 = vpop.f32.mrf.mxu1  ;;  %v1530_v9 = vpop.f32.mrf.mxu0 }
 0x2ee   : > { %v1872_v57 = vmax.f32 %v1864_v55, %v1417_v8  ;;  %v1874_v10 = vmax.f32 %v1866_v41, %v1530_v9  ;;  %v3179_v55 = vld [vmem:[#allocation11] sm:$0xff] }
 0x2ef   : > { %v1419_v11 = vpop.f32.mrf.mxu1  ;;  %v1532_v13 = vpop.f32.mrf.mxu0 }
 0x2f0   : > { %v1879_v14 = vmax.f32 %v1871_v1, %v1419_v11  ;;  %v1881_v17 = vmax.f32 %v1873_v7, %v1532_v13  ;;  %v2002_v7 = vsub.s32 3, %v2917_v28 }
 0x2f1   : > { %v1421_v18 = vpop.f32.mrf.mxu1  ;;  %v1534_v19 = vpop.f32.mrf.mxu0 }
 0x2f2   : > { %v1880_v20 = vmax.f32 %v1872_v57, %v1421_v18  ;;  %v1882_v21 = vmax.f32 %v1874_v10, %v1534_v19  ;;  %v2715_v18 = vmov 1966171168  }
 0x2f3   : > { %v2057_v19 = vunpack.c.l.s4 %v2715_v18 }
 0x304   : > { %v1425_v48 = vpop.f32.mrf.mxu1  ;;  %v1538_v23 = vpop.f32.mrf.mxu0 }
 0x305   : > { %v1887_v24 = vmax.f32 %v1879_v14, %v1425_v48  ;;  %v1889_v51 = vmax.f32 %v1881_v17, %v1538_v23  ;;  %v1991_v14 = vrot.slane %v3179_v55, %v498_v32  ;;  %v1999_v17 = vrot.slane %v3179_v55, %v682_v35 }
 0x306   : > { %v1427_v26 = vpop.f32.mrf.mxu1  ;;  %v1540_v27 = vpop.f32.mrf.mxu0  ;;  %v2003_v32 = vrot.slane %v3179_v55, %v2002_v7 }
 0x307   : > { %v1888_v29 = vmax.f32 %v1880_v20, %v1427_v26  ;;  %v1890_v33 = vmax.f32 %v1882_v21, %v1540_v27  ;;  %v1995_v26 = vrot.slane %v3179_v55, %v582_v31 }
 0x308   : > { %v1429_v34 = vpop.f32.mrf.mxu1  ;;  %v1542_v45 = vpop.f32.mrf.mxu0 }
 0x309   : > { %v1895_v46 = vmax.f32 %v1887_v24, %v1429_v34  ;;  %v1897_v37 = vmax.f32 %v1889_v51, %v1542_v45 }
 0x30a   : > { %v1431_v39 = vpop.f32.mrf.mxu1  ;;  %v1544_v40 = vpop.f32.mrf.mxu0 }
 0x30b   : > { %v1896_v42 = vmax.f32 %v1888_v29, %v1431_v39  ;;  %v1898_v43 = vmax.f32 %v1890_v33, %v1544_v40 }
 0x30c   : > { %v1435_v44 = vpop.f32.mrf.mxu1  ;;  %v1548_v47 = vpop.f32.mrf.mxu0 }
 0x30d   : > { %v1903_v15 = vmax.f32 %v1895_v46, %v1435_v44  ;;  %v1905_v53 = vmax.f32 %v1897_v37, %v1548_v47  ;;  %v2058_v46 = vunpack.c.0.s8 %v2057_v19 }
 0x30e   : > { %v1437_v54 = vpop.f32.mrf.mxu1  ;;  %v1550_v58 = vpop.f32.mrf.mxu0 }
 0x30f   : > { %v1904_v59 = vmax.f32 %v1896_v42, %v1437_v54  ;;  %v1906_v62 = vmax.f32 %v1898_v43, %v1550_v58  ;;  %v3207_v54 = vsub.s32 %v2058_v46, %v2917_v28 }
 0x310   : > { %v1439_v60 = vpop.f32.mrf.mxu1  ;;  %v1552_v61 = vpop.f32.mrf.mxu0 }
 0x311   : > { %v1911_v38 = vmax.f32 %v1903_v15, %v1439_v60  ;;  %v1913_v0 = vmax.f32 %v1905_v53, %v1552_v61 }
 0x312   : > { %v1441_v50 = vpop.f32.mrf.mxu1  ;;  %v1554_v2 = vpop.f32.mrf.mxu0 }
 0x313   : > { %v1939_v3 = vrot.slane %v1911_v38, 4  ;;  %v1951_v6 = vrot.slane %v1913_v0, 4  ;;  %v1912_v12 = vmax.f32 %v1904_v59, %v1441_v50  ;;  %v1914_v16 = vmax.f32 %v1906_v62, %v1554_v2 }
 0x314   : > { %v3171_v56 = vpop.f32.mrf.mxu1  ;;  %v3173_v22 = vpop.f32.mrf.mxu0 }
 0x315   : > { %v1940_v25 = vmax.f32 %v1911_v38, %v1939_v3  ;;  %v1952_v30 = vmax.f32 %v1913_v0, %v1951_v6  ;;  %v1945_v36 = vrot.slane %v1912_v12, 4  ;;  %v1957_v63 = vrot.slane %v1914_v16, 4 }
 0x316   : > { %v3175_v52 = vpop.f32.mrf.mxu1  ;;  %v3177_v49 = vpop.f32.mrf.mxu0 }
 0x317   : > { %v1941_v41 = vrot.slane %v1940_v25, 2  ;;  %v1953_v4 = vrot.slane %v1952_v30, 2  ;;  %v1946_v5 = vmax.f32 %v1912_v12, %v1945_v36  ;;  %v1958_v1 = vmax.f32 %v1914_v16, %v1957_v63 }
 0x318   : > { %v3182_v8 = vpop.f32.mrf.mxu1  ;;  %v3184_v9 = vpop.f32.mrf.mxu0 }
 0x319   : > { %v1942_v57 = vmax.f32 %v1940_v25, %v1941_v41  ;;  %v1954_v10 = vmax.f32 %v1952_v30, %v1953_v4  ;;  %v1947_v11 = vrot.slane %v1946_v5, 2  ;;  %v1959_v13 = vrot.slane %v1958_v1, 2 }
 0x31a   : > { %v3192_v20 = vpop.f32.mrf.mxu1  ;;  %v3194_v21 = vpop.f32.mrf.mxu0  ;;  %v1803_v19 = vmax.f32 %v3171_v56, %v3182_v8 }
 0x31b   : > { %v1943_v48 = vrot.slane %v1942_v57, 1  ;;  %v1955_v23 = vrot.slane %v1954_v10, 1  ;;  %v1948_v24 = vmax.f32 %v1946_v5, %v1947_v11  ;;  %v1960_v51 = vmax.f32 %v1958_v1, %v1959_v13 }
 0x31c   : > { %v1601_v27 = vpop.f32.mrf.mxu1  ;;  %v3200_v29 = vpop.f32.mrf.mxu0 }
 0x31d   : > { %v1944_v35 = vmax.f32 %v1942_v57, %v1943_v48  ;;  %v1956_v33 = vmax.f32 %v1954_v10, %v1955_v23  ;;  %v1949_v34 = vrot.slane %v1948_v24, 1  ;;  %v1961_v45 = vrot.slane %v1960_v51, 1 }
 0x31e   : > { %v1603_v37 = vpop.f32.mrf.mxu1  ;;  %v3202_v39 = vpop.f32.mrf.mxu0 }
 0x31f   : > { %v2028_v40 = vadd.f32 %v1991_v14, %v1944_v35  ;;  %v2030_v42 = vadd.f32 %v1999_v17, %v1956_v33  ;;  %v1950_v43 = vmax.f32 %v1948_v24, %v1949_v34  ;;  %v1962_v44 = vmax.f32 %v1960_v51, %v1961_v45 }
 0x320   : > { %v1605_v47 = vpop.f32.mrf.mxu1  ;;  %v3204_v15 = vpop.f32.mrf.mxu0  ;;  %v1804_v24 = vmax.f32 %v3175_v52, %v3192_v20  ;;  %v1811_v51 = vmax.f32 %v1803_v19, %v1601_v27  ;;  %v1806_v52 = vmax.f32 %v3177_v49, %v3194_v21 }
 0x321   : > { %v2029_v31 = vadd.f32 %v1995_v26, %v1950_v43  ;;  %v2031_v53 = vadd.f32 %v2003_v32, %v1962_v44  ;;  %v2036_v60 = vmax.f32 %v2028_v40, 0.0  ;;  %v2038_v61 = vmax.f32 %v2030_v42, 0.0 }
 0x322   : > { %v1607_v58 = vpop.f32.mrf.mxu1  ;;  %v3209_v59 = vpop.f32.mrf.mxu0  ;;  %v1812_v35 = vmax.f32 %v1804_v24, %v1603_v37  ;;  %v1819_v33 = vmax.f32 %v1811_v51, %v1605_v47  ;;  %v1805_v44 = vmax.f32 %v3173_v22, %v3184_v9 }
 0x323   : > { %v2037_v62 = vmax.f32 %v2029_v31, 0.0  ;;  %v2039_v38 = vmax.f32 %v2031_v53, 0.0 }
 0x324   : > { %v1611_v0 = vpop.f32.mrf.mxu1  ;;  %v1724_v50 = vpop.f32.mrf.mxu0  ;;  %v1820_v46 = vmax.f32 %v1812_v35, %v1607_v58  ;;  %v1813_v20 = vmax.f32 %v1805_v44, %v3200_v29  ;;  %v1814_v58 = vmax.f32 %v1806_v52, %v3202_v39 }
 0x325   : > { %v2052_v2 = vcombine.low %v2036_v60, %v2037_v62  ;;  %v2053_v3 = vcombine.low %v2038_v61, %v2039_v38  ;;  %v1827_v40 = vmax.f32 %v1819_v33, %v1611_v0 }
 0x326   : > { %v1613_v6 = vpop.f32.mrf.mxu1  ;;  %v1726_v12 = vpop.f32.mrf.mxu0  ;;  %v1821_v61 = vmax.f32 %v1813_v20, %v3204_v15  ;;  %v1822_v9 = vmax.f32 %v1814_v58, %v3209_v59 }
 0x327   : > { %v2062_v16 = vrot.slane %v2052_v2, %v3207_v54  ;;  %v2069_v25 = vrot.slane %v2053_v3, %v3207_v54  ;;  %v1828_v56 = vmax.f32 %v1820_v46, %v1613_v6 }
 0x328   : > { %v1615_v30 = vpop.f32.mrf.mxu1  ;;  %v1728_v36 = vpop.f32.mrf.mxu0  ;;  %v1829_v0 = vmax.f32 %v1821_v61, %v1724_v50  ;;  %v1830_v21 = vmax.f32 %v1822_v9, %v1726_v12 }
 0x329   : > { %v3213_v63 = vcombine.low %v2062_v16, %v2069_v25  ;;  %v1835_v8 = vmax.f32 %v1827_v40, %v1615_v30 }
 0x32a   : > { %v1617_v41 = vpop.f32.mrf.mxu1  ;;  %v1730_v4 = vpop.f32.mrf.mxu0  ;;  %v1837_v29 = vmax.f32 %v1829_v0, %v1728_v36 }
 0x32b   : > { %v1836_v27 = vmax.f32 %v1828_v56, %v1617_v41  ;;  %v1838_v41 = vmax.f32 %v1830_v21, %v1730_v4 }
 0x32c   : > { %v1621_v5 = vpop.f32.mrf.mxu1  ;;  %v1734_v1 = vpop.f32.mrf.mxu0 }
 0x32d   : > { %v1843_v37 = vmax.f32 %v1835_v8, %v1621_v5  ;;  %v1845_v5 = vmax.f32 %v1837_v29, %v1734_v1 }
 0x32e   : > { %v1623_v7 = vpop.f32.mrf.mxu1  ;;  %v1736_v57 = vpop.f32.mrf.mxu0 }
 0x32f   : > { %v1844_v62 = vmax.f32 %v1836_v27, %v1623_v7 }
 0x330   : > { %v1625_v10 = vpop.f32.mrf.mxu1  ;;  %v1738_v11 = vpop.f32.mrf.mxu0 }
 0x331   : > { %v1851_v38 = vmax.f32 %v1843_v37, %v1625_v10  ;;  %v1846_v10 = vmax.f32 %v1838_v41, %v1736_v57  ;;  %v1853_v24 = vmax.f32 %v1845_v5, %v1738_v11 }
 0x332   : > { %v1627_v13 = vpop.f32.mrf.mxu1  ;;  %v3215_v14 = vpop.f32.mrf.mxu0 }
 0x333   : > { %v1852_v2 = vmax.f32 %v1844_v62, %v1627_v13  ;;  %v1854_v13 = vmax.f32 %v1846_v10, %v3215_v14  ;;  %v2014_v10 = vsub.s32 6, %v2917_v28 }
 0x334   : > { %v1631_v17 = vpop.f32.mrf.mxu1  ;;  %v1744_v18 = vpop.f32.mrf.mxu0 }
 0x335   : > { %v1859_v3 = vmax.f32 %v1851_v38, %v1631_v17  ;;  %v1861_v17 = vmax.f32 %v1853_v24, %v1744_v18 }
 0x336   : > { %v1633_v48 = vpop.f32.mrf.mxu1  ;;  %v1746_v23 = vpop.f32.mrf.mxu0 }
 0x337   : > { %v1860_v16 = vmax.f32 %v1852_v2, %v1633_v48 }
 0x338   : > { %v1635_v26 = vpop.f32.mrf.mxu1  ;;  %v1748_v32 = vpop.f32.mrf.mxu0 }
 0x339   : > { %v1867_v25 = vmax.f32 %v1859_v3, %v1635_v26  ;;  %v1862_v26 = vmax.f32 %v1854_v13, %v1746_v23  ;;  %v1869_v33 = vmax.f32 %v1861_v17, %v1748_v32  ;;  %v2018_v17 = vsub.s32 7, %v2917_v28 }
 0x33a   : > { %v1637_v34 = vpop.f32.mrf.mxu1  ;;  %v1750_v45 = vpop.f32.mrf.mxu0 }
 0x33b   : > { %v1868_v39 = vmax.f32 %v1860_v16, %v1637_v34  ;;  %v1870_v46 = vmax.f32 %v1862_v26, %v1750_v45 }
 0x33c   : > { %v1641_v42 = vpop.f32.mrf.mxu1  ;;  %v1754_v43 = vpop.f32.mrf.mxu0 }
 0x33d   : > { %v1875_v19 = vmax.f32 %v1867_v25, %v1641_v42  ;;  %v1877_v40 = vmax.f32 %v1869_v33, %v1754_v43  ;;  %v2006_v25 = vsub.s32 4, %v2917_v28 }
 0x33e   : > { %v1643_v31 = vpop.f32.mrf.mxu1  ;;  %v1756_v53 = vpop.f32.mrf.mxu0 }
 0x33f   : > { %v1876_v51 = vmax.f32 %v1868_v39, %v1643_v31  ;;  %v1878_v56 = vmax.f32 %v1870_v46, %v1756_v53 }
 0x340   : > { %v1645_v47 = vpop.f32.mrf.mxu1  ;;  %v1758_v60 = vpop.f32.mrf.mxu0 }
 0x341   : > { %v1883_v59 = vmax.f32 %v1875_v19, %v1645_v47  ;;  %v1885_v8 = vmax.f32 %v1877_v40, %v1758_v60 }
 0x342   : > { %v1647_v22 = vpop.f32.mrf.mxu1  ;;  %v1760_v6 = vpop.f32.mrf.mxu0 }
 0x343   : > { %v1884_v35 = vmax.f32 %v1876_v51, %v1647_v22  ;;  %v1886_v52 = vmax.f32 %v1878_v56, %v1760_v6  ;;  %v2010_v6 = vsub.s32 5, %v2917_v28  ;;  %v2007_v51 = vrot.slane %v3179_v55, %v2006_v25 }
 0x344   : > { %v1651_v49 = vpop.f32.mrf.mxu1  ;;  %v1764_v15 = vpop.f32.mrf.mxu0 }
 0x345   : > { %v1891_v12 = vmax.f32 %v1883_v59, %v1651_v49  ;;  %v1893_v20 = vmax.f32 %v1885_v8, %v1764_v15  ;;  %v2011_v19 = vrot.slane %v3179_v55, %v2010_v6 }
 0x346   : > { %v1653_v30 = vpop.f32.mrf.mxu1  ;;  %v1766_v36 = vpop.f32.mrf.mxu0 }
 0x347   : > { %v1892_v4 = vmax.f32 %v1884_v35, %v1653_v30  ;;  %v1894_v47 = vmax.f32 %v1886_v52, %v1766_v36  ;;  %v2015_v36 = vrot.slane %v3179_v55, %v2014_v10 }
 0x348   : > { %v1655_v7 = vpop.f32.mrf.mxu1  ;;  %v1768_v11 = vpop.f32.mrf.mxu0 }
 0x349   : > { %v1899_v1 = vmax.f32 %v1891_v12, %v1655_v7  ;;  %v1901_v58 = vmax.f32 %v1893_v20, %v1768_v11 }
 0x34a   : > { %v1657_v50 = vpop.f32.mrf.mxu1  ;;  %v1770_v23 = vpop.f32.mrf.mxu0 }
 0x34b   : > { %v1900_v42 = vmax.f32 %v1892_v4, %v1657_v50  ;;  %v1902_v62 = vmax.f32 %v1894_v47, %v1770_v23 }
 0x34c   : > { %v1661_v48 = vpop.f32.mrf.mxu1 }
 0x34d   : > { %v1907_v57 = vmax.f32 %v1899_v1, %v1661_v48  ;;  %v2019_v1 = vrot.slane %v3179_v55, %v2018_v17 }
 0x34e   : > { %v1663_v34 = vpop.f32.mrf.mxu1 }
 0x34f   : > { %v1908_v31 = vmax.f32 %v1900_v42, %v1663_v34 }
 0x350   : > { %v1665_v44 = vpop.f32.mrf.mxu1 }
 0x351   : > { %v1915_v14 = vmax.f32 %v1907_v57, %v1665_v44 }
 0x352   : > { %v1667_v18 = vpop.f32.mrf.mxu1 }
 0x353   : > { %v1963_v27 = vrot.slane %v1915_v14, 4  ;;  %v1916_v37 = vmax.f32 %v1908_v31, %v1667_v18  ;;  %v2092_v18 = vrot.slane %v3213_v63, %v3207_v54 }
 0x354   : > { %v1774_v32 = vpop.f32.mrf.mxu1 }
 0x355   : > { %v1964_v61 = vmax.f32 %v1915_v14, %v1963_v27  ;;  %v1969_v45 = vrot.slane %v1916_v37, 4  ;;  %v1909_v9 = vmax.f32 %v1901_v58, %v1774_v32 }
 0x356   : > { %v1776_v43 = vpop.f32.mrf.mxu1 }
 0x357   : > { %v1965_v38 = vrot.slane %v1964_v61, 2  ;;  %v1970_v22 = vmax.f32 %v1916_v37, %v1969_v45  ;;  %v1910_v2 = vmax.f32 %v1902_v62, %v1776_v43 }
 0x358   : > { %v1778_v53 = vpop.f32.mrf.mxu1 }
 0x359   : > { %v1966_v60 = vmax.f32 %v1964_v61, %v1965_v38  ;;  %v1971_v0 = vrot.slane %v1970_v22, 2  ;;  %v1917_v3 = vmax.f32 %v1909_v9, %v1778_v53 }
 0x35a   : > { %v1780_v49 = vpop.f32.mrf.mxu1 }
 0x35b   : > { %v1972_v21 = vmax.f32 %v1970_v22, %v1971_v0  ;;  %v1975_v29 = vrot.slane %v1917_v3, 4  ;;  %v1918_v16 = vmax.f32 %v1910_v2, %v1780_v49  ;;  %v1967_v30 = vrot.slane %v1966_v60, 1 }
 0x35d   : > { %v1973_v41 = vrot.slane %v1972_v21, 1  ;;  %v1976_v5 = vmax.f32 %v1917_v3, %v1975_v29  ;;  %v1981_v39 = vrot.slane %v1918_v16, 4  ;;  %v1968_v59 = vmax.f32 %v1966_v60, %v1967_v30 }
 0x35f   : > { %v1974_v15 = vmax.f32 %v1972_v21, %v1973_v41  ;;  %v1977_v7 = vrot.slane %v1976_v5, 2  ;;  %v1982_v24 = vmax.f32 %v1918_v16, %v1981_v39  ;;  %v2032_v26 = vadd.f32 %v2007_v51, %v1968_v59 }
 0x361   : > { %v1978_v50 = vmax.f32 %v1976_v5, %v1977_v7  ;;  %v1983_v13 = vrot.slane %v1982_v24, 2  ;;  %v2033_v35 = vadd.f32 %v2011_v19, %v1974_v15  ;;  %v2040_v42 = vmax.f32 %v2032_v26, 0.0 }
 0x363   : > { %v1979_v12 = vrot.slane %v1978_v50, 1  ;;  %v1984_v48 = vmax.f32 %v1982_v24, %v1983_v13  ;;  %v2041_v34 = vmax.f32 %v2033_v35, 0.0 }
 0x365   : > { %v1980_v33 = vmax.f32 %v1978_v50, %v1979_v12  ;;  %v1985_v4 = vrot.slane %v1984_v48, 1  ;;  %v2054_v11 = vcombine.low %v2040_v42, %v2041_v34 }
 0x367   : > { %v2034_v46 = vadd.f32 %v2015_v36, %v1980_v33  ;;  %v1986_v40 = vmax.f32 %v1984_v48, %v1985_v4  ;;  %v2076_v8 = vrot.slane %v2054_v11, %v3207_v54 }
 0x369   : > { %v2035_v57 = vadd.f32 %v2019_v1, %v1986_v40  ;;  %v2042_v44 = vmax.f32 %v2034_v46, 0.0 }
 0x36b   : > { %v2043_v56 = vmax.f32 %v2035_v57, 0.0 }
 0x36d   : > { %v2055_v28 = vcombine.low %v2042_v44, %v2043_v56 }
 0x36f   : > { %v2083_v31 = vrot.slane %v2055_v28, %v3207_v54 }
 0x371   : > { %v2085_v14 = vcombine.low %v2076_v8, %v2083_v31 }
 0x373   : > { %v2099_v55 = vrot.slane %v2085_v14, %v3207_v54 }
 0x375   : > { %v2100_v52 = vcombine.low %v2092_v18, %v2099_v55 }
 0x377   : > { %2102 = vst [vmem:[%s384_s20] sm:$0xff] %v2100_v52 }
 0x378 PF: > { %s21_s26 = sadd.s32 1, %s2700_s26   ;;  %s3275_s24 = smov %s2696_s25 }
 0x379   : > { %p18_p7 = scmp.ge.s32.totalorder %s21_s26, 4   ;;  %s3276_s25 = smov %s3278_s12 }
 0x37b   :  { %20 = sbr.rel (!%p18_p7) target bundleno = 5 (0x5), region = 111 }
 0x380   :  { %2122 = vsyncpa [#allocation4], 1 }
 0x381   :  { %2124 = vsyncpa [#allocation4 + $0x1], 1 }
 0x382   :  { %2125 = vsyncpa [#allocation6], 1 }
 0x383   :  { %2126 = vsyncpa [#allocation9], 1 }
 0x384   :  { %2127 = vsyncpa [#allocation12], 1 }

// kernel: pointnet_encoder.7
= control target key start
LH: loop header
LB: loop body
LE: loop exit
PB: predicated region body
PF: predicated region fallthrough
CT: control target
= control target key end

     0   :  { %14 = vsyncpa [#allocation4], 0  ;;  %s3567_s0 = inlined_call_operand.vmem [shape: f32[2,128,3], index: 0, kind: input, shape index: {}]   ;;  %s3568_s1 = inlined_call_operand.vmem [shape: f32[2,3,64], index: 1, kind: input, shape index: {}]   ;;  %s3569_s2 = inlined_call_operand.hbm [shape: f32[1,64], index: 2, kind: input, shape index: {}]   ;;  %s3570_s3 = inlined_call_operand.hbm [shape: bf16[64,64], index: 3, kind: input, shape index: {}]   ;;  %s3571_s4 = inlined_call_operand.hbm [shape: f32[1,64], index: 4, kind: input, shape index: {}]   ;;  %s3572_s5 = inlined_call_operand.hbm [shape: bf16[64,128], index: 5, kind: input, shape index: {}]   ;;  %s3573_s6 = inlined_call_operand.hbm [shape: f32[1,128], index: 6, kind: input, shape index: {}]   ;;  %s3574_s7 = inlined_call_operand.hbm [shape: bf16[128,1024], index: 7, kind: input, shape index: {}]   ;;  %s3575_s8 = inlined_call_operand.hbm [shape: f32[1,1024], index: 8, kind: input, shape index: {}]   ;;  %s3576_s9 = inlined_call_operand.vmem [shape: f32[2,1,1024], index: 9, kind: output, shape index: {}]  }
   0x1   :  { %15 = vsyncpa [#allocation6], 0 }
   0x2   :  { %16 = vsyncpa [#allocation9], 0 }
   0x3   :  { %17 = vsyncpa [#allocation12], 0  ;;  %s3133_s30 = smov 0   ;;  %s3135_s10 = smov 0  }
   0x4   :  { %s3137_s11 = smov 0  }
   0x5 LB: > { %s3068_s12 = smov [#allocation5]   ;;  %s2521_s14 = sadd.s32 4294967295, %s3066_s11   ;;  %s3066_s11 = sphi %s3137_s11, %s23_s11   ;;  %s3062_s10 = sphi %s3135_s10, %s3585_s10   ;;  %s3058_s30 = sphi %s3133_s30, %s3584_s30  }
   0x6   : > { %s290_s13 = sshll.u32 %s3068_s12, 4  ;;  %p2523_p0 = scmp.ge.s32.totalorder %s3066_s11, 1  ;;  %s291_s13 = int_to_ptr.vmem [resolvable:$true] %s290_s13 }
   0x7   : > { %p267_p1 = scmp.lt.s32.totalorder %s3066_s11, 3  ;;  %p3151_p2 = scmp.eq.s32.totalorder %s2521_s14, 0 }
   0x8   : > { %s3069_s17 = smov [#allocation8]   ;;  %s3070_s20 = smov [#allocation11]  }
   0x9   : > { %s3579_s15 = scalar_select %p3151_p2, 1, 0 }
   0xa   : > { %p3155_p3 = pnand %p2523_p0, %p267_p1  ;;  %s314_s18 = sshll.u32 %s3069_s17, 4  ;;  %s3161_s18 = int_to_ptr.vmem [resolvable:$true] %s314_s18 }
   0xb   : > { %s338_s21 = sshll.u32 %s3070_s20, 4  ;;  %s2857_s23 = scalar_lea.vmem %s291_s13, 512  ;;  %s3169_s21 = int_to_ptr.vmem [resolvable:$true] %s338_s21 }
   0xc   : > { %p2738_p4 = pneg %p3155_p3  ;;  %p2858_p7 = scmp.ne.s32.totalorder %s291_s13, %s2857_s23 }
   0xd   : > { %p2865_p10 = scmp.lt.s32.totalorder %s291_s13, %s291_s13  ;;  %p2866_p11 = scmp.lt.s32.totalorder %s2857_s23, %s2857_s23 }
   0xe   : > { %p3165_p5 = pnand %p3151_p2, %p2738_p4 }
   0xf   : > { %p2867_p12 = por %p2866_p11, %p2865_p10 }
  0x10   : > { %p3173_p6 = pneg %p3165_p5 }
  0x12   : > { %p2860_p8 = pnand %p2858_p7, %p3173_p6 }
  0x14   : > { %p2861_p9 = pneg %p2860_p8 }
  0x16   : > { %p2868_p13 = pnand %p2867_p12, %p2861_p9 }
  0x18   : > { %2871 = shalt.err (!%p2868_p13)
}
  0x19   : > { %s3071_s24 = smov 64   ;;  %s3072_s25 = smov 4  }
  0x1a   : > { %2744 = dma.hbm_to_vmem [thread:$0]  (!%p3165_p5), %s3570_s3, 512, %s291_s13, [#allocation6], %s3071_s24, %s3071_s24, %s3072_s25  }
  0x1b   : > { %s2883_s28 = scalar_lea.vmem %s3161_s18, 512  ;;  %p2891_p7 = scmp.lt.s32.totalorder %s3161_s18, %s3161_s18 }
  0x1c   : > { %p2884_p0 = scmp.ne.s32.totalorder %s3161_s18, %s2883_s28  ;;  %p2892_p8 = scmp.lt.s32.totalorder %s2883_s28, %s2883_s28 }
  0x1e   : > { %p2886_p1 = pnand %p2884_p0, %p3173_p6  ;;  %p2893_p9 = por %p2892_p8, %p2891_p7 }
  0x20   : > { %p2887_p4 = pneg %p2886_p1 }
  0x22   : > { %p2894_p10 = pnand %p2893_p9, %p2887_p4 }
  0x24   : > { %2897 = shalt.err (!%p2894_p10)
}
  0x25   : > { %2750 = dma.hbm_to_vmem [thread:$0]  (!%p3165_p5), %s3572_s5, 512, %s3161_s18, [#allocation9], %s3071_s24, %s3071_s24, %s3072_s25  }
  0x26   : > { %s2909_s13 = scalar_lea.vmem %s3169_s21, 8192  ;;  %p2917_p0 = scmp.lt.s32.totalorder %s3169_s21, %s3169_s21 }
  0x27   : > { %p2910_p11 = scmp.ne.s32.totalorder %s3169_s21, %s2909_s13  ;;  %p2918_p1 = scmp.lt.s32.totalorder %s2909_s13, %s2909_s13 }
  0x29   : > { %p2912_p12 = pnand %p2910_p11, %p3173_p6  ;;  %p2919_p4 = por %p2918_p1, %p2917_p0 }
  0x2b   : > { %p2913_p13 = pneg %p2912_p12 }
  0x2d   : > { %p2920_p7 = pnand %p2919_p4, %p2913_p13 }
  0x2f   : > { %2923 = shalt.err (!%p2920_p7)
}
  0x30   : > { %s3073_s14 = smov 512   ;;  %s3074_s17 = smov 32  }
  0x31   : > { %2756 = dma.hbm_to_vmem [thread:$0]  (!%p3165_p5), %s3574_s7, 8192, %s3169_s21, [#allocation12], %s3073_s14, %s3073_s14, %s3074_s17  }
  0x32   : > { %s35_s23 = sadd.s32 1, %s3062_s10  ;;  %s3075_s24 = smov [#allocation3]  }
  0x33   : > { %p37_p8 = scmp.ge.s32.totalorder %s35_s23, 2  ;;  %s280_s25 = sshll.u32 %s3075_s24, 4  ;;  %s281_s25 = int_to_ptr.vmem [resolvable:$true] %s280_s25 }
  0x34   : > { %s2935_s26 = scalar_lea.vmem %s281_s25, 16  ;;  %s2942_s27 = scalar_lea.vmem %s281_s25, 32 }
  0x35   : > { %s3587_s23 = smov (%p37_p8, %s35_s23), 0  ;;  %p2936_p9 = scmp.ne.s32.totalorder %s281_s25, %s2935_s26 }
  0x36   : > { %p2943_p12 = scmp.lt.s32.totalorder %s281_s25, %s281_s25  ;;  %p2944_p13 = scmp.lt.s32.totalorder %s2942_s27, %s2935_s26 }
  0x37   : > { %p2938_p10 = pnand %p2936_p9, %p3173_p6 }
  0x38   : > { %p2945_p0 = por %p2944_p13, %p2943_p12 }
  0x39   : > { %p2939_p11 = pneg %p2938_p10 }
  0x3b   : > { %p2946_p1 = pnand %p2945_p0, %p2939_p11 }
  0x3d   : > { %2949 = shalt.err (!%p2946_p1)
}
  0x3e   : > { %2741 = dma.hbm_to_vmem [thread:$0]  (!%p3165_p5), %s3569_s2, 16, %s281_s25, [#allocation4]  }
  0x3f   : > { %s3076_s29 = smov [#allocation7]   ;;  %s3077_s13 = smov [#allocation10]  }
  0x40   : > { %s304_s12 = sshll.u32 %s3076_s29, 4  ;;  %s328_s14 = sshll.u32 %s3077_s13, 4  ;;  %s305_s12 = int_to_ptr.vmem [resolvable:$true] %s304_s12  ;;  %s329_s14 = int_to_ptr.vmem [resolvable:$true] %s328_s14 }
  0x41   : > { %s2961_s17 = scalar_lea.vmem %s305_s12, 16  ;;  %s2968_s20 = scalar_lea.vmem %s305_s12, 32 }
  0x42   : > { %p2962_p4 = scmp.ne.s32.totalorder %s305_s12, %s2961_s17  ;;  %p2969_p9 = scmp.lt.s32.totalorder %s305_s12, %s305_s12 }
  0x43   : > { %p2970_p10 = scmp.lt.s32.totalorder %s2968_s20, %s2961_s17 }
  0x44   : > { %p2964_p7 = pnand %p2962_p4, %p3173_p6 }
  0x45   : > { %p2971_p11 = por %p2970_p10, %p2969_p9 }
  0x46   : > { %p2965_p8 = pneg %p2964_p7 }
  0x48   : > { %p2972_p12 = pnand %p2971_p11, %p2965_p8 }
  0x4a   : > { %2975 = shalt.err (!%p2972_p12)
}
  0x4b   : > { %2747 = dma.hbm_to_vmem [thread:$0]  (!%p3165_p5), %s3571_s4, 16, %s305_s12, [#allocation6]  }
  0x4c   : > { %s2987_s25 = scalar_lea.vmem %s329_s14, 16  ;;  %s2994_s26 = scalar_lea.vmem %s329_s14, 32 }
  0x4d   : > { %p2988_p13 = scmp.ne.s32.totalorder %s329_s14, %s2987_s25  ;;  %p2995_p4 = scmp.lt.s32.totalorder %s329_s14, %s329_s14 }
  0x4e   : > { %p2996_p7 = scmp.lt.s32.totalorder %s2994_s26, %s2987_s25 }
  0x4f   : > { %p2990_p0 = pnand %p2988_p13, %p3173_p6 }
  0x50   : > { %p2997_p2 = por %p2996_p7, %p2995_p4 }
  0x51   : > { %p2991_p1 = pneg %p2990_p0 }
  0x53   : > { %p2998_p9 = pnand %p2997_p2, %p2991_p1 }
  0x55   : > { %3001 = shalt.err (!%p2998_p9)
}
  0x56   : > { %2753 = dma.hbm_to_vmem [thread:$0]  (!%p3165_p5), %s3573_s6, 16, %s329_s14, [#allocation9]  }
  0x57   : > { %s3078_s28 = smov [#allocation13]  }
  0x58   : > { %s352_s29 = sshll.u32 %s3078_s28, 4  ;;  %s353_s29 = int_to_ptr.vmem [resolvable:$true] %s352_s29 }
  0x59   : > { %s3013_s12 = scalar_lea.vmem %s353_s29, 128  ;;  %p3021_p12 = scmp.lt.s32.totalorder %s353_s29, %s353_s29 }
  0x5a   : > { %p3014_p8 = scmp.ne.s32.totalorder %s353_s29, %s3013_s12  ;;  %p3022_p13 = scmp.lt.s32.totalorder %s3013_s12, %s3013_s12 }
  0x5c   : > { %p3016_p10 = pnand %p3014_p8, %p3173_p6  ;;  %p3023_p0 = por %p3022_p13, %p3021_p12 }
  0x5e   : > { %p3017_p11 = pneg %p3016_p10 }
  0x60   : > { %p3024_p2 = pnand %p3023_p0, %p3017_p11 }
  0x62   : > { %3027 = shalt.err (!%p3024_p2)
}
  0x63   : > { %2759 = dma.hbm_to_vmem [thread:$0]  (!%p3165_p5), %s3575_s8, 128, %s353_s29, [#allocation12]  }
  0x64   : > { %385 = sbr.rel (%p3155_p3) target bundleno = 1093 (0x445), region = 56  ;;  %p3583_p1 = scmp.ne.s32.totalorder (!%p3155_p3), %s3579_s15, 0 }
  0x69   : > { %3041 = dma.done.wait (%p3583_p1), [#allocation4], 16  }
  0x6a   : > { %3043 = vsyncadd (%p3583_p1), [#allocation4], 4294967280 }
  0x6b   : > { %3045 = dma.done.wait (%p3583_p1), [#allocation6], 528  }
  0x6c   : > { %3047 = vsyncadd (%p3583_p1), [#allocation6], 4294966768 }
  0x6d   : > { %3049 = dma.done.wait (%p3583_p1), [#allocation9], 528  }
  0x6e   : > { %3051 = vsyncadd (%p3583_p1), [#allocation9], 4294966768 }
  0x6f   : > { %3053 = dma.done.wait (%p3583_p1), [#allocation12], 8320  }
  0x70   : > { %3055 = vsyncadd (%p3583_p1), [#allocation12], 4294958976  ;;  %p453_p3 = scmp.lt.s32.totalorder %s3058_s30, 1  ;;  %v3079_v0 = vmov 1   ;;  %v3080_v1 = vmov 0   ;;  %v2838_v7 = vld [vmem:[#allocation5 + $0x18] sm:$0xff]   ;;  %v581_v25 = vlaneseq }
  0x71   : > { %2814 = vset.pattern.permute.xlu1 %v3079_v0  ;;  %2813 = vset.pattern.permute.xlu0 %v3080_v1  ;;  %v3081_v8 = vmov 2   ;;  %v2839_v10 = vld [vmem:[#allocation5 + $0x10] sm:$0xff]   ;;  %v2840_v11 = vld [vmem:[#allocation5 + $0x8] sm:$0xff]   ;;  %v2841_v13 = vld [vmem:[#allocation5] sm:$0xff]   ;;  %vm886_vm0 = vcmask 523264  }
  0x72   : > { %s3589_s30 = smov (!%p453_p3, %s3058_s30), 1  ;;  %2662 = vmatprep.subr.bf16.mxu0 %v2838_v7  ;;  %v3309_v28 = vshrl.u32 %v581_v25, 7  ;;  %v2842_v36 = vld [vmem:[#allocation8 + $0x18] sm:$0xff]  }
  0x73   : > { %s2637_s16 = sshll.u32 %s3589_s30, 7  ;;  %2663 = vmatpush3.bf16.msra.mxu0 %v2838_v7  ;;  %s2542_s15 = sshll.u32 %s3589_s30, 2  ;;  %2686 = vmatprep.subr.bf16.mxu1 %v2842_v36  ;;  %v3339_v58 = vld [vmem:[#allocation3] ss:$0 sm:$0xff] }
  0x74   : > { %s3267_s14 = scalar_lea.vmem %s3567_s0, %s2637_s16  ;;  %2664 = vmatprep.subr.bf16.mxu0 %v2839_v10  ;;  %s465_s24 = scalar_lea.vmem %s3568_s1, %s2542_s15  ;;  %v583_v31 = vsub.s32 0, %v3309_v28  ;;  %v667_v32 = vsub.s32 1, %v3309_v28  ;;  %v767_v34 = vsub.s32 2, %v3309_v28  ;;  %2687 = vmatpush3.bf16.msra.mxu1 %v2842_v36 }
  0x75   : > { %v483_v2 = vld [vmem:[%s3267_s14] sm:$0xff]  ;;  %v484_v3 = vld [vmem:[%s3267_s14 + $0x8] sm:$0xff]  ;;  %v485_v4 = vld [vmem:[%s3267_s14 + $0x10] sm:$0xff]  ;;  %s2543_s25 = sshll.u32 %s3589_s30, 3 }
  0x76   : > { %602 = vperm.xlu1 %2814, %v483_v2   ;;  %503 = vperm.xlu0 %2813, %v483_v2   ;;  %v486_v5 = vld [vmem:[%s3267_s14 + $0x18] sm:$0xff]  ;;  %v488_v6 = vld [vmem:[%s3267_s14 + $0x28] sm:$0xff]  ;;  %v489_v9 = vld [vmem:[%s3267_s14 + $0x30] sm:$0xff]  ;;  %s469_s21 = scalar_lea.vmem %s3576_s9, %s2543_s25 }
  0x77   : > { %2665 = vmatpush3.bf16.msra.mxu0 %v2839_v10  ;;  %v487_v12 = vld [vmem:[%s3267_s14 + $0x20] sm:$0xff]  ;;  %v490_v14 = vld [vmem:[%s3267_s14 + $0x38] sm:$0xff]  ;;  %v492_v15 = vld [vmem:[%s3267_s14 + $0x48] sm:$0xff] }
  0x78   : > { %2666 = vmatprep.subr.bf16.mxu0 %v2840_v11  ;;  %v493_v16 = vld [vmem:[%s3267_s14 + $0x50] sm:$0xff]  ;;  %v495_v17 = vld [vmem:[%s3267_s14 + $0x60] sm:$0xff]  ;;  %v496_v18 = vld [vmem:[%s3267_s14 + $0x68] sm:$0xff] }
  0x79   : > { %v491_v19 = vld [vmem:[%s3267_s14 + $0x40] sm:$0xff]  ;;  %v497_v20 = vld [vmem:[%s3267_s14 + $0x70] sm:$0xff]  ;;  %v494_v21 = vld [vmem:[%s3267_s14 + $0x58] sm:$0xff] }
  0x7a   : > { %606 = vperm.xlu1 %2814, %v484_v3   ;;  %508 = vperm.xlu0 %2813, %v484_v3   ;;  %v498_v22 = vld [vmem:[%s3267_s14 + $0x78] sm:$0xff]  ;;  %v499_v33 = vld [vmem:[%s465_s24] sm:$0x7] }
  0x7b   : > { %2667 = vmatpush3.bf16.msra.mxu0 %v2840_v11  ;;  %v3319_v38 = vrot.slane %v499_v33, %v583_v31  ;;  %v3323_v39 = vrot.slane %v499_v33, %v667_v32  ;;  %v3327_v40 = vrot.slane %v499_v33, %v767_v34 }
  0x7c   : > { %2668 = vmatprep.subr.bf16.mxu0 %v2841_v13 }
  0x7e   : > { %2815 = vset.pattern.permute.xlu1 %v3080_v1  ;;  %513 = vperm.xlu0 %2813, %v485_v4  }
  0x7f   : > { %518 = vperm.xlu1 %2815, %v486_v5   ;;  %2669 = vmatpush3.bf16.msra.mxu0 %v2841_v13 }
  0x82   : > { %2816 = vset.pattern.permute.xlu0 %v3079_v0 }
  0x83   : > { %2817 = vset.pattern.permute.xlu1 %v3079_v0  ;;  %610 = vperm.xlu0 %2816, %v485_v4  }
  0x84   : > { %614 = vperm.xlu1 %2817, %v486_v5  }
  0x87   : > { %622 = vperm.xlu0 %2816, %v488_v6  }
  0x88   : > { %2818 = vset.pattern.permute.xlu1 %v3081_v8 }
  0x89   : > { %702 = vperm.xlu1 %2818, %v483_v2  }
  0x8b   : > { %626 = vperm.xlu0 %2816, %v489_v9  }
  0x8d   : > { %710 = vperm.xlu1 %2818, %v485_v4  }
  0x8f   : > { %2822 = vset.pattern.permute.xlu0 %v3081_v8 }
  0x90   : > { %706 = vperm.xlu0 %2822, %v484_v3  }
  0x91   : > { %714 = vperm.xlu1 %2818, %v486_v5  }
  0x94   : > { %718 = vperm.xlu0 %2822, %v487_v12  }
  0x95   : > { %2819 = vset.pattern.permute.xlu1 %v3080_v1 }
  0x96   : > { %528 = vperm.xlu1 %2819, %v488_v6  }
  0x98   : > { %730 = vperm.xlu0 %2822, %v490_v14  }
  0x9a   : > { %2820 = vset.pattern.permute.xlu1 %v3079_v0 }
  0x9b   : > { %618 = vperm.xlu1 %2820, %v487_v12  }
  0x9c   : > { %738 = vperm.xlu0 %2822, %v492_v15  }
  0x9f   : > { %2821 = vset.pattern.permute.xlu1 %v3080_v1 }
  0xa0   : > { %533 = vperm.xlu1 %2821, %v489_v9   ;;  %2830 = vset.pattern.permute.xlu0 %v3080_v1 }
  0xa1   : > { %523 = vperm.xlu0 %2830, %v487_v12  }
  0xa4   : > { %538 = vperm.xlu1 %2821, %v490_v14  }
  0xa5   : > { %548 = vperm.xlu0 %2830, %v492_v15  }
  0xa8   : > { %2823 = vset.pattern.permute.xlu1 %v3079_v0 }
  0xa9   : > { %630 = vperm.xlu1 %2823, %v490_v14   ;;  %553 = vperm.xlu0 %2830, %v493_v16  }
  0xad   : > { %2824 = vset.pattern.permute.xlu1 %v3081_v8  ;;  %563 = vperm.xlu0 %2830, %v495_v17  }
  0xae   : > { %722 = vperm.xlu1 %2824, %v488_v6  }
  0xb1   : > { %2831 = vset.pattern.permute.xlu0 %v3079_v0 }
  0xb2   : > { %726 = vperm.xlu1 %2824, %v489_v9   ;;  %642 = vperm.xlu0 %2831, %v493_v16  }
  0xb6   : > { %2825 = vset.pattern.permute.xlu1 %v3080_v1  ;;  %654 = vperm.xlu0 %2831, %v496_v18  }
  0xb7   : > { %543 = vperm.xlu1 %2825, %v491_v19  }
  0xba   : > { %658 = vperm.xlu0 %2831, %v497_v20  }
  0xbb   : > { %2826 = vset.pattern.permute.xlu1 %v3079_v0 }
  0xbc   : > { %634 = vperm.xlu1 %2826, %v491_v19  }
  0xbe   : > { %2836 = vset.pattern.permute.xlu0 %v3081_v8 }
  0xbf   : > { %750 = vperm.xlu0 %2836, %v495_v17  }
  0xc0   : > { %638 = vperm.xlu1 %2826, %v492_v15  }
  0xc3   : > { %762 = vperm.xlu0 %2836, %v498_v22  }
  0xc4   : > { %2827 = vset.pattern.permute.xlu1 %v3080_v1 }
  0xc5   : > { %558 = vperm.xlu1 %2827, %v494_v21  }
  0xc9   : > { %2828 = vset.pattern.permute.xlu1 %v3079_v0 }
  0xca   : > { %646 = vperm.xlu1 %2828, %v494_v21  }
  0xce   : > { %2829 = vset.pattern.permute.xlu1 %v3081_v8 }
  0xcf   : > { %734 = vperm.xlu1 %2829, %v491_v19  }
  0xd3   : > { %742 = vperm.xlu1 %2829, %v493_v16  }
  0xd7   : > { %746 = vperm.xlu1 %2829, %v494_v21  }
  0xdb   : > { %2832 = vset.pattern.permute.xlu1 %v3080_v1 }
  0xdc   : > { %568 = vperm.xlu1 %2832, %v496_v18  }
  0xe0   : > { %2833 = vset.pattern.permute.xlu1 %v3079_v0 }
  0xe1   : > { %650 = vperm.xlu1 %2833, %v495_v17  }
  0xe5   : > { %2834 = vset.pattern.permute.xlu1 %v3080_v1 }
  0xe6   : > { %573 = vperm.xlu1 %2834, %v497_v20  }
  0xea   : > { %578 = vperm.xlu1 %2834, %v498_v22  }
  0xee   : > { %2835 = vset.pattern.permute.xlu1 %v3079_v0 }
  0xef   : > { %662 = vperm.xlu1 %2835, %v498_v22  }
  0xf1   : > { %v603_v23 = vpop.permute.xlu1 %602  ;;  %v504_v24 = vpop.permute.xlu0 %503 }
  0xf2   : > { %v669_v44 = vmul.f32 %v3323_v39, %v603_v23  ;;  %v585_v45 = vmul.f32 %v3319_v38, %v504_v24 }
  0xf3   : > { %2837 = vset.pattern.permute.xlu1 %v3081_v8 }
  0xf4   : > { %754 = vperm.xlu1 %2837, %v496_v18   ;;  %v685_v50 = vadd.f32 %v669_v44, %v585_v45 }
  0xf5   : > { %v607_v26 = vpop.permute.xlu1 %606  ;;  %v509_v27 = vpop.permute.xlu0 %508 }
  0xf6   : > { %v670_v51 = vmul.f32 %v3323_v39, %v607_v26  ;;  %v586_v52 = vmul.f32 %v3319_v38, %v509_v27 }
  0xf8   : > { %758 = vperm.xlu1 %2837, %v497_v20   ;;  %v686_v61 = vadd.f32 %v670_v51, %v586_v52 }
  0xf9   : > { %v514_v29 = vpop.permute.xlu0 %513 }
  0xfa   : > { %v519_v30 = vpop.permute.xlu1 %518  ;;  %v587_v42 = vmul.f32 %v3319_v38, %v514_v29 }
  0xfb   : > { %v588_v57 = vmul.f32 %v3319_v38, %v519_v30 }
  0xfe   : > { %v611_v35 = vpop.permute.xlu0 %610 }
  0xff   : > { %v615_v37 = vpop.permute.xlu1 %614  ;;  %v671_v43 = vmul.f32 %v3323_v39, %v611_v35 }
 0x100   : > { %v672_v54 = vmul.f32 %v3323_v39, %v615_v37 }
 0x101   : > { %v687_v49 = vadd.f32 %v671_v43, %v587_v42 }
 0x102   : > { %v623_v41 = vpop.permute.xlu0 %622  ;;  %v688_v0 = vadd.f32 %v672_v54, %v588_v57 }
 0x103   : > { %v674_v30 = vmul.f32 %v3323_v39, %v623_v41 }
 0x104   : > { %v703_v46 = vpop.permute.xlu1 %702 }
 0x105   : > { %v769_v47 = vmul.f32 %v3327_v40, %v703_v46 }
 0x106   : > { %v627_v48 = vpop.permute.xlu0 %626 }
 0x107   : > { %v785_v56 = vadd.f32 %v769_v47, %v685_v50  ;;  %v675_v44 = vmul.f32 %v3323_v39, %v627_v48 }
 0x108   : > { %v711_v53 = vpop.permute.xlu1 %710 }
 0x109   : > { %v771_v55 = vmul.f32 %v3327_v40, %v711_v53  ;;  %v807_v4 = vadd.f32 %v3339_v58, %v785_v56 }
 0x10b   : > { %v787_v59 = vadd.f32 %v771_v55, %v687_v49  ;;  %v707_v60 = vpop.permute.xlu0 %706  ;;  %v823_v11 = vmax.f32 %v807_v4, 0.0 }
 0x10c   : > { %v770_v62 = vmul.f32 %v3327_v40, %v707_v60  ;;  %v715_v63 = vpop.permute.xlu1 %714 }
 0x10d   : > { %v772_v2 = vmul.f32 %v3327_v40, %v715_v63  ;;  %v809_v5 = vadd.f32 %v3339_v58, %v787_v59 }
 0x10e   : > { %v786_v3 = vadd.f32 %v770_v62, %v686_v61 }
 0x10f   : > { %v788_v6 = vadd.f32 %v772_v2, %v688_v0  ;;  %v719_v7 = vpop.permute.xlu0 %718  ;;  %v825_v13 = vmax.f32 %v809_v5, 0.0 }
 0x110   : > { %v808_v8 = vadd.f32 %v3339_v58, %v786_v3  ;;  %v773_v25 = vmul.f32 %v3327_v40, %v719_v7 }
 0x111   : > { %v810_v9 = vadd.f32 %v3339_v58, %v788_v6  ;;  %v529_v10 = vpop.permute.xlu1 %528 }
 0x112   : > { %v824_v12 = vmax.f32 %v808_v8, 0.0  ;;  %v590_v33 = vmul.f32 %v3319_v38, %v529_v10 }
 0x113   : > { %v826_v14 = vmax.f32 %v810_v9, 0.0  ;;  %v731_v15 = vpop.permute.xlu0 %730 }
 0x114   : > { %v839_v16 = vpack.c.bf16 %v824_v12, %v823_v11  ;;  %v776_v36 = vmul.f32 %v3327_v40, %v731_v15  ;;  %v690_v45 = vadd.f32 %v674_v30, %v590_v33 }
 0x115   : > { %v840_v17 = vpack.c.bf16 %v826_v14, %v825_v13 }
 0x116   : > { %v619_v18 = vpop.permute.xlu1 %618  ;;  %2670 = vmatprep.mubr.msk.bf16.mxu0 %vm886_vm0, %v839_v16 }
 0x117   : > { %2671 = vmatmul.mubr.msk.bf16.vlgmr.msra.gmra.mxu0 %vm886_vm0, %v840_v17  ;;  %v739_v19 = vpop.permute.xlu0 %738  ;;  %v673_v24 = vmul.f32 %v3323_v39, %v619_v18 }
 0x118   : > { %v778_v10 = vmul.f32 %v3327_v40, %v739_v19 }
 0x11b   : > { %v534_v20 = vpop.permute.xlu1 %533 }
 0x11c   : > { %v524_v21 = vpop.permute.xlu0 %523  ;;  %v591_v46 = vmul.f32 %v3319_v38, %v534_v20 }
 0x11d   : > { %v589_v23 = vmul.f32 %v3319_v38, %v524_v21 }
 0x11e   : > { %v691_v52 = vadd.f32 %v675_v44, %v591_v46 }
 0x11f   : > { %v539_v22 = vpop.permute.xlu1 %538  ;;  %v689_v26 = vadd.f32 %v673_v24, %v589_v23 }
 0x120   : > { %v592_v35 = vmul.f32 %v3319_v38, %v539_v22  ;;  %v549_v2 = vpop.permute.xlu0 %548 }
 0x121   : > { %v789_v37 = vadd.f32 %v773_v25, %v689_v26  ;;  %v594_v9 = vmul.f32 %v3319_v38, %v549_v2 }
 0x123   : > { %v811_v49 = vadd.f32 %v3339_v58, %v789_v37 }
 0x124   : > { %v631_v27 = vpop.permute.xlu1 %630  ;;  %v554_v4 = vpop.permute.xlu0 %553 }
 0x125   : > { %v676_v29 = vmul.f32 %v3323_v39, %v631_v27  ;;  %v827_v55 = vmax.f32 %v811_v49, 0.0  ;;  %v595_v17 = vmul.f32 %v3319_v38, %v554_v4 }
 0x127   : > { %v692_v42 = vadd.f32 %v676_v29, %v592_v35 }
 0x128   : > { %v564_v7 = vpop.permute.xlu0 %563 }
 0x129   : > { %v723_v43 = vpop.permute.xlu1 %722  ;;  %v792_v50 = vadd.f32 %v776_v36, %v692_v42 }
 0x12a   : > { %v774_v47 = vmul.f32 %v3327_v40, %v723_v43 }
 0x12b   : > { %v814_v56 = vadd.f32 %v3339_v58, %v792_v50  ;;  %v2843_v50 = vld [vmem:[#allocation8 + $0x10] sm:$0xff]  }
 0x12c   : > { %v790_v41 = vadd.f32 %v774_v47, %v690_v45  ;;  %2688 = vmatprep.subr.bf16.mxu1 %v2843_v50 }
 0x12d   : > { %v727_v51 = vpop.permute.xlu1 %726  ;;  %v830_v62 = vmax.f32 %v814_v56, 0.0  ;;  %v643_v13 = vpop.permute.xlu0 %642  ;;  %2689 = vmatpush3.bf16.msra.mxu1 %v2843_v50  ;;  %v2845_v56 = vld [vmem:[#allocation8] sm:$0xff]  }
 0x12e   : > { %v812_v53 = vadd.f32 %v3339_v58, %v790_v41  ;;  %v775_v54 = vmul.f32 %v3327_v40, %v727_v51  ;;  %v679_v18 = vmul.f32 %v3323_v39, %v643_v13 }
 0x130   : > { %v828_v57 = vmax.f32 %v812_v53, 0.0  ;;  %v791_v48 = vadd.f32 %v775_v54, %v691_v52  ;;  %v695_v19 = vadd.f32 %v679_v18, %v595_v17  ;;  %v2844_v54 = vld [vmem:[#allocation8 + $0x8] sm:$0xff]  }
 0x131   : > { %v655_v53 = vpop.permute.xlu0 %654  ;;  %2690 = vmatprep.subr.bf16.mxu1 %v2844_v54 }
 0x132   : > { %v841_v59 = vpack.c.bf16 %v828_v57, %v827_v55  ;;  %v813_v60 = vadd.f32 %v3339_v58, %v791_v48  ;;  %v544_v61 = vpop.permute.xlu1 %543  ;;  %2691 = vmatpush3.bf16.msra.mxu1 %v2844_v54  ;;  %v1240_v54 = vld [vmem:[#allocation11 + $0xc0] sm:$0xff] }
 0x133   : > { %v593_v15 = vmul.f32 %v3319_v38, %v544_v61  ;;  %2692 = vmatprep.subr.bf16.mxu1 %v2845_v56 }
 0x134   : > { %v829_v63 = vmax.f32 %v813_v60, 0.0  ;;  %2674 = vmatprep.mubr.msk.bf16.mxu0 %vm886_vm0, %v841_v59 }
 0x135   : > { %v659_v57 = vpop.permute.xlu0 %658 }
 0x136   : > { %v842_v0 = vpack.c.bf16 %v830_v62, %v829_v63  ;;  %2693 = vmatpush3.bf16.msra.mxu1 %v2845_v56  ;;  %v597_v62 = vmul.f32 %v3319_v38, %v564_v7  ;;  %v683_v7 = vmul.f32 %v3323_v39, %v659_v57 }
 0x137   : > { %v635_v3 = vpop.permute.xlu1 %634 }
 0x138   : > { %2675 = vmatmul.mubr.msk.bf16.gmra.mxu0 %vm886_vm0, %v842_v0  ;;  %v677_v14 = vmul.f32 %v3323_v39, %v635_v3 }
 0x13a   : > { %v693_v21 = vadd.f32 %v677_v14, %v593_v15  ;;  %v751_v61 = vpop.permute.xlu0 %750 }
 0x13b   : > { %v639_v5 = vpop.permute.xlu1 %638  ;;  %v781_v0 = vmul.f32 %v3327_v40, %v751_v61 }
 0x13c   : > { %v678_v8 = vmul.f32 %v3323_v39, %v639_v5  ;;  %v682_v5 = vmul.f32 %v3323_v39, %v655_v53 }
 0x13e   : > { %v694_v11 = vadd.f32 %v678_v8, %v594_v9  ;;  %v763_v4 = vpop.permute.xlu0 %762 }
 0x140   : > { %v559_v6 = vpop.permute.xlu1 %558  ;;  %v794_v16 = vadd.f32 %v778_v10, %v694_v11  ;;  %v784_v11 = vmul.f32 %v3327_v40, %v763_v4 }
 0x141   : > { %v596_v33 = vmul.f32 %v3319_v38, %v559_v6 }
 0x142   : > { %v816_v23 = vadd.f32 %v3339_v58, %v794_v16 }
 0x144   : > { %v832_v30 = vmax.f32 %v816_v23, 0.0 }
 0x145   : > { %v647_v12 = vpop.permute.xlu1 %646 }
 0x146   : > { %v680_v26 = vmul.f32 %v3323_v39, %v647_v12 }
 0x148   : > { %v696_v42 = vadd.f32 %v680_v26, %v596_v33  ;;  %v1272_v33 = vld [vmem:[#allocation11 + $0x1c0] sm:$0xff] }
 0x14a   : > { %v735_v20 = vpop.permute.xlu1 %734 }
 0x14b   : > { %v777_v22 = vmul.f32 %v3327_v40, %v735_v20 }
 0x14d   : > { %v793_v24 = vadd.f32 %v777_v22, %v693_v21 }
 0x14e   : > { %v743_v25 = vpop.permute.xlu1 %742 }
 0x14f   : > { %v815_v27 = vadd.f32 %v3339_v58, %v793_v24  ;;  %v779_v29 = vmul.f32 %v3327_v40, %v743_v25 }
 0x151   : > { %v831_v35 = vmax.f32 %v815_v27, 0.0  ;;  %v795_v36 = vadd.f32 %v779_v29, %v695_v19 }
 0x152   : > { %v747_v37 = vpop.permute.xlu1 %746 }
 0x153   : > { %v843_v43 = vpack.c.bf16 %v832_v30, %v831_v35  ;;  %v780_v44 = vmul.f32 %v3327_v40, %v747_v37  ;;  %v817_v45 = vadd.f32 %v3339_v58, %v795_v36  ;;  %v1276_v35 = vld [vmem:[#allocation11 + $0x1e0] sm:$0xff] }
 0x154   : > { %v2627_v36 = vcombine.low %v1272_v33, %v1276_v35  ;;  %v2628_v37 = vcombine.high %v1272_v33, %v1276_v35 }
 0x155   : > { %v796_v46 = vadd.f32 %v780_v44, %v696_v42  ;;  %2678 = vmatprep.mubr.msk.bf16.mxu0 %vm886_vm0, %v843_v43  ;;  %v833_v41 = vmax.f32 %v817_v45, 0.0  ;;  %v1277_v42 = vld [vmem:[#allocation11 + $0x1e8] sm:$0xff]  ;;  %v1264_v43 = vld [vmem:[#allocation11 + $0x180] sm:$0xff] }
 0x156   : > { %v1268_v44 = vld [vmem:[#allocation11 + $0x1a0] sm:$0xff]  ;;  %1600 = vmatprep.subr.bf16.mxu0 %v2628_v37 }
 0x157   : > { %v818_v47 = vadd.f32 %v3339_v58, %v796_v46  ;;  %v569_v49 = vpop.permute.xlu1 %568  ;;  %v2620_v46 = vcombine.high %v1264_v43, %v1268_v44  ;;  %1601 = vmatpush1.bf16.msra.mxu0 %v2627_v36 }
 0x158   : > { %v598_v6 = vmul.f32 %v3319_v38, %v569_v49  ;;  %v2619_v49 = vcombine.low %v1264_v43, %v1268_v44 }
 0x159   : > { %v834_v51 = vmax.f32 %v818_v47, 0.0  ;;  %v1260_v47 = vld [vmem:[#allocation11 + $0x160] sm:$0xff]  ;;  %1602 = vmatprep.subr.bf16.mxu0 %v2620_v46 }
 0x15a   : > { %v698_v13 = vadd.f32 %v682_v5, %v598_v6 }
 0x15b   : > { %v844_v52 = vpack.c.bf16 %v834_v51, %v833_v41  ;;  %v1248_v41 = vld [vmem:[#allocation11 + $0x100] sm:$0xff]  ;;  %1603 = vmatpush1.bf16.msra.mxu0 %v2619_v49 }
 0x15c   : > { %v651_v55 = vpop.permute.xlu1 %650  ;;  %v1252_v51 = vld [vmem:[#allocation11 + $0x120] sm:$0xff] }
 0x15d   : > { %2679 = vmatmul.mubr.msk.bf16.gmra.mxu0 %vm886_vm0, %v844_v52  ;;  %v681_v60 = vmul.f32 %v3323_v39, %v651_v55  ;;  %v2604_v53 = vcombine.high %v1248_v41, %v1252_v51  ;;  %v1244_v55 = vld [vmem:[#allocation11 + $0xe0] sm:$0xff]  ;;  %v2603_v57 = vcombine.low %v1248_v41, %v1252_v51 }
 0x15f   : > { %v697_v63 = vadd.f32 %v681_v60, %v597_v62  ;;  %v3404_v60 = vld [vmem:[#allocation7] ss:$0 sm:$0xff] }
 0x161   : > { %v574_v48 = vpop.permute.xlu1 %573  ;;  %v797_v9 = vadd.f32 %v781_v0, %v697_v63  ;;  %v2595_v0 = vcombine.low %v1240_v54, %v1244_v55 }
 0x162   : > { %v599_v14 = vmul.f32 %v3319_v38, %v574_v48 }
 0x163   : > { %v819_v16 = vadd.f32 %v3339_v58, %v797_v9  ;;  %v1265_v9 = vld [vmem:[#allocation11 + $0x188] sm:$0xff] }
 0x164   : > { %v699_v21 = vadd.f32 %v683_v7, %v599_v14 }
 0x165   : > { %v579_v59 = vpop.permute.xlu1 %578  ;;  %v835_v24 = vmax.f32 %v819_v16, 0.0  ;;  %v1261_v16 = vld [vmem:[#allocation11 + $0x168] sm:$0xff] }
 0x166   : > { %v600_v8 = vmul.f32 %v3319_v38, %v579_v59  ;;  %v2596_v59 = vcombine.high %v1240_v54, %v1244_v55  ;;  %v1236_v54 = vld [vmem:[#allocation11 + $0xa0] sm:$0xff]  ;;  %v1233_v55 = vld [vmem:[#allocation11 + $0x88] sm:$0xff] }
 0x16a   : > { %v663_v2 = vpop.permute.xlu1 %662 }
 0x16b   : > { %v684_v3 = vmul.f32 %v3323_v39, %v663_v2 }
 0x16d   : > { %v700_v10 = vadd.f32 %v684_v3, %v600_v8 }
 0x16f   : > { %v755_v12 = vpop.permute.xlu1 %754  ;;  %v800_v17 = vadd.f32 %v784_v11, %v700_v10  ;;  %v1269_v10 = vld [vmem:[#allocation11 + $0x1a8] sm:$0xff] }
 0x170   : > { %v782_v15 = vmul.f32 %v3327_v40, %v755_v12  ;;  %v2622_v14 = vcombine.high %v1265_v9, %v1269_v10 }
 0x171   : > { %v822_v19 = vadd.f32 %v3339_v58, %v800_v17  ;;  %v2621_v17 = vcombine.low %v1265_v9, %v1269_v10  ;;  %v1229_v10 = vld [vmem:[#allocation11 + $0x68] sm:$0xff] }
 0x172   : > { %v798_v18 = vadd.f32 %v782_v15, %v698_v13  ;;  %v1257_v15 = vld [vmem:[#allocation11 + $0x148] sm:$0xff] }
 0x173   : > { %v759_v20 = vpop.permute.xlu1 %758  ;;  %v838_v27 = vmax.f32 %v822_v19, 0.0  ;;  %v1245_v19 = vld [vmem:[#allocation11 + $0xe8] sm:$0xff] }
 0x174   : > { %v820_v22 = vadd.f32 %v3339_v58, %v798_v18  ;;  %v783_v23 = vmul.f32 %v3327_v40, %v759_v20  ;;  %v1273_v40 = vld [vmem:[#allocation11 + $0x1c8] sm:$0xff]  ;;  %v2614_v18 = vcombine.high %v1257_v15, %v1261_v16 }
 0x175   : > { %v2630_v45 = vcombine.high %v1273_v40, %v1277_v42  ;;  %v2629_v13 = vcombine.low %v1273_v40, %v1277_v42  ;;  %v1249_v20 = vld [vmem:[#allocation11 + $0x108] sm:$0xff] }
 0x176   : > { %v836_v25 = vmax.f32 %v820_v22, 0.0  ;;  %v799_v26 = vadd.f32 %v783_v23, %v699_v21  ;;  %v1253_v21 = vld [vmem:[#allocation11 + $0x128] sm:$0xff]  ;;  %v2613_v22 = vcombine.low %v1257_v15, %v1261_v16  ;;  %v1220_v15 = vld [vmem:[#allocation11 + $0x20] sm:$0xff] }
 0x177   : > { %1713 = vmatprep.subr.bf16.mxu1 %v2630_v45  ;;  %v2606_v23 = vcombine.high %v1249_v20, %v1253_v21  ;;  %v1217_v16 = vld [vmem:[#allocation11 + $0x8] sm:$0xff] }
 0x178   : > { %v845_v39 = vpack.c.bf16 %v836_v25, %v835_v24  ;;  %v821_v38 = vadd.f32 %v3339_v58, %v799_v26  ;;  %v1256_v58 = vld [vmem:[#allocation11 + $0x140] sm:$0xff]  ;;  %v1241_v24 = vld [vmem:[#allocation11 + $0xc8] sm:$0xff]  ;;  %v2605_v25 = vcombine.low %v1249_v20, %v1253_v21 }
 0x179   : > { %v2612_v50 = vcombine.high %v1256_v58, %v1260_v47  ;;  %v2611_v52 = vcombine.low %v1256_v58, %v1260_v47  ;;  %v2598_v26 = vcombine.high %v1241_v24, %v1245_v19 }
 0x17a   : > { %v837_v29 = vmax.f32 %v821_v38, 0.0  ;;  %2682 = vmatprep.mubr.msk.bf16.mxu0 %vm886_vm0, %v845_v39  ;;  %v2597_v39 = vcombine.low %v1241_v24, %v1245_v19 }
 0x17b   : > { %1604 = vmatprep.subr.bf16.mxu0 %v2612_v50 }
 0x17c   : > { %v846_v30 = vpack.c.bf16 %v838_v27, %v837_v29  ;;  %1605 = vmatpush1.bf16.msra.mxu0 %v2611_v52 }
 0x17d   : > { %1606 = vmatprep.subr.bf16.mxu0 %v2604_v53  ;;  %v1232_v53 = vld [vmem:[#allocation11 + $0x80] sm:$0xff] }
 0x17e   : > { %2683 = vmatmul.mubr.msk.bf16.gmra.mxu0 %vm886_vm0, %v846_v30 }
 0x17f   : > { %1632 = vmatprep.mubr.bf16.mxu0 %v3080_v1 }
 0x180   : > { %1607 = vmatpush1.bf16.msra.mxu0 %v2603_v57  ;;  %v2588_v57 = vcombine.high %v1232_v53, %v1236_v54 }
 0x181   : > { %1608 = vmatprep.subr.bf16.mxu0 %v2596_v59 }
 0x184   : > { %1609 = vmatpush1.bf16.msra.mxu0 %v2595_v0 }
 0x185   : > { %1610 = vmatprep.subr.bf16.mxu0 %v2588_v57  ;;  %v1270_v57 = vld [vmem:[#allocation11 + $0x1b0] sm:$0xff] }
 0x1d7   : > { %v2672_v56 = vpop.f32.mrf.mxu0 }
 0x1d8   : > { %v954_v2 = vadd.f32 %v2672_v56, %v3404_v60 }
 0x1d9   : > { %v945_v48 = vpop.f32.mrf.mxu0 }
 0x1da   : > { %v946_v62 = vadd.f32 %v3404_v60, %v945_v48  ;;  %v1010_v11 = vmax.f32 %v954_v2, 0.0  ;;  %v1237_v48 = vld [vmem:[#allocation11 + $0xa8] sm:$0xff] }
 0x1db   : > { %v2673_v61 = vpop.f32.mrf.mxu0 }
 0x1dc   : > { %v957_v63 = vadd.f32 %v2673_v61, %v3404_v60  ;;  %v1008_v6 = vmax.f32 %v946_v62, 0.0  ;;  %v2587_v61 = vcombine.low %v1232_v53, %v1236_v54  ;;  %v2589_v62 = vcombine.low %v1233_v55, %v1237_v48  ;;  %v1266_v54 = vld [vmem:[#allocation11 + $0x190] sm:$0xff] }
 0x1dd   : > { %v948_v3 = vpop.f32.mrf.mxu0 }
 0x1de   : > { %v949_v4 = vadd.f32 %v3404_v60, %v948_v3  ;;  %v1011_v5 = vmax.f32 %v957_v63, 0.0  ;;  %v2590_v63 = vcombine.high %v1233_v55, %v1237_v48  ;;  %1611 = vmatpush1.bf16.msra.mxu0 %v2587_v61  ;;  %v1267_v48 = vld [vmem:[#allocation11 + $0x198] sm:$0xff] }
 0x1e0   : > { %v1009_v8 = vmax.f32 %v949_v4, 0.0  ;;  %v1025_v7 = vpack.c.bf16 %v1011_v5, %v1010_v11  ;;  %v1224_v4 = vld [vmem:[#allocation11 + $0x40] sm:$0xff] }
 0x1e1   : > { %v1228_v5 = vld [vmem:[#allocation11 + $0x60] sm:$0xff] }
 0x1e2   : > { %v1024_v12 = vpack.c.bf16 %v1009_v8, %v1008_v6  ;;  %v1225_v6 = vld [vmem:[#allocation11 + $0x48] sm:$0xff]  ;;  %v2580_v9 = vcombine.high %v1224_v4, %v1228_v5 }
 0x1e4   : > { %2694 = vmatprep.mubr.msk.bf16.mxu1 %vm886_vm0, %v1024_v12  ;;  %v2579_v12 = vcombine.low %v1224_v4, %v1228_v5  ;;  %1612 = vmatprep.subr.bf16.mxu0 %v2580_v9  ;;  %v1262_v4 = vld [vmem:[#allocation11 + $0x170] sm:$0xff]  ;;  %v1259_v5 = vld [vmem:[#allocation11 + $0x158] sm:$0xff]  ;;  %v2623_v9 = vcombine.low %v1266_v54, %v1270_v57 }
 0x1e5   : > { %2695 = vmatmul.mubr.msk.bf16.vlgmr.msra.gmra.mxu1 %vm886_vm0, %v1025_v7  ;;  %v2582_v7 = vcombine.high %v1225_v6, %v1229_v10 }
 0x1e6   : > { %1714 = vmatpush1.bf16.msra.mxu1 %v2629_v13  ;;  %v2581_v13 = vcombine.low %v1225_v6, %v1229_v10  ;;  %1613 = vmatpush1.bf16.msra.mxu0 %v2579_v12  ;;  %v1263_v6 = vld [vmem:[#allocation11 + $0x178] sm:$0xff] }
 0x1e7   : > { %1715 = vmatprep.subr.bf16.mxu1 %v2622_v14  ;;  %v1216_v14 = vld [vmem:[#allocation11] sm:$0xff]  ;;  %v2618_v12 = vcombine.high %v1259_v5, %v1263_v6 }
 0x1e8   : > { %v2571_v20 = vcombine.low %v1216_v14, %v1220_v15 }
 0x1ea   : > { %1716 = vmatpush1.bf16.msra.mxu1 %v2621_v17  ;;  %v2572_v17 = vcombine.high %v1216_v14, %v1220_v15  ;;  %v1254_v14 = vld [vmem:[#allocation11 + $0x130] sm:$0xff]  ;;  %v1251_v15 = vld [vmem:[#allocation11 + $0x118] sm:$0xff] }
 0x1eb   : > { %1717 = vmatprep.subr.bf16.mxu1 %v2614_v18  ;;  %v1221_v18 = vld [vmem:[#allocation11 + $0x28] sm:$0xff] }
 0x1ec   : > { %v2573_v21 = vcombine.low %v1217_v16, %v1221_v18  ;;  %1614 = vmatprep.subr.bf16.mxu0 %v2572_v17 }
 0x1ed   : > { %1615 = vmatpush1.bf16.msra.mxu0 %v2571_v20  ;;  %v2617_v20 = vcombine.low %v1259_v5, %v1263_v6 }
 0x1ee   : > { %1718 = vmatpush1.bf16.msra.mxu1 %v2613_v22  ;;  %v2574_v22 = vcombine.high %v1217_v16, %v1221_v18  ;;  %v1255_v16 = vld [vmem:[#allocation11 + $0x138] sm:$0xff] }
 0x1ef   : > { %1719 = vmatprep.subr.bf16.mxu1 %v2606_v23 }
 0x1f2   : > { %1720 = vmatpush1.bf16.msra.mxu1 %v2605_v25 }
 0x1f3   : > { %1721 = vmatprep.subr.bf16.mxu1 %v2598_v26 }
 0x1f6   : > { %1722 = vmatpush1.bf16.msra.mxu1 %v2597_v39 }
 0x1f7   : > { %1723 = vmatprep.subr.bf16.mxu1 %v2590_v63  ;;  %v2624_v63 = vcombine.high %v1266_v54, %v1270_v57  ;;  %v1223_v54 = vld [vmem:[#allocation11 + $0x38] sm:$0xff] }
 0x1f8   : > { %v2676_v38 = vpop.f32.mrf.mxu0 }
 0x1f9   : > { %v970_v35 = vadd.f32 %v2676_v38, %v3404_v60 }
 0x1fa   : > { %v961_v27 = vpop.f32.mrf.mxu0  ;;  %1724 = vmatpush1.bf16.msra.mxu1 %v2589_v62 }
 0x1fb   : > { %v962_v30 = vadd.f32 %v3404_v60, %v961_v27  ;;  %v1014_v44 = vmax.f32 %v970_v35, 0.0  ;;  %1725 = vmatprep.subr.bf16.mxu1 %v2582_v7 }
 0x1fc   : > { %v2677_v29 = vpop.f32.mrf.mxu0 }
 0x1fd   : > { %v973_v33 = vadd.f32 %v2677_v29, %v3404_v60  ;;  %v1012_v42 = vmax.f32 %v962_v30, 0.0 }
 0x1fe   : > { %v964_v40 = vpop.f32.mrf.mxu0  ;;  %1726 = vmatpush1.bf16.msra.mxu1 %v2581_v13  ;;  %v1250_v13 = vld [vmem:[#allocation11 + $0x110] sm:$0xff] }
 0x1ff   : > { %v965_v36 = vadd.f32 %v3404_v60, %v964_v40  ;;  %v1015_v37 = vmax.f32 %v973_v33, 0.0  ;;  %1727 = vmatprep.subr.bf16.mxu1 %v2574_v22  ;;  %v2610_v22 = vcombine.high %v1251_v15, %v1255_v16 }
 0x201   : > { %v1013_v43 = vmax.f32 %v965_v36, 0.0  ;;  %v1027_v46 = vpack.c.bf16 %v1015_v37, %v1014_v44  ;;  %v1274_v37 = vld [vmem:[#allocation11 + $0x1d0] sm:$0xff] }
 0x202   : > { %1728 = vmatpush1.bf16.msra.mxu1 %v2573_v21  ;;  %v2608_v21 = vcombine.high %v1250_v13, %v1254_v14 }
 0x203   : > { %v1026_v45 = vpack.c.bf16 %v1013_v43, %v1012_v42  ;;  %v1278_v42 = vld [vmem:[#allocation11 + $0x1f0] sm:$0xff]  ;;  %v1275_v43 = vld [vmem:[#allocation11 + $0x1d8] sm:$0xff] }
 0x204   : > { %v2631_v44 = vcombine.low %v1274_v37, %v1278_v42 }
 0x205   : > { %2698 = vmatprep.mubr.msk.bf16.mxu1 %vm886_vm0, %v1026_v45  ;;  %v2632_v45 = vcombine.high %v1274_v37, %v1278_v42 }
 0x206   : > { %2699 = vmatmul.mubr.msk.bf16.gmra.mxu1 %vm886_vm0, %v1027_v46  ;;  %v1279_v46 = vld [vmem:[#allocation11 + $0x1f8] sm:$0xff] }
 0x207   : > { %1826 = vmatprep.subr.bf16.mxu0 %v2632_v45  ;;  %v1227_v45 = vld [vmem:[#allocation11 + $0x58] sm:$0xff] }
 0x21d   : > { %v2680_v58 = vpop.f32.mrf.mxu0 }
 0x21e   : > { %v986_v51 = vadd.f32 %v2680_v58, %v3404_v60  ;;  %v2633_v58 = vcombine.low %v1275_v43, %v1279_v46 }
 0x21f   : > { %v977_v47 = vpop.f32.mrf.mxu0 }
 0x220   : > { %v978_v50 = vadd.f32 %v3404_v60, %v977_v47  ;;  %v1018_v3 = vmax.f32 %v986_v51, 0.0 }
 0x221   : > { %v2681_v49 = vpop.f32.mrf.mxu0 }
 0x222   : > { %v989_v41 = vadd.f32 %v2681_v49, %v3404_v60  ;;  %v1016_v0 = vmax.f32 %v978_v50, 0.0  ;;  %v3431_v50 = vld [vmem:[#allocation10] ss:$0 sm:$0xff] }
 0x223   : > { %v980_v52 = vpop.f32.mrf.mxu0 }
 0x224   : > { %v981_v56 = vadd.f32 %v3404_v60, %v980_v52  ;;  %v1019_v59 = vmax.f32 %v989_v41, 0.0 }
 0x226   : > { %v1017_v2 = vmax.f32 %v981_v56, 0.0  ;;  %v1029_v11 = vpack.c.bf16 %v1019_v59, %v1018_v3  ;;  %v1271_v59 = vld [vmem:[#allocation11 + $0x1b8] sm:$0xff] }
 0x227   : > { %v2625_v10 = vcombine.low %v1267_v48, %v1271_v59 }
 0x228   : > { %v1028_v8 = vpack.c.bf16 %v1017_v2, %v1016_v0  ;;  %v2626_v0 = vcombine.high %v1267_v48, %v1271_v59  ;;  %v1258_v2 = vld [vmem:[#allocation11 + $0x150] sm:$0xff] }
 0x229   : > { %v2615_v18 = vcombine.low %v1258_v2, %v1262_v4 }
 0x22a   : > { %2702 = vmatprep.mubr.msk.bf16.mxu1 %vm886_vm0, %v1028_v8 }
 0x22b   : > { %2703 = vmatmul.mubr.msk.bf16.gmra.mxu1 %vm886_vm0, %v1029_v11  ;;  %v2616_v11 = vcombine.high %v1258_v2, %v1262_v4 }
 0x23e   : > { %v2684_v23 = vpop.f32.mrf.mxu0 }
 0x23f   : > { %v1002_v39 = vadd.f32 %v2684_v23, %v3404_v60  ;;  %v1242_v23 = vld [vmem:[#allocation11 + $0xd0] sm:$0xff] }
 0x240   : > { %v993_v24 = vpop.f32.mrf.mxu0 }
 0x241   : > { %v994_v25 = vadd.f32 %v3404_v60, %v993_v24  ;;  %v1022_v35 = vmax.f32 %v1002_v39, 0.0  ;;  %v1246_v24 = vld [vmem:[#allocation11 + $0xf0] sm:$0xff]  ;;  %v2609_v39 = vcombine.low %v1251_v15, %v1255_v16 }
 0x242   : > { %v2685_v19 = vpop.f32.mrf.mxu0 }
 0x243   : > { %v1005_v26 = vadd.f32 %v2685_v19, %v3404_v60  ;;  %v1020_v30 = vmax.f32 %v994_v25, 0.0  ;;  %v1243_v19 = vld [vmem:[#allocation11 + $0xd8] sm:$0xff] }
 0x244   : > { %v996_v38 = vpop.f32.mrf.mxu0  ;;  %v1247_v25 = vld [vmem:[#allocation11 + $0xf8] sm:$0xff] }
 0x245   : > { %v997_v27 = vadd.f32 %v3404_v60, %v996_v38  ;;  %v1023_v29 = vmax.f32 %v1005_v26, 0.0  ;;  %v2634_v60 = vcombine.high %v1275_v43, %v1279_v46  ;;  %v2607_v26 = vcombine.low %v1250_v13, %v1254_v14  ;;  %v1226_v43 = vld [vmem:[#allocation11 + $0x50] sm:$0xff]  ;;  %v1231_v46 = vld [vmem:[#allocation11 + $0x78] sm:$0xff] }
 0x246   : > { %v2600_v38 = vcombine.high %v1242_v23, %v1246_v24  ;;  %v2585_v57 = vcombine.low %v1227_v45, %v1231_v46 }
 0x247   : > { %v1021_v33 = vmax.f32 %v997_v27, 0.0  ;;  %v1031_v36 = vpack.c.bf16 %v1023_v29, %v1022_v35  ;;  %1939 = vmatprep.subr.bf16.mxu1 %v2634_v60  ;;  %v2602_v27 = vcombine.high %v1243_v19, %v1247_v25  ;;  %v1234_v29 = vld [vmem:[#allocation11 + $0x90] sm:$0xff]  ;;  %v1239_v35 = vld [vmem:[#allocation11 + $0xb8] sm:$0xff] }
 0x249   : > { %v1030_v40 = vpack.c.bf16 %v1021_v33, %v1020_v30  ;;  %v1238_v30 = vld [vmem:[#allocation11 + $0xb0] sm:$0xff]  ;;  %v1235_v33 = vld [vmem:[#allocation11 + $0x98] sm:$0xff] }
 0x24a   : > { %v2592_v37 = vcombine.high %v1234_v29, %v1238_v30  ;;  %v2594_v42 = vcombine.high %v1235_v33, %v1239_v35  ;;  %v2593_v60 = vcombine.low %v1235_v33, %v1239_v35 }
 0x24b   : > { %2706 = vmatprep.mubr.msk.bf16.mxu1 %vm886_vm0, %v1030_v40  ;;  %v2599_v40 = vcombine.low %v1242_v23, %v1246_v24 }
 0x24c   : > { %2707 = vmatmul.mubr.msk.bf16.gmra.mxu1 %vm886_vm0, %v1031_v36  ;;  %v2601_v36 = vcombine.low %v1243_v19, %v1247_v25 }
 0x24d   : > { %1745 = vmatprep.mubr.bf16.mxu1 %v3080_v1 }
 0x2a5   : > { %v2696_v47 = vpop.f32.mrf.mxu1 }
 0x2a6   : > { %v1138_v3 = vadd.f32 %v2696_v47, %v3431_v50 }
 0x2a7   : > { %v1129_v49 = vpop.f32.mrf.mxu1 }
 0x2a8   : > { %v1130_v51 = vadd.f32 %v3431_v50, %v1129_v49  ;;  %v1194_v7 = vmax.f32 %v1138_v3, 0.0  ;;  %v2586_v49 = vcombine.high %v1227_v45, %v1231_v46 }
 0x2a9   : > { %v2697_v41 = vpop.f32.mrf.mxu1 }
 0x2aa   : > { %v1192_v55 = vmax.f32 %v1130_v51, 0.0  ;;  %v1141_v61 = vadd.f32 %v2697_v41, %v3431_v50  ;;  %v1218_v41 = vld [vmem:[#allocation11 + $0x10] sm:$0xff] }
 0x2ab   : > { %v1132_v52 = vpop.f32.mrf.mxu1 }
 0x2ac   : > { %v1133_v53 = vadd.f32 %v3431_v50, %v1132_v52  ;;  %v1195_v8 = vmax.f32 %v1141_v61, 0.0  ;;  %v1222_v52 = vld [vmem:[#allocation11 + $0x30] sm:$0xff] }
 0x2ad   : > { %v2576_v48 = vcombine.high %v1218_v41, %v1222_v52  ;;  %v2575_v2 = vcombine.low %v1218_v41, %v1222_v52 }
 0x2ae   : > { %v1193_v56 = vmax.f32 %v1133_v53, 0.0  ;;  %v3443_v17 = vpack.c.bf16 %v1195_v8, %v1194_v7  ;;  %v1219_v53 = vld [vmem:[#allocation11 + $0x18] sm:$0xff] }
 0x2af   : > { %v2578_v59 = vcombine.high %v1219_v53, %v1223_v54  ;;  %v2577_v3 = vcombine.low %v1219_v53, %v1223_v54 }
 0x2b0   : > { %v3436_v62 = vpack.c.bf16 %v1193_v56, %v1192_v55 }
 0x2b2   : > { %1633 = vmatmul.mubr.bf16.vlgmr.msra.gmra.mxu0 %v3436_v62  ;;  %1746 = vmatmul.mubr.bf16.vlgmr.msra.gmra.mxu1 %v3436_v62 }
 0x2b3   : > { %1642 = vmatprep.mubr.bf16.mxu0 %v3080_v1  ;;  %1755 = vmatprep.mubr.bf16.mxu1 %v3080_v1 }
 0x2b4   : > { %1827 = vmatpush1.bf16.msra.mxu0 %v2631_v44  ;;  %1940 = vmatpush1.bf16.msra.mxu1 %v2633_v58  ;;  %v1230_v44 = vld [vmem:[#allocation11 + $0x70] sm:$0xff]  ;;  %v2591_v58 = vcombine.low %v1234_v29, %v1238_v30 }
 0x2b5   : > { %1828 = vmatprep.subr.bf16.mxu0 %v2624_v63  ;;  %1941 = vmatprep.subr.bf16.mxu1 %v2626_v0  ;;  %v2584_v47 = vcombine.high %v1226_v43, %v1230_v44  ;;  %v2583_v56 = vcombine.low %v1226_v43, %v1230_v44 }
 0x2b8   : > { %1829 = vmatpush1.bf16.msra.mxu0 %v2623_v9  ;;  %1942 = vmatpush1.bf16.msra.mxu1 %v2625_v10 }
 0x2b9   : > { %1830 = vmatprep.subr.bf16.mxu0 %v2616_v11  ;;  %1943 = vmatprep.subr.bf16.mxu1 %v2618_v12 }
 0x2ba   : > { %1643 = vmatmul.mubr.bf16.gmra.mxu0 %v3443_v17  ;;  %1756 = vmatmul.mubr.bf16.gmra.mxu1 %v3443_v17 }
 0x2bb   : > { %1652 = vmatprep.mubr.bf16.mxu0 %v3080_v1  ;;  %1765 = vmatprep.mubr.bf16.mxu1 %v3080_v1 }
 0x2bc   : > { %1831 = vmatpush1.bf16.msra.mxu0 %v2615_v18  ;;  %1944 = vmatpush1.bf16.msra.mxu1 %v2617_v20 }
 0x2bd   : > { %1832 = vmatprep.subr.bf16.mxu0 %v2608_v21  ;;  %1945 = vmatprep.subr.bf16.mxu1 %v2610_v22 }
 0x2c0   : > { %1833 = vmatpush1.bf16.msra.mxu0 %v2607_v26  ;;  %1946 = vmatpush1.bf16.msra.mxu1 %v2609_v39 }
 0x2c1   : > { %1834 = vmatprep.subr.bf16.mxu0 %v2600_v38  ;;  %1947 = vmatprep.subr.bf16.mxu1 %v2602_v27 }
 0x2c4   : > { %1835 = vmatpush1.bf16.msra.mxu0 %v2599_v40  ;;  %1948 = vmatpush1.bf16.msra.mxu1 %v2601_v36 }
 0x2c5   : > { %1836 = vmatprep.subr.bf16.mxu0 %v2592_v37  ;;  %1949 = vmatprep.subr.bf16.mxu1 %v2594_v42 }
 0x2c6   : > { %v2700_v51 = vpop.f32.mrf.mxu1 }
 0x2c7   : > { %v1154_v10 = vadd.f32 %v2700_v51, %v3431_v50 }
 0x2c8   : > { %v1145_v55 = vpop.f32.mrf.mxu1  ;;  %1837 = vmatpush1.bf16.msra.mxu0 %v2591_v58  ;;  %1950 = vmatpush1.bf16.msra.mxu1 %v2593_v60 }
 0x2c9   : > { %1838 = vmatprep.subr.bf16.mxu0 %v2584_v47  ;;  %1951 = vmatprep.subr.bf16.mxu1 %v2586_v49  ;;  %v1146_v63 = vadd.f32 %v3431_v50, %v1145_v55  ;;  %v1198_v12 = vmax.f32 %v1154_v10, 0.0 }
 0x2ca   : > { %v2701_v61 = vpop.f32.mrf.mxu1 }
 0x2cb   : > { %v1196_v5 = vmax.f32 %v1146_v63, 0.0  ;;  %v1157_v8 = vadd.f32 %v2701_v61, %v3431_v50 }
 0x2cc   : > { %v1148_v0 = vpop.f32.mrf.mxu1  ;;  %1839 = vmatpush1.bf16.msra.mxu0 %v2583_v56  ;;  %1952 = vmatpush1.bf16.msra.mxu1 %v2585_v57 }
 0x2cd   : > { %v1149_v4 = vadd.f32 %v3431_v50, %v1148_v0  ;;  %1840 = vmatprep.subr.bf16.mxu0 %v2576_v48  ;;  %1953 = vmatprep.subr.bf16.mxu1 %v2578_v59  ;;  %v1199_v11 = vmax.f32 %v1157_v8, 0.0 }
 0x2cf   : > { %v1197_v6 = vmax.f32 %v1149_v4, 0.0  ;;  %v1211_v13 = vpack.c.bf16 %v1199_v11, %v1198_v12 }
 0x2d0   : > { %1841 = vmatpush1.bf16.msra.mxu0 %v2575_v2  ;;  %1954 = vmatpush1.bf16.msra.mxu1 %v2577_v3 }
 0x2d1   : > { %v3452_v9 = vpack.c.bf16 %v1197_v6, %v1196_v5 }
 0x2d3   : > { %1653 = vmatmul.mubr.bf16.gmra.mxu0 %v3452_v9  ;;  %1766 = vmatmul.mubr.bf16.gmra.mxu1 %v3452_v9 }
 0x2d4   : > { %1662 = vmatprep.mubr.bf16.mxu0 %v3080_v1  ;;  %1775 = vmatprep.mubr.bf16.mxu1 %v3080_v1 }
 0x2db   : > { %1663 = vmatmul.mubr.bf16.gmra.mxu0 %v1211_v13  ;;  %1776 = vmatmul.mubr.bf16.gmra.mxu1 %v1211_v13 }
 0x2dc   : > { %1672 = vmatprep.mubr.bf16.mxu0 %v3080_v1  ;;  %1785 = vmatprep.mubr.bf16.mxu1 %v3080_v1 }
 0x2eb   : > { %v2704_v7 = vpop.f32.mrf.mxu1 }
 0x2ec   : > { %v1170_v19 = vadd.f32 %v2704_v7, %v3431_v50 }
 0x2ed   : > { %v1161_v14 = vpop.f32.mrf.mxu1 }
 0x2ee   : > { %v1162_v16 = vadd.f32 %v3431_v50, %v1161_v14  ;;  %v1202_v26 = vmax.f32 %v1170_v19, 0.0 }
 0x2ef   : > { %v2705_v15 = vpop.f32.mrf.mxu1 }
 0x2f0   : > { %v1200_v21 = vmax.f32 %v1162_v16, 0.0  ;;  %v1173_v23 = vadd.f32 %v2705_v15, %v3431_v50 }
 0x2f1   : > { %v1164_v18 = vpop.f32.mrf.mxu1 }
 0x2f2   : > { %v1165_v20 = vadd.f32 %v3431_v50, %v1164_v18  ;;  %v1203_v25 = vmax.f32 %v1173_v23, 0.0 }
 0x2f4   : > { %v1201_v22 = vmax.f32 %v1165_v20, 0.0  ;;  %v1213_v39 = vpack.c.bf16 %v1203_v25, %v1202_v26 }
 0x2f6   : > { %v1212_v24 = vpack.c.bf16 %v1201_v22, %v1200_v21 }
 0x2f8   : > { %1673 = vmatmul.mubr.bf16.gmra.mxu0 %v1212_v24  ;;  %1786 = vmatmul.mubr.bf16.gmra.mxu1 %v1212_v24 }
 0x2f9   : > { %1682 = vmatprep.mubr.bf16.mxu0 %v3080_v1  ;;  %1795 = vmatprep.mubr.bf16.mxu1 %v3080_v1 }
 0x300   : > { %1683 = vmatmul.mubr.bf16.gmra.mxu0 %v1213_v39  ;;  %1796 = vmatmul.mubr.bf16.gmra.mxu1 %v1213_v39 }
 0x301   : > { %1692 = vmatprep.mubr.bf16.mxu0 %v3080_v1  ;;  %1805 = vmatprep.mubr.bf16.mxu1 %v3080_v1 }
 0x30c   : > { %v2708_v38 = vpop.f32.mrf.mxu1 }
 0x30d   : > { %v1186_v43 = vadd.f32 %v2708_v38, %v3431_v50 }
 0x30e   : > { %v1177_v27 = vpop.f32.mrf.mxu1 }
 0x30f   : > { %v1178_v30 = vadd.f32 %v3431_v50, %v1177_v27  ;;  %v1206_v45 = vmax.f32 %v1186_v43, 0.0 }
 0x310   : > { %v2709_v29 = vpop.f32.mrf.mxu1 }
 0x311   : > { %v1204_v40 = vmax.f32 %v1178_v30, 0.0  ;;  %v1189_v37 = vadd.f32 %v2709_v29, %v3431_v50 }
 0x312   : > { %v1180_v33 = vpop.f32.mrf.mxu1 }
 0x313   : > { %v1181_v35 = vadd.f32 %v3431_v50, %v1180_v33  ;;  %v1207_v44 = vmax.f32 %v1189_v37, 0.0 }
 0x315   : > { %v1205_v36 = vmax.f32 %v1181_v35, 0.0  ;;  %v1215_v46 = vpack.c.bf16 %v1207_v44, %v1206_v45 }
 0x317   : > { %v1214_v42 = vpack.c.bf16 %v1205_v36, %v1204_v40 }
 0x319   : > { %1693 = vmatmul.mubr.bf16.gmra.mxu0 %v1214_v42  ;;  %1806 = vmatmul.mubr.bf16.gmra.mxu1 %v1214_v42 }
 0x31a   : > { %1702 = vmatprep.mubr.bf16.mxu0 %v3080_v1  ;;  %1815 = vmatprep.mubr.bf16.mxu1 %v3080_v1 }
 0x321   : > { %1703 = vmatmul.mubr.bf16.gmra.mxu0 %v1215_v46  ;;  %1816 = vmatmul.mubr.bf16.gmra.mxu1 %v1215_v46 }
 0x322   : > { %1858 = vmatprep.mubr.bf16.mxu0 %v3080_v1  ;;  %1971 = vmatprep.mubr.bf16.mxu1 %v3080_v1 }
 0x329   : > { %1859 = vmatmul.mubr.bf16.vlgmr.msra.gmra.mxu0 %v3436_v62  ;;  %1972 = vmatmul.mubr.bf16.vlgmr.msra.gmra.mxu1 %v3436_v62 }
 0x32a   : > { %1868 = vmatprep.mubr.bf16.mxu0 %v3080_v1  ;;  %1981 = vmatprep.mubr.bf16.mxu1 %v3080_v1 }
 0x331   : > { %1869 = vmatmul.mubr.bf16.gmra.mxu0 %v3443_v17  ;;  %1982 = vmatmul.mubr.bf16.gmra.mxu1 %v3443_v17 }
 0x332   : > { %1878 = vmatprep.mubr.bf16.mxu0 %v3080_v1  ;;  %1991 = vmatprep.mubr.bf16.mxu1 %v3080_v1 }
 0x339   : > { %1879 = vmatmul.mubr.bf16.gmra.mxu0 %v3452_v9  ;;  %1992 = vmatmul.mubr.bf16.gmra.mxu1 %v3452_v9 }
 0x33a   : > { %1888 = vmatprep.mubr.bf16.mxu0 %v3080_v1  ;;  %2001 = vmatprep.mubr.bf16.mxu1 %v3080_v1 }
 0x341   : > { %1889 = vmatmul.mubr.bf16.gmra.mxu0 %v1211_v13  ;;  %2002 = vmatmul.mubr.bf16.gmra.mxu1 %v1211_v13 }
 0x342   : > { %1898 = vmatprep.mubr.bf16.mxu0 %v3080_v1  ;;  %2011 = vmatprep.mubr.bf16.mxu1 %v3080_v1 }
 0x349   : > { %1899 = vmatmul.mubr.bf16.gmra.mxu0 %v1212_v24  ;;  %2012 = vmatmul.mubr.bf16.gmra.mxu1 %v1212_v24 }
 0x34a   : > { %1908 = vmatprep.mubr.bf16.mxu0 %v3080_v1  ;;  %2021 = vmatprep.mubr.bf16.mxu1 %v3080_v1 }
 0x351   : > { %1909 = vmatmul.mubr.bf16.gmra.mxu0 %v1213_v39  ;;  %2022 = vmatmul.mubr.bf16.gmra.mxu1 %v1213_v39 }
 0x352   : > { %1918 = vmatprep.mubr.bf16.mxu0 %v3080_v1  ;;  %2031 = vmatprep.mubr.bf16.mxu1 %v3080_v1 }
 0x359   : > { %1919 = vmatmul.mubr.bf16.gmra.mxu0 %v1214_v42  ;;  %2032 = vmatmul.mubr.bf16.gmra.mxu1 %v1214_v42 }
 0x35a   : > { %1928 = vmatprep.mubr.bf16.mxu0 %v3080_v1  ;;  %2041 = vmatprep.mubr.bf16.mxu1 %v3080_v1 }
 0x361   : > { %1929 = vmatmul.mubr.bf16.gmra.mxu0 %v1215_v46  ;;  %2042 = vmatmul.mubr.bf16.gmra.mxu1 %v1215_v46 }
 0x372   : > { %v1634_v50 = vpop.f32.mrf.mxu0  ;;  %v1747_v62 = vpop.f32.mrf.mxu1 }
 0x374   : > { %v1636_v17 = vpop.f32.mrf.mxu0  ;;  %v1749_v58 = vpop.f32.mrf.mxu1 }
 0x376   : > { %v1638_v60 = vpop.f32.mrf.mxu0  ;;  %v1751_v47 = vpop.f32.mrf.mxu1 }
 0x377   : > { %v2068_v49 = vmax.f32 %v1634_v50, %v1638_v60  ;;  %v2070_v41 = vmax.f32 %v1747_v62, %v1751_v47 }
 0x378   : > { %v1640_v51 = vpop.f32.mrf.mxu0  ;;  %v1753_v52 = vpop.f32.mrf.mxu1 }
 0x379   : > { %v2069_v53 = vmax.f32 %v1636_v17, %v1640_v51  ;;  %v2071_v54 = vmax.f32 %v1749_v58, %v1753_v52 }
 0x37a   : > { %v1644_v55 = vpop.f32.mrf.mxu0  ;;  %v1757_v56 = vpop.f32.mrf.mxu1 }
 0x37b   : > { %v2076_v57 = vmax.f32 %v2068_v49, %v1644_v55  ;;  %v2078_v48 = vmax.f32 %v2070_v41, %v1757_v56 }
 0x37c   : > { %v1646_v59 = vpop.f32.mrf.mxu0  ;;  %v1759_v1 = vpop.f32.mrf.mxu1 }
 0x37d   : > { %v2077_v61 = vmax.f32 %v2069_v53, %v1646_v59  ;;  %v2079_v63 = vmax.f32 %v2071_v54, %v1759_v1 }
 0x37e   : > { %v1648_v0 = vpop.f32.mrf.mxu0  ;;  %v1761_v2 = vpop.f32.mrf.mxu1 }
 0x37f   : > { %v2084_v3 = vmax.f32 %v2076_v57, %v1648_v0  ;;  %v2086_v4 = vmax.f32 %v2078_v48, %v1761_v2 }
 0x380   : > { %v1650_v5 = vpop.f32.mrf.mxu0  ;;  %v1763_v6 = vpop.f32.mrf.mxu1 }
 0x381   : > { %v2085_v8 = vmax.f32 %v2077_v61, %v1650_v5  ;;  %v2087_v9 = vmax.f32 %v2079_v63, %v1763_v6 }
 0x393   : > { %v1654_v10 = vpop.f32.mrf.mxu0  ;;  %v1767_v11 = vpop.f32.mrf.mxu1 }
 0x394   : > { %v2092_v12 = vmax.f32 %v2084_v3, %v1654_v10  ;;  %v2094_v13 = vmax.f32 %v2086_v4, %v1767_v11 }
 0x395   : > { %v1656_v7 = vpop.f32.mrf.mxu0  ;;  %v1769_v14 = vpop.f32.mrf.mxu1 }
 0x396   : > { %v2093_v15 = vmax.f32 %v2085_v8, %v1656_v7  ;;  %v2095_v16 = vmax.f32 %v2087_v9, %v1769_v14 }
 0x397   : > { %v1658_v18 = vpop.f32.mrf.mxu0  ;;  %v1771_v20 = vpop.f32.mrf.mxu1 }
 0x398   : > { %v2100_v21 = vmax.f32 %v2092_v12, %v1658_v18  ;;  %v2102_v22 = vmax.f32 %v2094_v13, %v1771_v20 }
 0x399   : > { %v1660_v23 = vpop.f32.mrf.mxu0  ;;  %v1773_v24 = vpop.f32.mrf.mxu1 }
 0x39a   : > { %v2101_v19 = vmax.f32 %v2093_v15, %v1660_v23  ;;  %v2103_v25 = vmax.f32 %v2095_v16, %v1773_v24 }
 0x39b   : > { %v1664_v26 = vpop.f32.mrf.mxu0  ;;  %v1777_v39 = vpop.f32.mrf.mxu1 }
 0x39c   : > { %v2108_v38 = vmax.f32 %v2100_v21, %v1664_v26  ;;  %v2110_v27 = vmax.f32 %v2102_v22, %v1777_v39 }
 0x39d   : > { %v1666_v29 = vpop.f32.mrf.mxu0  ;;  %v1779_v30 = vpop.f32.mrf.mxu1 }
 0x39e   : > { %v2109_v33 = vmax.f32 %v2101_v19, %v1666_v29  ;;  %v2111_v35 = vmax.f32 %v2103_v25, %v1779_v30 }
 0x39f   : > { %v1668_v40 = vpop.f32.mrf.mxu0  ;;  %v1781_v36 = vpop.f32.mrf.mxu1 }
 0x3a0   : > { %v2116_v37 = vmax.f32 %v2108_v38, %v1668_v40  ;;  %v2118_v42 = vmax.f32 %v2110_v27, %v1781_v36 }
 0x3a1   : > { %v1670_v43 = vpop.f32.mrf.mxu0  ;;  %v1783_v44 = vpop.f32.mrf.mxu1 }
 0x3a2   : > { %v2117_v45 = vmax.f32 %v2109_v33, %v1670_v43  ;;  %v2119_v46 = vmax.f32 %v2111_v35, %v1783_v44 }
 0x3b8   : > { %v1674_v50 = vpop.f32.mrf.mxu0  ;;  %v1787_v62 = vpop.f32.mrf.mxu1 }
 0x3b9   : > { %v2124_v17 = vmax.f32 %v2116_v37, %v1674_v50  ;;  %v2126_v58 = vmax.f32 %v2118_v42, %v1787_v62 }
 0x3ba   : > { %v1676_v60 = vpop.f32.mrf.mxu0  ;;  %v1789_v47 = vpop.f32.mrf.mxu1 }
 0x3bb   : > { %v2125_v49 = vmax.f32 %v2117_v45, %v1676_v60  ;;  %v2127_v41 = vmax.f32 %v2119_v46, %v1789_v47 }
 0x3bc   : > { %v1678_v51 = vpop.f32.mrf.mxu0  ;;  %v1791_v52 = vpop.f32.mrf.mxu1 }
 0x3bd   : > { %v2132_v53 = vmax.f32 %v2124_v17, %v1678_v51  ;;  %v2134_v54 = vmax.f32 %v2126_v58, %v1791_v52 }
 0x3be   : > { %v1680_v55 = vpop.f32.mrf.mxu0  ;;  %v1793_v56 = vpop.f32.mrf.mxu1 }
 0x3bf   : > { %v2133_v57 = vmax.f32 %v2125_v49, %v1680_v55  ;;  %v2135_v48 = vmax.f32 %v2127_v41, %v1793_v56 }
 0x3c0   : > { %v1684_v59 = vpop.f32.mrf.mxu0  ;;  %v1797_v1 = vpop.f32.mrf.mxu1 }
 0x3c1   : > { %v2140_v61 = vmax.f32 %v2132_v53, %v1684_v59  ;;  %v2142_v63 = vmax.f32 %v2134_v54, %v1797_v1 }
 0x3c2   : > { %v1686_v0 = vpop.f32.mrf.mxu0  ;;  %v1799_v2 = vpop.f32.mrf.mxu1 }
 0x3c3   : > { %v2141_v3 = vmax.f32 %v2133_v57, %v1686_v0  ;;  %v2143_v4 = vmax.f32 %v2135_v48, %v1799_v2  ;;  %v3505_v57 = vld [vmem:[#allocation13] sm:$0xff] }
 0x3c4   : > { %v1688_v5 = vpop.f32.mrf.mxu0  ;;  %v1801_v6 = vpop.f32.mrf.mxu1 }
 0x3c5   : > { %v2148_v8 = vmax.f32 %v2140_v61, %v1688_v5  ;;  %v2150_v9 = vmax.f32 %v2142_v63, %v1801_v6  ;;  %v2271_v63 = vsub.s32 3, %v3309_v28 }
 0x3c6   : > { %v1690_v10 = vpop.f32.mrf.mxu0  ;;  %v1803_v11 = vpop.f32.mrf.mxu1 }
 0x3c7   : > { %v2149_v12 = vmax.f32 %v2141_v3, %v1690_v10  ;;  %v2151_v13 = vmax.f32 %v2143_v4, %v1803_v11  ;;  %v3082_v10 = vmov 1966171168  }
 0x3c8   : > { %v2326_v11 = vunpack.c.l.s4 %v3082_v10 }
 0x3d9   : > { %v1694_v7 = vpop.f32.mrf.mxu0  ;;  %v1807_v14 = vpop.f32.mrf.mxu1 }
 0x3da   : > { %v2156_v15 = vmax.f32 %v2148_v8, %v1694_v7  ;;  %v2158_v16 = vmax.f32 %v2150_v9, %v1807_v14  ;;  %v2260_v8 = vrot.slane %v3505_v57, %v583_v31  ;;  %v2268_v9 = vrot.slane %v3505_v57, %v767_v34 }
 0x3db   : > { %v1696_v18 = vpop.f32.mrf.mxu0  ;;  %v1809_v20 = vpop.f32.mrf.mxu1  ;;  %v2272_v31 = vrot.slane %v3505_v57, %v2271_v63 }
 0x3dc   : > { %v2157_v21 = vmax.f32 %v2149_v12, %v1696_v18  ;;  %v2159_v22 = vmax.f32 %v2151_v13, %v1809_v20  ;;  %v2264_v18 = vrot.slane %v3505_v57, %v667_v32 }
 0x3dd   : > { %v1698_v23 = vpop.f32.mrf.mxu0  ;;  %v1811_v24 = vpop.f32.mrf.mxu1 }
 0x3de   : > { %v2164_v19 = vmax.f32 %v2156_v15, %v1698_v23  ;;  %v2166_v25 = vmax.f32 %v2158_v16, %v1811_v24 }
 0x3df   : > { %v1700_v26 = vpop.f32.mrf.mxu0  ;;  %v1813_v39 = vpop.f32.mrf.mxu1 }
 0x3e0   : > { %v2165_v38 = vmax.f32 %v2157_v21, %v1700_v26  ;;  %v2167_v27 = vmax.f32 %v2159_v22, %v1813_v39 }
 0x3e1   : > { %v1704_v29 = vpop.f32.mrf.mxu0  ;;  %v1817_v30 = vpop.f32.mrf.mxu1 }
 0x3e2   : > { %v2172_v33 = vmax.f32 %v2164_v19, %v1704_v29  ;;  %v2174_v35 = vmax.f32 %v2166_v25, %v1817_v30  ;;  %v2327_v19 = vunpack.c.0.s8 %v2326_v11 }
 0x3e3   : > { %v1706_v40 = vpop.f32.mrf.mxu0  ;;  %v1819_v36 = vpop.f32.mrf.mxu1 }
 0x3e4   : > { %v2173_v37 = vmax.f32 %v2165_v38, %v1706_v40  ;;  %v2175_v42 = vmax.f32 %v2167_v27, %v1819_v36  ;;  %v3527_v32 = vsub.s32 %v2327_v19, %v3309_v28 }
 0x3e5   : > { %v1708_v43 = vpop.f32.mrf.mxu0  ;;  %v1821_v44 = vpop.f32.mrf.mxu1 }
 0x3e6   : > { %v2180_v45 = vmax.f32 %v2172_v33, %v1708_v43  ;;  %v2182_v46 = vmax.f32 %v2174_v35, %v1821_v44 }
 0x3e7   : > { %v1710_v50 = vpop.f32.mrf.mxu0  ;;  %v1823_v62 = vpop.f32.mrf.mxu1 }
 0x3e8   : > { %v2208_v17 = vrot.slane %v2180_v45, 4  ;;  %v2220_v58 = vrot.slane %v2182_v46, 4  ;;  %v2181_v60 = vmax.f32 %v2173_v37, %v1710_v50  ;;  %v2183_v47 = vmax.f32 %v2175_v42, %v1823_v62 }
 0x3e9   : > { %v3497_v49 = vpop.f32.mrf.mxu0  ;;  %v3499_v41 = vpop.f32.mrf.mxu1 }
 0x3ea   : > { %v2209_v51 = vmax.f32 %v2180_v45, %v2208_v17  ;;  %v2221_v52 = vmax.f32 %v2182_v46, %v2220_v58  ;;  %v2214_v53 = vrot.slane %v2181_v60, 4  ;;  %v2226_v54 = vrot.slane %v2183_v47, 4 }
 0x3eb   : > { %v3501_v55 = vpop.f32.mrf.mxu0  ;;  %v3503_v56 = vpop.f32.mrf.mxu1 }
 0x3ec   : > { %v2210_v48 = vrot.slane %v2209_v51, 2  ;;  %v2222_v59 = vrot.slane %v2221_v52, 2  ;;  %v2215_v1 = vmax.f32 %v2181_v60, %v2214_v53  ;;  %v2227_v61 = vmax.f32 %v2183_v47, %v2226_v54 }
 0x3ed   : > { %v3508_v0 = vpop.f32.mrf.mxu0  ;;  %v3510_v2 = vpop.f32.mrf.mxu1 }
 0x3ee   : > { %v2211_v3 = vmax.f32 %v2209_v51, %v2210_v48  ;;  %v2223_v4 = vmax.f32 %v2221_v52, %v2222_v59  ;;  %v2216_v5 = vrot.slane %v2215_v1, 2  ;;  %v2228_v6 = vrot.slane %v2227_v61, 2 }
 0x3ef   : > { %v3518_v12 = vpop.f32.mrf.mxu0  ;;  %v3520_v13 = vpop.f32.mrf.mxu1  ;;  %v2072_v11 = vmax.f32 %v3497_v49, %v3508_v0 }
 0x3f0   : > { %v2212_v7 = vrot.slane %v2211_v3, 1  ;;  %v2224_v14 = vrot.slane %v2223_v4, 1  ;;  %v2217_v15 = vmax.f32 %v2215_v1, %v2216_v5  ;;  %v2229_v16 = vmax.f32 %v2227_v61, %v2228_v6 }
 0x3f1   : > { %v1870_v20 = vpop.f32.mrf.mxu0  ;;  %v1983_v21 = vpop.f32.mrf.mxu1 }
 0x3f2   : > { %v2213_v22 = vmax.f32 %v2211_v3, %v2212_v7  ;;  %v2225_v34 = vmax.f32 %v2223_v4, %v2224_v14  ;;  %v2218_v23 = vrot.slane %v2217_v15, 1  ;;  %v2230_v24 = vrot.slane %v2229_v16, 1 }
 0x3f3   : > { %v1872_v25 = vpop.f32.mrf.mxu0  ;;  %v1985_v26 = vpop.f32.mrf.mxu1  ;;  %v2074_v7 = vmax.f32 %v3499_v41, %v3510_v2 }
 0x3f4   : > { %v2297_v39 = vadd.f32 %v2260_v8, %v2213_v22  ;;  %v2299_v38 = vadd.f32 %v2268_v9, %v2225_v34  ;;  %v2219_v27 = vmax.f32 %v2217_v15, %v2218_v23  ;;  %v2231_v29 = vmax.f32 %v2229_v16, %v2230_v24 }
 0x3f5   : > { %v1874_v30 = vpop.f32.mrf.mxu0  ;;  %v1987_v33 = vpop.f32.mrf.mxu1  ;;  %v2073_v16 = vmax.f32 %v3501_v55, %v3518_v12  ;;  %v2082_v22 = vmax.f32 %v2074_v7, %v1983_v21 }
 0x3f6   : > { %v2298_v35 = vadd.f32 %v2264_v18, %v2219_v27  ;;  %v2300_v40 = vadd.f32 %v2272_v31, %v2231_v29  ;;  %v2305_v42 = vmax.f32 %v2297_v39, 0.0  ;;  %v2307_v43 = vmax.f32 %v2299_v38, 0.0 }
 0x3f7   : > { %v1876_v36 = vpop.f32.mrf.mxu0  ;;  %v1989_v37 = vpop.f32.mrf.mxu1  ;;  %v2075_v18 = vmax.f32 %v3503_v56, %v3520_v13  ;;  %v2080_v31 = vmax.f32 %v2072_v11, %v1870_v20  ;;  %v2081_v24 = vmax.f32 %v2073_v16, %v1872_v25  ;;  %v2090_v38 = vmax.f32 %v2082_v22, %v1987_v33 }
 0x3f8   : > { %v2306_v44 = vmax.f32 %v2298_v35, 0.0  ;;  %v2308_v45 = vmax.f32 %v2300_v40, 0.0 }
 0x3f9   : > { %v1880_v46 = vpop.f32.mrf.mxu0  ;;  %v1993_v50 = vpop.f32.mrf.mxu1  ;;  %v2083_v19 = vmax.f32 %v2075_v18, %v1985_v26  ;;  %v2088_v39 = vmax.f32 %v2080_v31, %v1874_v30  ;;  %v2089_v27 = vmax.f32 %v2081_v24, %v1876_v36 }
 0x3fa   : > { %v2321_v62 = vcombine.low %v2305_v42, %v2306_v44  ;;  %v2322_v17 = vcombine.low %v2307_v43, %v2308_v45  ;;  %v2098_v29 = vmax.f32 %v2090_v38, %v1993_v50 }
 0x3fb   : > { %v1882_v58 = vpop.f32.mrf.mxu0  ;;  %v1995_v60 = vpop.f32.mrf.mxu1  ;;  %v2091_v41 = vmax.f32 %v2083_v19, %v1989_v37  ;;  %v2096_v2 = vmax.f32 %v2088_v39, %v1880_v46 }
 0x3fc   : > { %v2331_v47 = vrot.slane %v2321_v62, %v3527_v32  ;;  %v2338_v51 = vrot.slane %v2322_v17, %v3527_v32  ;;  %v2097_v55 = vmax.f32 %v2089_v27, %v1882_v58 }
 0x3fd   : > { %v1884_v52 = vpop.f32.mrf.mxu0  ;;  %v1997_v53 = vpop.f32.mrf.mxu1  ;;  %v2099_v12 = vmax.f32 %v2091_v41, %v1995_v60 }
 0x3fe   : > { %v3531_v54 = vcombine.low %v2331_v47, %v2338_v51  ;;  %v2104_v42 = vmax.f32 %v2096_v2, %v1884_v52  ;;  %v2106_v56 = vmax.f32 %v2098_v29, %v1997_v53 }
 0x3ff   : > { %v1886_v48 = vpop.f32.mrf.mxu0  ;;  %v1999_v59 = vpop.f32.mrf.mxu1 }
 0x400   : > { %v2105_v21 = vmax.f32 %v2097_v55, %v1886_v48  ;;  %v2107_v43 = vmax.f32 %v2099_v12, %v1999_v59 }
 0x401   : > { %v1890_v1 = vpop.f32.mrf.mxu0  ;;  %v2003_v61 = vpop.f32.mrf.mxu1 }
 0x402   : > { %v2112_v25 = vmax.f32 %v2104_v42, %v1890_v1  ;;  %v2114_v26 = vmax.f32 %v2106_v56, %v2003_v61 }
 0x403   : > { %v1892_v63 = vpop.f32.mrf.mxu0  ;;  %v2005_v3 = vpop.f32.mrf.mxu1 }
 0x404   : > { %v2113_v44 = vmax.f32 %v2105_v21, %v1892_v63  ;;  %v2115_v45 = vmax.f32 %v2107_v43, %v2005_v3 }
 0x405   : > { %v1894_v4 = vpop.f32.mrf.mxu0  ;;  %v2007_v5 = vpop.f32.mrf.mxu1 }
 0x406   : > { %v2120_v36 = vmax.f32 %v2112_v25, %v1894_v4  ;;  %v2122_v37 = vmax.f32 %v2114_v26, %v2007_v5 }
 0x407   : > { %v1896_v6 = vpop.f32.mrf.mxu0  ;;  %v2009_v8 = vpop.f32.mrf.mxu1 }
 0x408   : > { %v2121_v62 = vmax.f32 %v2113_v44, %v1896_v6  ;;  %v2123_v17 = vmax.f32 %v2115_v45, %v2009_v8 }
 0x409   : > { %v1900_v9 = vpop.f32.mrf.mxu0  ;;  %v2013_v10 = vpop.f32.mrf.mxu1 }
 0x40a   : > { %v2128_v58 = vmax.f32 %v2120_v36, %v1900_v9  ;;  %v2130_v60 = vmax.f32 %v2122_v37, %v2013_v10  ;;  %v2275_v36 = vsub.s32 4, %v3309_v28  ;;  %v2283_v37 = vsub.s32 6, %v3309_v28 }
 0x40b   : > { %v1902_v14 = vpop.f32.mrf.mxu0  ;;  %v2015_v15 = vpop.f32.mrf.mxu1 }
 0x40c   : > { %v2129_v52 = vmax.f32 %v2121_v62, %v1902_v14  ;;  %v2131_v53 = vmax.f32 %v2123_v17, %v2015_v15 }
 0x40d   : > { %v1904_v34 = vpop.f32.mrf.mxu0  ;;  %v2017_v23 = vpop.f32.mrf.mxu1 }
 0x40e   : > { %v2136_v48 = vmax.f32 %v2128_v58, %v1904_v34  ;;  %v2138_v59 = vmax.f32 %v2130_v60, %v2017_v23  ;;  %v2279_v58 = vsub.s32 5, %v3309_v28  ;;  %v2287_v60 = vsub.s32 7, %v3309_v28 }
 0x40f   : > { %v1906_v49 = vpop.f32.mrf.mxu0  ;;  %v2019_v0 = vpop.f32.mrf.mxu1 }
 0x410   : > { %v2137_v11 = vmax.f32 %v2129_v52, %v1906_v49  ;;  %v2139_v7 = vmax.f32 %v2131_v53, %v2019_v0 }
 0x411   : > { %v1910_v35 = vpop.f32.mrf.mxu0  ;;  %v2023_v40 = vpop.f32.mrf.mxu1 }
 0x412   : > { %v2144_v63 = vmax.f32 %v2136_v48, %v1910_v35  ;;  %v2146_v3 = vmax.f32 %v2138_v59, %v2023_v40  ;;  %v2276_v48 = vrot.slane %v3505_v57, %v2275_v36  ;;  %v2284_v59 = vrot.slane %v3505_v57, %v2283_v37 }
 0x413   : > { %v1912_v13 = vpop.f32.mrf.mxu0  ;;  %v2025_v20 = vpop.f32.mrf.mxu1 }
 0x414   : > { %v2145_v16 = vmax.f32 %v2137_v11, %v1912_v13  ;;  %v2147_v18 = vmax.f32 %v2139_v7, %v2025_v20 }
 0x415   : > { %v1914_v30 = vpop.f32.mrf.mxu0  ;;  %v2027_v33 = vpop.f32.mrf.mxu1 }
 0x416   : > { %v2152_v6 = vmax.f32 %v2144_v63, %v1914_v30  ;;  %v2154_v8 = vmax.f32 %v2146_v3, %v2027_v33  ;;  %v2280_v63 = vrot.slane %v3505_v57, %v2279_v58  ;;  %v2288_v3 = vrot.slane %v3505_v57, %v2287_v60 }
 0x417   : > { %v1916_v46 = vpop.f32.mrf.mxu0  ;;  %v2029_v50 = vpop.f32.mrf.mxu1 }
 0x418   : > { %v2153_v31 = vmax.f32 %v2145_v16, %v1916_v46  ;;  %v2155_v22 = vmax.f32 %v2147_v18, %v2029_v50 }
 0x419   : > { %v1920_v47 = vpop.f32.mrf.mxu0  ;;  %v2033_v51 = vpop.f32.mrf.mxu1 }
 0x41a   : > { %v2160_v14 = vmax.f32 %v2152_v6, %v1920_v47  ;;  %v2162_v15 = vmax.f32 %v2154_v8, %v2033_v51 }
 0x41b   : > { %v1922_v1 = vpop.f32.mrf.mxu0  ;;  %v2035_v61 = vpop.f32.mrf.mxu1 }
 0x41c   : > { %v2161_v24 = vmax.f32 %v2153_v31, %v1922_v1  ;;  %v2163_v19 = vmax.f32 %v2155_v22, %v2035_v61 }
 0x41d   : > { %v1924_v4 = vpop.f32.mrf.mxu0  ;;  %v2037_v5 = vpop.f32.mrf.mxu1 }
 0x41e   : > { %v2168_v39 = vmax.f32 %v2160_v14, %v1924_v4  ;;  %v2170_v38 = vmax.f32 %v2162_v15, %v2037_v5 }
 0x41f   : > { %v1926_v9 = vpop.f32.mrf.mxu0  ;;  %v2039_v10 = vpop.f32.mrf.mxu1 }
 0x420   : > { %v2169_v27 = vmax.f32 %v2161_v24, %v1926_v9  ;;  %v2171_v41 = vmax.f32 %v2163_v19, %v2039_v10 }
 0x421   : > { %v1930_v34 = vpop.f32.mrf.mxu0  ;;  %v2043_v23 = vpop.f32.mrf.mxu1 }
 0x422   : > { %v2176_v2 = vmax.f32 %v2168_v39, %v1930_v34  ;;  %v2178_v29 = vmax.f32 %v2170_v38, %v2043_v23  ;;  %v2361_v38 = vrot.slane %v3531_v54, %v3527_v32 }
 0x423   : > { %v1932_v49 = vpop.f32.mrf.mxu0  ;;  %v2045_v0 = vpop.f32.mrf.mxu1 }
 0x424   : > { %v2177_v55 = vmax.f32 %v2169_v27, %v1932_v49  ;;  %v2179_v12 = vmax.f32 %v2171_v41, %v2045_v0 }
 0x425   : > { %v1934_v35 = vpop.f32.mrf.mxu0  ;;  %v2047_v40 = vpop.f32.mrf.mxu1 }
 0x426   : > { %v2184_v42 = vmax.f32 %v2176_v2, %v1934_v35  ;;  %v2186_v56 = vmax.f32 %v2178_v29, %v2047_v40 }
 0x427   : > { %v1936_v13 = vpop.f32.mrf.mxu0  ;;  %v2049_v20 = vpop.f32.mrf.mxu1 }
 0x428   : > { %v2232_v21 = vrot.slane %v2184_v42, 4  ;;  %v2244_v43 = vrot.slane %v2186_v56, 4  ;;  %v2185_v25 = vmax.f32 %v2177_v55, %v1936_v13  ;;  %v2187_v26 = vmax.f32 %v2179_v12, %v2049_v20 }
 0x42a   : > { %v2233_v30 = vmax.f32 %v2184_v42, %v2232_v21  ;;  %v2245_v33 = vmax.f32 %v2186_v56, %v2244_v43  ;;  %v2238_v44 = vrot.slane %v2185_v25, 4  ;;  %v2250_v45 = vrot.slane %v2187_v26, 4 }
 0x42c   : > { %v2234_v46 = vrot.slane %v2233_v30, 2  ;;  %v2246_v50 = vrot.slane %v2245_v33, 2  ;;  %v2239_v62 = vmax.f32 %v2185_v25, %v2238_v44  ;;  %v2251_v17 = vmax.f32 %v2187_v26, %v2250_v45 }
 0x42e   : > { %v2235_v47 = vmax.f32 %v2233_v30, %v2234_v46  ;;  %v2247_v51 = vmax.f32 %v2245_v33, %v2246_v50  ;;  %v2240_v52 = vrot.slane %v2239_v62, 2  ;;  %v2252_v53 = vrot.slane %v2251_v17, 2 }
 0x430   : > { %v2236_v1 = vrot.slane %v2235_v47, 1  ;;  %v2248_v61 = vrot.slane %v2247_v51, 1  ;;  %v2241_v11 = vmax.f32 %v2239_v62, %v2240_v52  ;;  %v2253_v7 = vmax.f32 %v2251_v17, %v2252_v53 }
 0x432   : > { %v2237_v4 = vmax.f32 %v2235_v47, %v2236_v1  ;;  %v2249_v5 = vmax.f32 %v2247_v51, %v2248_v61  ;;  %v2242_v16 = vrot.slane %v2241_v11, 1  ;;  %v2254_v28 = vrot.slane %v2253_v7, 1 }
 0x434   : > { %v2301_v18 = vadd.f32 %v2276_v48, %v2237_v4  ;;  %v2303_v6 = vadd.f32 %v2284_v59, %v2249_v5  ;;  %v2243_v8 = vmax.f32 %v2241_v11, %v2242_v16  ;;  %v2255_v9 = vmax.f32 %v2253_v7, %v2254_v28 }
 0x436   : > { %v2302_v10 = vadd.f32 %v2280_v63, %v2243_v8  ;;  %v2304_v31 = vadd.f32 %v2288_v3, %v2255_v9  ;;  %v2309_v22 = vmax.f32 %v2301_v18, 0.0  ;;  %v2311_v14 = vmax.f32 %v2303_v6, 0.0 }
 0x438   : > { %v2310_v15 = vmax.f32 %v2302_v10, 0.0  ;;  %v2312_v34 = vmax.f32 %v2304_v31, 0.0 }
 0x43a   : > { %v2323_v23 = vcombine.low %v2309_v22, %v2310_v15  ;;  %v2324_v24 = vcombine.low %v2311_v14, %v2312_v34 }
 0x43c   : > { %v2345_v19 = vrot.slane %v2323_v23, %v3527_v32  ;;  %v2352_v57 = vrot.slane %v2324_v24, %v3527_v32 }
 0x43e   : > { %v2354_v39 = vcombine.low %v2345_v19, %v2352_v57 }
 0x440   : > { %v2368_v49 = vrot.slane %v2354_v39, %v3527_v32 }
 0x442   : > { %v2369_v0 = vcombine.low %v2361_v38, %v2368_v49 }
 0x444   : > { %2371 = vst [vmem:[%s469_s21] sm:$0xff] %v2369_v0 }
 0x445 PF: > { %s23_s11 = sadd.s32 1, %s3066_s11   ;;  %s3584_s30 = smov %s3062_s10 }
 0x446   : > { %p20_p5 = scmp.ge.s32.totalorder %s23_s11, 4   ;;  %s3585_s10 = smov %s3587_s23 }
 0x448   :  { %22 = sbr.rel (!%p20_p5) target bundleno = 5 (0x5), region = 126 }
 0x44d   :  { %2391 = vsyncpa [#allocation4], 1 }
 0x44e   :  { %2393 = vsyncpa [#allocation4 + $0x1], 1 }
 0x44f   :  { %2394 = vsyncpa [#allocation6], 1 }
 0x450   :  { %2395 = vsyncpa [#allocation9], 1 }
 0x451   :  { %2396 = vsyncpa [#allocation12], 1 }

// kernel: pointnet_encoder.6
= control target key start
LH: loop header
LB: loop body
LE: loop exit
PB: predicated region body
PF: predicated region fallthrough
CT: control target
= control target key end

     0   :  { %12 = vsyncpa [#allocation3], 0  ;;  %s3881_s0 = inlined_call_operand.vmem [shape: f32[2,1024], index: 0, kind: input, shape index: {}]   ;;  %s3882_s1 = inlined_call_operand.hbm [shape: bf16[1024,512], index: 1, kind: input, shape index: {}]   ;;  %s3883_s2 = inlined_call_operand.hbm [shape: f32[1,512], index: 2, kind: input, shape index: {}]   ;;  %s3884_s3 = inlined_call_operand.hbm [shape: bf16[512,256], index: 3, kind: input, shape index: {}]   ;;  %s3885_s4 = inlined_call_operand.hbm [shape: f32[1,256], index: 4, kind: input, shape index: {}]   ;;  %s3886_s5 = inlined_call_operand.vmem [shape: bf16[256,9], index: 5, kind: input, shape index: {}]   ;;  %s3887_s6 = inlined_call_operand.hbm [shape: f32[1,9], index: 6, kind: input, shape index: {}]   ;;  %s3888_s7 = inlined_call_operand.vmem [shape: f32[2,9], index: 7, kind: output, shape index: {}]  }
   0x1   :  { %13 = vsyncpa [#allocation5], 0 }
   0x2   :  { %14 = vsyncpa [#allocation8], 0  ;;  %s3676_s24 = smov [#allocation4]   ;;  %s3677_s26 = smov [#allocation7]  }
   0x3   :  { %s35_s25 = sshll.u32 %s3676_s24, 4  ;;  %s57_s27 = sshll.u32 %s3677_s26, 4  ;;  %s36_s25 = int_to_ptr.vmem [resolvable:$true] %s35_s25  ;;  %s58_s27 = int_to_ptr.vmem [resolvable:$true] %s57_s27 }
   0x4   :  { %s3578_s28 = scalar_lea.vmem %s36_s25, 64  ;;  %p3583_p1 = scmp.lt.s32.totalorder %s36_s25, %s36_s25 }
   0x5   :  { %p3579_p0 = scmp.ne.s32.totalorder %s36_s25, %s3578_s28  ;;  %p3584_p2 = scmp.lt.s32.totalorder %s3578_s28, %s3578_s28 }
   0x7   :  { %p3585_p3 = por %p3584_p2, %p3583_p1 }
   0x9   :  { %p3586_p4 = pnand %p3585_p3, %p3579_p0 }
   0xb   :  { %3589 = shalt.err (!%p3586_p4)
}
   0xc   :  { %38 = dma.hbm_to_vmem [thread:$0]  %s3883_s2, 64, %s36_s25, [#allocation5]  }
   0xd   :  { %s3598_s8 = scalar_lea.vmem %s58_s27, 32  ;;  %p3603_p6 = scmp.lt.s32.totalorder %s58_s27, %s58_s27 }
   0xe   :  { %p3599_p5 = scmp.ne.s32.totalorder %s58_s27, %s3598_s8  ;;  %p3604_p7 = scmp.lt.s32.totalorder %s3598_s8, %s3598_s8 }
  0x10   :  { %p3605_p8 = por %p3604_p7, %p3603_p6 }
  0x12   :  { %p3606_p9 = pnand %p3605_p8, %p3599_p5 }
  0x14   :  { %3609 = shalt.err (!%p3606_p9)
}
  0x15   :  { %60 = dma.hbm_to_vmem [thread:$0]  %s3885_s4, 32, %s58_s27, [#allocation8]  }
  0x16   :  { %s3678_s11 = smov [#allocation2]  }
  0x17   :  { %s22_s12 = sshll.u32 %s3678_s11, 4  ;;  %s23_s12 = int_to_ptr.vmem [resolvable:$true] %s22_s12 }
  0x18   :  { %s3618_s13 = scalar_lea.vmem %s23_s12, 32768  ;;  %p3623_p11 = scmp.lt.s32.totalorder %s23_s12, %s23_s12 }
  0x19   :  { %p3619_p10 = scmp.ne.s32.totalorder %s23_s12, %s3618_s13  ;;  %p3624_p12 = scmp.lt.s32.totalorder %s3618_s13, %s3618_s13 }
  0x1b   :  { %p3625_p13 = por %p3624_p12, %p3623_p11 }
  0x1d   :  { %p3626_p0 = pnand %p3625_p13, %p3619_p10 }
  0x1f   :  { %3629 = shalt.err (!%p3626_p0)
}
  0x20   :  { %s3679_s2 = smov 256   ;;  %s3680_s14 = smov 16  }
  0x21   :  { %28 = dma.hbm_to_vmem [thread:$0]  %s3882_s1, 32768, %s23_s12, [#allocation3], %s3679_s2, %s3679_s2, %s3680_s14  }
  0x22   :  { %s3681_s17 = smov [#allocation6]  }
  0x23   :  { %s44_s18 = sshll.u32 %s3681_s17, 4  ;;  %s45_s18 = int_to_ptr.vmem [resolvable:$true] %s44_s18 }
  0x24   :  { %s3638_s4 = scalar_lea.vmem %s45_s18, 8192  ;;  %p3643_p2 = scmp.lt.s32.totalorder %s45_s18, %s45_s18 }
  0x25   :  { %p3639_p1 = scmp.ne.s32.totalorder %s45_s18, %s3638_s4  ;;  %p3644_p3 = scmp.lt.s32.totalorder %s3638_s4, %s3638_s4 }
  0x27   :  { %p3645_p4 = por %p3644_p3, %p3643_p2 }
  0x29   :  { %p3646_p5 = pnand %p3645_p4, %p3639_p1 }
  0x2b   :  { %3649 = shalt.err (!%p3646_p5)
}
  0x2c   :  { %s3682_s19 = smov 128   ;;  %s3683_s20 = smov 8  }
  0x2d   :  { %50 = dma.hbm_to_vmem [thread:$0]  %s3884_s3, 8192, %s45_s18, [#allocation5], %s3682_s19, %s3682_s19, %s3683_s20  }
  0x2e   :  { %s3684_s23 = smov [#allocation9]  }
  0x2f   :  { %s69_s24 = sshll.u32 %s3684_s23, 4  ;;  %s70_s24 = int_to_ptr.vmem [resolvable:$true] %s69_s24 }
  0x30   :  { %s3658_s1 = scalar_lea.vmem %s70_s24, 16  ;;  %s3662_s25 = scalar_lea.vmem %s70_s24, 32 }
  0x31   :  { %p3659_p6 = scmp.ne.s32.totalorder %s70_s24, %s3658_s1  ;;  %p3663_p7 = scmp.lt.s32.totalorder %s70_s24, %s70_s24 }
  0x32   :  { %p3664_p8 = scmp.lt.s32.totalorder %s3662_s25, %s3658_s1 }
  0x34   :  { %p3665_p9 = por %p3664_p8, %p3663_p7 }
  0x36   :  { %p3666_p10 = pnand %p3665_p9, %p3659_p6 }
  0x38   :  { %3669 = shalt.err (!%p3666_p10)
}
  0x39   :  { %72 = dma.hbm_to_vmem [thread:$0]  %s3887_s6, 16, %s70_s24, [#allocation8]  }
  0x3a   :  { %3670 = dma.done.wait [#allocation3], 32768  }
  0x3b   :  { %3671 = vsyncadd [#allocation3], 4294934528 }
  0x3c   :  { %3672 = dma.done.wait [#allocation5], 8256  }
  0x3d   :  { %3673 = vsyncadd [#allocation5], 4294959040 }
  0x3e   :  { %3674 = dma.done.wait [#allocation8], 48  }
  0x3f   :  { %3675 = vsyncadd [#allocation8], 4294967248  ;;  %v3072_v0 = vld [vmem:[#allocation2 + $0xe4] ss:$16 sps:$4 sm:$0xff]   ;;  %v3076_v2 = vld [vmem:[#allocation2 + $0xe0] ss:$16 sps:$4 sm:$0xff]   ;;  %v97_v38 = vlaneseq }
  0x40   :  { %v3074_v1 = vld [vmem:[#allocation2 + $0x2e4] ss:$16 sps:$4 sm:$0xff]   ;;  %1701 = vmatprep.subr.bf16.mxu0 %v3072_v0  ;;  %v3077_v3 = vld [vmem:[#allocation2 + $0x2e0] ss:$16 sps:$4 sm:$0xff]   ;;  %v3685_v36 = vmov 1983009808  }
  0x41   :  { %1742 = vmatprep.subr.bf16.mxu1 %v3074_v1  ;;  %v3078_v4 = vld [vmem:[#allocation2 + $0xc4] ss:$16 sps:$4 sm:$0xff]   ;;  %1702 = vmatpush1.bf16.msra.mxu0 %v3076_v2  ;;  %v3082_v6 = vld [vmem:[#allocation2 + $0xc0] ss:$16 sps:$4 sm:$0xff]   ;;  %v95_v37 = vunpack.c.l.s4 %v3685_v36  ;;  %v3741_v43 = vshrl.u32 %v97_v38, 7  ;;  %vm2694_vm0 = vcmask 66560  }
  0x42   :  { %1743 = vmatpush1.bf16.msra.mxu1 %v3077_v3  ;;  %v3080_v5 = vld [vmem:[#allocation2 + $0x2c4] ss:$16 sps:$4 sm:$0xff]   ;;  %1703 = vmatprep.subr.bf16.mxu0 %v3078_v4  ;;  %v3083_v7 = vld [vmem:[#allocation2 + $0x2c0] ss:$16 sps:$4 sm:$0xff]  }
  0x43   :  { %1744 = vmatprep.subr.bf16.mxu1 %v3080_v5  ;;  %v3084_v8 = vld [vmem:[#allocation2 + $0xa4] ss:$16 sps:$4 sm:$0xff]   ;;  %v3088_v10 = vld [vmem:[#allocation2 + $0xa0] ss:$16 sps:$4 sm:$0xff]   ;;  %v96_v42 = vunpack.c.0.s8 %v95_v37 }
  0x44   :  { %v3086_v9 = vld [vmem:[#allocation2 + $0x2a4] ss:$16 sps:$4 sm:$0xff]   ;;  %v3089_v11 = vld [vmem:[#allocation2 + $0x2a0] ss:$16 sps:$4 sm:$0xff]  }
  0x45   :  { %1704 = vmatpush1.bf16.msra.mxu0 %v3082_v6  ;;  %v3090_v12 = vld [vmem:[#allocation2 + $0x84] ss:$16 sps:$4 sm:$0xff]   ;;  %v3094_v14 = vld [vmem:[#allocation2 + $0x80] ss:$16 sps:$4 sm:$0xff]   ;;  %v3744_v49 = vsub.s32 %v96_v42, %v3741_v43  ;;  %v90_v42 = vld [vmem:[%s3881_s0 + $0x8] sm:$0xff] }
  0x46   :  { %1745 = vmatpush1.bf16.msra.mxu1 %v3083_v7  ;;  %1705 = vmatprep.subr.bf16.mxu0 %v3084_v8  ;;  %v3092_v13 = vld [vmem:[#allocation2 + $0x284] ss:$16 sps:$4 sm:$0xff]   ;;  %v3095_v15 = vld [vmem:[#allocation2 + $0x280] ss:$16 sps:$4 sm:$0xff]  }
  0x47   :  { %1746 = vmatprep.subr.bf16.mxu1 %v3086_v9  ;;  %v3096_v16 = vld [vmem:[#allocation2 + $0x64] ss:$16 sps:$4 sm:$0xff]   ;;  %v3100_v18 = vld [vmem:[#allocation2 + $0x60] ss:$16 sps:$4 sm:$0xff]  }
  0x48   :  { %v3098_v17 = vld [vmem:[#allocation2 + $0x264] ss:$16 sps:$4 sm:$0xff]   ;;  %v3101_v19 = vld [vmem:[#allocation2 + $0x260] ss:$16 sps:$4 sm:$0xff]  }
  0x49   :  { %1706 = vmatpush1.bf16.msra.mxu0 %v3088_v10  ;;  %v3102_v20 = vld [vmem:[#allocation2 + $0x44] ss:$16 sps:$4 sm:$0xff]   ;;  %v3106_v22 = vld [vmem:[#allocation2 + $0x40] ss:$16 sps:$4 sm:$0xff]  }
  0x4a   :  { %1747 = vmatpush1.bf16.msra.mxu1 %v3089_v11  ;;  %1707 = vmatprep.subr.bf16.mxu0 %v3090_v12  ;;  %v3104_v21 = vld [vmem:[#allocation2 + $0x244] ss:$16 sps:$4 sm:$0xff]   ;;  %v3107_v23 = vld [vmem:[#allocation2 + $0x240] ss:$16 sps:$4 sm:$0xff]  }
  0x4b   :  { %1748 = vmatprep.subr.bf16.mxu1 %v3092_v13  ;;  %v3108_v24 = vld [vmem:[#allocation2 + $0x24] ss:$16 sps:$4 sm:$0xff]   ;;  %v3112_v26 = vld [vmem:[#allocation2 + $0x20] ss:$16 sps:$4 sm:$0xff]  }
  0x4c   :  { %v3110_v25 = vld [vmem:[#allocation2 + $0x224] ss:$16 sps:$4 sm:$0xff]   ;;  %v3113_v27 = vld [vmem:[#allocation2 + $0x220] ss:$16 sps:$4 sm:$0xff]  }
  0x4d   :  { %1708 = vmatpush1.bf16.msra.mxu0 %v3094_v14  ;;  %v3114_v28 = vld [vmem:[#allocation2 + $0x4] ss:$16 sps:$4 sm:$0xff]   ;;  %v3118_v30 = vld [vmem:[#allocation2] ss:$16 sps:$4 sm:$0xff]  }
  0x4e   :  { %1749 = vmatpush1.bf16.msra.mxu1 %v3095_v15  ;;  %1709 = vmatprep.subr.bf16.mxu0 %v3096_v16  ;;  %v3116_v29 = vld [vmem:[#allocation2 + $0x204] ss:$16 sps:$4 sm:$0xff]   ;;  %v3119_v31 = vld [vmem:[#allocation2 + $0x200] ss:$16 sps:$4 sm:$0xff]  }
  0x4f   :  { %1750 = vmatprep.subr.bf16.mxu1 %v3098_v17  ;;  %v3120_v32 = vld [vmem:[#allocation2 + $0x1e4] ss:$16 sps:$4 sm:$0xff]   ;;  %v3124_v34 = vld [vmem:[#allocation2 + $0x1e0] ss:$16 sps:$4 sm:$0xff]  }
  0x50   :  { %v3122_v33 = vld [vmem:[#allocation2 + $0x3e4] ss:$16 sps:$4 sm:$0xff]   ;;  %v3125_v35 = vld [vmem:[#allocation2 + $0x3e0] ss:$16 sps:$4 sm:$0xff]  }
  0x51   :  { %1710 = vmatpush1.bf16.msra.mxu0 %v3100_v18  ;;  %v3126_v39 = vld [vmem:[#allocation2 + $0x1c4] ss:$16 sps:$4 sm:$0xff]   ;;  %v3130_v41 = vld [vmem:[#allocation2 + $0x1c0] ss:$16 sps:$4 sm:$0xff]  }
  0x52   :  { %1751 = vmatpush1.bf16.msra.mxu1 %v3101_v19  ;;  %1711 = vmatprep.subr.bf16.mxu0 %v3102_v20  ;;  %v3128_v40 = vld [vmem:[#allocation2 + $0x3c4] ss:$16 sps:$4 sm:$0xff]   ;;  %v3131_v44 = vld [vmem:[#allocation2 + $0x3c0] ss:$16 sps:$4 sm:$0xff]  }
  0x53   :  { %1752 = vmatprep.subr.bf16.mxu1 %v3104_v21  ;;  %v3132_v45 = vld [vmem:[#allocation2 + $0x1a4] ss:$16 sps:$4 sm:$0xff]   ;;  %v3136_v47 = vld [vmem:[#allocation2 + $0x1a0] ss:$16 sps:$4 sm:$0xff]  }
  0x54   :  { %v3134_v46 = vld [vmem:[#allocation2 + $0x3a4] ss:$16 sps:$4 sm:$0xff]   ;;  %v3137_v48 = vld [vmem:[#allocation2 + $0x3a0] ss:$16 sps:$4 sm:$0xff]  }
  0x55   :  { %1712 = vmatpush1.bf16.msra.mxu0 %v3106_v22  ;;  %v3138_v50 = vld [vmem:[#allocation2 + $0x184] ss:$16 sps:$4 sm:$0xff]   ;;  %v3142_v53 = vld [vmem:[#allocation2 + $0x180] ss:$16 sps:$4 sm:$0xff]  }
  0x56   :  { %1753 = vmatpush1.bf16.msra.mxu1 %v3107_v23  ;;  %1713 = vmatprep.subr.bf16.mxu0 %v3108_v24  ;;  %v3140_v51 = vld [vmem:[#allocation2 + $0x384] ss:$16 sps:$4 sm:$0xff]   ;;  %v3143_v56 = vld [vmem:[#allocation2 + $0x380] ss:$16 sps:$4 sm:$0xff]  }
  0x57   :  { %1754 = vmatprep.subr.bf16.mxu1 %v3110_v25  ;;  %v89_v52 = vld [vmem:[%s3881_s0] sm:$0xff] }
  0x58   :  { %v100_v54 = vrot.slane %v89_v52, %v3744_v49  ;;  %v93_v55 = vcombine.high %v89_v52, %v89_v52  ;;  %v3144_v57 = vld [vmem:[#allocation2 + $0x164] ss:$16 sps:$4 sm:$0xff]   ;;  %v3148_v61 = vld [vmem:[#allocation2 + $0x160] ss:$16 sps:$4 sm:$0xff]  }
  0x59   :  { %1714 = vmatpush1.bf16.msra.mxu0 %v3112_v26  ;;  %v3146_v58 = vld [vmem:[#allocation2 + $0x364] ss:$16 sps:$4 sm:$0xff]   ;;  %v3149_v0 = vld [vmem:[#allocation2 + $0x360] ss:$16 sps:$4 sm:$0xff]  }
  0x5a   :  { %1755 = vmatpush1.bf16.msra.mxu1 %v3113_v27  ;;  %1715 = vmatprep.subr.bf16.mxu0 %v3114_v28  ;;  %v108_v59 = vcombine.high %v100_v54, %v100_v54  ;;  %v107_v60 = vrot.slane %v93_v55, %v3744_v49  ;;  %v3150_v1 = vld [vmem:[#allocation2 + $0x144] ss:$16 sps:$4 sm:$0xff]   ;;  %v3154_v4 = vld [vmem:[#allocation2 + $0x140] ss:$16 sps:$4 sm:$0xff]   ;;  %v3757_v16 = vpack.c.bf16 %v100_v54, %v100_v54 }
  0x5b   :  { %1756 = vmatprep.subr.bf16.mxu1 %v3116_v29  ;;  %v3152_v2 = vld [vmem:[#allocation2 + $0x344] ss:$16 sps:$4 sm:$0xff]   ;;  %v3155_v5 = vld [vmem:[#allocation2 + $0x340] ss:$16 sps:$4 sm:$0xff]  }
  0x5c   :  { %v3751_v62 = vpack.c.bf16 %v108_v59, %v108_v59  ;;  %v109_v63 = vcombine.high %v107_v60, %v107_v60  ;;  %v3156_v6 = vld [vmem:[#allocation2 + $0x124] ss:$16 sps:$4 sm:$0xff]   ;;  %v3160_v8 = vld [vmem:[#allocation2 + $0x120] ss:$16 sps:$4 sm:$0xff]   ;;  %v3759_v17 = vpack.c.bf16 %v107_v60, %v107_v60 }
  0x5d   :  { %1716 = vmatpush1.bf16.msra.mxu0 %v3118_v30  ;;  %v3158_v7 = vld [vmem:[#allocation2 + $0x324] ss:$16 sps:$4 sm:$0xff]   ;;  %v3161_v9 = vld [vmem:[#allocation2 + $0x320] ss:$16 sps:$4 sm:$0xff]  }
  0x5e   :  { %1757 = vmatpush1.bf16.msra.mxu1 %v3119_v31  ;;  %1717 = vmatprep.subr.bf16.mxu0 %v3120_v32  ;;  %v3753_v3 = vpack.c.bf16 %v109_v63, %v109_v63  ;;  %v3162_v10 = vld [vmem:[#allocation2 + $0x104] ss:$16 sps:$4 sm:$0xff]   ;;  %v3166_v12 = vld [vmem:[#allocation2 + $0x100] ss:$16 sps:$4 sm:$0xff]  }
  0x5f   :  { %1758 = vmatprep.subr.bf16.mxu1 %v3122_v33  ;;  %1733 = vmatprep.mubr.bf16.mxu0 %v3751_v62  ;;  %v3164_v11 = vld [vmem:[#allocation2 + $0x304] ss:$16 sps:$4 sm:$0xff]   ;;  %v3167_v13 = vld [vmem:[#allocation2 + $0x300] ss:$16 sps:$4 sm:$0xff]  }
  0x60   :  { %1774 = vmatprep.mubr.bf16.mxu1 %v3753_v3  ;;  %v3171_v14 = vld [vmem:[#allocation2 + $0x4e4] ss:$16 sps:$4 sm:$0xff]   ;;  %v3169_v18 = vld [vmem:[#allocation2 + $0x4e0] ss:$16 sps:$4 sm:$0xff]  }
  0x61   :  { %1718 = vmatpush2.bf16.msra.mxu0 %v3124_v34  ;;  %v3174_v15 = vld [vmem:[#allocation2 + $0x6e4] ss:$16 sps:$4 sm:$0xff]   ;;  %v3172_v19 = vld [vmem:[#allocation2 + $0x6e0] ss:$16 sps:$4 sm:$0xff]  }
  0x62   :  { %1759 = vmatpush2.bf16.msra.mxu1 %v3125_v35  ;;  %1719 = vmatprep.subr.bf16.mxu0 %v3126_v39  ;;  %v3177_v20 = vld [vmem:[#allocation2 + $0x4c4] ss:$16 sps:$4 sm:$0xff]   ;;  %v3175_v22 = vld [vmem:[#allocation2 + $0x4c0] ss:$16 sps:$4 sm:$0xff]  }
  0x63   :  { %1760 = vmatprep.subr.bf16.mxu1 %v3128_v40  ;;  %v3180_v21 = vld [vmem:[#allocation2 + $0x6c4] ss:$16 sps:$4 sm:$0xff]   ;;  %v3178_v23 = vld [vmem:[#allocation2 + $0x6c0] ss:$16 sps:$4 sm:$0xff]  }
  0x64   :  { %v3183_v24 = vld [vmem:[#allocation2 + $0x4a4] ss:$16 sps:$4 sm:$0xff]   ;;  %v3181_v26 = vld [vmem:[#allocation2 + $0x4a0] ss:$16 sps:$4 sm:$0xff]  }
  0x65   :  { %1720 = vmatpush2.bf16.msra.mxu0 %v3130_v41  ;;  %v3186_v25 = vld [vmem:[#allocation2 + $0x6a4] ss:$16 sps:$4 sm:$0xff]   ;;  %v3184_v27 = vld [vmem:[#allocation2 + $0x6a0] ss:$16 sps:$4 sm:$0xff]  }
  0x66   :  { %1761 = vmatpush2.bf16.msra.mxu1 %v3131_v44  ;;  %1721 = vmatprep.subr.bf16.mxu0 %v3132_v45  ;;  %v3189_v28 = vld [vmem:[#allocation2 + $0x484] ss:$16 sps:$4 sm:$0xff]   ;;  %v3187_v30 = vld [vmem:[#allocation2 + $0x480] ss:$16 sps:$4 sm:$0xff]   ;;  %v3767_v44 = vrot.slane %v90_v42, %v3744_v49  ;;  %v110_v45 = vcombine.high %v90_v42, %v90_v42  ;;  %v3281_v42 = vld [vmem:[#allocation2 + $0x2a8] ss:$16 sps:$4 sm:$0xff]  }
  0x67   :  { %1762 = vmatprep.subr.bf16.mxu1 %v3134_v46  ;;  %v3192_v29 = vld [vmem:[#allocation2 + $0x684] ss:$16 sps:$4 sm:$0xff]   ;;  %v3190_v31 = vld [vmem:[#allocation2 + $0x680] ss:$16 sps:$4 sm:$0xff]  }
  0x68   :  { %v3195_v32 = vld [vmem:[#allocation2 + $0x464] ss:$16 sps:$4 sm:$0xff]   ;;  %v3193_v34 = vld [vmem:[#allocation2 + $0x460] ss:$16 sps:$4 sm:$0xff]  }
  0x69   :  { %1722 = vmatpush2.bf16.msra.mxu0 %v3136_v47  ;;  %v3198_v33 = vld [vmem:[#allocation2 + $0x664] ss:$16 sps:$4 sm:$0xff]   ;;  %v3196_v35 = vld [vmem:[#allocation2 + $0x660] ss:$16 sps:$4 sm:$0xff]  }
  0x6a   :  { %1763 = vmatpush2.bf16.msra.mxu1 %v3137_v48  ;;  %1723 = vmatprep.subr.bf16.mxu0 %v3138_v50  ;;  %v3201_v36 = vld [vmem:[#allocation2 + $0x444] ss:$16 sps:$4 sm:$0xff]   ;;  %v3199_v38 = vld [vmem:[#allocation2 + $0x440] ss:$16 sps:$4 sm:$0xff]   ;;  %v125_v48 = vcombine.high %v3767_v44, %v3767_v44  ;;  %v3772_v50 = vrot.slane %v110_v45, %v3744_v49  ;;  %v3289_v45 = vld [vmem:[#allocation2 + $0x28c] ss:$16 sps:$4 sm:$0xff]  }
  0x6b   :  { %1764 = vmatprep.subr.bf16.mxu1 %v3140_v51  ;;  %v3204_v37 = vld [vmem:[#allocation2 + $0x644] ss:$16 sps:$4 sm:$0xff]   ;;  %v3202_v39 = vld [vmem:[#allocation2 + $0x640] ss:$16 sps:$4 sm:$0xff]  }
  0x6c   :  { %v3207_v40 = vld [vmem:[#allocation2 + $0x424] ss:$16 sps:$4 sm:$0xff]   ;;  %v3205_v46 = vld [vmem:[#allocation2 + $0x420] ss:$16 sps:$4 sm:$0xff]   ;;  %v126_v54 = vcombine.high %v3772_v50, %v3772_v50 }
  0x6d   :  { %1724 = vmatpush2.bf16.msra.mxu0 %v3142_v53  ;;  %v3210_v41 = vld [vmem:[#allocation2 + $0x624] ss:$16 sps:$4 sm:$0xff]   ;;  %v3208_v47 = vld [vmem:[#allocation2 + $0x620] ss:$16 sps:$4 sm:$0xff]   ;;  %v3774_v53 = vpack.c.bf16 %v125_v48, %v125_v48  ;;  %v3292_v48 = vld [vmem:[#allocation2 + $0x6c] ss:$16 sps:$4 sm:$0xff]  }
  0x6e   :  { %1765 = vmatpush2.bf16.msra.mxu1 %v3143_v56  ;;  %1725 = vmatprep.subr.bf16.mxu0 %v3144_v57  ;;  %v3213_v51 = vld [vmem:[#allocation2 + $0x404] ss:$16 sps:$4 sm:$0xff]   ;;  %v3211_v55 = vld [vmem:[#allocation2 + $0x400] ss:$16 sps:$4 sm:$0xff]   ;;  %v3778_v57 = vpack.c.bf16 %v126_v54, %v126_v54  ;;  %v3296_v54 = vld [vmem:[#allocation2 + $0x48] ss:$16 sps:$4 sm:$0xff]  }
  0x6f   :  { %1766 = vmatprep.subr.bf16.mxu1 %v3146_v58  ;;  %v3216_v52 = vld [vmem:[#allocation2 + $0x604] ss:$16 sps:$4 sm:$0xff]   ;;  %v3214_v56 = vld [vmem:[#allocation2 + $0x600] ss:$16 sps:$4 sm:$0xff]  }
  0x70   :  { %v3219_v58 = vld [vmem:[#allocation2 + $0x5e4] ss:$16 sps:$4 sm:$0xff]   ;;  %v3217_v59 = vld [vmem:[#allocation2 + $0x5e0] ss:$16 sps:$4 sm:$0xff]  }
  0x71   :  { %1726 = vmatpush2.bf16.msra.mxu0 %v3148_v61  ;;  %v3222_v49 = vld [vmem:[#allocation2 + $0x7e4] ss:$16 sps:$4 sm:$0xff]   ;;  %v3220_v60 = vld [vmem:[#allocation2 + $0x7e0] ss:$16 sps:$4 sm:$0xff]  }
  0x72   :  { %1767 = vmatpush2.bf16.msra.mxu1 %v3149_v0  ;;  %1727 = vmatprep.subr.bf16.mxu0 %v3150_v1  ;;  %v3225_v61 = vld [vmem:[#allocation2 + $0x5c4] ss:$16 sps:$4 sm:$0xff]   ;;  %v3223_v0 = vld [vmem:[#allocation2 + $0x5c0] ss:$16 sps:$4 sm:$0xff]  }
  0x73   :  { %1768 = vmatprep.subr.bf16.mxu1 %v3152_v2  ;;  %v3228_v63 = vld [vmem:[#allocation2 + $0x7c4] ss:$16 sps:$4 sm:$0xff]   ;;  %v3226_v1 = vld [vmem:[#allocation2 + $0x7c0] ss:$16 sps:$4 sm:$0xff]  }
  0x74   :  { %v3231_v2 = vld [vmem:[#allocation2 + $0x5a4] ss:$16 sps:$4 sm:$0xff]  }
  0x75   :  { %1728 = vmatpush2.bf16.msra.mxu0 %v3154_v4  ;;  %v3234_v4 = vld [vmem:[#allocation2 + $0x7a4] ss:$16 sps:$4 sm:$0xff]  }
  0x76   :  { %1769 = vmatpush2.bf16.msra.mxu1 %v3155_v5  ;;  %1729 = vmatprep.subr.bf16.mxu0 %v3156_v6  ;;  %v3229_v5 = vld [vmem:[#allocation2 + $0x5a0] ss:$16 sps:$4 sm:$0xff]  }
  0x77   :  { %1770 = vmatprep.subr.bf16.mxu1 %v3158_v7  ;;  %v3232_v6 = vld [vmem:[#allocation2 + $0x7a0] ss:$16 sps:$4 sm:$0xff]   ;;  %v3237_v7 = vld [vmem:[#allocation2 + $0x584] ss:$16 sps:$4 sm:$0xff]  }
  0x79   :  { %1730 = vmatpush2.bf16.msra.mxu0 %v3160_v8  ;;  %v3240_v8 = vld [vmem:[#allocation2 + $0x784] ss:$16 sps:$4 sm:$0xff]  }
  0x7a   :  { %1771 = vmatpush2.bf16.msra.mxu1 %v3161_v9  ;;  %1731 = vmatprep.subr.bf16.mxu0 %v3162_v10  ;;  %v3235_v9 = vld [vmem:[#allocation2 + $0x580] ss:$16 sps:$4 sm:$0xff]  }
  0x7b   :  { %1772 = vmatprep.subr.bf16.mxu1 %v3164_v11  ;;  %v3238_v10 = vld [vmem:[#allocation2 + $0x780] ss:$16 sps:$4 sm:$0xff]   ;;  %v3243_v11 = vld [vmem:[#allocation2 + $0x564] ss:$16 sps:$4 sm:$0xff]  }
  0x7d   :  { %1732 = vmatpush2.bf16.msra.mxu0 %v3166_v12  ;;  %v3246_v12 = vld [vmem:[#allocation2 + $0x764] ss:$16 sps:$4 sm:$0xff]  }
  0x7e   :  { %1773 = vmatpush2.bf16.msra.mxu1 %v3167_v13  ;;  %1783 = vmatprep.subr.bf16.mxu0 %v3171_v14  ;;  %v3241_v13 = vld [vmem:[#allocation2 + $0x560] ss:$16 sps:$4 sm:$0xff]  }
  0x7f   :  { %1824 = vmatprep.subr.bf16.mxu1 %v3174_v15  ;;  %v3244_v14 = vld [vmem:[#allocation2 + $0x760] ss:$16 sps:$4 sm:$0xff]   ;;  %v3249_v15 = vld [vmem:[#allocation2 + $0x544] ss:$16 sps:$4 sm:$0xff]  }
  0x80   :  { %1734 = vmatmul.mubr.bf16.vlgmr.msra.gmra.mxu0 %v3757_v16 }
  0x81   :  { %1775 = vmatmul.mubr.bf16.vlgmr.msra.gmra.mxu1 %v3759_v17  ;;  %1784 = vmatpush1.bf16.msra.mxu0 %v3169_v18  ;;  %v3252_v18 = vld [vmem:[#allocation2 + $0x744] ss:$16 sps:$4 sm:$0xff]  }
  0x82   :  { %1825 = vmatpush1.bf16.msra.mxu1 %v3172_v19  ;;  %1785 = vmatprep.subr.bf16.mxu0 %v3177_v20  ;;  %v3247_v19 = vld [vmem:[#allocation2 + $0x540] ss:$16 sps:$4 sm:$0xff]  }
  0x83   :  { %1826 = vmatprep.subr.bf16.mxu1 %v3180_v21  ;;  %1815 = vmatprep.mubr.bf16.mxu0 %v3774_v53  ;;  %v3250_v20 = vld [vmem:[#allocation2 + $0x740] ss:$16 sps:$4 sm:$0xff]   ;;  %v3255_v21 = vld [vmem:[#allocation2 + $0x524] ss:$16 sps:$4 sm:$0xff]  }
  0x84   :  { %1856 = vmatprep.mubr.bf16.mxu1 %v3778_v57 }
  0x85   :  { %1786 = vmatpush1.bf16.msra.mxu0 %v3175_v22  ;;  %v3258_v22 = vld [vmem:[#allocation2 + $0x724] ss:$16 sps:$4 sm:$0xff]  }
  0x86   :  { %1827 = vmatpush1.bf16.msra.mxu1 %v3178_v23  ;;  %1787 = vmatprep.subr.bf16.mxu0 %v3183_v24  ;;  %v3253_v23 = vld [vmem:[#allocation2 + $0x520] ss:$16 sps:$4 sm:$0xff]  }
  0x87   :  { %1828 = vmatprep.subr.bf16.mxu1 %v3186_v25  ;;  %v3256_v24 = vld [vmem:[#allocation2 + $0x720] ss:$16 sps:$4 sm:$0xff]   ;;  %v3261_v25 = vld [vmem:[#allocation2 + $0x504] ss:$16 sps:$4 sm:$0xff]  }
  0x89   :  { %1788 = vmatpush1.bf16.msra.mxu0 %v3181_v26  ;;  %v3264_v26 = vld [vmem:[#allocation2 + $0x704] ss:$16 sps:$4 sm:$0xff]  }
  0x8a   :  { %1829 = vmatpush1.bf16.msra.mxu1 %v3184_v27  ;;  %1789 = vmatprep.subr.bf16.mxu0 %v3189_v28  ;;  %v3259_v27 = vld [vmem:[#allocation2 + $0x500] ss:$16 sps:$4 sm:$0xff]  }
  0x8b   :  { %1830 = vmatprep.subr.bf16.mxu1 %v3192_v29  ;;  %v3262_v28 = vld [vmem:[#allocation2 + $0x700] ss:$16 sps:$4 sm:$0xff]   ;;  %v3268_v29 = vld [vmem:[#allocation2 + $0xec] ss:$16 sps:$4 sm:$0xff]  }
  0x8d   :  { %1790 = vmatpush1.bf16.msra.mxu0 %v3187_v30  ;;  %v3271_v30 = vld [vmem:[#allocation2 + $0x2ec] ss:$16 sps:$4 sm:$0xff]  }
  0x8e   :  { %1831 = vmatpush1.bf16.msra.mxu1 %v3190_v31  ;;  %1791 = vmatprep.subr.bf16.mxu0 %v3195_v32  ;;  %v3784_v31 = vpack.c.bf16 %v3767_v44, %v3767_v44  ;;  %v3788_v32 = vpack.c.bf16 %v3772_v50, %v3772_v50  ;;  %v3286_v44 = vld [vmem:[#allocation2 + $0x8c] ss:$16 sps:$4 sm:$0xff]  }
  0x8f   :  { %1832 = vmatprep.subr.bf16.mxu1 %v3198_v33  ;;  %v3266_v33 = vld [vmem:[#allocation2 + $0xe8] ss:$16 sps:$4 sm:$0xff]   ;;  %v3295_v50 = vld [vmem:[#allocation2 + $0x26c] ss:$16 sps:$4 sm:$0xff]  }
  0x91   :  { %1792 = vmatpush1.bf16.msra.mxu0 %v3193_v34  ;;  %v3269_v34 = vld [vmem:[#allocation2 + $0x2e8] ss:$16 sps:$4 sm:$0xff]  }
  0x92   :  { %1833 = vmatpush1.bf16.msra.mxu1 %v3196_v35  ;;  %1793 = vmatprep.subr.bf16.mxu0 %v3201_v36  ;;  %v3274_v35 = vld [vmem:[#allocation2 + $0xcc] ss:$16 sps:$4 sm:$0xff]  }
  0x93   :  { %1834 = vmatprep.subr.bf16.mxu1 %v3204_v37  ;;  %v3277_v36 = vld [vmem:[#allocation2 + $0x2cc] ss:$16 sps:$4 sm:$0xff]   ;;  %v3272_v37 = vld [vmem:[#allocation2 + $0xc8] ss:$16 sps:$4 sm:$0xff]  }
  0x95   :  { %1794 = vmatpush1.bf16.msra.mxu0 %v3199_v38  ;;  %v3275_v38 = vld [vmem:[#allocation2 + $0x2c8] ss:$16 sps:$4 sm:$0xff]  }
  0x96   :  { %1835 = vmatpush1.bf16.msra.mxu1 %v3202_v39  ;;  %1795 = vmatprep.subr.bf16.mxu0 %v3207_v40  ;;  %v3280_v39 = vld [vmem:[#allocation2 + $0xac] ss:$16 sps:$4 sm:$0xff]  }
  0x97   :  { %1836 = vmatprep.subr.bf16.mxu1 %v3210_v41  ;;  %v3283_v40 = vld [vmem:[#allocation2 + $0x2ac] ss:$16 sps:$4 sm:$0xff]   ;;  %v3278_v41 = vld [vmem:[#allocation2 + $0xa8] ss:$16 sps:$4 sm:$0xff]  }
  0x99   :  { %1796 = vmatpush1.bf16.msra.mxu0 %v3205_v46  ;;  %v3284_v46 = vld [vmem:[#allocation2 + $0x88] ss:$16 sps:$4 sm:$0xff]  }
  0x9a   :  { %1837 = vmatpush1.bf16.msra.mxu1 %v3208_v47  ;;  %1797 = vmatprep.subr.bf16.mxu0 %v3213_v51  ;;  %v3287_v47 = vld [vmem:[#allocation2 + $0x288] ss:$16 sps:$4 sm:$0xff]   ;;  %v3298_v51 = vld [vmem:[#allocation2 + $0x4c] ss:$16 sps:$4 sm:$0xff]  }
  0x9b   :  { %1838 = vmatprep.subr.bf16.mxu1 %v3216_v52  ;;  %v3301_v52 = vld [vmem:[#allocation2 + $0x24c] ss:$16 sps:$4 sm:$0xff]  }
  0x9d   :  { %1798 = vmatpush1.bf16.msra.mxu0 %v3211_v55  ;;  %v3299_v55 = vld [vmem:[#allocation2 + $0x248] ss:$16 sps:$4 sm:$0xff]  }
  0x9e   :  { %1839 = vmatpush1.bf16.msra.mxu1 %v3214_v56  ;;  %1799 = vmatprep.subr.bf16.mxu0 %v3219_v58  ;;  %v3304_v56 = vld [vmem:[#allocation2 + $0x2c] ss:$16 sps:$4 sm:$0xff]  }
  0x9f   :  { %1840 = vmatprep.subr.bf16.mxu1 %v3222_v49  ;;  %v3307_v58 = vld [vmem:[#allocation2 + $0x22c] ss:$16 sps:$4 sm:$0xff]   ;;  %v3302_v49 = vld [vmem:[#allocation2 + $0x28] ss:$16 sps:$4 sm:$0xff]  }
  0xa1   :  { %1800 = vmatpush2.bf16.msra.mxu0 %v3217_v59  ;;  %v3305_v59 = vld [vmem:[#allocation2 + $0x228] ss:$16 sps:$4 sm:$0xff]  }
  0xa2   :  { %1841 = vmatpush2.bf16.msra.mxu1 %v3220_v60  ;;  %1801 = vmatprep.subr.bf16.mxu0 %v3225_v61  ;;  %v3310_v60 = vld [vmem:[#allocation2 + $0xc] ss:$16 sps:$4 sm:$0xff]  }
  0xa3   :  { %1842 = vmatprep.subr.bf16.mxu1 %v3228_v63  ;;  %v3313_v61 = vld [vmem:[#allocation2 + $0x20c] ss:$16 sps:$4 sm:$0xff]   ;;  %v3308_v63 = vld [vmem:[#allocation2 + $0x8] ss:$16 sps:$4 sm:$0xff]  }
  0xa5   :  { %1802 = vmatpush2.bf16.msra.mxu0 %v3223_v0  ;;  %v3311_v0 = vld [vmem:[#allocation2 + $0x208] ss:$16 sps:$4 sm:$0xff]  }
  0xa6   :  { %1843 = vmatpush2.bf16.msra.mxu1 %v3226_v1  ;;  %1803 = vmatprep.subr.bf16.mxu0 %v3231_v2  ;;  %v3316_v1 = vld [vmem:[#allocation2 + $0x1ec] ss:$16 sps:$4 sm:$0xff]  }
  0xa7   :  { %1844 = vmatprep.subr.bf16.mxu1 %v3234_v4  ;;  %v3319_v2 = vld [vmem:[#allocation2 + $0x3ec] ss:$16 sps:$4 sm:$0xff]   ;;  %v3314_v4 = vld [vmem:[#allocation2 + $0x1e8] ss:$16 sps:$4 sm:$0xff]  }
  0xa9   :  { %1804 = vmatpush2.bf16.msra.mxu0 %v3229_v5  ;;  %v3317_v5 = vld [vmem:[#allocation2 + $0x3e8] ss:$16 sps:$4 sm:$0xff]  }
  0xaa   :  { %1845 = vmatpush2.bf16.msra.mxu1 %v3232_v6  ;;  %1805 = vmatprep.subr.bf16.mxu0 %v3237_v7  ;;  %v3322_v6 = vld [vmem:[#allocation2 + $0x1cc] ss:$16 sps:$4 sm:$0xff]  }
  0xab   :  { %1846 = vmatprep.subr.bf16.mxu1 %v3240_v8  ;;  %v3325_v7 = vld [vmem:[#allocation2 + $0x3cc] ss:$16 sps:$4 sm:$0xff]   ;;  %v3320_v8 = vld [vmem:[#allocation2 + $0x1c8] ss:$16 sps:$4 sm:$0xff]  }
  0xad   :  { %1806 = vmatpush2.bf16.msra.mxu0 %v3235_v9  ;;  %v3323_v9 = vld [vmem:[#allocation2 + $0x3c8] ss:$16 sps:$4 sm:$0xff]  }
  0xae   :  { %1847 = vmatpush2.bf16.msra.mxu1 %v3238_v10  ;;  %1807 = vmatprep.subr.bf16.mxu0 %v3243_v11  ;;  %v3328_v10 = vld [vmem:[#allocation2 + $0x1ac] ss:$16 sps:$4 sm:$0xff]  }
  0xaf   :  { %1848 = vmatprep.subr.bf16.mxu1 %v3246_v12  ;;  %v3331_v11 = vld [vmem:[#allocation2 + $0x3ac] ss:$16 sps:$4 sm:$0xff]   ;;  %v3326_v12 = vld [vmem:[#allocation2 + $0x1a8] ss:$16 sps:$4 sm:$0xff]  }
  0xb1   :  { %1808 = vmatpush2.bf16.msra.mxu0 %v3241_v13  ;;  %v3329_v13 = vld [vmem:[#allocation2 + $0x3a8] ss:$16 sps:$4 sm:$0xff]  }
  0xb2   :  { %1849 = vmatpush2.bf16.msra.mxu1 %v3244_v14  ;;  %1809 = vmatprep.subr.bf16.mxu0 %v3249_v15  ;;  %v3334_v14 = vld [vmem:[#allocation2 + $0x18c] ss:$16 sps:$4 sm:$0xff]  }
  0xb3   :  { %1850 = vmatprep.subr.bf16.mxu1 %v3252_v18  ;;  %v3337_v15 = vld [vmem:[#allocation2 + $0x38c] ss:$16 sps:$4 sm:$0xff]   ;;  %v3332_v18 = vld [vmem:[#allocation2 + $0x188] ss:$16 sps:$4 sm:$0xff]  }
  0xb5   :  { %1810 = vmatpush2.bf16.msra.mxu0 %v3247_v19  ;;  %v3335_v19 = vld [vmem:[#allocation2 + $0x388] ss:$16 sps:$4 sm:$0xff]  }
  0xb6   :  { %1851 = vmatpush2.bf16.msra.mxu1 %v3250_v20  ;;  %1811 = vmatprep.subr.bf16.mxu0 %v3255_v21  ;;  %v3340_v20 = vld [vmem:[#allocation2 + $0x16c] ss:$16 sps:$4 sm:$0xff]  }
  0xb7   :  { %1852 = vmatprep.subr.bf16.mxu1 %v3258_v22  ;;  %v3343_v21 = vld [vmem:[#allocation2 + $0x36c] ss:$16 sps:$4 sm:$0xff]   ;;  %v3338_v22 = vld [vmem:[#allocation2 + $0x168] ss:$16 sps:$4 sm:$0xff]  }
  0xb9   :  { %1812 = vmatpush2.bf16.msra.mxu0 %v3253_v23  ;;  %v3341_v23 = vld [vmem:[#allocation2 + $0x368] ss:$16 sps:$4 sm:$0xff]  }
  0xba   :  { %1853 = vmatpush2.bf16.msra.mxu1 %v3256_v24  ;;  %1813 = vmatprep.subr.bf16.mxu0 %v3261_v25  ;;  %v3346_v24 = vld [vmem:[#allocation2 + $0x14c] ss:$16 sps:$4 sm:$0xff]  }
  0xbb   :  { %1854 = vmatprep.subr.bf16.mxu1 %v3264_v26  ;;  %v3349_v25 = vld [vmem:[#allocation2 + $0x34c] ss:$16 sps:$4 sm:$0xff]   ;;  %v3344_v26 = vld [vmem:[#allocation2 + $0x148] ss:$16 sps:$4 sm:$0xff]  }
  0xbd   :  { %1814 = vmatpush2.bf16.msra.mxu0 %v3259_v27  ;;  %v3347_v27 = vld [vmem:[#allocation2 + $0x348] ss:$16 sps:$4 sm:$0xff]  }
  0xbe   :  { %1855 = vmatpush2.bf16.msra.mxu1 %v3262_v28  ;;  %1865 = vmatprep.subr.bf16.mxu0 %v3268_v29  ;;  %v3352_v28 = vld [vmem:[#allocation2 + $0x12c] ss:$16 sps:$4 sm:$0xff]  }
  0xbf   :  { %1906 = vmatprep.subr.bf16.mxu1 %v3271_v30  ;;  %v3355_v29 = vld [vmem:[#allocation2 + $0x32c] ss:$16 sps:$4 sm:$0xff]   ;;  %v3350_v30 = vld [vmem:[#allocation2 + $0x128] ss:$16 sps:$4 sm:$0xff]  }
  0xc0   :  { %1816 = vmatmul.mubr.bf16.vlgmr.msra.gmra.mxu0 %v3784_v31 }
  0xc1   :  { %1857 = vmatmul.mubr.bf16.vlgmr.msra.gmra.mxu1 %v3788_v32  ;;  %1866 = vmatpush1.bf16.msra.mxu0 %v3266_v33  ;;  %v3353_v33 = vld [vmem:[#allocation2 + $0x328] ss:$16 sps:$4 sm:$0xff]  }
  0xc2   :  { %1907 = vmatpush1.bf16.msra.mxu1 %v3269_v34  ;;  %1867 = vmatprep.subr.bf16.mxu0 %v3274_v35  ;;  %v3358_v34 = vld [vmem:[#allocation2 + $0x10c] ss:$16 sps:$4 sm:$0xff]  }
  0xc3   :  { %1908 = vmatprep.subr.bf16.mxu1 %v3277_v36  ;;  %1897 = vmatprep.mubr.bf16.mxu0 %v3751_v62  ;;  %v3290_v62 = vld [vmem:[#allocation2 + $0x68] ss:$16 sps:$4 sm:$0xff]   ;;  %v3361_v35 = vld [vmem:[#allocation2 + $0x30c] ss:$16 sps:$4 sm:$0xff]  }
  0xc4   :  { %1938 = vmatprep.mubr.bf16.mxu1 %v3753_v3  ;;  %v3293_v3 = vld [vmem:[#allocation2 + $0x268] ss:$16 sps:$4 sm:$0xff]  }
  0xc5   :  { %1868 = vmatpush1.bf16.msra.mxu0 %v3272_v37  ;;  %v3356_v36 = vld [vmem:[#allocation2 + $0x108] ss:$16 sps:$4 sm:$0xff]  }
  0xc6   :  { %1909 = vmatpush1.bf16.msra.mxu1 %v3275_v38  ;;  %1869 = vmatprep.subr.bf16.mxu0 %v3280_v39  ;;  %v3359_v37 = vld [vmem:[#allocation2 + $0x308] ss:$16 sps:$4 sm:$0xff]   ;;  %v3364_v38 = vld [vmem:[#allocation2 + $0x4ec] ss:$16 sps:$4 sm:$0xff]  }
  0xc7   :  { %1910 = vmatprep.subr.bf16.mxu1 %v3283_v40  ;;  %v3367_v39 = vld [vmem:[#allocation2 + $0x6ec] ss:$16 sps:$4 sm:$0xff]   ;;  %v3362_v40 = vld [vmem:[#allocation2 + $0x4e8] ss:$16 sps:$4 sm:$0xff]  }
  0xc9   :  { %1870 = vmatpush1.bf16.msra.mxu0 %v3278_v41  ;;  %v3365_v41 = vld [vmem:[#allocation2 + $0x6e8] ss:$16 sps:$4 sm:$0xff]  }
  0xca   :  { %1911 = vmatpush1.bf16.msra.mxu1 %v3281_v42  ;;  %1871 = vmatprep.subr.bf16.mxu0 %v3286_v44  ;;  %v3370_v42 = vld [vmem:[#allocation2 + $0x4cc] ss:$16 sps:$4 sm:$0xff]  }
  0xcb   :  { %1912 = vmatprep.subr.bf16.mxu1 %v3289_v45  ;;  %v3373_v44 = vld [vmem:[#allocation2 + $0x6cc] ss:$16 sps:$4 sm:$0xff]   ;;  %v3368_v45 = vld [vmem:[#allocation2 + $0x4c8] ss:$16 sps:$4 sm:$0xff]  }
  0xcd   :  { %1872 = vmatpush1.bf16.msra.mxu0 %v3284_v46  ;;  %v3371_v46 = vld [vmem:[#allocation2 + $0x6c8] ss:$16 sps:$4 sm:$0xff]  }
  0xce   :  { %1913 = vmatpush1.bf16.msra.mxu1 %v3287_v47  ;;  %1873 = vmatprep.subr.bf16.mxu0 %v3292_v48  ;;  %v3376_v47 = vld [vmem:[#allocation2 + $0x4ac] ss:$16 sps:$4 sm:$0xff]  }
  0xcf   :  { %1914 = vmatprep.subr.bf16.mxu1 %v3295_v50  ;;  %v3379_v48 = vld [vmem:[#allocation2 + $0x6ac] ss:$16 sps:$4 sm:$0xff]   ;;  %v3374_v50 = vld [vmem:[#allocation2 + $0x4a8] ss:$16 sps:$4 sm:$0xff]  }
  0xd1   :  { %1874 = vmatpush1.bf16.msra.mxu0 %v3290_v62  ;;  %v3377_v62 = vld [vmem:[#allocation2 + $0x6a8] ss:$16 sps:$4 sm:$0xff]  }
  0xd2   :  { %1915 = vmatpush1.bf16.msra.mxu1 %v3293_v3  ;;  %1875 = vmatprep.subr.bf16.mxu0 %v3298_v51  ;;  %v3382_v3 = vld [vmem:[#allocation2 + $0x48c] ss:$16 sps:$4 sm:$0xff]   ;;  %v3380_v51 = vld [vmem:[#allocation2 + $0x488] ss:$16 sps:$4 sm:$0xff]  }
  0xd3   :  { %1916 = vmatprep.subr.bf16.mxu1 %v3301_v52  ;;  %v3388_v52 = vld [vmem:[#allocation2 + $0x46c] ss:$16 sps:$4 sm:$0xff]  }
  0xd5   :  { %1876 = vmatpush1.bf16.msra.mxu0 %v3296_v54  ;;  %v3391_v54 = vld [vmem:[#allocation2 + $0x66c] ss:$16 sps:$4 sm:$0xff]  }
  0xd6   :  { %1917 = vmatpush1.bf16.msra.mxu1 %v3299_v55  ;;  %1877 = vmatprep.subr.bf16.mxu0 %v3304_v56  ;;  %v3386_v55 = vld [vmem:[#allocation2 + $0x468] ss:$16 sps:$4 sm:$0xff]  }
  0xd7   :  { %1918 = vmatprep.subr.bf16.mxu1 %v3307_v58  ;;  %v3389_v56 = vld [vmem:[#allocation2 + $0x668] ss:$16 sps:$4 sm:$0xff]   ;;  %v3394_v58 = vld [vmem:[#allocation2 + $0x44c] ss:$16 sps:$4 sm:$0xff]  }
  0xd9   :  { %1878 = vmatpush1.bf16.msra.mxu0 %v3302_v49  ;;  %v3395_v49 = vld [vmem:[#allocation2 + $0x648] ss:$16 sps:$4 sm:$0xff]  }
  0xda   :  { %1919 = vmatpush1.bf16.msra.mxu1 %v3305_v59  ;;  %1879 = vmatprep.subr.bf16.mxu0 %v3310_v60  ;;  %v3400_v59 = vld [vmem:[#allocation2 + $0x42c] ss:$16 sps:$4 sm:$0xff]  }
  0xdb   :  { %1920 = vmatprep.subr.bf16.mxu1 %v3313_v61  ;;  %v3403_v60 = vld [vmem:[#allocation2 + $0x62c] ss:$16 sps:$4 sm:$0xff]   ;;  %v3398_v61 = vld [vmem:[#allocation2 + $0x428] ss:$16 sps:$4 sm:$0xff]  }
  0xdd   :  { %1880 = vmatpush1.bf16.msra.mxu0 %v3308_v63  ;;  %v3401_v63 = vld [vmem:[#allocation2 + $0x628] ss:$16 sps:$4 sm:$0xff]  }
  0xde   :  { %1921 = vmatpush1.bf16.msra.mxu1 %v3311_v0  ;;  %1881 = vmatprep.subr.bf16.mxu0 %v3316_v1  ;;  %v3406_v0 = vld [vmem:[#allocation2 + $0x40c] ss:$16 sps:$4 sm:$0xff]  }
  0xdf   :  { %1922 = vmatprep.subr.bf16.mxu1 %v3319_v2  ;;  %v3409_v1 = vld [vmem:[#allocation2 + $0x60c] ss:$16 sps:$4 sm:$0xff]   ;;  %v3404_v2 = vld [vmem:[#allocation2 + $0x408] ss:$16 sps:$4 sm:$0xff]  }
  0xe1   :  { %1882 = vmatpush2.bf16.msra.mxu0 %v3314_v4  ;;  %v3407_v4 = vld [vmem:[#allocation2 + $0x608] ss:$16 sps:$4 sm:$0xff]  }
  0xe2   :  { %1923 = vmatpush2.bf16.msra.mxu1 %v3317_v5  ;;  %1883 = vmatprep.subr.bf16.mxu0 %v3322_v6  ;;  %v3412_v5 = vld [vmem:[#allocation2 + $0x5ec] ss:$16 sps:$4 sm:$0xff]  }
  0xe3   :  { %1924 = vmatprep.subr.bf16.mxu1 %v3325_v7  ;;  %v3415_v6 = vld [vmem:[#allocation2 + $0x7ec] ss:$16 sps:$4 sm:$0xff]   ;;  %v3410_v7 = vld [vmem:[#allocation2 + $0x5e8] ss:$16 sps:$4 sm:$0xff]  }
  0xe5   :  { %1884 = vmatpush2.bf16.msra.mxu0 %v3320_v8  ;;  %v3413_v8 = vld [vmem:[#allocation2 + $0x7e8] ss:$16 sps:$4 sm:$0xff]  }
  0xe6   :  { %1925 = vmatpush2.bf16.msra.mxu1 %v3323_v9  ;;  %1885 = vmatprep.subr.bf16.mxu0 %v3328_v10  ;;  %v3418_v9 = vld [vmem:[#allocation2 + $0x5cc] ss:$16 sps:$4 sm:$0xff]  }
  0xe7   :  { %1926 = vmatprep.subr.bf16.mxu1 %v3331_v11  ;;  %v3421_v10 = vld [vmem:[#allocation2 + $0x7cc] ss:$16 sps:$4 sm:$0xff]   ;;  %v3416_v11 = vld [vmem:[#allocation2 + $0x5c8] ss:$16 sps:$4 sm:$0xff]  }
  0xe9   :  { %1886 = vmatpush2.bf16.msra.mxu0 %v3326_v12  ;;  %v3419_v12 = vld [vmem:[#allocation2 + $0x7c8] ss:$16 sps:$4 sm:$0xff]  }
  0xea   :  { %1927 = vmatpush2.bf16.msra.mxu1 %v3329_v13  ;;  %1887 = vmatprep.subr.bf16.mxu0 %v3334_v14  ;;  %v3424_v13 = vld [vmem:[#allocation2 + $0x5ac] ss:$16 sps:$4 sm:$0xff]  }
  0xeb   :  { %1928 = vmatprep.subr.bf16.mxu1 %v3337_v15  ;;  %v3427_v14 = vld [vmem:[#allocation2 + $0x7ac] ss:$16 sps:$4 sm:$0xff]   ;;  %v3422_v15 = vld [vmem:[#allocation2 + $0x5a8] ss:$16 sps:$4 sm:$0xff]  }
  0xed   :  { %1888 = vmatpush2.bf16.msra.mxu0 %v3332_v18  ;;  %v3425_v18 = vld [vmem:[#allocation2 + $0x7a8] ss:$16 sps:$4 sm:$0xff]  }
  0xee   :  { %1929 = vmatpush2.bf16.msra.mxu1 %v3335_v19  ;;  %1889 = vmatprep.subr.bf16.mxu0 %v3340_v20  ;;  %v3430_v19 = vld [vmem:[#allocation2 + $0x58c] ss:$16 sps:$4 sm:$0xff]  }
  0xef   :  { %1930 = vmatprep.subr.bf16.mxu1 %v3343_v21  ;;  %v3433_v20 = vld [vmem:[#allocation2 + $0x78c] ss:$16 sps:$4 sm:$0xff]   ;;  %v3428_v21 = vld [vmem:[#allocation2 + $0x588] ss:$16 sps:$4 sm:$0xff]  }
  0xf1   :  { %1890 = vmatpush2.bf16.msra.mxu0 %v3338_v22  ;;  %v3431_v22 = vld [vmem:[#allocation2 + $0x788] ss:$16 sps:$4 sm:$0xff]  }
  0xf2   :  { %1931 = vmatpush2.bf16.msra.mxu1 %v3341_v23  ;;  %1891 = vmatprep.subr.bf16.mxu0 %v3346_v24  ;;  %v3436_v23 = vld [vmem:[#allocation2 + $0x56c] ss:$16 sps:$4 sm:$0xff]  }
  0xf3   :  { %1932 = vmatprep.subr.bf16.mxu1 %v3349_v25  ;;  %v3439_v24 = vld [vmem:[#allocation2 + $0x76c] ss:$16 sps:$4 sm:$0xff]   ;;  %v3434_v25 = vld [vmem:[#allocation2 + $0x568] ss:$16 sps:$4 sm:$0xff]  }
  0xf5   :  { %1892 = vmatpush2.bf16.msra.mxu0 %v3344_v26  ;;  %v3437_v26 = vld [vmem:[#allocation2 + $0x768] ss:$16 sps:$4 sm:$0xff]  }
  0xf6   :  { %1933 = vmatpush2.bf16.msra.mxu1 %v3347_v27  ;;  %1893 = vmatprep.subr.bf16.mxu0 %v3352_v28  ;;  %v3442_v27 = vld [vmem:[#allocation2 + $0x54c] ss:$16 sps:$4 sm:$0xff]  }
  0xf7   :  { %1934 = vmatprep.subr.bf16.mxu1 %v3355_v29  ;;  %v3445_v28 = vld [vmem:[#allocation2 + $0x74c] ss:$16 sps:$4 sm:$0xff]   ;;  %v3440_v29 = vld [vmem:[#allocation2 + $0x548] ss:$16 sps:$4 sm:$0xff]  }
  0xf9   :  { %1894 = vmatpush2.bf16.msra.mxu0 %v3350_v30  ;;  %v3443_v30 = vld [vmem:[#allocation2 + $0x748] ss:$16 sps:$4 sm:$0xff]  }
  0xfa   :  { %1935 = vmatpush2.bf16.msra.mxu1 %v3353_v33  ;;  %1895 = vmatprep.subr.bf16.mxu0 %v3358_v34  ;;  %v3448_v33 = vld [vmem:[#allocation2 + $0x52c] ss:$16 sps:$4 sm:$0xff]  }
  0xfb   :  { %1936 = vmatprep.subr.bf16.mxu1 %v3361_v35  ;;  %v3451_v34 = vld [vmem:[#allocation2 + $0x72c] ss:$16 sps:$4 sm:$0xff]   ;;  %v3446_v35 = vld [vmem:[#allocation2 + $0x528] ss:$16 sps:$4 sm:$0xff]  }
  0xfd   :  { %1896 = vmatpush2.bf16.msra.mxu0 %v3356_v36  ;;  %v3449_v36 = vld [vmem:[#allocation2 + $0x728] ss:$16 sps:$4 sm:$0xff]  }
  0xfe   :  { %1937 = vmatpush2.bf16.msra.mxu1 %v3359_v37  ;;  %1947 = vmatprep.subr.bf16.mxu0 %v3364_v38  ;;  %v3454_v37 = vld [vmem:[#allocation2 + $0x50c] ss:$16 sps:$4 sm:$0xff]  }
  0xff   :  { %1988 = vmatprep.subr.bf16.mxu1 %v3367_v39  ;;  %v3457_v38 = vld [vmem:[#allocation2 + $0x70c] ss:$16 sps:$4 sm:$0xff]   ;;  %v3452_v39 = vld [vmem:[#allocation2 + $0x508] ss:$16 sps:$4 sm:$0xff]  }
 0x100   :  { %1898 = vmatmul.mubr.bf16.vlgmr.msra.gmra.mxu0 %v3757_v16  ;;  %v3385_v16 = vld [vmem:[#allocation2 + $0x68c] ss:$16 sps:$4 sm:$0xff]  }
 0x101   :  { %1939 = vmatmul.mubr.bf16.vlgmr.msra.gmra.mxu1 %v3759_v17  ;;  %1948 = vmatpush1.bf16.msra.mxu0 %v3362_v40  ;;  %v3383_v17 = vld [vmem:[#allocation2 + $0x688] ss:$16 sps:$4 sm:$0xff]  }
 0x102   :  { %1989 = vmatpush1.bf16.msra.mxu1 %v3365_v41  ;;  %1949 = vmatprep.subr.bf16.mxu0 %v3370_v42  ;;  %v3455_v40 = vld [vmem:[#allocation2 + $0x708] ss:$16 sps:$4 sm:$0xff]   ;;  %v3458_v42 = vld [vmem:[#allocation6 + $0x70] ss:$8 sps:$4 sm:$0xff]  }
 0x103   :  { %1990 = vmatprep.subr.bf16.mxu1 %v3373_v44  ;;  %1979 = vmatprep.mubr.bf16.mxu0 %v3774_v53  ;;  %v3397_v53 = vld [vmem:[#allocation2 + $0x64c] ss:$16 sps:$4 sm:$0xff]   ;;  %v3460_v41 = vld [vmem:[#allocation6 + $0x74] ss:$8 sps:$4 sm:$0xff]   ;;  %v3463_v44 = vld [vmem:[#allocation6 + $0x64] ss:$8 sps:$4 sm:$0xff]  }
 0x104   :  { %2020 = vmatprep.mubr.bf16.mxu1 %v3778_v57  ;;  %v3392_v57 = vld [vmem:[#allocation2 + $0x448] ss:$16 sps:$4 sm:$0xff]  }
 0x105   :  { %1950 = vmatpush1.bf16.msra.mxu0 %v3368_v45 }
 0x106   :  { %1991 = vmatpush1.bf16.msra.mxu1 %v3371_v46  ;;  %1951 = vmatprep.subr.bf16.mxu0 %v3376_v47  ;;  %v3461_v47 = vld [vmem:[#allocation6 + $0x60] ss:$8 sps:$4 sm:$0xff]  }
 0x107   :  { %1992 = vmatprep.subr.bf16.mxu1 %v3379_v48 }
 0x109   :  { %1952 = vmatpush1.bf16.msra.mxu0 %v3374_v50 }
 0x10a   :  { %1993 = vmatpush1.bf16.msra.mxu1 %v3377_v62  ;;  %1953 = vmatprep.subr.bf16.mxu0 %v3382_v3  ;;  %v3466_v62 = vld [vmem:[#allocation6 + $0x54] ss:$8 sps:$4 sm:$0xff]  }
 0x10b   :  { %1994 = vmatprep.subr.bf16.mxu1 %v3385_v16 }
 0x10d   :  { %1954 = vmatpush1.bf16.msra.mxu0 %v3380_v51  ;;  %v3464_v51 = vld [vmem:[#allocation6 + $0x50] ss:$8 sps:$4 sm:$0xff]  }
 0x10e   :  { %1995 = vmatpush1.bf16.msra.mxu1 %v3383_v17  ;;  %1955 = vmatprep.subr.bf16.mxu0 %v3388_v52 }
 0x10f   :  { %1996 = vmatprep.subr.bf16.mxu1 %v3391_v54  ;;  %v3469_v54 = vld [vmem:[#allocation6 + $0x44] ss:$8 sps:$4 sm:$0xff]  }
 0x111   :  { %1956 = vmatpush1.bf16.msra.mxu0 %v3386_v55  ;;  %v3506_v55 = vld [vmem:[#allocation6 + $0x170] ss:$8 sps:$4 sm:$0xff]  }
 0x112   :  { %1997 = vmatpush1.bf16.msra.mxu1 %v3389_v56  ;;  %1957 = vmatprep.subr.bf16.mxu0 %v3394_v58  ;;  %v3511_v56 = vld [vmem:[#allocation6 + $0x164] ss:$8 sps:$4 sm:$0xff]   ;;  %v3509_v58 = vld [vmem:[#allocation6 + $0x160] ss:$8 sps:$4 sm:$0xff]  }
 0x113   :  { %1998 = vmatprep.subr.bf16.mxu1 %v3397_v53  ;;  %v3472_v53 = vld [vmem:[#allocation6 + $0x34] ss:$8 sps:$4 sm:$0xff]  }
 0x115   :  { %1958 = vmatpush1.bf16.msra.mxu0 %v3392_v57  ;;  %v3514_v57 = vld [vmem:[#allocation6 + $0x154] ss:$8 sps:$4 sm:$0xff]  }
 0x116   :  { %1999 = vmatpush1.bf16.msra.mxu1 %v3395_v49  ;;  %1959 = vmatprep.subr.bf16.mxu0 %v3400_v59  ;;  %v3470_v49 = vld [vmem:[#allocation6 + $0x30] ss:$8 sps:$4 sm:$0xff]  }
 0x117   :  { %2000 = vmatprep.subr.bf16.mxu1 %v3403_v60  ;;  %v3512_v59 = vld [vmem:[#allocation6 + $0x150] ss:$8 sps:$4 sm:$0xff]   ;;  %v3475_v60 = vld [vmem:[#allocation6 + $0x24] ss:$8 sps:$4 sm:$0xff]  }
 0x119   :  { %1960 = vmatpush1.bf16.msra.mxu0 %v3398_v61  ;;  %v3517_v61 = vld [vmem:[#allocation6 + $0x144] ss:$8 sps:$4 sm:$0xff]  }
 0x11a   :  { %2001 = vmatpush1.bf16.msra.mxu1 %v3401_v63  ;;  %1961 = vmatprep.subr.bf16.mxu0 %v3406_v0  ;;  %v3473_v63 = vld [vmem:[#allocation6 + $0x20] ss:$8 sps:$4 sm:$0xff]  }
 0x11b   :  { %2002 = vmatprep.subr.bf16.mxu1 %v3409_v1  ;;  %v3515_v0 = vld [vmem:[#allocation6 + $0x140] ss:$8 sps:$4 sm:$0xff]   ;;  %v3478_v1 = vld [vmem:[#allocation6 + $0x14] ss:$8 sps:$4 sm:$0xff]  }
 0x11d   :  { %1962 = vmatpush1.bf16.msra.mxu0 %v3404_v2  ;;  %v3520_v2 = vld [vmem:[#allocation6 + $0x134] ss:$8 sps:$4 sm:$0xff]  }
 0x11e   :  { %2003 = vmatpush1.bf16.msra.mxu1 %v3407_v4  ;;  %1963 = vmatprep.subr.bf16.mxu0 %v3412_v5  ;;  %v3476_v4 = vld [vmem:[#allocation6 + $0x10] ss:$8 sps:$4 sm:$0xff]  }
 0x11f   :  { %2004 = vmatprep.subr.bf16.mxu1 %v3415_v6  ;;  %v3518_v5 = vld [vmem:[#allocation6 + $0x130] ss:$8 sps:$4 sm:$0xff]   ;;  %v3481_v6 = vld [vmem:[#allocation6 + $0x4] ss:$8 sps:$4 sm:$0xff]  }
 0x121   :  { %1964 = vmatpush2.bf16.msra.mxu0 %v3410_v7  ;;  %v3523_v7 = vld [vmem:[#allocation6 + $0x124] ss:$8 sps:$4 sm:$0xff]  }
 0x122   :  { %2005 = vmatpush2.bf16.msra.mxu1 %v3413_v8  ;;  %1965 = vmatprep.subr.bf16.mxu0 %v3418_v9  ;;  %v3479_v8 = vld [vmem:[#allocation6] ss:$8 sps:$4 sm:$0xff]  }
 0x123   :  { %2006 = vmatprep.subr.bf16.mxu1 %v3421_v10  ;;  %v3521_v9 = vld [vmem:[#allocation6 + $0x120] ss:$8 sps:$4 sm:$0xff]   ;;  %v3484_v10 = vld [vmem:[#allocation6 + $0xf4] ss:$8 sps:$4 sm:$0xff]  }
 0x125   :  { %1966 = vmatpush2.bf16.msra.mxu0 %v3416_v11  ;;  %v3526_v11 = vld [vmem:[#allocation6 + $0x114] ss:$8 sps:$4 sm:$0xff]  }
 0x126   :  { %2007 = vmatpush2.bf16.msra.mxu1 %v3419_v12  ;;  %1967 = vmatprep.subr.bf16.mxu0 %v3424_v13  ;;  %v3482_v12 = vld [vmem:[#allocation6 + $0xf0] ss:$8 sps:$4 sm:$0xff]  }
 0x127   :  { %2008 = vmatprep.subr.bf16.mxu1 %v3427_v14  ;;  %v3524_v13 = vld [vmem:[#allocation6 + $0x110] ss:$8 sps:$4 sm:$0xff]   ;;  %v3487_v14 = vld [vmem:[#allocation6 + $0xe4] ss:$8 sps:$4 sm:$0xff]  }
 0x129   :  { %1968 = vmatpush2.bf16.msra.mxu0 %v3422_v15  ;;  %v3529_v15 = vld [vmem:[#allocation6 + $0x104] ss:$8 sps:$4 sm:$0xff]  }
 0x12a   :  { %2009 = vmatpush2.bf16.msra.mxu1 %v3425_v18  ;;  %1969 = vmatprep.subr.bf16.mxu0 %v3430_v19  ;;  %v3485_v18 = vld [vmem:[#allocation6 + $0xe0] ss:$8 sps:$4 sm:$0xff]  }
 0x12b   :  { %2010 = vmatprep.subr.bf16.mxu1 %v3433_v20  ;;  %v3527_v19 = vld [vmem:[#allocation6 + $0x100] ss:$8 sps:$4 sm:$0xff]   ;;  %v3490_v20 = vld [vmem:[#allocation6 + $0xd4] ss:$8 sps:$4 sm:$0xff]  }
 0x12d   :  { %1970 = vmatpush2.bf16.msra.mxu0 %v3428_v21  ;;  %v3532_v21 = vld [vmem:[#allocation6 + $0x1f4] ss:$8 sps:$4 sm:$0xff]  }
 0x12e   :  { %2011 = vmatpush2.bf16.msra.mxu1 %v3431_v22  ;;  %1971 = vmatprep.subr.bf16.mxu0 %v3436_v23  ;;  %v3488_v22 = vld [vmem:[#allocation6 + $0xd0] ss:$8 sps:$4 sm:$0xff]  }
 0x12f   :  { %2012 = vmatprep.subr.bf16.mxu1 %v3439_v24  ;;  %v3530_v23 = vld [vmem:[#allocation6 + $0x1f0] ss:$8 sps:$4 sm:$0xff]   ;;  %v3493_v24 = vld [vmem:[#allocation6 + $0xc4] ss:$8 sps:$4 sm:$0xff]  }
 0x131   :  { %1972 = vmatpush2.bf16.msra.mxu0 %v3434_v25  ;;  %v3535_v25 = vld [vmem:[#allocation6 + $0x1e4] ss:$8 sps:$4 sm:$0xff]  }
 0x132   :  { %2013 = vmatpush2.bf16.msra.mxu1 %v3437_v26  ;;  %1973 = vmatprep.subr.bf16.mxu0 %v3442_v27  ;;  %v3491_v26 = vld [vmem:[#allocation6 + $0xc0] ss:$8 sps:$4 sm:$0xff]  }
 0x133   :  { %2014 = vmatprep.subr.bf16.mxu1 %v3445_v28  ;;  %v3533_v27 = vld [vmem:[#allocation6 + $0x1e0] ss:$8 sps:$4 sm:$0xff]   ;;  %v3496_v28 = vld [vmem:[#allocation6 + $0xb4] ss:$8 sps:$4 sm:$0xff]  }
 0x135   :  { %1974 = vmatpush2.bf16.msra.mxu0 %v3440_v29  ;;  %v3538_v29 = vld [vmem:[#allocation6 + $0x1d4] ss:$8 sps:$4 sm:$0xff]  }
 0x136   :  { %2015 = vmatpush2.bf16.msra.mxu1 %v3443_v30  ;;  %1975 = vmatprep.subr.bf16.mxu0 %v3448_v33  ;;  %v3494_v30 = vld [vmem:[#allocation6 + $0xb0] ss:$8 sps:$4 sm:$0xff]  }
 0x137   :  { %2016 = vmatprep.subr.bf16.mxu1 %v3451_v34  ;;  %v3536_v33 = vld [vmem:[#allocation6 + $0x1d0] ss:$8 sps:$4 sm:$0xff]   ;;  %v3499_v34 = vld [vmem:[#allocation6 + $0xa4] ss:$8 sps:$4 sm:$0xff]  }
 0x139   :  { %1976 = vmatpush2.bf16.msra.mxu0 %v3446_v35  ;;  %v3541_v35 = vld [vmem:[#allocation6 + $0x1c4] ss:$8 sps:$4 sm:$0xff]  }
 0x13a   :  { %2017 = vmatpush2.bf16.msra.mxu1 %v3449_v36  ;;  %1977 = vmatprep.subr.bf16.mxu0 %v3454_v37  ;;  %v3497_v36 = vld [vmem:[#allocation6 + $0xa0] ss:$8 sps:$4 sm:$0xff]  }
 0x13b   :  { %2018 = vmatprep.subr.bf16.mxu1 %v3457_v38  ;;  %v3539_v37 = vld [vmem:[#allocation6 + $0x1c0] ss:$8 sps:$4 sm:$0xff]   ;;  %v3502_v38 = vld [vmem:[#allocation6 + $0x94] ss:$8 sps:$4 sm:$0xff]  }
 0x13d   :  { %1978 = vmatpush2.bf16.msra.mxu0 %v3452_v39  ;;  %v3544_v39 = vld [vmem:[#allocation6 + $0x1b4] ss:$8 sps:$4 sm:$0xff]  }
 0x13e   :  { %2019 = vmatpush2.bf16.msra.mxu1 %v3455_v40  ;;  %2433 = vmatprep.subr.bf16.mxu0 %v3460_v41  ;;  %v403_v40 = vsub.s32 0, %v3741_v43  ;;  %v3809_v41 = vld [vmem:[#allocation4] sm:$0xf] }
 0x140   :  { %v3798_v45 = vpop.f32.mrf.mxu0  ;;  %1980 = vmatmul.mubr.bf16.vlgmr.msra.gmra.mxu0 %v3784_v31  ;;  %v3508_v31 = vld [vmem:[#allocation6 + $0x174] ss:$8 sps:$4 sm:$0xff]  }
 0x141   :  { %v3800_v46 = vpop.f32.mrf.mxu1  ;;  %2021 = vmatmul.mubr.bf16.vlgmr.msra.gmra.mxu1 %v3788_v32  ;;  %2434 = vmatpush1.bf16.msra.mxu0 %v3458_v42  ;;  %v3467_v32 = vld [vmem:[#allocation6 + $0x40] ss:$8 sps:$4 sm:$0xff]   ;;  %v407_v42 = vsub.s32 1, %v3741_v43 }
 0x142   :  { %v3804_v48 = vpop.f32.mrf.mxu0  ;;  %2435 = vmatprep.subr.bf16.mxu0 %v3463_v44  ;;  %2474 = vmatprep.subr.bf16.mxu1 %v3508_v31  ;;  %v3500_v44 = vld [vmem:[#allocation6 + $0x90] ss:$8 sps:$4 sm:$0xff]   ;;  %v3545_v31 = vld [vmem:[#allocation6 + $0x1a0] ss:$8 sps:$4 sm:$0xff]  }
 0x143   :  { %v3806_v50 = vpop.f32.mrf.mxu1  ;;  %2475 = vmatpush1.bf16.msra.mxu1 %v3506_v55 }
 0x144   :  { %v1739_v3 = vpop.f32.mrf.mxu0  ;;  %2476 = vmatprep.subr.bf16.mxu1 %v3511_v56 }
 0x145   :  { %v1780_v16 = vpop.f32.mrf.mxu1  ;;  %2436 = vmatpush1.bf16.msra.mxu0 %v3461_v47  ;;  %v3542_v47 = vld [vmem:[#allocation6 + $0x1b0] ss:$8 sps:$4 sm:$0xff]   ;;  %v404_v3 = vrot.slane %v3809_v41, %v403_v40 }
 0x146   :  { %v1740_v17 = vpop.f32.mrf.mxu0  ;;  %2437 = vmatprep.subr.bf16.mxu0 %v3466_v62  ;;  %v3505_v62 = vld [vmem:[#allocation6 + $0x84] ss:$8 sps:$4 sm:$0xff]   ;;  %v408_v16 = vrot.slane %v3809_v41, %v407_v42 }
 0x147   :  { %v1781_v52 = vpop.f32.mrf.mxu1  ;;  %2477 = vmatpush1.bf16.msra.mxu1 %v3509_v58  ;;  %v1736_v17 = vadd.f32 %v3798_v45, %v404_v3  ;;  %v3548_v45 = vld [vmem:[#allocation6 + $0x190] ss:$8 sps:$4 sm:$0xff]  }
 0x148   :  { %2478 = vmatprep.subr.bf16.mxu1 %v3514_v57  ;;  %v1738_v52 = vadd.f32 %v3804_v48, %v408_v16 }
 0x149   :  { %2438 = vmatpush1.bf16.msra.mxu0 %v3464_v51  ;;  %v3503_v51 = vld [vmem:[#allocation6 + $0x80] ss:$8 sps:$4 sm:$0xff]   ;;  %v1777_v55 = vadd.f32 %v3800_v46, %v1736_v17 }
 0x14a   :  { %2439 = vmatprep.subr.bf16.mxu0 %v3469_v54  ;;  %v3547_v54 = vld [vmem:[#allocation6 + $0x1a4] ss:$8 sps:$4 sm:$0xff]   ;;  %v1779_v58 = vadd.f32 %v3806_v50, %v1738_v52 }
 0x14b   :  { %2479 = vmatpush1.bf16.msra.mxu1 %v3512_v59  ;;  %v3550_v59 = vld [vmem:[#allocation6 + $0x194] ss:$8 sps:$4 sm:$0xff]  }
 0x14c   :  { %2480 = vmatprep.subr.bf16.mxu1 %v3517_v61 }
 0x14d   :  { %2440 = vmatpush1.bf16.msra.mxu0 %v3467_v32 }
 0x14e   :  { %2441 = vmatprep.subr.bf16.mxu0 %v3472_v53 }
 0x14f   :  { %2481 = vmatpush1.bf16.msra.mxu1 %v3515_v0 }
 0x150   :  { %2482 = vmatprep.subr.bf16.mxu1 %v3520_v2 }
 0x151   :  { %2442 = vmatpush1.bf16.msra.mxu0 %v3470_v49 }
 0x152   :  { %2443 = vmatprep.subr.bf16.mxu0 %v3475_v60 }
 0x153   :  { %2483 = vmatpush1.bf16.msra.mxu1 %v3518_v5 }
 0x154   :  { %2484 = vmatprep.subr.bf16.mxu1 %v3523_v7 }
 0x155   :  { %2444 = vmatpush1.bf16.msra.mxu0 %v3473_v63 }
 0x156   :  { %2445 = vmatprep.subr.bf16.mxu0 %v3478_v1 }
 0x157   :  { %2485 = vmatpush1.bf16.msra.mxu1 %v3521_v9 }
 0x158   :  { %2486 = vmatprep.subr.bf16.mxu1 %v3526_v11 }
 0x159   :  { %2446 = vmatpush1.bf16.msra.mxu0 %v3476_v4  ;;  %v3553_v4 = vld [vmem:[#allocation6 + $0x184] ss:$8 sps:$4 sm:$0xff]  }
 0x15a   :  { %2447 = vmatprep.subr.bf16.mxu0 %v3481_v6  ;;  %v3551_v6 = vld [vmem:[#allocation6 + $0x180] ss:$8 sps:$4 sm:$0xff]  }
 0x15b   :  { %2487 = vmatpush1.bf16.msra.mxu1 %v3524_v13 }
 0x15c   :  { %2488 = vmatprep.subr.bf16.mxu1 %v3529_v15 }
 0x15d   :  { %2448 = vmatpush1.bf16.msra.mxu0 %v3479_v8 }
 0x15e   :  { %2449 = vmatprep.subr.bf16.mxu0 %v3484_v10 }
 0x15f   :  { %2489 = vmatpush1.bf16.msra.mxu1 %v3527_v19  ;;  %v3555_v19 = vld [vmem:[%s3886_s5 + $0x38] sm:$0xff]  }
 0x160   :  { %2490 = vmatprep.subr.bf16.mxu1 %v3532_v21  ;;  %v3557_v21 = vld [vmem:[%s3886_s5 + $0x30] sm:$0xff]  }
 0x161   :  { %2450 = vmatpush2.bf16.msra.mxu0 %v3482_v12 }
 0x162   :  { %2451 = vmatprep.subr.bf16.mxu0 %v3487_v14 }
 0x163   :  { %2491 = vmatpush2.bf16.msra.mxu1 %v3530_v23  ;;  %v3559_v23 = vld [vmem:[%s3886_s5 + $0x28] sm:$0xff]  }
 0x164   :  { %2492 = vmatprep.subr.bf16.mxu1 %v3535_v25  ;;  %v3561_v25 = vld [vmem:[%s3886_s5 + $0x20] sm:$0xff]  }
 0x165   :  { %2452 = vmatpush2.bf16.msra.mxu0 %v3485_v18  ;;  %v3554_v18 = vld [vmem:[%s3886_s5 + $0x78] sm:$0xff]  }
 0x166   :  { %2453 = vmatprep.subr.bf16.mxu0 %v3490_v20  ;;  %v3556_v20 = vld [vmem:[%s3886_s5 + $0x70] sm:$0xff]  }
 0x167   :  { %2493 = vmatpush2.bf16.msra.mxu1 %v3533_v27  ;;  %v3563_v27 = vld [vmem:[%s3886_s5 + $0x18] sm:$0xff]  }
 0x168   :  { %2494 = vmatprep.subr.bf16.mxu1 %v3538_v29  ;;  %v3565_v29 = vld [vmem:[%s3886_s5 + $0x10] sm:$0xff]  }
 0x169   :  { %2454 = vmatpush2.bf16.msra.mxu0 %v3488_v22  ;;  %v3558_v22 = vld [vmem:[%s3886_s5 + $0x68] sm:$0xff]  }
 0x16a   :  { %2455 = vmatprep.subr.bf16.mxu0 %v3493_v24  ;;  %v3560_v24 = vld [vmem:[%s3886_s5 + $0x60] sm:$0xff]  }
 0x16b   :  { %2495 = vmatpush2.bf16.msra.mxu1 %v3536_v33  ;;  %v415_v33 = vsub.s32 3, %v3741_v43 }
 0x16c   :  { %2496 = vmatprep.subr.bf16.mxu1 %v3541_v35 }
 0x16d   :  { %2456 = vmatpush2.bf16.msra.mxu0 %v3491_v26  ;;  %v3562_v26 = vld [vmem:[%s3886_s5 + $0x58] sm:$0xff]   ;;  %v416_v35 = vrot.slane %v3809_v41, %v415_v33 }
 0x16e   :  { %2457 = vmatprep.subr.bf16.mxu0 %v3496_v28  ;;  %v3564_v28 = vld [vmem:[%s3886_s5 + $0x50] sm:$0xff]  }
 0x16f   :  { %2497 = vmatpush2.bf16.msra.mxu1 %v3539_v37 }
 0x170   :  { %2498 = vmatprep.subr.bf16.mxu1 %v3544_v39 }
 0x171   :  { %2458 = vmatpush2.bf16.msra.mxu0 %v3494_v30  ;;  %v411_v30 = vsub.s32 2, %v3741_v43 }
 0x172   :  { %2459 = vmatprep.subr.bf16.mxu0 %v3499_v34 }
 0x173   :  { %2499 = vmatpush2.bf16.msra.mxu1 %v3542_v47  ;;  %v412_v34 = vrot.slane %v3809_v41, %v411_v30 }
 0x174   :  { %2500 = vmatprep.subr.bf16.mxu1 %v3547_v54 }
 0x175   :  { %2460 = vmatpush2.bf16.msra.mxu0 %v3497_v36 }
 0x176   :  { %2461 = vmatprep.subr.bf16.mxu0 %v3502_v38 }
 0x177   :  { %2501 = vmatpush2.bf16.msra.mxu1 %v3545_v31 }
 0x178   :  { %2502 = vmatprep.subr.bf16.mxu1 %v3550_v59  ;;  %v3567_v59 = vld [vmem:[%s3886_s5 + $0x8] sm:$0xff]  }
 0x179   :  { %2462 = vmatpush2.bf16.msra.mxu0 %v3500_v44 }
 0x17a   :  { %2463 = vmatprep.subr.bf16.mxu0 %v3505_v62 }
 0x17b   :  { %2503 = vmatpush2.bf16.msra.mxu1 %v3548_v45  ;;  %v3568_v45 = vld [vmem:[%s3886_s5 + $0x40] sm:$0xff]  }
 0x17c   :  { %2504 = vmatprep.subr.bf16.mxu1 %v3553_v4 }
 0x17d   :  { %2464 = vmatpush2.bf16.msra.mxu0 %v3503_v51 }
 0x17e   :  { %3040 = vmatprep.subr.bf16.mxu0 %v3554_v18 }
 0x17f   :  { %2505 = vmatpush2.bf16.msra.mxu1 %v3551_v6 }
 0x180   :  { %v1817_v56 = vpop.f32.mrf.mxu0 }
 0x181   :  { %v1858_v32 = vpop.f32.mrf.mxu1  ;;  %v1818_v53 = vadd.f32 %v1817_v56, %v1777_v55 }
 0x182   :  { %v1819_v57 = vpop.f32.mrf.mxu0 }
 0x183   :  { %v1860_v49 = vpop.f32.mrf.mxu1  ;;  %v1859_v60 = vadd.f32 %v1858_v32, %v1818_v53  ;;  %v1820_v61 = vadd.f32 %v1819_v57, %v1779_v58 }
 0x184   :  { %v1821_v63 = vpop.f32.mrf.mxu0 }
 0x185   :  { %v1862_v48 = vpop.f32.mrf.mxu1  ;;  %v1861_v0 = vadd.f32 %v1860_v49, %v1820_v61  ;;  %v2029_v46 = vmax.f32 %v1859_v60, 0.0  ;;  %v3566_v49 = vld [vmem:[%s3886_s5 + $0x48] sm:$0xff]   ;;  %v3569_v63 = vld [vmem:[%s3886_s5] sm:$0xff]  }
 0x186   :  { %v1822_v1 = vpop.f32.mrf.mxu0 }
 0x187   :  { %v1863_v2 = vpop.f32.mrf.mxu1  ;;  %v2030_v5 = vmax.f32 %v1861_v0, 0.0  ;;  %v2033_v7 = vpack.c.bf16 %v2029_v46, %v2029_v46  ;;  %v2101_v0 = vld [vmem:[#allocation7] sm:$0x3] }
 0x188   :  { %v2106_v46 = vrot.slane %v2101_v0, %v403_v40  ;;  %v2110_v1 = vrot.slane %v2101_v0, %v407_v42 }
 0x189   :  { %v2034_v50 = vpack.c.bf16 %v2030_v5, %v2030_v5 }
 0x18b   :  { %2465 = vmatprep.mubr.bf16.mxu0 %v2034_v50 }
 0x18c   :  { %2466 = vmatmul.mubr.bf16.vlgmr.msra.gmra.mxu0 %v2033_v7 }
 0x18d   :  { %3041 = vmatpush3.bf16.msra.mxu0 %v3555_v19 }
 0x18e   :  { %3042 = vmatprep.subr.bf16.mxu0 %v3556_v20 }
 0x191   :  { %3043 = vmatpush3.bf16.msra.mxu0 %v3557_v21 }
 0x192   :  { %3044 = vmatprep.subr.bf16.mxu0 %v3558_v22 }
 0x195   :  { %3045 = vmatpush3.bf16.msra.mxu0 %v3559_v23 }
 0x196   :  { %3046 = vmatprep.subr.bf16.mxu0 %v3560_v24 }
 0x199   :  { %3047 = vmatpush3.bf16.msra.mxu0 %v3561_v25 }
 0x19a   :  { %3048 = vmatprep.subr.bf16.mxu0 %v3562_v26 }
 0x19d   :  { %3049 = vmatpush3.bf16.msra.mxu0 %v3563_v27 }
 0x19e   :  { %3050 = vmatprep.subr.bf16.mxu0 %v3564_v28 }
 0x1a1   :  { %3051 = vmatpush3.bf16.msra.mxu0 %v3565_v29 }
 0x1a2   :  { %3052 = vmatprep.subr.bf16.mxu0 %v3566_v49 }
 0x1a5   :  { %3053 = vmatpush3.bf16.msra.mxu0 %v3567_v59 }
 0x1a6   :  { %3054 = vmatprep.subr.bf16.mxu0 %v3568_v45 }
 0x1a9   :  { %3055 = vmatpush3.bf16.msra.mxu0 %v3569_v63 }
 0x1c0   :  { %v1899_v8 = vpop.f32.mrf.mxu0 }
 0x1c1   :  { %v1940_v9 = vpop.f32.mrf.mxu1  ;;  %v1900_v36 = vadd.f32 %v1899_v8, %v412_v34 }
 0x1c2   :  { %v1901_v10 = vpop.f32.mrf.mxu0 }
 0x1c3   :  { %v1942_v11 = vpop.f32.mrf.mxu1  ;;  %v1902_v37 = vadd.f32 %v1901_v10, %v416_v35  ;;  %v1941_v38 = vadd.f32 %v1940_v9, %v1900_v36 }
 0x1c4   :  { %v1903_v12 = vpop.f32.mrf.mxu0 }
 0x1c5   :  { %v1944_v13 = vpop.f32.mrf.mxu1  ;;  %v1943_v47 = vadd.f32 %v1942_v11, %v1902_v37 }
 0x1c6   :  { %v1904_v14 = vpop.f32.mrf.mxu0 }
 0x1c7   :  { %v1945_v15 = vpop.f32.mrf.mxu1 }
 0x1c8   :  { %v3023_v15 = vld [vmem:[#allocation9] ss:$0 sm:$0xff] }
 0x200   :  { %v1981_v39 = vpop.f32.mrf.mxu0 }
 0x201   :  { %v2022_v44 = vpop.f32.mrf.mxu1  ;;  %v1982_v62 = vadd.f32 %v1981_v39, %v1941_v38 }
 0x202   :  { %v1983_v3 = vpop.f32.mrf.mxu0 }
 0x203   :  { %v2024_v16 = vpop.f32.mrf.mxu1  ;;  %v2023_v51 = vadd.f32 %v2022_v44, %v1982_v62  ;;  %v1984_v17 = vadd.f32 %v1983_v3, %v1943_v47 }
 0x204   :  { %v1985_v52 = vpop.f32.mrf.mxu0 }
 0x205   :  { %v2026_v54 = vpop.f32.mrf.mxu1  ;;  %v2025_v55 = vadd.f32 %v2024_v16, %v1984_v17  ;;  %v2031_v31 = vmax.f32 %v2023_v51, 0.0 }
 0x206   :  { %v1986_v56 = vpop.f32.mrf.mxu0 }
 0x207   :  { %v2027_v32 = vpop.f32.mrf.mxu1  ;;  %v2032_v58 = vmax.f32 %v2025_v55, 0.0  ;;  %v2035_v41 = vpack.c.bf16 %v2031_v31, %v2031_v31 }
 0x209   :  { %v2036_v53 = vpack.c.bf16 %v2032_v58, %v2032_v58 }
 0x20b   :  { %2506 = vmatprep.mubr.bf16.mxu1 %v2036_v53 }
 0x20c   :  { %2507 = vmatmul.mubr.bf16.vlgmr.msra.gmra.mxu1 %v2035_v41 }
 0x24c   :  { %v2467_v57 = vpop.f32.mrf.mxu0 }
 0x24d   :  { %v2468_v2 = vadd.f32 %v2467_v57, %v2106_v46 }
 0x24e   :  { %v2469_v60 = vpop.f32.mrf.mxu0 }
 0x24f   :  { %v2470_v5 = vadd.f32 %v2469_v60, %v2110_v1 }
 0x250   :  { %v2471_v61 = vpop.f32.mrf.mxu0 }
 0x252   :  { %v2472_v48 = vpop.f32.mrf.mxu0 }
 0x2cc   :  { %v2508_v4 = vpop.f32.mrf.mxu1 }
 0x2cd   :  { %v2509_v6 = vadd.f32 %v2508_v4, %v2468_v2 }
 0x2ce   :  { %v2510_v50 = vpop.f32.mrf.mxu1 }
 0x2cf   :  { %v2511_v7 = vadd.f32 %v2510_v50, %v2470_v5  ;;  %v2515_v8 = vmax.f32 %v2509_v6, 0.0 }
 0x2d0   :  { %v2512_v9 = vpop.f32.mrf.mxu1 }
 0x2d1   :  { %v2516_v10 = vmax.f32 %v2511_v7, 0.0  ;;  %v2517_v13 = vpack.c.bf16 %v2515_v8, %v2515_v8 }
 0x2d2   :  { %v2513_v11 = vpop.f32.mrf.mxu1 }
 0x2d3   :  { %v2518_v12 = vpack.c.bf16 %v2516_v10, %v2516_v10 }
 0x2d5   :  { %2686 = vmatprep.mubr.bf16.mxu0 %v2518_v12 }
 0x2d6   :  { %2687 = vmatmul.mubr.bf16.vlgmr.msra.gmra.mxu0 %v2517_v13 }
 0x396   :  { %v3056_v14 = vpop.f32.mrf.mxu0 }
 0x398   :  { %v3057_v40 = vpop.f32.mrf.mxu0 }
 0x399   :  { %v3058_v18 = vadd.f32 %v3057_v40, %v3056_v14 }
 0x39a   :  { %v3059_v43 = vpop.f32.mrf.mxu0 }
 0x39b   :  { %v2689_v42 = vadd.f32 %v3058_v18, %v3023_v15 }
 0x39c   :  { %v3060_v19 = vpop.f32.mrf.mxu0 }
 0x39d   :  { %2695 = vst.msk [vmem:[%s3888_s7] sm:$0x3] %vm2694_vm0, %v2689_v42 }
 0x39e   :  { %2700 = vsyncpa [#allocation3], 1 }
 0x39f   :  { %2701 = vsyncpa [#allocation5], 1 }
 0x3a0   :  { %2702 = vsyncpa [#allocation8], 1 }

// kernel: pointnet_encoder.9
= control target key start
LH: loop header
LB: loop body
LE: loop exit
PB: predicated region body
PF: predicated region fallthrough
CT: control target
= control target key end

     0   :  { %s2413_s24 = smov 0   ;;  %s2415_s25 = smov 0   ;;  %s3023_s0 = inlined_call_operand.vmem [shape: f32[2,128,3], index: 0, kind: input, shape index: {}]   ;;  %s3024_s1 = inlined_call_operand.vmem [shape: f32[2,3,64], index: 1, kind: input, shape index: {}]   ;;  %s3025_s2 = inlined_call_operand.vmem [shape: f32[1,64], index: 2, kind: input, shape index: {}]   ;;  %s3026_s3 = inlined_call_operand.vmem [shape: bf16[2,64,128], index: 3, kind: input, shape index: {}]   ;;  %s3027_s4 = inlined_call_operand.vmem [shape: f32[1,128], index: 4, kind: input, shape index: {}]   ;;  %s3028_s5 = inlined_call_operand.vmem [shape: bf16[128,1024], index: 5, kind: input, shape index: {}]   ;;  %s3029_s6 = inlined_call_operand.vmem [shape: f32[1,1024], index: 6, kind: input, shape index: {}]   ;;  %s3030_s7 = inlined_call_operand.vmem [shape: f32[2,1,1024], index: 7, kind: output, shape index: {}]  }
   0x1   :  { %s2417_s26 = smov 0  }
   0x2 LB: > { %s29_s27 = sadd.s32 1, %s2363_s25  ;;  %p2147_p0 = scmp.ge.s32.totalorder %s2367_s26, 1  ;;  %s2367_s26 = sphi %s2417_s26, %s17_s26   ;;  %s2363_s25 = sphi %s2415_s25, %s3032_s25   ;;  %s2359_s24 = sphi %s2413_s24, %s3031_s24  }
   0x3   : > { %p31_p1 = scmp.ge.s32.totalorder %s29_s27, 2  ;;  %p275_p2 = scmp.lt.s32.totalorder %s2367_s26, 3 }
   0x5   : > { %s3034_s27 = smov (%p31_p1, %s29_s27), 0  ;;  %p276_p3 = pnand %p2147_p0, %p275_p2 }
   0x6   : > { %p320_p4 = scmp.lt.s32.totalorder (!%p276_p3), %s2359_s24, 1 }
   0x7   : > { %279 = sbr.rel (%p276_p3) target bundleno = 791 (0x317), region = 48 }
   0xc   : > { %v2369_v0 = vmov 1   ;;  %v2370_v1 = vmov 0   ;;  %s3036_s24 = smov (!%p320_p4, %s2359_s24), 1  ;;  %v2371_v8 = vmov 2   ;;  %v453_v25 = vlaneseq  ;;  %v960_v36 = vld [vmem:[%s3028_s5 + $0x1c0] sm:$0xff]  ;;  %v2503_v38 = vld [vmem:[%s3028_s5 + $0x1c8] sm:$0xff] }
   0xd   : > { %2317 = vset.pattern.permute.xlu1 %v2369_v0  ;;  %2316 = vset.pattern.permute.xlu0 %v2370_v1  ;;  %s2234_s28 = sshll.u32 %s3036_s24, 7  ;;  %s2235_s9 = sshll.u32 %s3036_s24, 5  ;;  %v964_v37 = vld [vmem:[%s3028_s5 + $0x1e0] sm:$0xff]  ;;  %v2508_v41 = vld [vmem:[%s3028_s5 + $0x1e8] sm:$0xff]  ;;  %vm758_vm0 = vcmask 523264  }
   0xe   : > { %1320 = vmatprep.mubr.bf16.mxu1 %v2370_v1  ;;  %s2440_s8 = scalar_lea.vmem %s3023_s0, %s2234_s28  ;;  %s337_s12 = scalar_lea.vmem %s3026_s3, %s2235_s9  ;;  %v2486_v28 = vshrl.u32 %v453_v25, 7  ;;  %v2225_v40 = vcombine.high %v960_v36, %v964_v37  ;;  %v2224_v42 = vcombine.low %v960_v36, %v964_v37  ;;  %v952_v43 = vld [vmem:[%s3028_s5 + $0x180] sm:$0xff]  ;;  %v2227_v47 = vcombine.high %v2503_v38, %v2508_v41 }
   0xf   : > { %v355_v2 = vld [vmem:[%s2440_s8] sm:$0xff]  ;;  %v356_v3 = vld [vmem:[%s2440_s8 + $0x8] sm:$0xff]  ;;  %v357_v4 = vld [vmem:[%s2440_s8 + $0x10] sm:$0xff]  ;;  %s2150_s13 = sshll.u32 %s3036_s24, 2  ;;  %s2153_s18 = sshll.u32 %s3036_s24, 3 }
  0x10   : > { %474 = vperm.xlu1 %2317, %v355_v2   ;;  %375 = vperm.xlu0 %2316, %v355_v2   ;;  %v358_v5 = vld [vmem:[%s2440_s8 + $0x18] sm:$0xff]  ;;  %v360_v6 = vld [vmem:[%s2440_s8 + $0x28] sm:$0xff]  ;;  %v361_v9 = vld [vmem:[%s2440_s8 + $0x30] sm:$0xff]  ;;  %s332_s16 = scalar_lea.vmem %s3024_s1, %s2150_s13  ;;  %v455_v31 = vsub.s32 0, %v2486_v28  ;;  %v539_v32 = vsub.s32 1, %v2486_v28  ;;  %v639_v34 = vsub.s32 2, %v2486_v28  ;;  %s341_s21 = scalar_lea.vmem %s3030_s7, %s2153_s18 }
  0x11   : > { %v2341_v7 = vld [vmem:[%s337_s12 + $0x18] sm:$0xff]   ;;  %v2342_v10 = vld [vmem:[%s337_s12 + $0x10] sm:$0xff]   ;;  %v2343_v11 = vld [vmem:[%s337_s12 + $0x8] sm:$0xff]   ;;  %1288 = vmatprep.subr.bf16.mxu1 %v2225_v40 }
  0x12   : > { %2248 = vmatprep.subr.bf16.mxu0 %v2341_v7  ;;  %v359_v12 = vld [vmem:[%s2440_s8 + $0x20] sm:$0xff]  ;;  %v362_v14 = vld [vmem:[%s2440_s8 + $0x38] sm:$0xff]  ;;  %v364_v15 = vld [vmem:[%s2440_s8 + $0x48] sm:$0xff]  ;;  %1289 = vmatpush1.bf16.msra.mxu1 %v2224_v42 }
  0x13   : > { %2249 = vmatpush3.bf16.msra.mxu0 %v2341_v7  ;;  %v2344_v13 = vld [vmem:[%s337_s12] sm:$0xff]   ;;  %v365_v16 = vld [vmem:[%s2440_s8 + $0x50] sm:$0xff]  ;;  %v368_v18 = vld [vmem:[%s2440_s8 + $0x68] sm:$0xff] }
  0x14   : > { %478 = vperm.xlu1 %2317, %v356_v3   ;;  %380 = vperm.xlu0 %2316, %v356_v3   ;;  %v367_v17 = vld [vmem:[%s2440_s8 + $0x60] sm:$0xff]  ;;  %v369_v20 = vld [vmem:[%s2440_s8 + $0x70] sm:$0xff]  ;;  %v366_v21 = vld [vmem:[%s2440_s8 + $0x58] sm:$0xff] }
  0x15   : > { %2250 = vmatprep.subr.bf16.mxu0 %v2342_v10  ;;  %v363_v19 = vld [vmem:[%s2440_s8 + $0x40] sm:$0xff]  ;;  %v370_v22 = vld [vmem:[%s2440_s8 + $0x78] sm:$0xff]  ;;  %v953_v40 = vld [vmem:[%s3028_s5 + $0x188] sm:$0xff] }
  0x16   : > { %v371_v33 = vld [vmem:[%s332_s16] sm:$0x7]  ;;  %v957_v42 = vld [vmem:[%s3028_s5 + $0x1a8] sm:$0xff] }
  0x17   : > { %2251 = vmatpush3.bf16.msra.mxu0 %v2342_v10  ;;  %v956_v44 = vld [vmem:[%s3028_s5 + $0x1a0] sm:$0xff]  ;;  %v2518_v45 = vrot.slane %v371_v33, %v455_v31  ;;  %v2522_v46 = vrot.slane %v371_v33, %v539_v32  ;;  %v2534_v51 = vrot.slane %v371_v33, %v639_v34 }
  0x18   : > { %2318 = vset.pattern.permute.xlu1 %v2370_v1  ;;  %385 = vperm.xlu0 %2316, %v357_v4   ;;  %v2217_v48 = vcombine.high %v952_v43, %v956_v44  ;;  %v944_v49 = vld [vmem:[%s3028_s5 + $0x140] sm:$0xff]  ;;  %v2216_v53 = vcombine.low %v952_v43, %v956_v44 }
  0x19   : > { %390 = vperm.xlu1 %2318, %v358_v5   ;;  %2252 = vmatprep.subr.bf16.mxu0 %v2343_v11  ;;  %v948_v50 = vld [vmem:[%s3028_s5 + $0x160] sm:$0xff] }
  0x1a   : > { %1290 = vmatprep.subr.bf16.mxu1 %v2217_v48  ;;  %v2209_v56 = vcombine.high %v944_v49, %v948_v50  ;;  %v936_v60 = vld [vmem:[%s3028_s5 + $0x100] sm:$0xff] }
  0x1b   : > { %2253 = vmatpush3.bf16.msra.mxu0 %v2343_v11  ;;  %v940_v61 = vld [vmem:[%s3028_s5 + $0x120] sm:$0xff]  ;;  %1291 = vmatpush1.bf16.msra.mxu1 %v2216_v53  ;;  %v2219_v53 = vcombine.high %v953_v40, %v957_v42 }
  0x1c   : > { %2319 = vset.pattern.permute.xlu0 %v2369_v0  ;;  %2254 = vmatprep.subr.bf16.mxu0 %v2344_v13 }
  0x1d   : > { %2320 = vset.pattern.permute.xlu1 %v2369_v0  ;;  %482 = vperm.xlu0 %2319, %v357_v4  }
  0x1e   : > { %486 = vperm.xlu1 %2320, %v358_v5   ;;  %1292 = vmatprep.subr.bf16.mxu1 %v2209_v56  ;;  %v949_v56 = vld [vmem:[%s3028_s5 + $0x168] sm:$0xff] }
  0x1f   : > { %2255 = vmatpush3.bf16.msra.mxu0 %v2344_v13  ;;  %v2200_v13 = vcombine.low %v936_v60, %v940_v61 }
  0x20   : > { %1401 = vmatprep.subr.bf16.mxu0 %v2227_v47 }
  0x21   : > { %494 = vperm.xlu0 %2319, %v360_v6  }
  0x22   : > { %2321 = vset.pattern.permute.xlu1 %v2371_v8 }
  0x23   : > { %574 = vperm.xlu1 %2321, %v355_v2  }
  0x25   : > { %498 = vperm.xlu0 %2319, %v361_v9  }
  0x27   : > { %582 = vperm.xlu1 %2321, %v357_v4  }
  0x29   : > { %2325 = vset.pattern.permute.xlu0 %v2371_v8 }
  0x2a   : > { %578 = vperm.xlu0 %2325, %v356_v3   ;;  %v2201_v3 = vcombine.high %v936_v60, %v940_v61 }
  0x2b   : > { %586 = vperm.xlu1 %2321, %v358_v5  }
  0x2e   : > { %590 = vperm.xlu0 %2325, %v359_v12  }
  0x2f   : > { %2322 = vset.pattern.permute.xlu1 %v2370_v1 }
  0x30   : > { %400 = vperm.xlu1 %2322, %v360_v6  }
  0x32   : > { %602 = vperm.xlu0 %2325, %v362_v14  }
  0x34   : > { %2323 = vset.pattern.permute.xlu1 %v2369_v0 }
  0x35   : > { %490 = vperm.xlu1 %2323, %v359_v12  }
  0x36   : > { %610 = vperm.xlu0 %2325, %v364_v15  }
  0x39   : > { %2324 = vset.pattern.permute.xlu1 %v2370_v1 }
  0x3a   : > { %405 = vperm.xlu1 %2324, %v361_v9   ;;  %2333 = vset.pattern.permute.xlu0 %v2370_v1 }
  0x3b   : > { %395 = vperm.xlu0 %2333, %v359_v12  }
  0x3e   : > { %410 = vperm.xlu1 %2324, %v362_v14  }
  0x3f   : > { %420 = vperm.xlu0 %2333, %v364_v15  }
  0x42   : > { %2326 = vset.pattern.permute.xlu1 %v2369_v0 }
  0x43   : > { %502 = vperm.xlu1 %2326, %v362_v14   ;;  %425 = vperm.xlu0 %2333, %v365_v16  }
  0x47   : > { %2327 = vset.pattern.permute.xlu1 %v2371_v8  ;;  %435 = vperm.xlu0 %2333, %v367_v17  }
  0x48   : > { %594 = vperm.xlu1 %2327, %v360_v6  }
  0x4b   : > { %2334 = vset.pattern.permute.xlu0 %v2369_v0 }
  0x4c   : > { %598 = vperm.xlu1 %2327, %v361_v9   ;;  %514 = vperm.xlu0 %2334, %v365_v16   ;;  %v932_v9 = vld [vmem:[%s3028_s5 + $0xe0] sm:$0xff] }
  0x50   : > { %2328 = vset.pattern.permute.xlu1 %v2370_v1  ;;  %526 = vperm.xlu0 %2334, %v368_v18  }
  0x51   : > { %415 = vperm.xlu1 %2328, %v363_v19  }
  0x54   : > { %530 = vperm.xlu0 %2334, %v369_v20  }
  0x55   : > { %2329 = vset.pattern.permute.xlu1 %v2369_v0 }
  0x56   : > { %506 = vperm.xlu1 %2329, %v363_v19  }
  0x58   : > { %2339 = vset.pattern.permute.xlu0 %v2371_v8 }
  0x59   : > { %622 = vperm.xlu0 %2339, %v367_v17  }
  0x5a   : > { %510 = vperm.xlu1 %2329, %v364_v15   ;;  %v2565_v15 = vld [vmem:[%s3025_s2] ss:$0 sm:$0xff] }
  0x5d   : > { %634 = vperm.xlu0 %2339, %v370_v22  }
  0x5e   : > { %2330 = vset.pattern.permute.xlu1 %v2370_v1 }
  0x5f   : > { %430 = vperm.xlu1 %2330, %v366_v21  }
  0x63   : > { %2331 = vset.pattern.permute.xlu1 %v2369_v0 }
  0x64   : > { %518 = vperm.xlu1 %2331, %v366_v21  }
  0x68   : > { %2332 = vset.pattern.permute.xlu1 %v2371_v8 }
  0x69   : > { %606 = vperm.xlu1 %2332, %v363_v19  }
  0x6d   : > { %614 = vperm.xlu1 %2332, %v365_v16  }
  0x71   : > { %618 = vperm.xlu1 %2332, %v366_v21  }
  0x75   : > { %2335 = vset.pattern.permute.xlu1 %v2370_v1 }
  0x76   : > { %440 = vperm.xlu1 %2335, %v368_v18  }
  0x7a   : > { %2336 = vset.pattern.permute.xlu1 %v2369_v0 }
  0x7b   : > { %522 = vperm.xlu1 %2336, %v367_v17  }
  0x7f   : > { %2337 = vset.pattern.permute.xlu1 %v2370_v1 }
  0x80   : > { %445 = vperm.xlu1 %2337, %v369_v20  }
  0x84   : > { %450 = vperm.xlu1 %2337, %v370_v22  }
  0x88   : > { %2338 = vset.pattern.permute.xlu1 %v2369_v0  ;;  %v2208_v0 = vcombine.low %v944_v49, %v948_v50  ;;  %v2226_v49 = vcombine.low %v2503_v38, %v2508_v41  ;;  %v937_v41 = vld [vmem:[%s3028_s5 + $0x108] sm:$0xff] }
  0x89   : > { %534 = vperm.xlu1 %2338, %v370_v22  }
  0x8a   : > { %1293 = vmatpush1.bf16.msra.mxu1 %v2208_v0 }
  0x8b   : > { %v475_v23 = vpop.permute.xlu1 %474  ;;  %v376_v24 = vpop.permute.xlu0 %375  ;;  %1294 = vmatprep.subr.bf16.mxu1 %v2201_v3  ;;  %v933_v3 = vld [vmem:[%s3028_s5 + $0xe8] sm:$0xff] }
  0x8c   : > { %v541_v57 = vmul.f32 %v2522_v46, %v475_v23  ;;  %v457_v58 = vmul.f32 %v2518_v45, %v376_v24 }
  0x8d   : > { %2340 = vset.pattern.permute.xlu1 %v2371_v8  ;;  %v928_v8 = vld [vmem:[%s3028_s5 + $0xc0] sm:$0xff] }
  0x8e   : > { %626 = vperm.xlu1 %2340, %v368_v18   ;;  %v557_v4 = vadd.f32 %v541_v57, %v457_v58  ;;  %v2193_v18 = vcombine.high %v928_v8, %v932_v9  ;;  %1295 = vmatpush1.bf16.msra.mxu1 %v2200_v13  ;;  %v2218_v58 = vcombine.low %v953_v40, %v957_v42 }
  0x8f   : > { %v479_v26 = vpop.permute.xlu1 %478  ;;  %v381_v27 = vpop.permute.xlu0 %380 }
  0x90   : > { %v542_v5 = vmul.f32 %v2522_v46, %v479_v26  ;;  %v458_v6 = vmul.f32 %v2518_v45, %v381_v27  ;;  %v2192_v26 = vcombine.low %v928_v8, %v932_v9  ;;  %1296 = vmatprep.subr.bf16.mxu1 %v2193_v18 }
  0x92   : > { %630 = vperm.xlu1 %2340, %v369_v20   ;;  %v558_v19 = vadd.f32 %v542_v5, %v458_v6  ;;  %1297 = vmatpush1.bf16.msra.mxu1 %v2192_v26 }
  0x93   : > { %v386_v29 = vpop.permute.xlu0 %385 }
  0x94   : > { %v391_v30 = vpop.permute.xlu1 %390  ;;  %v459_v54 = vmul.f32 %v2518_v45, %v386_v29 }
  0x95   : > { %v460_v14 = vmul.f32 %v2518_v45, %v391_v30 }
  0x98   : > { %v483_v35 = vpop.permute.xlu0 %482 }
  0x99   : > { %v487_v39 = vpop.permute.xlu1 %486  ;;  %v543_v55 = vmul.f32 %v2522_v46, %v483_v35 }
  0x9a   : > { %v544_v10 = vmul.f32 %v2522_v46, %v487_v39 }
  0x9b   : > { %v559_v2 = vadd.f32 %v543_v55, %v459_v54  ;;  %v945_v55 = vld [vmem:[%s3028_s5 + $0x148] sm:$0xff] }
  0x9c   : > { %v2536_v52 = vpop.permute.xlu0 %494  ;;  %v560_v22 = vadd.f32 %v544_v10, %v460_v14  ;;  %v2211_v38 = vcombine.high %v945_v55, %v949_v56  ;;  %v2210_v61 = vcombine.low %v945_v55, %v949_v56 }
  0x9d   : > { %v546_v14 = vmul.f32 %v2522_v46, %v2536_v52 }
  0x9e   : > { %v575_v59 = vpop.permute.xlu1 %574 }
  0x9f   : > { %v641_v62 = vmul.f32 %v2534_v51, %v575_v59  ;;  %v941_v59 = vld [vmem:[%s3028_s5 + $0x128] sm:$0xff] }
  0xa0   : > { %v2549_v63 = vpop.permute.xlu0 %498  ;;  %v2203_v0 = vcombine.high %v937_v41, %v941_v59  ;;  %v2202_v6 = vcombine.low %v937_v41, %v941_v59 }
  0xa1   : > { %v657_v12 = vadd.f32 %v641_v62, %v557_v4 }
  0xa2   : > { %v583_v7 = vpop.permute.xlu1 %582 }
  0xa3   : > { %v643_v11 = vmul.f32 %v2534_v51, %v583_v7  ;;  %v679_v25 = vadd.f32 %v2565_v15, %v657_v12 }
  0xa5   : > { %v659_v16 = vadd.f32 %v643_v11, %v559_v2  ;;  %v579_v17 = vpop.permute.xlu0 %578  ;;  %v695_v37 = vmax.f32 %v679_v25, 0.0  ;;  %v929_v2 = vld [vmem:[%s3028_s5 + $0xc8] sm:$0xff] }
  0xa6   : > { %v642_v20 = vmul.f32 %v2534_v51, %v579_v17  ;;  %v587_v21 = vpop.permute.xlu1 %586  ;;  %v2195_v7 = vcombine.high %v929_v2, %v933_v3  ;;  %v2194_v12 = vcombine.low %v929_v2, %v933_v3 }
  0xa7   : > { %v644_v23 = vmul.f32 %v2534_v51, %v587_v21  ;;  %v681_v27 = vadd.f32 %v2565_v15, %v659_v16 }
  0xa8   : > { %v658_v24 = vadd.f32 %v642_v20, %v558_v19 }
  0xa9   : > { %v660_v29 = vadd.f32 %v644_v23, %v560_v22  ;;  %v591_v30 = vpop.permute.xlu0 %590  ;;  %v697_v43 = vmax.f32 %v681_v27, 0.0  ;;  %v547_v22 = vmul.f32 %v2522_v46, %v2549_v63 }
  0xaa   : > { %v680_v33 = vadd.f32 %v2565_v15, %v658_v24  ;;  %v645_v9 = vmul.f32 %v2534_v51, %v591_v30 }
  0xab   : > { %v682_v35 = vadd.f32 %v2565_v15, %v660_v29  ;;  %v401_v36 = vpop.permute.xlu1 %400 }
  0xac   : > { %v696_v39 = vmax.f32 %v680_v33, 0.0  ;;  %v462_v16 = vmul.f32 %v2518_v45, %v401_v36 }
  0xad   : > { %v698_v44 = vmax.f32 %v682_v35, 0.0  ;;  %v603_v47 = vpop.permute.xlu0 %602 }
  0xae   : > { %v711_v48 = vpack.c.bf16 %v696_v39, %v695_v37  ;;  %v648_v18 = vmul.f32 %v2534_v51, %v603_v47  ;;  %v562_v23 = vadd.f32 %v546_v14, %v462_v16 }
  0xaf   : > { %v712_v50 = vpack.c.bf16 %v698_v44, %v697_v43 }
  0xb0   : > { %v491_v54 = vpop.permute.xlu1 %490  ;;  %2256 = vmatprep.mubr.msk.bf16.mxu0 %vm758_vm0, %v711_v48 }
  0xb1   : > { %2257 = vmatmul.mubr.msk.bf16.vlgmr.msra.gmra.mxu0 %vm758_vm0, %v712_v50  ;;  %v2589_v57 = vpop.permute.xlu0 %610  ;;  %v545_v8 = vmul.f32 %v2522_v46, %v491_v54 }
  0xb2   : > { %1402 = vmatpush1.bf16.msra.mxu0 %v2226_v49  ;;  %v650_v41 = vmul.f32 %v2534_v51, %v2589_v57 }
  0xb3   : > { %1403 = vmatprep.subr.bf16.mxu0 %v2219_v53 }
  0xb5   : > { %v406_v60 = vpop.permute.xlu1 %405 }
  0xb6   : > { %1404 = vmatpush1.bf16.msra.mxu0 %v2218_v58  ;;  %v396_v62 = vpop.permute.xlu0 %395  ;;  %v463_v24 = vmul.f32 %v2518_v45, %v406_v60 }
  0xb7   : > { %1405 = vmatprep.subr.bf16.mxu0 %v2211_v38  ;;  %v461_v5 = vmul.f32 %v2518_v45, %v396_v62 }
  0xb8   : > { %v563_v30 = vadd.f32 %v547_v22, %v463_v24 }
  0xb9   : > { %v411_v4 = vpop.permute.xlu1 %410  ;;  %v561_v10 = vadd.f32 %v545_v8, %v461_v5 }
  0xba   : > { %1406 = vmatpush1.bf16.msra.mxu0 %v2210_v61  ;;  %v464_v17 = vmul.f32 %v2518_v45, %v411_v4  ;;  %v421_v49 = vpop.permute.xlu0 %420 }
  0xbb   : > { %1407 = vmatprep.subr.bf16.mxu0 %v2203_v0  ;;  %v661_v19 = vadd.f32 %v645_v9, %v561_v10  ;;  %v466_v38 = vmul.f32 %v2518_v45, %v421_v49 }
  0xbd   : > { %v683_v52 = vadd.f32 %v2565_v15, %v661_v19 }
  0xbe   : > { %v503_v11 = vpop.permute.xlu1 %502  ;;  %1408 = vmatpush1.bf16.msra.mxu0 %v2202_v6  ;;  %v426_v53 = vpop.permute.xlu0 %425 }
  0xbf   : > { %v548_v13 = vmul.f32 %v2522_v46, %v503_v11  ;;  %1409 = vmatprep.subr.bf16.mxu0 %v2195_v7  ;;  %v699_v36 = vmax.f32 %v683_v52, 0.0  ;;  %v467_v3 = vmul.f32 %v2518_v45, %v426_v53  ;;  %v924_v52 = vld [vmem:[%s3028_s5 + $0xa0] sm:$0xff] }
  0xc1   : > { %v564_v20 = vadd.f32 %v548_v13, %v464_v17 }
  0xc2   : > { %1410 = vmatpush1.bf16.msra.mxu0 %v2194_v12  ;;  %v2623_v56 = vpop.permute.xlu0 %435 }
  0xc3   : > { %v595_v21 = vpop.permute.xlu1 %594  ;;  %v664_v26 = vadd.f32 %v648_v18, %v564_v20 }
  0xc4   : > { %v646_v25 = vmul.f32 %v2534_v51, %v595_v21 }
  0xc5   : > { %v686_v37 = vadd.f32 %v2565_v15, %v664_v26  ;;  %v921_v26 = vld [vmem:[%s3028_s5 + $0x88] sm:$0xff] }
  0xc6   : > { %v662_v27 = vadd.f32 %v646_v25, %v562_v23  ;;  %v920_v25 = vld [vmem:[%s3028_s5 + $0x80] sm:$0xff] }
  0xc7   : > { %v599_v29 = vpop.permute.xlu1 %598  ;;  %v702_v44 = vmax.f32 %v686_v37, 0.0  ;;  %v515_v61 = vpop.permute.xlu0 %514  ;;  %v2184_v37 = vcombine.low %v920_v25, %v924_v52 }
  0xc8   : > { %v684_v33 = vadd.f32 %v2565_v15, %v662_v27  ;;  %v647_v35 = vmul.f32 %v2534_v51, %v599_v29  ;;  %v551_v4 = vmul.f32 %v2522_v46, %v515_v61  ;;  %v2185_v27 = vcombine.high %v920_v25, %v924_v52  ;;  %v925_v29 = vld [vmem:[%s3028_s5 + $0xa8] sm:$0xff] }
  0xca   : > { %v700_v39 = vmax.f32 %v684_v33, 0.0  ;;  %v663_v63 = vadd.f32 %v647_v35, %v563_v30  ;;  %v567_v57 = vadd.f32 %v551_v4, %v467_v3  ;;  %v2186_v35 = vcombine.low %v921_v26, %v925_v29  ;;  %1298 = vmatprep.subr.bf16.mxu1 %v2185_v27 }
  0xcb   : > { %1299 = vmatpush1.bf16.msra.mxu1 %v2184_v37  ;;  %v527_v49 = vpop.permute.xlu0 %526 }
  0xcc   : > { %v713_v40 = vpack.c.bf16 %v700_v39, %v699_v36  ;;  %v685_v42 = vadd.f32 %v2565_v15, %v663_v63  ;;  %v416_v43 = vpop.permute.xlu1 %415  ;;  %v2187_v36 = vcombine.high %v921_v26, %v925_v29 }
  0xcd   : > { %v465_v0 = vmul.f32 %v2518_v45, %v416_v43  ;;  %v913_v43 = vld [vmem:[%s3028_s5 + $0x48] sm:$0xff] }
  0xce   : > { %v701_v47 = vmax.f32 %v685_v42, 0.0  ;;  %2260 = vmatprep.mubr.msk.bf16.mxu0 %vm758_vm0, %v713_v40  ;;  %1411 = vmatprep.subr.bf16.mxu0 %v2187_v36  ;;  %v912_v40 = vld [vmem:[%s3028_s5 + $0x40] sm:$0xff] }
  0xcf   : > { %v916_v42 = vld [vmem:[%s3028_s5 + $0x60] sm:$0xff]  ;;  %1412 = vmatpush1.bf16.msra.mxu0 %v2186_v35 }
  0xd0   : > { %v714_v48 = vpack.c.bf16 %v702_v44, %v701_v47  ;;  %v2177_v44 = vcombine.high %v912_v40, %v916_v42  ;;  %v917_v47 = vld [vmem:[%s3028_s5 + $0x68] sm:$0xff] }
  0xd1   : > { %v507_v50 = vpop.permute.xlu1 %506  ;;  %v2179_v53 = vcombine.high %v913_v43, %v917_v47 }
  0xd2   : > { %2261 = vmatmul.mubr.msk.bf16.gmra.mxu0 %vm758_vm0, %v714_v48  ;;  %v549_v62 = vmul.f32 %v2522_v46, %v507_v50  ;;  %v2178_v50 = vcombine.low %v913_v43, %v917_v47  ;;  %1300 = vmatprep.subr.bf16.mxu1 %v2177_v44  ;;  %v967_v44 = vld [vmem:[%s3028_s5 + $0x1f8] sm:$0xff] }
  0xd3   : > { %1413 = vmatprep.subr.bf16.mxu0 %v2179_v53 }
  0xd4   : > { %v565_v6 = vadd.f32 %v549_v62, %v465_v0  ;;  %1414 = vmatpush1.bf16.msra.mxu0 %v2178_v50  ;;  %v2718_v50 = vld [vmem:[%s3027_s4] ss:$0 sm:$0xff] }
  0xd5   : > { %v511_v54 = vpop.permute.xlu1 %510 }
  0xd6   : > { %v550_v58 = vmul.f32 %v2522_v46, %v511_v54  ;;  %v2176_v54 = vcombine.low %v912_v40, %v916_v42  ;;  %v966_v40 = vld [vmem:[%s3028_s5 + $0x1f0] sm:$0xff] }
  0xd8   : > { %v566_v59 = vadd.f32 %v550_v58, %v466_v38  ;;  %v904_v58 = vld [vmem:[%s3028_s5] sm:$0xff]  ;;  %1301 = vmatpush1.bf16.msra.mxu1 %v2176_v54 }
  0xd9   : > { %v908_v38 = vld [vmem:[%s3028_s5 + $0x20] sm:$0xff] }
  0xda   : > { %v431_v55 = vpop.permute.xlu1 %430  ;;  %v666_v2 = vadd.f32 %v650_v41, %v566_v59  ;;  %v905_v41 = vld [vmem:[%s3028_s5 + $0x8] sm:$0xff]  ;;  %v2169_v59 = vcombine.high %v904_v58, %v908_v38  ;;  %v2168_v0 = vcombine.low %v904_v58, %v908_v38  ;;  %v954_v38 = vld [vmem:[%s3028_s5 + $0x190] sm:$0xff] }
  0xdb   : > { %v468_v16 = vmul.f32 %v2518_v45, %v431_v55 }
  0xdc   : > { %v688_v8 = vadd.f32 %v2565_v15, %v666_v2  ;;  %1302 = vmatprep.subr.bf16.mxu1 %v2169_v59  ;;  %v531_v2 = vpop.permute.xlu0 %530 }
  0xdd   : > { %1303 = vmatpush1.bf16.msra.mxu1 %v2168_v0 }
  0xde   : > { %v704_v14 = vmax.f32 %v688_v8, 0.0 }
  0xdf   : > { %v519_v60 = vpop.permute.xlu1 %518 }
  0xe0   : > { %v552_v11 = vmul.f32 %v2522_v46, %v519_v60  ;;  %v909_v60 = vld [vmem:[%s3028_s5 + $0x28] sm:$0xff] }
  0xe1   : > { %v2170_v61 = vcombine.low %v905_v41, %v909_v60  ;;  %v2171_v62 = vcombine.high %v905_v41, %v909_v60  ;;  %v958_v60 = vld [vmem:[%s3028_s5 + $0x1b0] sm:$0xff] }
  0xe2   : > { %v568_v20 = vadd.f32 %v552_v11, %v468_v16 }
  0xe3   : > { %1415 = vmatprep.subr.bf16.mxu0 %v2171_v62  ;;  %v959_v62 = vld [vmem:[%s3028_s5 + $0x1b8] sm:$0xff] }
  0xe4   : > { %v607_v5 = vpop.permute.xlu1 %606  ;;  %1416 = vmatpush1.bf16.msra.mxu0 %v2170_v61  ;;  %v955_v61 = vld [vmem:[%s3028_s5 + $0x198] sm:$0xff] }
  0xe5   : > { %v649_v7 = vmul.f32 %v2534_v51, %v607_v5 }
  0xe7   : > { %v665_v9 = vadd.f32 %v649_v7, %v565_v6  ;;  %v623_v6 = vpop.permute.xlu0 %622  ;;  %v469_v7 = vmul.f32 %v2518_v45, %v2623_v56  ;;  %v555_v56 = vmul.f32 %v2522_v46, %v531_v2 }
  0xe8   : > { %v615_v10 = vpop.permute.xlu1 %614 }
  0xe9   : > { %v687_v12 = vadd.f32 %v2565_v15, %v665_v9  ;;  %v651_v13 = vmul.f32 %v2534_v51, %v615_v10  ;;  %v653_v9 = vmul.f32 %v2534_v51, %v623_v6  ;;  %v2742_v6 = vcombine.high %v955_v61, %v959_v62 }
  0xeb   : > { %v703_v17 = vmax.f32 %v687_v12, 0.0  ;;  %v667_v18 = vadd.f32 %v651_v13, %v567_v57  ;;  %v635_v11 = vpop.permute.xlu0 %634  ;;  %v554_v12 = vmul.f32 %v2522_v46, %v527_v49 }
  0xec   : > { %v619_v19 = vpop.permute.xlu1 %618 }
  0xed   : > { %v715_v21 = vpack.c.bf16 %v704_v14, %v703_v17  ;;  %v652_v22 = vmul.f32 %v2534_v51, %v619_v19  ;;  %v689_v23 = vadd.f32 %v2565_v15, %v667_v18  ;;  %v656_v18 = vmul.f32 %v2534_v51, %v635_v11 }
  0xee   : > { %v2220_v11 = vcombine.low %v954_v38, %v958_v60 }
  0xef   : > { %v668_v24 = vadd.f32 %v652_v22, %v568_v20  ;;  %2264 = vmatprep.mubr.msk.bf16.mxu0 %vm758_vm0, %v715_v21  ;;  %v705_v39 = vmax.f32 %v689_v23, 0.0 }
  0xf1   : > { %v690_v30 = vadd.f32 %v2565_v15, %v668_v24  ;;  %v441_v33 = vpop.permute.xlu1 %440 }
  0xf2   : > { %v470_v13 = vmul.f32 %v2518_v45, %v441_v33 }
  0xf3   : > { %v706_v63 = vmax.f32 %v690_v30, 0.0 }
  0xf4   : > { %v570_v20 = vadd.f32 %v554_v12, %v470_v13  ;;  %v2759_v12 = vcombine.low %v955_v61, %v959_v62 }
  0xf5   : > { %v716_v48 = vpack.c.bf16 %v706_v63, %v705_v39 }
  0xf6   : > { %v523_v55 = vpop.permute.xlu1 %522 }
  0xf7   : > { %2265 = vmatmul.mubr.msk.bf16.gmra.mxu0 %vm758_vm0, %v716_v48  ;;  %v553_v5 = vmul.f32 %v2522_v46, %v523_v55 }
  0xf9   : > { %v569_v8 = vadd.f32 %v553_v5, %v469_v7  ;;  %v946_v5 = vld [vmem:[%s3028_s5 + $0x150] sm:$0xff] }
  0xfb   : > { %v446_v3 = vpop.permute.xlu1 %445  ;;  %v669_v16 = vadd.f32 %v653_v9, %v569_v8  ;;  %v950_v8 = vld [vmem:[%s3028_s5 + $0x170] sm:$0xff]  ;;  %v947_v9 = vld [vmem:[%s3028_s5 + $0x158] sm:$0xff] }
  0xfc   : > { %v471_v21 = vmul.f32 %v2518_v45, %v446_v3  ;;  %v2213_v13 = vcombine.high %v946_v5, %v950_v8 }
  0xfd   : > { %v691_v23 = vadd.f32 %v2565_v15, %v669_v16 }
  0xfe   : > { %v571_v26 = vadd.f32 %v555_v56, %v471_v21  ;;  %v2212_v21 = vcombine.low %v946_v5, %v950_v8 }
  0xff   : > { %v451_v4 = vpop.permute.xlu1 %450  ;;  %v707_v30 = vmax.f32 %v691_v23, 0.0 }
 0x100   : > { %v472_v14 = vmul.f32 %v2518_v45, %v451_v4  ;;  %v2221_v4 = vcombine.high %v954_v38, %v958_v60  ;;  %v910_v38 = vld [vmem:[%s3028_s5 + $0x30] sm:$0xff] }
 0x104   : > { %v535_v57 = vpop.permute.xlu1 %534 }
 0x105   : > { %v556_v10 = vmul.f32 %v2522_v46, %v535_v57  ;;  %v951_v57 = vld [vmem:[%s3028_s5 + $0x178] sm:$0xff] }
 0x106   : > { %v2765_v16 = vcombine.high %v947_v9, %v951_v57 }
 0x107   : > { %v572_v17 = vadd.f32 %v556_v10, %v472_v14  ;;  %v938_v14 = vld [vmem:[%s3028_s5 + $0x110] sm:$0xff] }
 0x109   : > { %v627_v19 = vpop.permute.xlu1 %626  ;;  %v672_v24 = vadd.f32 %v656_v18, %v572_v17  ;;  %v942_v18 = vld [vmem:[%s3028_s5 + $0x130] sm:$0xff] }
 0x10a   : > { %v654_v22 = vmul.f32 %v2534_v51, %v627_v19  ;;  %v939_v19 = vld [vmem:[%s3028_s5 + $0x118] sm:$0xff]  ;;  %v2205_v23 = vcombine.high %v938_v14, %v942_v18 }
 0x10b   : > { %v694_v33 = vadd.f32 %v2565_v15, %v672_v24  ;;  %v930_v24 = vld [vmem:[%s3028_s5 + $0xd0] sm:$0xff] }
 0x10c   : > { %v670_v25 = vadd.f32 %v654_v22, %v570_v20  ;;  %v943_v20 = vld [vmem:[%s3028_s5 + $0x138] sm:$0xff]  ;;  %v2779_v22 = vcombine.low %v947_v9, %v951_v57 }
 0x10d   : > { %v631_v52 = vpop.permute.xlu1 %630  ;;  %v710_v37 = vmax.f32 %v694_v33, 0.0 }
 0x10e   : > { %v692_v27 = vadd.f32 %v2565_v15, %v670_v25  ;;  %v655_v29 = vmul.f32 %v2534_v51, %v631_v52  ;;  %v962_v51 = vld [vmem:[%s3028_s5 + $0x1d0] sm:$0xff]  ;;  %v2785_v25 = vcombine.high %v939_v19, %v943_v20 }
 0x10f   : > { %v2228_v42 = vcombine.low %v962_v51, %v966_v40  ;;  %v2229_v43 = vcombine.high %v962_v51, %v966_v40  ;;  %v934_v52 = vld [vmem:[%s3028_s5 + $0xf0] sm:$0xff] }
 0x110   : > { %v708_v35 = vmax.f32 %v692_v27, 0.0  ;;  %v671_v36 = vadd.f32 %v655_v29, %v571_v26  ;;  %v931_v26 = vld [vmem:[%s3028_s5 + $0xd8] sm:$0xff]  ;;  %v2204_v29 = vcombine.low %v938_v14, %v942_v18  ;;  %v2197_v33 = vcombine.high %v930_v24, %v934_v52  ;;  %v914_v40 = vld [vmem:[%s3028_s5 + $0x50] sm:$0xff] }
 0x111   : > { %1514 = vmatprep.subr.bf16.mxu1 %v2229_v43  ;;  %v935_v27 = vld [vmem:[%s3028_s5 + $0xf8] sm:$0xff]  ;;  %v918_v43 = vld [vmem:[%s3028_s5 + $0x70] sm:$0xff] }
 0x112   : > { %v717_v46 = vpack.c.bf16 %v708_v35, %v707_v30  ;;  %v693_v45 = vadd.f32 %v2565_v15, %v671_v36  ;;  %v963_v15 = vld [vmem:[%s3028_s5 + $0x1d8] sm:$0xff]  ;;  %v2801_v30 = vcombine.low %v939_v19, %v943_v20  ;;  %v922_v35 = vld [vmem:[%s3028_s5 + $0x90] sm:$0xff]  ;;  %v2807_v36 = vcombine.high %v931_v26, %v935_v27 }
 0x113   : > { %v2712_v47 = vcombine.high %v963_v15, %v967_v44  ;;  %v2737_v3 = vcombine.low %v963_v15, %v967_v44  ;;  %v915_v15 = vld [vmem:[%s3028_s5 + $0x58] sm:$0xff]  ;;  %v2180_v61 = vcombine.low %v914_v40, %v918_v43 }
 0x114   : > { %v709_v39 = vmax.f32 %v693_v45, 0.0  ;;  %2268 = vmatprep.mubr.msk.bf16.mxu0 %vm758_vm0, %v717_v46  ;;  %v926_v46 = vld [vmem:[%s3028_s5 + $0xb0] sm:$0xff]  ;;  %v923_v45 = vld [vmem:[%s3028_s5 + $0x98] sm:$0xff] }
 0x115   : > { %1627 = vmatprep.subr.bf16.mxu0 %v2712_v47  ;;  %v2189_v51 = vcombine.high %v922_v35, %v926_v46  ;;  %v919_v44 = vld [vmem:[%s3028_s5 + $0x78] sm:$0xff] }
 0x116   : > { %v718_v63 = vpack.c.bf16 %v710_v37, %v709_v39  ;;  %v927_v37 = vld [vmem:[%s3028_s5 + $0xb8] sm:$0xff]  ;;  %v2196_v39 = vcombine.low %v930_v24, %v934_v52  ;;  %v2855_v62 = vcombine.low %v915_v15, %v919_v44 }
 0x118   : > { %2269 = vmatmul.mubr.msk.bf16.gmra.mxu0 %vm758_vm0, %v718_v63  ;;  %v2819_v63 = vcombine.low %v931_v26, %v935_v27 }
 0x119   : > { %1433 = vmatprep.mubr.bf16.mxu0 %v2370_v1 }
 0x171   : > { %v2258_v48 = vpop.f32.mrf.mxu0 }
 0x172   : > { %v826_v7 = vadd.f32 %v2258_v48, %v2718_v50  ;;  %v2188_v48 = vcombine.low %v922_v35, %v926_v46 }
 0x173   : > { %v817_v49 = vpop.f32.mrf.mxu0 }
 0x174   : > { %v818_v54 = vadd.f32 %v2718_v50, %v817_v49  ;;  %v882_v17 = vmax.f32 %v826_v7, 0.0  ;;  %v2837_v49 = vcombine.low %v923_v45, %v927_v37 }
 0x175   : > { %v2259_v53 = vpop.f32.mrf.mxu0 }
 0x176   : > { %v880_v41 = vmax.f32 %v818_v54, 0.0  ;;  %v829_v0 = vadd.f32 %v2259_v53, %v2718_v50  ;;  %v2181_v53 = vcombine.high %v914_v40, %v918_v43  ;;  %v906_v54 = vld [vmem:[%s3028_s5 + $0x10] sm:$0xff] }
 0x177   : > { %v820_v55 = vpop.f32.mrf.mxu0  ;;  %v2172_v9 = vcombine.low %v906_v54, %v910_v38 }
 0x178   : > { %v821_v58 = vadd.f32 %v2718_v50, %v820_v55  ;;  %v883_v10 = vmax.f32 %v829_v0, 0.0  ;;  %v2843_v55 = vcombine.high %v915_v15, %v919_v44  ;;  %v2173_v0 = vcombine.high %v906_v54, %v910_v38 }
 0x17a   : > { %v881_v59 = vmax.f32 %v821_v58, 0.0  ;;  %v2776_v56 = vpack.c.bf16 %v883_v10, %v882_v17 }
 0x17c   : > { %v2735_v2 = vpack.c.bf16 %v881_v59, %v880_v41  ;;  %v907_v41 = vld [vmem:[%s3028_s5 + $0x18] sm:$0xff] }
 0x17d   : > { %v911_v59 = vld [vmem:[%s3028_s5 + $0x38] sm:$0xff] }
 0x17e   : > { %1321 = vmatmul.mubr.bf16.vlgmr.msra.gmra.mxu1 %v2735_v2  ;;  %1434 = vmatmul.mubr.bf16.vlgmr.msra.gmra.mxu0 %v2735_v2  ;;  %v2862_v57 = vcombine.low %v907_v41, %v911_v59 }
 0x17f   : > { %1330 = vmatprep.mubr.bf16.mxu1 %v2370_v1  ;;  %1443 = vmatprep.mubr.bf16.mxu0 %v2370_v1 }
 0x180   : > { %1515 = vmatpush1.bf16.msra.mxu1 %v2228_v42  ;;  %1628 = vmatpush1.bf16.msra.mxu0 %v2737_v3  ;;  %v2825_v42 = vcombine.high %v923_v45, %v927_v37 }
 0x181   : > { %1516 = vmatprep.subr.bf16.mxu1 %v2221_v4  ;;  %1629 = vmatprep.subr.bf16.mxu0 %v2742_v6  ;;  %v2858_v4 = vcombine.high %v907_v41, %v911_v59 }
 0x184   : > { %1517 = vmatpush1.bf16.msra.mxu1 %v2220_v11  ;;  %1630 = vmatpush1.bf16.msra.mxu0 %v2759_v12 }
 0x185   : > { %1518 = vmatprep.subr.bf16.mxu1 %v2213_v13  ;;  %1631 = vmatprep.subr.bf16.mxu0 %v2765_v16 }
 0x186   : > { %1331 = vmatmul.mubr.bf16.gmra.mxu1 %v2776_v56  ;;  %1444 = vmatmul.mubr.bf16.gmra.mxu0 %v2776_v56 }
 0x187   : > { %1340 = vmatprep.mubr.bf16.mxu1 %v2370_v1  ;;  %1453 = vmatprep.mubr.bf16.mxu0 %v2370_v1 }
 0x188   : > { %1519 = vmatpush1.bf16.msra.mxu1 %v2212_v21  ;;  %1632 = vmatpush1.bf16.msra.mxu0 %v2779_v22 }
 0x189   : > { %1520 = vmatprep.subr.bf16.mxu1 %v2205_v23  ;;  %1633 = vmatprep.subr.bf16.mxu0 %v2785_v25 }
 0x18c   : > { %1521 = vmatpush1.bf16.msra.mxu1 %v2204_v29  ;;  %1634 = vmatpush1.bf16.msra.mxu0 %v2801_v30 }
 0x18d   : > { %1522 = vmatprep.subr.bf16.mxu1 %v2197_v33  ;;  %1635 = vmatprep.subr.bf16.mxu0 %v2807_v36 }
 0x190   : > { %1523 = vmatpush1.bf16.msra.mxu1 %v2196_v39  ;;  %1636 = vmatpush1.bf16.msra.mxu0 %v2819_v63 }
 0x191   : > { %1524 = vmatprep.subr.bf16.mxu1 %v2189_v51  ;;  %1637 = vmatprep.subr.bf16.mxu0 %v2825_v42 }
 0x192   : > { %v2262_v58 = vpop.f32.mrf.mxu0 }
 0x193   : > { %v842_v18 = vadd.f32 %v2262_v58, %v2718_v50 }
 0x194   : > { %v833_v60 = vpop.f32.mrf.mxu0  ;;  %1525 = vmatpush1.bf16.msra.mxu1 %v2188_v48  ;;  %1638 = vmatpush1.bf16.msra.mxu0 %v2837_v49 }
 0x195   : > { %1526 = vmatprep.subr.bf16.mxu1 %v2181_v53  ;;  %1639 = vmatprep.subr.bf16.mxu0 %v2843_v55  ;;  %v834_v7 = vadd.f32 %v2718_v50, %v833_v60  ;;  %v886_v20 = vmax.f32 %v842_v18, 0.0 }
 0x196   : > { %v2263_v5 = vpop.f32.mrf.mxu0 }
 0x197   : > { %v884_v11 = vmax.f32 %v834_v7, 0.0  ;;  %v845_v14 = vadd.f32 %v2263_v5, %v2718_v50 }
 0x198   : > { %v836_v8 = vpop.f32.mrf.mxu0  ;;  %1527 = vmatpush1.bf16.msra.mxu1 %v2180_v61  ;;  %1640 = vmatpush1.bf16.msra.mxu0 %v2855_v62 }
 0x199   : > { %v837_v10 = vadd.f32 %v2718_v50, %v836_v8  ;;  %1528 = vmatprep.subr.bf16.mxu1 %v2173_v0  ;;  %1641 = vmatprep.subr.bf16.mxu0 %v2858_v4  ;;  %v887_v19 = vmax.f32 %v845_v14, 0.0 }
 0x19b   : > { %v885_v13 = vmax.f32 %v837_v10, 0.0  ;;  %v2876_v21 = vpack.c.bf16 %v887_v19, %v886_v20 }
 0x19c   : > { %1529 = vmatpush1.bf16.msra.mxu1 %v2172_v9  ;;  %1642 = vmatpush1.bf16.msra.mxu0 %v2862_v57 }
 0x19d   : > { %v2868_v17 = vpack.c.bf16 %v885_v13, %v884_v11  ;;  %2272 = vmatprep.subr.bf16.mxu1 %v2712_v47 }
 0x19f   : > { %1341 = vmatmul.mubr.bf16.gmra.mxu1 %v2868_v17  ;;  %1454 = vmatmul.mubr.bf16.gmra.mxu0 %v2868_v17 }
 0x1a0   : > { %1350 = vmatprep.mubr.bf16.mxu1 %v2370_v1  ;;  %1463 = vmatprep.mubr.bf16.mxu0 %v2370_v1 }
 0x1a7   : > { %1351 = vmatmul.mubr.bf16.gmra.mxu1 %v2876_v21  ;;  %1464 = vmatmul.mubr.bf16.gmra.mxu0 %v2876_v21 }
 0x1a8   : > { %1360 = vmatprep.mubr.bf16.mxu1 %v2370_v1  ;;  %1473 = vmatprep.mubr.bf16.mxu0 %v2370_v1 }
 0x1b7   : > { %v2266_v47 = vpop.f32.mrf.mxu0 }
 0x1b8   : > { %v858_v45 = vadd.f32 %v2266_v47, %v2718_v50 }
 0x1b9   : > { %v849_v23 = vpop.f32.mrf.mxu0 }
 0x1ba   : > { %v850_v52 = vadd.f32 %v2718_v50, %v849_v23  ;;  %v890_v39 = vmax.f32 %v858_v45, 0.0 }
 0x1bb   : > { %v2267_v24 = vpop.f32.mrf.mxu0 }
 0x1bc   : > { %v888_v29 = vmax.f32 %v850_v52, 0.0  ;;  %v861_v35 = vadd.f32 %v2267_v24, %v2718_v50 }
 0x1bd   : > { %v852_v26 = vpop.f32.mrf.mxu0 }
 0x1be   : > { %v853_v27 = vadd.f32 %v2718_v50, %v852_v26  ;;  %v891_v37 = vmax.f32 %v861_v35, 0.0 }
 0x1c0   : > { %v889_v33 = vmax.f32 %v853_v27, 0.0  ;;  %v901_v51 = vpack.c.bf16 %v891_v37, %v890_v39 }
 0x1c2   : > { %v2885_v46 = vpack.c.bf16 %v889_v33, %v888_v29 }
 0x1c4   : > { %1361 = vmatmul.mubr.bf16.gmra.mxu1 %v2885_v46  ;;  %1474 = vmatmul.mubr.bf16.gmra.mxu0 %v2885_v46 }
 0x1c5   : > { %1370 = vmatprep.mubr.bf16.mxu1 %v2370_v1  ;;  %1483 = vmatprep.mubr.bf16.mxu0 %v2370_v1 }
 0x1cc   : > { %1371 = vmatmul.mubr.bf16.gmra.mxu1 %v901_v51  ;;  %1484 = vmatmul.mubr.bf16.gmra.mxu0 %v901_v51 }
 0x1cd   : > { %1380 = vmatprep.mubr.bf16.mxu1 %v2370_v1  ;;  %1493 = vmatprep.mubr.bf16.mxu0 %v2370_v1 }
 0x1d8   : > { %v2270_v40 = vpop.f32.mrf.mxu0 }
 0x1d9   : > { %v874_v59 = vadd.f32 %v2270_v40, %v2718_v50 }
 0x1da   : > { %v865_v43 = vpop.f32.mrf.mxu0 }
 0x1db   : > { %v866_v44 = vadd.f32 %v2718_v50, %v865_v43  ;;  %v894_v61 = vmax.f32 %v874_v59, 0.0 }
 0x1dc   : > { %v2271_v15 = vpop.f32.mrf.mxu0 }
 0x1dd   : > { %v892_v54 = vmax.f32 %v866_v44, 0.0  ;;  %v877_v38 = vadd.f32 %v2271_v15, %v2718_v50 }
 0x1de   : > { %v868_v48 = vpop.f32.mrf.mxu0 }
 0x1df   : > { %v869_v53 = vadd.f32 %v2718_v50, %v868_v48  ;;  %v895_v60 = vmax.f32 %v877_v38, 0.0 }
 0x1e1   : > { %v893_v58 = vmax.f32 %v869_v53, 0.0  ;;  %v903_v0 = vpack.c.bf16 %v895_v60, %v894_v61 }
 0x1e3   : > { %v902_v41 = vpack.c.bf16 %v893_v58, %v892_v54 }
 0x1e5   : > { %1381 = vmatmul.mubr.bf16.gmra.mxu1 %v902_v41  ;;  %1494 = vmatmul.mubr.bf16.gmra.mxu0 %v902_v41 }
 0x1e6   : > { %1390 = vmatprep.mubr.bf16.mxu1 %v2370_v1  ;;  %1503 = vmatprep.mubr.bf16.mxu0 %v2370_v1 }
 0x1ed   : > { %1391 = vmatmul.mubr.bf16.gmra.mxu1 %v903_v0  ;;  %1504 = vmatmul.mubr.bf16.gmra.mxu0 %v903_v0 }
 0x1ee   : > { %1546 = vmatprep.mubr.bf16.mxu1 %v2370_v1  ;;  %1659 = vmatprep.mubr.bf16.mxu0 %v2370_v1 }
 0x1f5   : > { %1547 = vmatmul.mubr.bf16.vlgmr.msra.gmra.mxu1 %v2735_v2  ;;  %1660 = vmatmul.mubr.bf16.vlgmr.msra.gmra.mxu0 %v2735_v2 }
 0x1f6   : > { %2280 = vmatpush1.bf16.msra.mxu1 %v2737_v3  ;;  %1556 = vmatprep.mubr.bf16.mxu1 %v2370_v1 }
 0x1f7   : > { %2273 = vmatprep.subr.bf16.mxu1 %v2742_v6  ;;  %1669 = vmatprep.mubr.bf16.mxu0 %v2370_v1 }
 0x1fa   : > { %2281 = vmatpush1.bf16.msra.mxu1 %v2759_v12 }
 0x1fb   : > { %2274 = vmatprep.subr.bf16.mxu1 %v2765_v16 }
 0x1fd   : > { %1557 = vmatmul.mubr.bf16.gmra.mxu1 %v2776_v56  ;;  %1670 = vmatmul.mubr.bf16.gmra.mxu0 %v2776_v56 }
 0x1fe   : > { %1566 = vmatprep.mubr.bf16.mxu1 %v2370_v1  ;;  %1679 = vmatprep.mubr.bf16.mxu0 %v2370_v1 }
 0x1ff   : > { %2282 = vmatpush1.bf16.msra.mxu1 %v2779_v22 }
 0x200   : > { %2275 = vmatprep.subr.bf16.mxu1 %v2785_v25 }
 0x203   : > { %2283 = vmatpush1.bf16.msra.mxu1 %v2801_v30 }
 0x204   : > { %2276 = vmatprep.subr.bf16.mxu1 %v2807_v36 }
 0x205   : > { %1567 = vmatmul.mubr.bf16.gmra.mxu1 %v2868_v17  ;;  %1680 = vmatmul.mubr.bf16.gmra.mxu0 %v2868_v17 }
 0x206   : > { %1576 = vmatprep.mubr.bf16.mxu1 %v2370_v1  ;;  %1689 = vmatprep.mubr.bf16.mxu0 %v2370_v1 }
 0x207   : > { %2284 = vmatpush1.bf16.msra.mxu1 %v2819_v63 }
 0x208   : > { %2277 = vmatprep.subr.bf16.mxu1 %v2825_v42 }
 0x20b   : > { %2285 = vmatpush1.bf16.msra.mxu1 %v2837_v49 }
 0x20c   : > { %2278 = vmatprep.subr.bf16.mxu1 %v2843_v55 }
 0x20d   : > { %1577 = vmatmul.mubr.bf16.gmra.mxu1 %v2876_v21  ;;  %1690 = vmatmul.mubr.bf16.gmra.mxu0 %v2876_v21 }
 0x20e   : > { %1586 = vmatprep.mubr.bf16.mxu1 %v2370_v1  ;;  %1699 = vmatprep.mubr.bf16.mxu0 %v2370_v1 }
 0x20f   : > { %2286 = vmatpush1.bf16.msra.mxu1 %v2855_v62 }
 0x210   : > { %2279 = vmatprep.subr.bf16.mxu1 %v2858_v4 }
 0x213   : > { %2287 = vmatpush1.bf16.msra.mxu1 %v2862_v57 }
 0x215   : > { %1587 = vmatmul.mubr.bf16.gmra.mxu1 %v2885_v46  ;;  %1700 = vmatmul.mubr.bf16.gmra.mxu0 %v2885_v46 }
 0x216   : > { %1596 = vmatprep.mubr.bf16.mxu1 %v2370_v1  ;;  %1709 = vmatprep.mubr.bf16.mxu0 %v2370_v1 }
 0x21d   : > { %1597 = vmatmul.mubr.bf16.gmra.mxu1 %v901_v51  ;;  %1710 = vmatmul.mubr.bf16.gmra.mxu0 %v901_v51 }
 0x21e   : > { %1606 = vmatprep.mubr.bf16.mxu1 %v2370_v1  ;;  %1719 = vmatprep.mubr.bf16.mxu0 %v2370_v1 }
 0x225   : > { %1607 = vmatmul.mubr.bf16.gmra.mxu1 %v902_v41  ;;  %1720 = vmatmul.mubr.bf16.gmra.mxu0 %v902_v41 }
 0x226   : > { %1616 = vmatprep.mubr.bf16.mxu1 %v2370_v1 }
 0x22d   : > { %1617 = vmatmul.mubr.bf16.gmra.mxu1 %v903_v0 }
 0x22e   : > { %1729 = vmatprep.mubr.bf16.mxu1 %v2370_v1 }
 0x235   : > { %1730 = vmatmul.mubr.bf16.vlgmr.msra.gmra.mxu1 %v903_v0 }
 0x23e   : > { %v1322_v50 = vpop.f32.mrf.mxu1  ;;  %v1435_v2 = vpop.f32.mrf.mxu0 }
 0x240   : > { %v1324_v3 = vpop.f32.mrf.mxu1  ;;  %v1437_v6 = vpop.f32.mrf.mxu0 }
 0x242   : > { %v1326_v12 = vpop.f32.mrf.mxu1  ;;  %v1439_v16 = vpop.f32.mrf.mxu0 }
 0x243   : > { %v1756_v56 = vmax.f32 %v1322_v50, %v1326_v12  ;;  %v1758_v22 = vmax.f32 %v1435_v2, %v1439_v16 }
 0x244   : > { %v1328_v25 = vpop.f32.mrf.mxu1  ;;  %v1441_v30 = vpop.f32.mrf.mxu0 }
 0x245   : > { %v1757_v36 = vmax.f32 %v1324_v3, %v1328_v25  ;;  %v1759_v63 = vmax.f32 %v1437_v6, %v1441_v30 }
 0x246   : > { %v1332_v42 = vpop.f32.mrf.mxu1  ;;  %v1445_v49 = vpop.f32.mrf.mxu0 }
 0x247   : > { %v1764_v55 = vmax.f32 %v1756_v56, %v1332_v42  ;;  %v1766_v62 = vmax.f32 %v1758_v22, %v1445_v49 }
 0x248   : > { %v1334_v4 = vpop.f32.mrf.mxu1  ;;  %v1447_v5 = vpop.f32.mrf.mxu0 }
 0x249   : > { %v1765_v1 = vmax.f32 %v1757_v36, %v1334_v4  ;;  %v1767_v7 = vmax.f32 %v1759_v63, %v1447_v5 }
 0x24a   : > { %v1336_v8 = vpop.f32.mrf.mxu1  ;;  %v1449_v9 = vpop.f32.mrf.mxu0 }
 0x24b   : > { %v1772_v57 = vmax.f32 %v1764_v55, %v1336_v8  ;;  %v1774_v10 = vmax.f32 %v1766_v62, %v1449_v9 }
 0x24c   : > { %v1338_v11 = vpop.f32.mrf.mxu1  ;;  %v1451_v13 = vpop.f32.mrf.mxu0 }
 0x24d   : > { %v1773_v14 = vmax.f32 %v1765_v1, %v1338_v11  ;;  %v1775_v17 = vmax.f32 %v1767_v7, %v1451_v13 }
 0x25f   : > { %v1342_v18 = vpop.f32.mrf.mxu1  ;;  %v1455_v19 = vpop.f32.mrf.mxu0 }
 0x260   : > { %v1780_v20 = vmax.f32 %v1772_v57, %v1342_v18  ;;  %v1782_v21 = vmax.f32 %v1774_v10, %v1455_v19 }
 0x261   : > { %v1344_v47 = vpop.f32.mrf.mxu1  ;;  %v1457_v23 = vpop.f32.mrf.mxu0 }
 0x262   : > { %v1781_v24 = vmax.f32 %v1773_v14, %v1344_v47  ;;  %v1783_v52 = vmax.f32 %v1775_v17, %v1457_v23 }
 0x263   : > { %v1346_v26 = vpop.f32.mrf.mxu1  ;;  %v1459_v27 = vpop.f32.mrf.mxu0 }
 0x264   : > { %v1788_v29 = vmax.f32 %v1780_v20, %v1346_v26  ;;  %v1790_v33 = vmax.f32 %v1782_v21, %v1459_v27 }
 0x265   : > { %v1348_v35 = vpop.f32.mrf.mxu1  ;;  %v1461_v46 = vpop.f32.mrf.mxu0 }
 0x266   : > { %v1789_v45 = vmax.f32 %v1781_v24, %v1348_v35  ;;  %v1791_v37 = vmax.f32 %v1783_v52, %v1461_v46 }
 0x267   : > { %v1352_v39 = vpop.f32.mrf.mxu1  ;;  %v1465_v51 = vpop.f32.mrf.mxu0 }
 0x268   : > { %v1796_v40 = vmax.f32 %v1788_v29, %v1352_v39  ;;  %v1798_v43 = vmax.f32 %v1790_v33, %v1465_v51 }
 0x269   : > { %v1354_v15 = vpop.f32.mrf.mxu1  ;;  %v1467_v44 = vpop.f32.mrf.mxu0 }
 0x26a   : > { %v1797_v48 = vmax.f32 %v1789_v45, %v1354_v15  ;;  %v1799_v53 = vmax.f32 %v1791_v37, %v1467_v44 }
 0x26b   : > { %v1356_v54 = vpop.f32.mrf.mxu1  ;;  %v1469_v58 = vpop.f32.mrf.mxu0 }
 0x26c   : > { %v1804_v38 = vmax.f32 %v1796_v40, %v1356_v54  ;;  %v1806_v41 = vmax.f32 %v1798_v43, %v1469_v58 }
 0x26d   : > { %v1358_v59 = vpop.f32.mrf.mxu1  ;;  %v1471_v60 = vpop.f32.mrf.mxu0 }
 0x26e   : > { %v1805_v61 = vmax.f32 %v1797_v48, %v1358_v59  ;;  %v1807_v0 = vmax.f32 %v1799_v53, %v1471_v60 }
 0x284   : > { %v1362_v50 = vpop.f32.mrf.mxu1  ;;  %v1475_v2 = vpop.f32.mrf.mxu0 }
 0x285   : > { %v1812_v3 = vmax.f32 %v1804_v38, %v1362_v50  ;;  %v1814_v6 = vmax.f32 %v1806_v41, %v1475_v2 }
 0x286   : > { %v1364_v12 = vpop.f32.mrf.mxu1  ;;  %v1477_v16 = vpop.f32.mrf.mxu0 }
 0x287   : > { %v1813_v56 = vmax.f32 %v1805_v61, %v1364_v12  ;;  %v1815_v22 = vmax.f32 %v1807_v0, %v1477_v16 }
 0x288   : > { %v1366_v25 = vpop.f32.mrf.mxu1  ;;  %v1479_v30 = vpop.f32.mrf.mxu0 }
 0x289   : > { %v1820_v36 = vmax.f32 %v1812_v3, %v1366_v25  ;;  %v1822_v63 = vmax.f32 %v1814_v6, %v1479_v30 }
 0x28a   : > { %v1368_v42 = vpop.f32.mrf.mxu1  ;;  %v1481_v49 = vpop.f32.mrf.mxu0 }
 0x28b   : > { %v1821_v55 = vmax.f32 %v1813_v56, %v1368_v42  ;;  %v1823_v62 = vmax.f32 %v1815_v22, %v1481_v49 }
 0x28c   : > { %v1372_v4 = vpop.f32.mrf.mxu1  ;;  %v1485_v5 = vpop.f32.mrf.mxu0 }
 0x28d   : > { %v1828_v1 = vmax.f32 %v1820_v36, %v1372_v4  ;;  %v1830_v7 = vmax.f32 %v1822_v63, %v1485_v5 }
 0x28e   : > { %v1374_v8 = vpop.f32.mrf.mxu1  ;;  %v1487_v9 = vpop.f32.mrf.mxu0 }
 0x28f   : > { %v1829_v57 = vmax.f32 %v1821_v55, %v1374_v8  ;;  %v1831_v10 = vmax.f32 %v1823_v62, %v1487_v9  ;;  %v2952_v55 = vld [vmem:[%s3029_s6] sm:$0xff]  ;;  %v1959_v9 = vsub.s32 3, %v2486_v28 }
 0x290   : > { %v1376_v11 = vpop.f32.mrf.mxu1  ;;  %v1489_v13 = vpop.f32.mrf.mxu0 }
 0x291   : > { %v1836_v14 = vmax.f32 %v1828_v1, %v1376_v11  ;;  %v1838_v17 = vmax.f32 %v1830_v7, %v1489_v13  ;;  %v2372_v7 = vmov 1966171168  }
 0x292   : > { %v1378_v18 = vpop.f32.mrf.mxu1  ;;  %v1491_v19 = vpop.f32.mrf.mxu0  ;;  %v2006_v8 = vunpack.c.l.s4 %v2372_v7 }
 0x293   : > { %v1837_v20 = vmax.f32 %v1829_v57, %v1378_v18  ;;  %v1839_v21 = vmax.f32 %v1831_v10, %v1491_v19  ;;  %v1948_v18 = vrot.slane %v2952_v55, %v455_v31 }
 0x2a5   : > { %v1382_v47 = vpop.f32.mrf.mxu1  ;;  %v1495_v23 = vpop.f32.mrf.mxu0 }
 0x2a6   : > { %v1844_v24 = vmax.f32 %v1836_v14, %v1382_v47  ;;  %v1846_v52 = vmax.f32 %v1838_v17, %v1495_v23 }
 0x2a7   : > { %v1384_v26 = vpop.f32.mrf.mxu1  ;;  %v1497_v27 = vpop.f32.mrf.mxu0 }
 0x2a8   : > { %v1845_v29 = vmax.f32 %v1837_v20, %v1384_v26  ;;  %v1847_v33 = vmax.f32 %v1839_v21, %v1497_v27  ;;  %v1952_v26 = vrot.slane %v2952_v55, %v539_v32  ;;  %v2007_v27 = vunpack.c.0.s8 %v2006_v8 }
 0x2a9   : > { %v1386_v35 = vpop.f32.mrf.mxu1  ;;  %v1499_v46 = vpop.f32.mrf.mxu0 }
 0x2aa   : > { %v1852_v45 = vmax.f32 %v1844_v24, %v1386_v35  ;;  %v1854_v37 = vmax.f32 %v1846_v52, %v1499_v46  ;;  %v1956_v52 = vrot.slane %v2952_v55, %v639_v34 }
 0x2ab   : > { %v1388_v39 = vpop.f32.mrf.mxu1  ;;  %v1501_v51 = vpop.f32.mrf.mxu0 }
 0x2ac   : > { %v1853_v40 = vmax.f32 %v1845_v29, %v1388_v39  ;;  %v1855_v43 = vmax.f32 %v1847_v33, %v1501_v51  ;;  %v1960_v29 = vrot.slane %v2952_v55, %v1959_v9 }
 0x2ad   : > { %v1392_v15 = vpop.f32.mrf.mxu1  ;;  %v1505_v44 = vpop.f32.mrf.mxu0 }
 0x2ae   : > { %v1860_v48 = vmax.f32 %v1852_v45, %v1392_v15  ;;  %v1862_v53 = vmax.f32 %v1854_v37, %v1505_v44  ;;  %v2972_v15 = vsub.s32 %v2007_v27, %v2486_v28 }
 0x2af   : > { %v1394_v54 = vpop.f32.mrf.mxu1  ;;  %v1507_v58 = vpop.f32.mrf.mxu0 }
 0x2b0   : > { %v1861_v38 = vmax.f32 %v1853_v40, %v1394_v54  ;;  %v1863_v60 = vmax.f32 %v1855_v43, %v1507_v58 }
 0x2b1   : > { %v1396_v41 = vpop.f32.mrf.mxu1  ;;  %v1509_v59 = vpop.f32.mrf.mxu0 }
 0x2b2   : > { %v1868_v61 = vmax.f32 %v1860_v48, %v1396_v41  ;;  %v1870_v0 = vmax.f32 %v1862_v53, %v1509_v59 }
 0x2b3   : > { %v1398_v50 = vpop.f32.mrf.mxu1  ;;  %v1511_v2 = vpop.f32.mrf.mxu0 }
 0x2b4   : > { %v1896_v3 = vrot.slane %v1868_v61, 4  ;;  %v1908_v6 = vrot.slane %v1870_v0, 4  ;;  %v1869_v12 = vmax.f32 %v1861_v38, %v1398_v50  ;;  %v1871_v16 = vmax.f32 %v1863_v60, %v1511_v2 }
 0x2b5   : > { %v2941_v56 = vpop.f32.mrf.mxu1  ;;  %v2943_v22 = vpop.f32.mrf.mxu0 }
 0x2b6   : > { %v1897_v25 = vmax.f32 %v1868_v61, %v1896_v3  ;;  %v1909_v30 = vmax.f32 %v1870_v0, %v1908_v6  ;;  %v1902_v36 = vrot.slane %v1869_v12, 4  ;;  %v1914_v63 = vrot.slane %v1871_v16, 4 }
 0x2b7   : > { %v2945_v42 = vpop.f32.mrf.mxu1  ;;  %v2947_v49 = vpop.f32.mrf.mxu0 }
 0x2b8   : > { %v1898_v62 = vrot.slane %v1897_v25, 2  ;;  %v1910_v4 = vrot.slane %v1909_v30, 2  ;;  %v1903_v5 = vmax.f32 %v1869_v12, %v1902_v36  ;;  %v1915_v1 = vmax.f32 %v1871_v16, %v1914_v63 }
 0x2b9   : > { %v2955_v57 = vpop.f32.mrf.mxu1  ;;  %v2957_v10 = vpop.f32.mrf.mxu0 }
 0x2ba   : > { %v1899_v11 = vmax.f32 %v1897_v25, %v1898_v62  ;;  %v1911_v13 = vmax.f32 %v1909_v30, %v1910_v4  ;;  %v1904_v14 = vrot.slane %v1903_v5, 2  ;;  %v1916_v17 = vrot.slane %v1915_v1, 2 }
 0x2bb   : > { %v1554_v19 = vpop.f32.mrf.mxu1  ;;  %v2962_v20 = vpop.f32.mrf.mxu0 }
 0x2bc   : > { %v1900_v21 = vrot.slane %v1899_v11, 1  ;;  %v1912_v47 = vrot.slane %v1911_v13, 1  ;;  %v1905_v23 = vmax.f32 %v1903_v5, %v1904_v14  ;;  %v1917_v24 = vmax.f32 %v1915_v1, %v1916_v17 }
 0x2bd   : > { %v1558_v33 = vpop.f32.mrf.mxu1  ;;  %v1671_v31 = vpop.f32.mrf.mxu0 }
 0x2be   : > { %v1901_v35 = vmax.f32 %v1899_v11, %v1900_v21  ;;  %v1913_v46 = vmax.f32 %v1911_v13, %v1912_v47  ;;  %v1906_v45 = vrot.slane %v1905_v23, 1  ;;  %v1918_v37 = vrot.slane %v1917_v24, 1 }
 0x2bf   : > { %v1560_v39 = vpop.f32.mrf.mxu1  ;;  %v1673_v51 = vpop.f32.mrf.mxu0  ;;  %v1760_v13 = vmax.f32 %v2941_v56, %v2955_v57 }
 0x2c0   : > { %v1907_v40 = vmax.f32 %v1905_v23, %v1906_v45  ;;  %v1919_v43 = vmax.f32 %v1917_v24, %v1918_v37  ;;  %v1985_v32 = vadd.f32 %v1948_v18, %v1901_v35  ;;  %v1987_v48 = vadd.f32 %v1956_v52, %v1913_v46 }
 0x2c1   : > { %v1562_v34 = vpop.f32.mrf.mxu1  ;;  %v2974_v44 = vpop.f32.mrf.mxu0  ;;  %v1761_v18 = vmax.f32 %v2945_v42, %v1554_v19  ;;  %v1768_v21 = vmax.f32 %v1760_v13, %v1558_v33  ;;  %v1762_v37 = vmax.f32 %v2943_v22, %v2957_v10  ;;  %v1763_v42 = vmax.f32 %v2947_v49, %v2962_v20 }
 0x2c2   : > { %v1986_v53 = vadd.f32 %v1952_v26, %v1907_v40  ;;  %v1988_v54 = vadd.f32 %v1960_v29, %v1919_v43 }
 0x2c3   : > { %v1564_v58 = vpop.f32.mrf.mxu1  ;;  %v1677_v38 = vpop.f32.mrf.mxu0  ;;  %v1769_v24 = vmax.f32 %v1761_v18, %v1560_v39  ;;  %v1776_v52 = vmax.f32 %v1768_v21, %v1562_v34  ;;  %v1770_v19 = vmax.f32 %v1762_v37, %v1671_v31 }
 0x2c4   : > { %v2001_v41 = vcombine.low %v1985_v32, %v1986_v53  ;;  %v2002_v59 = vcombine.low %v1987_v48, %v1988_v54  ;;  %v1771_v48 = vmax.f32 %v1763_v42, %v1673_v51 }
 0x2c5   : > { %v1568_v60 = vpop.f32.mrf.mxu1  ;;  %v1681_v61 = vpop.f32.mrf.mxu0  ;;  %v1777_v29 = vmax.f32 %v1769_v24, %v1564_v58  ;;  %v1778_v53 = vmax.f32 %v1770_v19, %v2974_v44 }
 0x2c6   : > { %v2977_v0 = vrot.slane %v2001_v41, %v2972_v15  ;;  %v2980_v50 = vrot.slane %v2002_v59, %v2972_v15  ;;  %v1784_v35 = vmax.f32 %v1776_v52, %v1568_v60  ;;  %v1779_v59 = vmax.f32 %v1771_v48, %v1677_v38 }
 0x2c7   : > { %v1570_v2 = vpop.f32.mrf.mxu1  ;;  %v1683_v3 = vpop.f32.mrf.mxu0  ;;  %v1786_v22 = vmax.f32 %v1778_v53, %v1681_v61 }
 0x2c8   : > { %v2033_v6 = vcombine.low %v2977_v0, %v2980_v50  ;;  %v1785_v40 = vmax.f32 %v1777_v29, %v1570_v2  ;;  %v1787_v13 = vmax.f32 %v1779_v59, %v1683_v3 }
 0x2c9   : > { %v1572_v12 = vpop.f32.mrf.mxu1  ;;  %v1685_v16 = vpop.f32.mrf.mxu0 }
 0x2ca   : > { %v1792_v56 = vmax.f32 %v1784_v35, %v1572_v12  ;;  %v1794_v18 = vmax.f32 %v1786_v22, %v1685_v16 }
 0x2cb   : > { %v1574_v25 = vpop.f32.mrf.mxu1  ;;  %v1687_v30 = vpop.f32.mrf.mxu0 }
 0x2cc   : > { %v1793_v33 = vmax.f32 %v1785_v40, %v1574_v25  ;;  %v1795_v25 = vmax.f32 %v1787_v13, %v1687_v30 }
 0x2cd   : > { %v1578_v36 = vpop.f32.mrf.mxu1  ;;  %v1691_v63 = vpop.f32.mrf.mxu0 }
 0x2ce   : > { %v1800_v39 = vmax.f32 %v1792_v56, %v1578_v36  ;;  %v1802_v36 = vmax.f32 %v1794_v18, %v1691_v63 }
 0x2cf   : > { %v1580_v62 = vpop.f32.mrf.mxu1  ;;  %v1693_v4 = vpop.f32.mrf.mxu0 }
 0x2d0   : > { %v1801_v54 = vmax.f32 %v1793_v33, %v1580_v62  ;;  %v1803_v62 = vmax.f32 %v1795_v25, %v1693_v4 }
 0x2d1   : > { %v1582_v5 = vpop.f32.mrf.mxu1  ;;  %v1695_v1 = vpop.f32.mrf.mxu0 }
 0x2d2   : > { %v1808_v58 = vmax.f32 %v1800_v39, %v1582_v5  ;;  %v1810_v5 = vmax.f32 %v1802_v36, %v1695_v1 }
 0x2d3   : > { %v1584_v7 = vpop.f32.mrf.mxu1  ;;  %v2984_v8 = vpop.f32.mrf.mxu0 }
 0x2d4   : > { %v1809_v10 = vmax.f32 %v1801_v54, %v1584_v7  ;;  %v1811_v7 = vmax.f32 %v1803_v62, %v2984_v8 }
 0x2d5   : > { %v1588_v9 = vpop.f32.mrf.mxu1  ;;  %v1701_v11 = vpop.f32.mrf.mxu0 }
 0x2d6   : > { %v1816_v60 = vmax.f32 %v1808_v58, %v1588_v9  ;;  %v1818_v9 = vmax.f32 %v1810_v5, %v1701_v11 }
 0x2d7   : > { %v1590_v14 = vpop.f32.mrf.mxu1  ;;  %v1703_v17 = vpop.f32.mrf.mxu0 }
 0x2d8   : > { %v1817_v49 = vmax.f32 %v1809_v10, %v1590_v14 }
 0x2d9   : > { %v1592_v47 = vpop.f32.mrf.mxu1  ;;  %v1705_v23 = vpop.f32.mrf.mxu0 }
 0x2da   : > { %v1824_v20 = vmax.f32 %v1816_v60, %v1592_v47  ;;  %v1819_v47 = vmax.f32 %v1811_v7, %v1703_v17  ;;  %v1826_v35 = vmax.f32 %v1818_v9, %v1705_v23  ;;  %v1975_v9 = vsub.s32 7, %v2486_v28 }
 0x2db   : > { %v1594_v26 = vpop.f32.mrf.mxu1  ;;  %v1707_v27 = vpop.f32.mrf.mxu0 }
 0x2dc   : > { %v1825_v21 = vmax.f32 %v1817_v49, %v1594_v26 }
 0x2dd   : > { %v1598_v46 = vpop.f32.mrf.mxu1  ;;  %v1711_v45 = vpop.f32.mrf.mxu0 }
 0x2de   : > { %v1832_v51 = vmax.f32 %v1824_v20, %v1598_v46  ;;  %v1827_v46 = vmax.f32 %v1819_v47, %v1707_v27  ;;  %v1834_v37 = vmax.f32 %v1826_v35, %v1711_v45 }
 0x2df   : > { %v1600_v57 = vpop.f32.mrf.mxu1  ;;  %v1713_v43 = vpop.f32.mrf.mxu0 }
 0x2e0   : > { %v1833_v52 = vmax.f32 %v1825_v21, %v1600_v57  ;;  %v1835_v57 = vmax.f32 %v1827_v46, %v1713_v43 }
 0x2e1   : > { %v1602_v34 = vpop.f32.mrf.mxu1  ;;  %v1715_v32 = vpop.f32.mrf.mxu0 }
 0x2e2   : > { %v1840_v38 = vmax.f32 %v1832_v51, %v1602_v34  ;;  %v1842_v42 = vmax.f32 %v1834_v37, %v1715_v32 }
 0x2e3   : > { %v1604_v41 = vpop.f32.mrf.mxu1  ;;  %v1717_v2 = vpop.f32.mrf.mxu0 }
 0x2e4   : > { %v1841_v29 = vmax.f32 %v1833_v52, %v1604_v41  ;;  %v1843_v33 = vmax.f32 %v1835_v57, %v1717_v2  ;;  %v1971_v52 = vsub.s32 6, %v2486_v28 }
 0x2e5   : > { %v1608_v12 = vpop.f32.mrf.mxu1  ;;  %v1721_v24 = vpop.f32.mrf.mxu0 }
 0x2e6   : > { %v1848_v3 = vmax.f32 %v1840_v38, %v1608_v12  ;;  %v1850_v39 = vmax.f32 %v1842_v42, %v1721_v24  ;;  %v1963_v24 = vsub.s32 4, %v2486_v28  ;;  %v1972_v47 = vrot.slane %v2952_v55, %v1971_v52 }
 0x2e7   : > { %v1610_v31 = vpop.f32.mrf.mxu1  ;;  %v1723_v16 = vpop.f32.mrf.mxu0 }
 0x2e8   : > { %v1849_v30 = vmax.f32 %v1841_v29, %v1610_v31  ;;  %v1851_v53 = vmax.f32 %v1843_v33, %v1723_v16  ;;  %v1967_v31 = vsub.s32 5, %v2486_v28 }
 0x2e9   : > { %v1612_v44 = vpop.f32.mrf.mxu1  ;;  %v1725_v1 = vpop.f32.mrf.mxu0 }
 0x2ea   : > { %v1856_v63 = vmax.f32 %v1848_v3, %v1612_v44  ;;  %v1858_v54 = vmax.f32 %v1850_v39, %v1725_v1  ;;  %v1968_v5 = vrot.slane %v2952_v55, %v1967_v31  ;;  %v1964_v3 = vrot.slane %v2952_v55, %v1963_v24 }
 0x2eb   : > { %v1614_v61 = vpop.f32.mrf.mxu1  ;;  %v1727_v17 = vpop.f32.mrf.mxu0 }
 0x2ec   : > { %v1857_v40 = vmax.f32 %v1849_v30, %v1614_v61  ;;  %v1859_v41 = vmax.f32 %v1851_v53, %v1727_v17 }
 0x2ed   : > { %v1618_v14 = vpop.f32.mrf.mxu1 }
 0x2ee   : > { %v1864_v4 = vmax.f32 %v1856_v63, %v1618_v14 }
 0x2ef   : > { %v1620_v26 = vpop.f32.mrf.mxu1 }
 0x2f0   : > { %v1865_v19 = vmax.f32 %v1857_v40, %v1620_v26  ;;  %v1976_v26 = vrot.slane %v2952_v55, %v1975_v9 }
 0x2f1   : > { %v1622_v56 = vpop.f32.mrf.mxu1 }
 0x2f2   : > { %v1872_v8 = vmax.f32 %v1864_v4, %v1622_v56 }
 0x2f3   : > { %v1624_v11 = vpop.f32.mrf.mxu1 }
 0x2f4   : > { %v1920_v34 = vrot.slane %v1872_v8, 4  ;;  %v1873_v48 = vmax.f32 %v1865_v19, %v1624_v11  ;;  %v2041_v19 = vrot.slane %v2033_v6, %v2972_v15 }
 0x2f5   : > { %v1731_v23 = vpop.f32.mrf.mxu1 }
 0x2f6   : > { %v1921_v58 = vmax.f32 %v1872_v8, %v1920_v34  ;;  %v1926_v27 = vrot.slane %v1873_v48, 4  ;;  %v1866_v10 = vmax.f32 %v1858_v54, %v1731_v23 }
 0x2f7   : > { %v1733_v45 = vpop.f32.mrf.mxu1 }
 0x2f8   : > { %v1922_v59 = vrot.slane %v1921_v58, 2  ;;  %v1927_v22 = vmax.f32 %v1873_v48, %v1926_v27  ;;  %v1867_v60 = vmax.f32 %v1859_v41, %v1733_v45 }
 0x2f9   : > { %v1735_v43 = vpop.f32.mrf.mxu1 }
 0x2fa   : > { %v1928_v32 = vrot.slane %v1927_v22, 2  ;;  %v1874_v12 = vmax.f32 %v1866_v10, %v1735_v43  ;;  %v1923_v2 = vmax.f32 %v1921_v58, %v1922_v59 }
 0x2fb   : > { %v1737_v13 = vpop.f32.mrf.mxu1 }
 0x2fc   : > { %v1929_v18 = vmax.f32 %v1927_v22, %v1928_v32  ;;  %v1932_v49 = vrot.slane %v1874_v12, 4  ;;  %v1875_v20 = vmax.f32 %v1867_v60, %v1737_v13  ;;  %v1924_v51 = vrot.slane %v1923_v2, 1 }
 0x2fe   : > { %v1930_v25 = vrot.slane %v1929_v18, 1  ;;  %v1933_v36 = vmax.f32 %v1874_v12, %v1932_v49  ;;  %v1938_v21 = vrot.slane %v1875_v20, 4  ;;  %v1925_v29 = vmax.f32 %v1923_v2, %v1924_v51 }
 0x300   : > { %v1934_v44 = vrot.slane %v1933_v36, 2  ;;  %v1939_v62 = vmax.f32 %v1875_v20, %v1938_v21  ;;  %v1931_v38 = vmax.f32 %v1929_v18, %v1930_v25  ;;  %v1989_v46 = vadd.f32 %v1964_v3, %v1925_v29 }
 0x302   : > { %v1935_v61 = vmax.f32 %v1933_v36, %v1934_v44  ;;  %v1940_v7 = vrot.slane %v1939_v62, 2  ;;  %v1990_v35 = vadd.f32 %v1968_v5, %v1931_v38 }
 0x304   : > { %v1936_v16 = vrot.slane %v1935_v61, 1  ;;  %v1941_v14 = vmax.f32 %v1939_v62, %v1940_v7  ;;  %v2003_v40 = vcombine.low %v1989_v46, %v1990_v35 }
 0x306   : > { %v1937_v30 = vmax.f32 %v1935_v61, %v1936_v16  ;;  %v1942_v63 = vrot.slane %v1941_v14, 1  ;;  %v2025_v28 = vrot.slane %v2003_v40, %v2972_v15 }
 0x308   : > { %v1943_v37 = vmax.f32 %v1941_v14, %v1942_v63  ;;  %v1991_v4 = vadd.f32 %v1972_v47, %v1937_v30 }
 0x30a   : > { %v1992_v1 = vadd.f32 %v1976_v26, %v1943_v37 }
 0x30c   : > { %v2004_v56 = vcombine.low %v1991_v4, %v1992_v1 }
 0x30e   : > { %v2032_v57 = vrot.slane %v2004_v56, %v2972_v15 }
 0x310   : > { %v2034_v42 = vcombine.low %v2025_v28, %v2032_v57 }
 0x312   : > { %v2048_v8 = vrot.slane %v2034_v42, %v2972_v15 }
 0x314   : > { %v2049_v55 = vcombine.low %v2041_v19, %v2048_v8 }
 0x316   : > { %2051 = vst [vmem:[%s341_s21] sm:$0xff] %v2049_v55 }
 0x317 PF: > { %s17_s26 = sadd.s32 1, %s2367_s26   ;;  %s3031_s24 = smov %s2363_s25 }
 0x318   : > { %p14_p5 = scmp.ge.s32.totalorder %s17_s26, 4   ;;  %s3032_s25 = smov %s3034_s27 }
 0x31a   :  { %16 = sbr.rel (!%p14_p5) target bundleno = 2 (0x2), region = 92 }

// kernel: pointnet_encoder.8
= control target key start
LH: loop header
LB: loop body
LE: loop exit
PB: predicated region body
PF: predicated region fallthrough
CT: control target
= control target key end

     0   :  { %12 = vsyncpa [#allocation3], 0  ;;  %s7895_s24 = smov [#allocation2]   ;;  %s9943_s0 = inlined_call_operand.vmem [shape: f32[2,1024], index: 0, kind: input, shape index: {}]   ;;  %s9944_s1 = inlined_call_operand.hbm [shape: bf16[1024,512], index: 1, kind: input, shape index: {}]   ;;  %s9945_s2 = inlined_call_operand.vmem [shape: f32[1,512], index: 2, kind: input, shape index: {}]   ;;  %s9946_s3 = inlined_call_operand.vmem [shape: bf16[512,256], index: 3, kind: input, shape index: {}]   ;;  %s9947_s4 = inlined_call_operand.vmem [shape: f32[1,256], index: 4, kind: input, shape index: {}]   ;;  %s9948_s5 = inlined_call_operand.vmem [shape: bf16[256,4096], index: 5, kind: input, shape index: {}]   ;;  %s9949_s6 = inlined_call_operand.vmem [shape: f32[1,4096], index: 6, kind: input, shape index: {}]   ;;  %s9950_s7 = inlined_call_operand.vmem [shape: f32[2,4096], index: 7, kind: output, shape index: {}]  }
   0x1   :  { %s20_s25 = sshll.u32 %s7895_s24, 4  ;;  %s21_s25 = int_to_ptr.vmem [resolvable:$true] %s20_s25 }
   0x2   :  { %s7881_s26 = scalar_lea.vmem %s21_s25, 32768  ;;  %p7886_p1 = scmp.lt.s32.totalorder %s21_s25, %s21_s25 }
   0x3   :  { %p7882_p0 = scmp.ne.s32.totalorder %s21_s25, %s7881_s26  ;;  %p7887_p2 = scmp.lt.s32.totalorder %s7881_s26, %s7881_s26 }
   0x5   :  { %p7888_p3 = por %p7887_p2, %p7886_p1 }
   0x7   :  { %p7889_p4 = pnand %p7888_p3, %p7882_p0 }
   0x9   :  { %7892 = shalt.err (!%p7889_p4)
}
   0xa   :  { %s7896_s27 = smov 256   ;;  %s7897_s28 = smov 16  }
   0xb   :  { %26 = dma.hbm_to_vmem [thread:$0]  %s9944_s1, 32768, %s21_s25, [#allocation3], %s7896_s27, %s7896_s27, %s7897_s28  }
   0xc   :  { %7893 = dma.done.wait [#allocation3], 32768  }
   0xd   :  { %7894 = vsyncadd [#allocation3], 4294934528  ;;  %v7391_v0 = vld [vmem:[#allocation2 + $0xe4] ss:$16 sps:$4 sm:$0xff]   ;;  %v7395_v2 = vld [vmem:[#allocation2 + $0xe0] ss:$16 sps:$4 sm:$0xff]   ;;  %v48_v38 = vlaneseq }
   0xe   :  { %v7393_v1 = vld [vmem:[#allocation2 + $0x2e4] ss:$16 sps:$4 sm:$0xff]   ;;  %1652 = vmatprep.subr.bf16.mxu0 %v7391_v0  ;;  %v7396_v3 = vld [vmem:[#allocation2 + $0x2e0] ss:$16 sps:$4 sm:$0xff]   ;;  %v7898_v36 = vmov 1983009808  }
   0xf   :  { %1693 = vmatprep.subr.bf16.mxu1 %v7393_v1  ;;  %v7397_v4 = vld [vmem:[#allocation2 + $0xc4] ss:$16 sps:$4 sm:$0xff]   ;;  %1653 = vmatpush1.bf16.msra.mxu0 %v7395_v2  ;;  %v7401_v6 = vld [vmem:[#allocation2 + $0xc0] ss:$16 sps:$4 sm:$0xff]   ;;  %v46_v37 = vunpack.c.l.s4 %v7898_v36  ;;  %v7942_v43 = vshrl.u32 %v48_v38, 7 }
  0x10   :  { %1694 = vmatpush1.bf16.msra.mxu1 %v7396_v3  ;;  %v7399_v5 = vld [vmem:[#allocation2 + $0x2c4] ss:$16 sps:$4 sm:$0xff]   ;;  %1654 = vmatprep.subr.bf16.mxu0 %v7397_v4  ;;  %v7402_v7 = vld [vmem:[#allocation2 + $0x2c0] ss:$16 sps:$4 sm:$0xff]  }
  0x11   :  { %1695 = vmatprep.subr.bf16.mxu1 %v7399_v5  ;;  %v7403_v8 = vld [vmem:[#allocation2 + $0xa4] ss:$16 sps:$4 sm:$0xff]   ;;  %v7407_v10 = vld [vmem:[#allocation2 + $0xa0] ss:$16 sps:$4 sm:$0xff]   ;;  %v47_v42 = vunpack.c.0.s8 %v46_v37 }
  0x12   :  { %v7405_v9 = vld [vmem:[#allocation2 + $0x2a4] ss:$16 sps:$4 sm:$0xff]   ;;  %v7408_v11 = vld [vmem:[#allocation2 + $0x2a0] ss:$16 sps:$4 sm:$0xff]  }
  0x13   :  { %1655 = vmatpush1.bf16.msra.mxu0 %v7401_v6  ;;  %v7409_v12 = vld [vmem:[#allocation2 + $0x84] ss:$16 sps:$4 sm:$0xff]   ;;  %v7413_v14 = vld [vmem:[#allocation2 + $0x80] ss:$16 sps:$4 sm:$0xff]   ;;  %v7945_v49 = vsub.s32 %v47_v42, %v7942_v43  ;;  %v41_v42 = vld [vmem:[%s9943_s0 + $0x8] sm:$0xff] }
  0x14   :  { %1696 = vmatpush1.bf16.msra.mxu1 %v7402_v7  ;;  %1656 = vmatprep.subr.bf16.mxu0 %v7403_v8  ;;  %v7411_v13 = vld [vmem:[#allocation2 + $0x284] ss:$16 sps:$4 sm:$0xff]   ;;  %v7414_v15 = vld [vmem:[#allocation2 + $0x280] ss:$16 sps:$4 sm:$0xff]  }
  0x15   :  { %1697 = vmatprep.subr.bf16.mxu1 %v7405_v9  ;;  %v7415_v16 = vld [vmem:[#allocation2 + $0x64] ss:$16 sps:$4 sm:$0xff]   ;;  %v7419_v18 = vld [vmem:[#allocation2 + $0x60] ss:$16 sps:$4 sm:$0xff]  }
  0x16   :  { %v7417_v17 = vld [vmem:[#allocation2 + $0x264] ss:$16 sps:$4 sm:$0xff]   ;;  %v7420_v19 = vld [vmem:[#allocation2 + $0x260] ss:$16 sps:$4 sm:$0xff]  }
  0x17   :  { %1657 = vmatpush1.bf16.msra.mxu0 %v7407_v10  ;;  %v7421_v20 = vld [vmem:[#allocation2 + $0x44] ss:$16 sps:$4 sm:$0xff]   ;;  %v7425_v22 = vld [vmem:[#allocation2 + $0x40] ss:$16 sps:$4 sm:$0xff]  }
  0x18   :  { %1698 = vmatpush1.bf16.msra.mxu1 %v7408_v11  ;;  %1658 = vmatprep.subr.bf16.mxu0 %v7409_v12  ;;  %v7423_v21 = vld [vmem:[#allocation2 + $0x244] ss:$16 sps:$4 sm:$0xff]   ;;  %v7426_v23 = vld [vmem:[#allocation2 + $0x240] ss:$16 sps:$4 sm:$0xff]  }
  0x19   :  { %1699 = vmatprep.subr.bf16.mxu1 %v7411_v13  ;;  %v7427_v24 = vld [vmem:[#allocation2 + $0x24] ss:$16 sps:$4 sm:$0xff]   ;;  %v7431_v26 = vld [vmem:[#allocation2 + $0x20] ss:$16 sps:$4 sm:$0xff]  }
  0x1a   :  { %v7429_v25 = vld [vmem:[#allocation2 + $0x224] ss:$16 sps:$4 sm:$0xff]   ;;  %v7432_v27 = vld [vmem:[#allocation2 + $0x220] ss:$16 sps:$4 sm:$0xff]  }
  0x1b   :  { %1659 = vmatpush1.bf16.msra.mxu0 %v7413_v14  ;;  %v7433_v28 = vld [vmem:[#allocation2 + $0x4] ss:$16 sps:$4 sm:$0xff]   ;;  %v7437_v30 = vld [vmem:[#allocation2] ss:$16 sps:$4 sm:$0xff]  }
  0x1c   :  { %1700 = vmatpush1.bf16.msra.mxu1 %v7414_v15  ;;  %1660 = vmatprep.subr.bf16.mxu0 %v7415_v16  ;;  %v7435_v29 = vld [vmem:[#allocation2 + $0x204] ss:$16 sps:$4 sm:$0xff]   ;;  %v7438_v31 = vld [vmem:[#allocation2 + $0x200] ss:$16 sps:$4 sm:$0xff]  }
  0x1d   :  { %1701 = vmatprep.subr.bf16.mxu1 %v7417_v17  ;;  %v7439_v32 = vld [vmem:[#allocation2 + $0x1e4] ss:$16 sps:$4 sm:$0xff]   ;;  %v7443_v34 = vld [vmem:[#allocation2 + $0x1e0] ss:$16 sps:$4 sm:$0xff]  }
  0x1e   :  { %v7441_v33 = vld [vmem:[#allocation2 + $0x3e4] ss:$16 sps:$4 sm:$0xff]   ;;  %v7444_v35 = vld [vmem:[#allocation2 + $0x3e0] ss:$16 sps:$4 sm:$0xff]  }
  0x1f   :  { %1661 = vmatpush1.bf16.msra.mxu0 %v7419_v18  ;;  %v7445_v39 = vld [vmem:[#allocation2 + $0x1c4] ss:$16 sps:$4 sm:$0xff]   ;;  %v7449_v41 = vld [vmem:[#allocation2 + $0x1c0] ss:$16 sps:$4 sm:$0xff]  }
  0x20   :  { %1702 = vmatpush1.bf16.msra.mxu1 %v7420_v19  ;;  %1662 = vmatprep.subr.bf16.mxu0 %v7421_v20  ;;  %v7447_v40 = vld [vmem:[#allocation2 + $0x3c4] ss:$16 sps:$4 sm:$0xff]   ;;  %v7450_v44 = vld [vmem:[#allocation2 + $0x3c0] ss:$16 sps:$4 sm:$0xff]  }
  0x21   :  { %1703 = vmatprep.subr.bf16.mxu1 %v7423_v21  ;;  %v7451_v45 = vld [vmem:[#allocation2 + $0x1a4] ss:$16 sps:$4 sm:$0xff]   ;;  %v7455_v47 = vld [vmem:[#allocation2 + $0x1a0] ss:$16 sps:$4 sm:$0xff]  }
  0x22   :  { %v7453_v46 = vld [vmem:[#allocation2 + $0x3a4] ss:$16 sps:$4 sm:$0xff]   ;;  %v7456_v48 = vld [vmem:[#allocation2 + $0x3a0] ss:$16 sps:$4 sm:$0xff]  }
  0x23   :  { %1663 = vmatpush1.bf16.msra.mxu0 %v7425_v22  ;;  %v7457_v50 = vld [vmem:[#allocation2 + $0x184] ss:$16 sps:$4 sm:$0xff]   ;;  %v7461_v53 = vld [vmem:[#allocation2 + $0x180] ss:$16 sps:$4 sm:$0xff]  }
  0x24   :  { %1704 = vmatpush1.bf16.msra.mxu1 %v7426_v23  ;;  %1664 = vmatprep.subr.bf16.mxu0 %v7427_v24  ;;  %v7459_v51 = vld [vmem:[#allocation2 + $0x384] ss:$16 sps:$4 sm:$0xff]   ;;  %v7462_v56 = vld [vmem:[#allocation2 + $0x380] ss:$16 sps:$4 sm:$0xff]  }
  0x25   :  { %1705 = vmatprep.subr.bf16.mxu1 %v7429_v25  ;;  %v40_v52 = vld [vmem:[%s9943_s0] sm:$0xff] }
  0x26   :  { %v51_v54 = vrot.slane %v40_v52, %v7945_v49  ;;  %v44_v55 = vcombine.high %v40_v52, %v40_v52  ;;  %v7463_v57 = vld [vmem:[#allocation2 + $0x164] ss:$16 sps:$4 sm:$0xff]   ;;  %v7467_v61 = vld [vmem:[#allocation2 + $0x160] ss:$16 sps:$4 sm:$0xff]  }
  0x27   :  { %1665 = vmatpush1.bf16.msra.mxu0 %v7431_v26  ;;  %v7465_v58 = vld [vmem:[#allocation2 + $0x364] ss:$16 sps:$4 sm:$0xff]   ;;  %v7468_v0 = vld [vmem:[#allocation2 + $0x360] ss:$16 sps:$4 sm:$0xff]  }
  0x28   :  { %1706 = vmatpush1.bf16.msra.mxu1 %v7432_v27  ;;  %1666 = vmatprep.subr.bf16.mxu0 %v7433_v28  ;;  %v59_v59 = vcombine.high %v51_v54, %v51_v54  ;;  %v58_v60 = vrot.slane %v44_v55, %v7945_v49  ;;  %v7469_v1 = vld [vmem:[#allocation2 + $0x144] ss:$16 sps:$4 sm:$0xff]   ;;  %v7473_v4 = vld [vmem:[#allocation2 + $0x140] ss:$16 sps:$4 sm:$0xff]   ;;  %v7958_v16 = vpack.c.bf16 %v51_v54, %v51_v54 }
  0x29   :  { %1707 = vmatprep.subr.bf16.mxu1 %v7435_v29  ;;  %v7471_v2 = vld [vmem:[#allocation2 + $0x344] ss:$16 sps:$4 sm:$0xff]   ;;  %v7474_v5 = vld [vmem:[#allocation2 + $0x340] ss:$16 sps:$4 sm:$0xff]  }
  0x2a   :  { %v7952_v62 = vpack.c.bf16 %v59_v59, %v59_v59  ;;  %v60_v63 = vcombine.high %v58_v60, %v58_v60  ;;  %v7475_v6 = vld [vmem:[#allocation2 + $0x124] ss:$16 sps:$4 sm:$0xff]   ;;  %v7479_v8 = vld [vmem:[#allocation2 + $0x120] ss:$16 sps:$4 sm:$0xff]   ;;  %v7960_v17 = vpack.c.bf16 %v58_v60, %v58_v60 }
  0x2b   :  { %1667 = vmatpush1.bf16.msra.mxu0 %v7437_v30  ;;  %v7477_v7 = vld [vmem:[#allocation2 + $0x324] ss:$16 sps:$4 sm:$0xff]   ;;  %v7480_v9 = vld [vmem:[#allocation2 + $0x320] ss:$16 sps:$4 sm:$0xff]  }
  0x2c   :  { %1708 = vmatpush1.bf16.msra.mxu1 %v7438_v31  ;;  %1668 = vmatprep.subr.bf16.mxu0 %v7439_v32  ;;  %v7954_v3 = vpack.c.bf16 %v60_v63, %v60_v63  ;;  %v7481_v10 = vld [vmem:[#allocation2 + $0x104] ss:$16 sps:$4 sm:$0xff]   ;;  %v7485_v12 = vld [vmem:[#allocation2 + $0x100] ss:$16 sps:$4 sm:$0xff]  }
  0x2d   :  { %1709 = vmatprep.subr.bf16.mxu1 %v7441_v33  ;;  %1684 = vmatprep.mubr.bf16.mxu0 %v7952_v62  ;;  %v7483_v11 = vld [vmem:[#allocation2 + $0x304] ss:$16 sps:$4 sm:$0xff]   ;;  %v7486_v13 = vld [vmem:[#allocation2 + $0x300] ss:$16 sps:$4 sm:$0xff]  }
  0x2e   :  { %1725 = vmatprep.mubr.bf16.mxu1 %v7954_v3  ;;  %v7490_v14 = vld [vmem:[#allocation2 + $0x4e4] ss:$16 sps:$4 sm:$0xff]   ;;  %v7488_v18 = vld [vmem:[#allocation2 + $0x4e0] ss:$16 sps:$4 sm:$0xff]  }
  0x2f   :  { %1669 = vmatpush2.bf16.msra.mxu0 %v7443_v34  ;;  %v7493_v15 = vld [vmem:[#allocation2 + $0x6e4] ss:$16 sps:$4 sm:$0xff]   ;;  %v7491_v19 = vld [vmem:[#allocation2 + $0x6e0] ss:$16 sps:$4 sm:$0xff]  }
  0x30   :  { %1710 = vmatpush2.bf16.msra.mxu1 %v7444_v35  ;;  %1670 = vmatprep.subr.bf16.mxu0 %v7445_v39  ;;  %v7496_v20 = vld [vmem:[#allocation2 + $0x4c4] ss:$16 sps:$4 sm:$0xff]   ;;  %v7494_v22 = vld [vmem:[#allocation2 + $0x4c0] ss:$16 sps:$4 sm:$0xff]  }
  0x31   :  { %1711 = vmatprep.subr.bf16.mxu1 %v7447_v40  ;;  %v7499_v21 = vld [vmem:[#allocation2 + $0x6c4] ss:$16 sps:$4 sm:$0xff]   ;;  %v7497_v23 = vld [vmem:[#allocation2 + $0x6c0] ss:$16 sps:$4 sm:$0xff]  }
  0x32   :  { %v7502_v24 = vld [vmem:[#allocation2 + $0x4a4] ss:$16 sps:$4 sm:$0xff]   ;;  %v7500_v26 = vld [vmem:[#allocation2 + $0x4a0] ss:$16 sps:$4 sm:$0xff]  }
  0x33   :  { %1671 = vmatpush2.bf16.msra.mxu0 %v7449_v41  ;;  %v7505_v25 = vld [vmem:[#allocation2 + $0x6a4] ss:$16 sps:$4 sm:$0xff]   ;;  %v7503_v27 = vld [vmem:[#allocation2 + $0x6a0] ss:$16 sps:$4 sm:$0xff]  }
  0x34   :  { %1712 = vmatpush2.bf16.msra.mxu1 %v7450_v44  ;;  %1672 = vmatprep.subr.bf16.mxu0 %v7451_v45  ;;  %v7508_v28 = vld [vmem:[#allocation2 + $0x484] ss:$16 sps:$4 sm:$0xff]   ;;  %v7506_v30 = vld [vmem:[#allocation2 + $0x480] ss:$16 sps:$4 sm:$0xff]   ;;  %v7968_v44 = vrot.slane %v41_v42, %v7945_v49  ;;  %v61_v45 = vcombine.high %v41_v42, %v41_v42  ;;  %v7597_v42 = vld [vmem:[#allocation2 + $0xa8] ss:$16 sps:$4 sm:$0xff]  }
  0x35   :  { %1713 = vmatprep.subr.bf16.mxu1 %v7453_v46  ;;  %v7511_v29 = vld [vmem:[#allocation2 + $0x684] ss:$16 sps:$4 sm:$0xff]   ;;  %v7509_v31 = vld [vmem:[#allocation2 + $0x680] ss:$16 sps:$4 sm:$0xff]  }
  0x36   :  { %v7514_v32 = vld [vmem:[#allocation2 + $0x464] ss:$16 sps:$4 sm:$0xff]   ;;  %v7512_v34 = vld [vmem:[#allocation2 + $0x460] ss:$16 sps:$4 sm:$0xff]  }
  0x37   :  { %1673 = vmatpush2.bf16.msra.mxu0 %v7455_v47  ;;  %v7517_v33 = vld [vmem:[#allocation2 + $0x664] ss:$16 sps:$4 sm:$0xff]   ;;  %v7515_v35 = vld [vmem:[#allocation2 + $0x660] ss:$16 sps:$4 sm:$0xff]  }
  0x38   :  { %1714 = vmatpush2.bf16.msra.mxu1 %v7456_v48  ;;  %1674 = vmatprep.subr.bf16.mxu0 %v7457_v50  ;;  %v7520_v36 = vld [vmem:[#allocation2 + $0x444] ss:$16 sps:$4 sm:$0xff]   ;;  %v7518_v38 = vld [vmem:[#allocation2 + $0x440] ss:$16 sps:$4 sm:$0xff]   ;;  %v76_v48 = vcombine.high %v7968_v44, %v7968_v44  ;;  %v7973_v50 = vrot.slane %v61_v45, %v7945_v49  ;;  %v7605_v45 = vld [vmem:[#allocation2 + $0x8c] ss:$16 sps:$4 sm:$0xff]  }
  0x39   :  { %1715 = vmatprep.subr.bf16.mxu1 %v7459_v51  ;;  %v7523_v37 = vld [vmem:[#allocation2 + $0x644] ss:$16 sps:$4 sm:$0xff]   ;;  %v7521_v39 = vld [vmem:[#allocation2 + $0x640] ss:$16 sps:$4 sm:$0xff]  }
  0x3a   :  { %v7526_v40 = vld [vmem:[#allocation2 + $0x424] ss:$16 sps:$4 sm:$0xff]   ;;  %v7524_v46 = vld [vmem:[#allocation2 + $0x420] ss:$16 sps:$4 sm:$0xff]   ;;  %v77_v54 = vcombine.high %v7973_v50, %v7973_v50 }
  0x3b   :  { %1675 = vmatpush2.bf16.msra.mxu0 %v7461_v53  ;;  %v7529_v41 = vld [vmem:[#allocation2 + $0x624] ss:$16 sps:$4 sm:$0xff]   ;;  %v7527_v47 = vld [vmem:[#allocation2 + $0x620] ss:$16 sps:$4 sm:$0xff]   ;;  %v7975_v53 = vpack.c.bf16 %v76_v48, %v76_v48  ;;  %v7606_v48 = vld [vmem:[#allocation2 + $0x288] ss:$16 sps:$4 sm:$0xff]  }
  0x3c   :  { %1716 = vmatpush2.bf16.msra.mxu1 %v7462_v56  ;;  %1676 = vmatprep.subr.bf16.mxu0 %v7463_v57  ;;  %v7532_v51 = vld [vmem:[#allocation2 + $0x404] ss:$16 sps:$4 sm:$0xff]   ;;  %v7530_v55 = vld [vmem:[#allocation2 + $0x400] ss:$16 sps:$4 sm:$0xff]   ;;  %v7979_v57 = vpack.c.bf16 %v77_v54, %v77_v54  ;;  %v7620_v54 = vld [vmem:[#allocation2 + $0x24c] ss:$16 sps:$4 sm:$0xff]  }
  0x3d   :  { %1717 = vmatprep.subr.bf16.mxu1 %v7465_v58  ;;  %v7535_v52 = vld [vmem:[#allocation2 + $0x604] ss:$16 sps:$4 sm:$0xff]   ;;  %v7533_v56 = vld [vmem:[#allocation2 + $0x600] ss:$16 sps:$4 sm:$0xff]  }
  0x3e   :  { %v7538_v58 = vld [vmem:[#allocation2 + $0x5e4] ss:$16 sps:$4 sm:$0xff]   ;;  %v7536_v60 = vld [vmem:[#allocation2 + $0x5e0] ss:$16 sps:$4 sm:$0xff]  }
  0x3f   :  { %1677 = vmatpush2.bf16.msra.mxu0 %v7467_v61  ;;  %v7541_v59 = vld [vmem:[#allocation2 + $0x7e4] ss:$16 sps:$4 sm:$0xff]   ;;  %v7539_v61 = vld [vmem:[#allocation2 + $0x7e0] ss:$16 sps:$4 sm:$0xff]  }
  0x40   :  { %1718 = vmatpush2.bf16.msra.mxu1 %v7468_v0  ;;  %1678 = vmatprep.subr.bf16.mxu0 %v7469_v1  ;;  %v7544_v63 = vld [vmem:[#allocation2 + $0x5c4] ss:$16 sps:$4 sm:$0xff]   ;;  %v7542_v1 = vld [vmem:[#allocation2 + $0x5c0] ss:$16 sps:$4 sm:$0xff]  }
  0x41   :  { %1719 = vmatprep.subr.bf16.mxu1 %v7471_v2  ;;  %v7547_v0 = vld [vmem:[#allocation2 + $0x7c4] ss:$16 sps:$4 sm:$0xff]   ;;  %v7545_v2 = vld [vmem:[#allocation2 + $0x7c0] ss:$16 sps:$4 sm:$0xff]  }
  0x43   :  { %1679 = vmatpush2.bf16.msra.mxu0 %v7473_v4  ;;  %v7550_v4 = vld [vmem:[#allocation2 + $0x5a4] ss:$16 sps:$4 sm:$0xff]  }
  0x44   :  { %1720 = vmatpush2.bf16.msra.mxu1 %v7474_v5  ;;  %1680 = vmatprep.subr.bf16.mxu0 %v7475_v6  ;;  %v7553_v5 = vld [vmem:[#allocation2 + $0x7a4] ss:$16 sps:$4 sm:$0xff]   ;;  %v7548_v6 = vld [vmem:[#allocation2 + $0x5a0] ss:$16 sps:$4 sm:$0xff]  }
  0x45   :  { %1721 = vmatprep.subr.bf16.mxu1 %v7477_v7  ;;  %v7551_v7 = vld [vmem:[#allocation2 + $0x7a0] ss:$16 sps:$4 sm:$0xff]  }
  0x47   :  { %1681 = vmatpush2.bf16.msra.mxu0 %v7479_v8  ;;  %v7556_v8 = vld [vmem:[#allocation2 + $0x584] ss:$16 sps:$4 sm:$0xff]  }
  0x48   :  { %1722 = vmatpush2.bf16.msra.mxu1 %v7480_v9  ;;  %1682 = vmatprep.subr.bf16.mxu0 %v7481_v10  ;;  %v7559_v9 = vld [vmem:[#allocation2 + $0x784] ss:$16 sps:$4 sm:$0xff]   ;;  %v7554_v10 = vld [vmem:[#allocation2 + $0x580] ss:$16 sps:$4 sm:$0xff]  }
  0x49   :  { %1723 = vmatprep.subr.bf16.mxu1 %v7483_v11  ;;  %v7557_v11 = vld [vmem:[#allocation2 + $0x780] ss:$16 sps:$4 sm:$0xff]  }
  0x4b   :  { %1683 = vmatpush2.bf16.msra.mxu0 %v7485_v12  ;;  %v7562_v12 = vld [vmem:[#allocation2 + $0x564] ss:$16 sps:$4 sm:$0xff]  }
  0x4c   :  { %1724 = vmatpush2.bf16.msra.mxu1 %v7486_v13  ;;  %1734 = vmatprep.subr.bf16.mxu0 %v7490_v14  ;;  %v7565_v13 = vld [vmem:[#allocation2 + $0x764] ss:$16 sps:$4 sm:$0xff]   ;;  %v7560_v14 = vld [vmem:[#allocation2 + $0x560] ss:$16 sps:$4 sm:$0xff]  }
  0x4d   :  { %1775 = vmatprep.subr.bf16.mxu1 %v7493_v15  ;;  %v7563_v15 = vld [vmem:[#allocation2 + $0x760] ss:$16 sps:$4 sm:$0xff]  }
  0x4e   :  { %1685 = vmatmul.mubr.bf16.vlgmr.msra.gmra.mxu0 %v7958_v16 }
  0x4f   :  { %1726 = vmatmul.mubr.bf16.vlgmr.msra.gmra.mxu1 %v7960_v17  ;;  %1735 = vmatpush1.bf16.msra.mxu0 %v7488_v18  ;;  %v7568_v18 = vld [vmem:[#allocation2 + $0x544] ss:$16 sps:$4 sm:$0xff]  }
  0x50   :  { %1776 = vmatpush1.bf16.msra.mxu1 %v7491_v19  ;;  %1736 = vmatprep.subr.bf16.mxu0 %v7496_v20  ;;  %v7571_v19 = vld [vmem:[#allocation2 + $0x744] ss:$16 sps:$4 sm:$0xff]   ;;  %v7566_v20 = vld [vmem:[#allocation2 + $0x540] ss:$16 sps:$4 sm:$0xff]  }
  0x51   :  { %1777 = vmatprep.subr.bf16.mxu1 %v7499_v21  ;;  %1766 = vmatprep.mubr.bf16.mxu0 %v7975_v53  ;;  %v7569_v21 = vld [vmem:[#allocation2 + $0x740] ss:$16 sps:$4 sm:$0xff]  }
  0x52   :  { %1807 = vmatprep.mubr.bf16.mxu1 %v7979_v57 }
  0x53   :  { %1737 = vmatpush1.bf16.msra.mxu0 %v7494_v22  ;;  %v7574_v22 = vld [vmem:[#allocation2 + $0x524] ss:$16 sps:$4 sm:$0xff]  }
  0x54   :  { %1778 = vmatpush1.bf16.msra.mxu1 %v7497_v23  ;;  %1738 = vmatprep.subr.bf16.mxu0 %v7502_v24  ;;  %v7577_v23 = vld [vmem:[#allocation2 + $0x724] ss:$16 sps:$4 sm:$0xff]   ;;  %v7572_v24 = vld [vmem:[#allocation2 + $0x520] ss:$16 sps:$4 sm:$0xff]  }
  0x55   :  { %1779 = vmatprep.subr.bf16.mxu1 %v7505_v25  ;;  %v7575_v25 = vld [vmem:[#allocation2 + $0x720] ss:$16 sps:$4 sm:$0xff]  }
  0x57   :  { %1739 = vmatpush1.bf16.msra.mxu0 %v7500_v26  ;;  %v7580_v26 = vld [vmem:[#allocation2 + $0x504] ss:$16 sps:$4 sm:$0xff]  }
  0x58   :  { %1780 = vmatpush1.bf16.msra.mxu1 %v7503_v27  ;;  %1740 = vmatprep.subr.bf16.mxu0 %v7508_v28  ;;  %v7583_v27 = vld [vmem:[#allocation2 + $0x704] ss:$16 sps:$4 sm:$0xff]   ;;  %v7578_v28 = vld [vmem:[#allocation2 + $0x500] ss:$16 sps:$4 sm:$0xff]  }
  0x59   :  { %1781 = vmatprep.subr.bf16.mxu1 %v7511_v29  ;;  %v7581_v29 = vld [vmem:[#allocation2 + $0x700] ss:$16 sps:$4 sm:$0xff]  }
  0x5b   :  { %1741 = vmatpush1.bf16.msra.mxu0 %v7506_v30  ;;  %v7587_v30 = vld [vmem:[#allocation2 + $0xec] ss:$16 sps:$4 sm:$0xff]  }
  0x5c   :  { %1782 = vmatpush1.bf16.msra.mxu1 %v7509_v31  ;;  %1742 = vmatprep.subr.bf16.mxu0 %v7514_v32  ;;  %v7590_v31 = vld [vmem:[#allocation2 + $0x2ec] ss:$16 sps:$4 sm:$0xff]   ;;  %v7985_v32 = vpack.c.bf16 %v7968_v44, %v7968_v44  ;;  %v7600_v44 = vld [vmem:[#allocation2 + $0x2a8] ss:$16 sps:$4 sm:$0xff]  }
  0x5d   :  { %1783 = vmatprep.subr.bf16.mxu1 %v7517_v33  ;;  %v7989_v33 = vpack.c.bf16 %v7973_v50, %v7973_v50  ;;  %v7611_v50 = vld [vmem:[#allocation2 + $0x6c] ss:$16 sps:$4 sm:$0xff]  }
  0x5f   :  { %1743 = vmatpush1.bf16.msra.mxu0 %v7512_v34  ;;  %v7585_v34 = vld [vmem:[#allocation2 + $0xe8] ss:$16 sps:$4 sm:$0xff]  }
  0x60   :  { %1784 = vmatpush1.bf16.msra.mxu1 %v7515_v35  ;;  %1744 = vmatprep.subr.bf16.mxu0 %v7520_v36  ;;  %v7588_v35 = vld [vmem:[#allocation2 + $0x2e8] ss:$16 sps:$4 sm:$0xff]   ;;  %v7593_v36 = vld [vmem:[#allocation2 + $0xcc] ss:$16 sps:$4 sm:$0xff]  }
  0x61   :  { %1785 = vmatprep.subr.bf16.mxu1 %v7523_v37  ;;  %v7596_v37 = vld [vmem:[#allocation2 + $0x2cc] ss:$16 sps:$4 sm:$0xff]  }
  0x63   :  { %1745 = vmatpush1.bf16.msra.mxu0 %v7518_v38  ;;  %v7591_v38 = vld [vmem:[#allocation2 + $0xc8] ss:$16 sps:$4 sm:$0xff]  }
  0x64   :  { %1786 = vmatpush1.bf16.msra.mxu1 %v7521_v39  ;;  %1746 = vmatprep.subr.bf16.mxu0 %v7526_v40  ;;  %v7594_v39 = vld [vmem:[#allocation2 + $0x2c8] ss:$16 sps:$4 sm:$0xff]   ;;  %v7599_v40 = vld [vmem:[#allocation2 + $0xac] ss:$16 sps:$4 sm:$0xff]  }
  0x65   :  { %1787 = vmatprep.subr.bf16.mxu1 %v7529_v41  ;;  %v7602_v41 = vld [vmem:[#allocation2 + $0x2ac] ss:$16 sps:$4 sm:$0xff]  }
  0x67   :  { %1747 = vmatpush1.bf16.msra.mxu0 %v7524_v46  ;;  %v7608_v46 = vld [vmem:[#allocation2 + $0x28c] ss:$16 sps:$4 sm:$0xff]  }
  0x68   :  { %1788 = vmatpush1.bf16.msra.mxu1 %v7527_v47  ;;  %1748 = vmatprep.subr.bf16.mxu0 %v7532_v51  ;;  %v7603_v47 = vld [vmem:[#allocation2 + $0x88] ss:$16 sps:$4 sm:$0xff]   ;;  %v7614_v51 = vld [vmem:[#allocation2 + $0x26c] ss:$16 sps:$4 sm:$0xff]  }
  0x69   :  { %1789 = vmatprep.subr.bf16.mxu1 %v7535_v52  ;;  %v7617_v52 = vld [vmem:[#allocation2 + $0x4c] ss:$16 sps:$4 sm:$0xff]  }
  0x6b   :  { %1749 = vmatpush1.bf16.msra.mxu0 %v7530_v55  ;;  %v7615_v55 = vld [vmem:[#allocation2 + $0x48] ss:$16 sps:$4 sm:$0xff]  }
  0x6c   :  { %1790 = vmatpush1.bf16.msra.mxu1 %v7533_v56  ;;  %1750 = vmatprep.subr.bf16.mxu0 %v7538_v58  ;;  %v7618_v56 = vld [vmem:[#allocation2 + $0x248] ss:$16 sps:$4 sm:$0xff]   ;;  %v7623_v58 = vld [vmem:[#allocation2 + $0x2c] ss:$16 sps:$4 sm:$0xff]  }
  0x6d   :  { %1791 = vmatprep.subr.bf16.mxu1 %v7541_v59  ;;  %v7626_v59 = vld [vmem:[#allocation2 + $0x22c] ss:$16 sps:$4 sm:$0xff]  }
  0x6f   :  { %1751 = vmatpush2.bf16.msra.mxu0 %v7536_v60  ;;  %v7621_v60 = vld [vmem:[#allocation2 + $0x28] ss:$16 sps:$4 sm:$0xff]  }
  0x70   :  { %1792 = vmatpush2.bf16.msra.mxu1 %v7539_v61  ;;  %1752 = vmatprep.subr.bf16.mxu0 %v7544_v63  ;;  %v7624_v61 = vld [vmem:[#allocation2 + $0x228] ss:$16 sps:$4 sm:$0xff]   ;;  %v7629_v63 = vld [vmem:[#allocation2 + $0xc] ss:$16 sps:$4 sm:$0xff]  }
  0x71   :  { %1793 = vmatprep.subr.bf16.mxu1 %v7547_v0  ;;  %v7632_v0 = vld [vmem:[#allocation2 + $0x20c] ss:$16 sps:$4 sm:$0xff]  }
  0x73   :  { %1753 = vmatpush2.bf16.msra.mxu0 %v7542_v1  ;;  %v7627_v1 = vld [vmem:[#allocation2 + $0x8] ss:$16 sps:$4 sm:$0xff]  }
  0x74   :  { %1794 = vmatpush2.bf16.msra.mxu1 %v7545_v2  ;;  %1754 = vmatprep.subr.bf16.mxu0 %v7550_v4  ;;  %v7630_v2 = vld [vmem:[#allocation2 + $0x208] ss:$16 sps:$4 sm:$0xff]   ;;  %v7635_v4 = vld [vmem:[#allocation2 + $0x1ec] ss:$16 sps:$4 sm:$0xff]  }
  0x75   :  { %1795 = vmatprep.subr.bf16.mxu1 %v7553_v5  ;;  %v7638_v5 = vld [vmem:[#allocation2 + $0x3ec] ss:$16 sps:$4 sm:$0xff]  }
  0x77   :  { %1755 = vmatpush2.bf16.msra.mxu0 %v7548_v6  ;;  %v7633_v6 = vld [vmem:[#allocation2 + $0x1e8] ss:$16 sps:$4 sm:$0xff]  }
  0x78   :  { %1796 = vmatpush2.bf16.msra.mxu1 %v7551_v7  ;;  %1756 = vmatprep.subr.bf16.mxu0 %v7556_v8  ;;  %v7636_v7 = vld [vmem:[#allocation2 + $0x3e8] ss:$16 sps:$4 sm:$0xff]   ;;  %v7641_v8 = vld [vmem:[#allocation2 + $0x1cc] ss:$16 sps:$4 sm:$0xff]  }
  0x79   :  { %1797 = vmatprep.subr.bf16.mxu1 %v7559_v9  ;;  %v7644_v9 = vld [vmem:[#allocation2 + $0x3cc] ss:$16 sps:$4 sm:$0xff]  }
  0x7b   :  { %1757 = vmatpush2.bf16.msra.mxu0 %v7554_v10  ;;  %v7639_v10 = vld [vmem:[#allocation2 + $0x1c8] ss:$16 sps:$4 sm:$0xff]  }
  0x7c   :  { %1798 = vmatpush2.bf16.msra.mxu1 %v7557_v11  ;;  %1758 = vmatprep.subr.bf16.mxu0 %v7562_v12  ;;  %v7642_v11 = vld [vmem:[#allocation2 + $0x3c8] ss:$16 sps:$4 sm:$0xff]   ;;  %v7647_v12 = vld [vmem:[#allocation2 + $0x1ac] ss:$16 sps:$4 sm:$0xff]  }
  0x7d   :  { %1799 = vmatprep.subr.bf16.mxu1 %v7565_v13  ;;  %v7650_v13 = vld [vmem:[#allocation2 + $0x3ac] ss:$16 sps:$4 sm:$0xff]  }
  0x7f   :  { %1759 = vmatpush2.bf16.msra.mxu0 %v7560_v14  ;;  %v7645_v14 = vld [vmem:[#allocation2 + $0x1a8] ss:$16 sps:$4 sm:$0xff]  }
  0x80   :  { %1800 = vmatpush2.bf16.msra.mxu1 %v7563_v15  ;;  %1760 = vmatprep.subr.bf16.mxu0 %v7568_v18  ;;  %v7648_v15 = vld [vmem:[#allocation2 + $0x3a8] ss:$16 sps:$4 sm:$0xff]   ;;  %v7653_v18 = vld [vmem:[#allocation2 + $0x18c] ss:$16 sps:$4 sm:$0xff]  }
  0x81   :  { %1801 = vmatprep.subr.bf16.mxu1 %v7571_v19  ;;  %v7656_v19 = vld [vmem:[#allocation2 + $0x38c] ss:$16 sps:$4 sm:$0xff]  }
  0x83   :  { %1761 = vmatpush2.bf16.msra.mxu0 %v7566_v20  ;;  %v7651_v20 = vld [vmem:[#allocation2 + $0x188] ss:$16 sps:$4 sm:$0xff]  }
  0x84   :  { %1802 = vmatpush2.bf16.msra.mxu1 %v7569_v21  ;;  %1762 = vmatprep.subr.bf16.mxu0 %v7574_v22  ;;  %v7654_v21 = vld [vmem:[#allocation2 + $0x388] ss:$16 sps:$4 sm:$0xff]   ;;  %v7659_v22 = vld [vmem:[#allocation2 + $0x16c] ss:$16 sps:$4 sm:$0xff]  }
  0x85   :  { %1803 = vmatprep.subr.bf16.mxu1 %v7577_v23  ;;  %v7662_v23 = vld [vmem:[#allocation2 + $0x36c] ss:$16 sps:$4 sm:$0xff]  }
  0x87   :  { %1763 = vmatpush2.bf16.msra.mxu0 %v7572_v24  ;;  %v7657_v24 = vld [vmem:[#allocation2 + $0x168] ss:$16 sps:$4 sm:$0xff]  }
  0x88   :  { %1804 = vmatpush2.bf16.msra.mxu1 %v7575_v25  ;;  %1764 = vmatprep.subr.bf16.mxu0 %v7580_v26  ;;  %v7660_v25 = vld [vmem:[#allocation2 + $0x368] ss:$16 sps:$4 sm:$0xff]   ;;  %v7665_v26 = vld [vmem:[#allocation2 + $0x14c] ss:$16 sps:$4 sm:$0xff]  }
  0x89   :  { %1805 = vmatprep.subr.bf16.mxu1 %v7583_v27  ;;  %v7668_v27 = vld [vmem:[#allocation2 + $0x34c] ss:$16 sps:$4 sm:$0xff]  }
  0x8b   :  { %1765 = vmatpush2.bf16.msra.mxu0 %v7578_v28  ;;  %v7663_v28 = vld [vmem:[#allocation2 + $0x148] ss:$16 sps:$4 sm:$0xff]  }
  0x8c   :  { %1806 = vmatpush2.bf16.msra.mxu1 %v7581_v29  ;;  %1816 = vmatprep.subr.bf16.mxu0 %v7587_v30  ;;  %v7666_v29 = vld [vmem:[#allocation2 + $0x348] ss:$16 sps:$4 sm:$0xff]   ;;  %v7671_v30 = vld [vmem:[#allocation2 + $0x12c] ss:$16 sps:$4 sm:$0xff]  }
  0x8d   :  { %1857 = vmatprep.subr.bf16.mxu1 %v7590_v31  ;;  %v7674_v31 = vld [vmem:[#allocation2 + $0x32c] ss:$16 sps:$4 sm:$0xff]  }
  0x8e   :  { %1767 = vmatmul.mubr.bf16.vlgmr.msra.gmra.mxu0 %v7985_v32 }
  0x8f   :  { %1808 = vmatmul.mubr.bf16.vlgmr.msra.gmra.mxu1 %v7989_v33  ;;  %1817 = vmatpush1.bf16.msra.mxu0 %v7585_v34  ;;  %v7669_v34 = vld [vmem:[#allocation2 + $0x128] ss:$16 sps:$4 sm:$0xff]  }
  0x90   :  { %1858 = vmatpush1.bf16.msra.mxu1 %v7588_v35  ;;  %1818 = vmatprep.subr.bf16.mxu0 %v7593_v36  ;;  %v7672_v35 = vld [vmem:[#allocation2 + $0x328] ss:$16 sps:$4 sm:$0xff]   ;;  %v7677_v36 = vld [vmem:[#allocation2 + $0x10c] ss:$16 sps:$4 sm:$0xff]  }
  0x91   :  { %1859 = vmatprep.subr.bf16.mxu1 %v7596_v37  ;;  %1848 = vmatprep.mubr.bf16.mxu0 %v7952_v62  ;;  %v7609_v62 = vld [vmem:[#allocation2 + $0x68] ss:$16 sps:$4 sm:$0xff]   ;;  %v7680_v37 = vld [vmem:[#allocation2 + $0x30c] ss:$16 sps:$4 sm:$0xff]  }
  0x92   :  { %1889 = vmatprep.mubr.bf16.mxu1 %v7954_v3  ;;  %v7612_v3 = vld [vmem:[#allocation2 + $0x268] ss:$16 sps:$4 sm:$0xff]  }
  0x93   :  { %1819 = vmatpush1.bf16.msra.mxu0 %v7591_v38  ;;  %v7675_v38 = vld [vmem:[#allocation2 + $0x108] ss:$16 sps:$4 sm:$0xff]  }
  0x94   :  { %1860 = vmatpush1.bf16.msra.mxu1 %v7594_v39  ;;  %1820 = vmatprep.subr.bf16.mxu0 %v7599_v40  ;;  %v7678_v39 = vld [vmem:[#allocation2 + $0x308] ss:$16 sps:$4 sm:$0xff]   ;;  %v7683_v40 = vld [vmem:[#allocation2 + $0x4ec] ss:$16 sps:$4 sm:$0xff]  }
  0x95   :  { %1861 = vmatprep.subr.bf16.mxu1 %v7602_v41  ;;  %v7686_v41 = vld [vmem:[#allocation2 + $0x6ec] ss:$16 sps:$4 sm:$0xff]  }
  0x97   :  { %1821 = vmatpush1.bf16.msra.mxu0 %v7597_v42  ;;  %v7681_v42 = vld [vmem:[#allocation2 + $0x4e8] ss:$16 sps:$4 sm:$0xff]  }
  0x98   :  { %1862 = vmatpush1.bf16.msra.mxu1 %v7600_v44  ;;  %1822 = vmatprep.subr.bf16.mxu0 %v7605_v45  ;;  %v7684_v44 = vld [vmem:[#allocation2 + $0x6e8] ss:$16 sps:$4 sm:$0xff]   ;;  %v7689_v45 = vld [vmem:[#allocation2 + $0x4cc] ss:$16 sps:$4 sm:$0xff]  }
  0x99   :  { %1863 = vmatprep.subr.bf16.mxu1 %v7608_v46  ;;  %v7692_v46 = vld [vmem:[#allocation2 + $0x6cc] ss:$16 sps:$4 sm:$0xff]  }
  0x9b   :  { %1823 = vmatpush1.bf16.msra.mxu0 %v7603_v47  ;;  %v7687_v47 = vld [vmem:[#allocation2 + $0x4c8] ss:$16 sps:$4 sm:$0xff]  }
  0x9c   :  { %1864 = vmatpush1.bf16.msra.mxu1 %v7606_v48  ;;  %1824 = vmatprep.subr.bf16.mxu0 %v7611_v50  ;;  %v7690_v48 = vld [vmem:[#allocation2 + $0x6c8] ss:$16 sps:$4 sm:$0xff]   ;;  %v7695_v50 = vld [vmem:[#allocation2 + $0x4ac] ss:$16 sps:$4 sm:$0xff]  }
  0x9d   :  { %1865 = vmatprep.subr.bf16.mxu1 %v7614_v51  ;;  %v7698_v51 = vld [vmem:[#allocation2 + $0x6ac] ss:$16 sps:$4 sm:$0xff]  }
  0x9f   :  { %1825 = vmatpush1.bf16.msra.mxu0 %v7609_v62  ;;  %v7693_v62 = vld [vmem:[#allocation2 + $0x4a8] ss:$16 sps:$4 sm:$0xff]  }
  0xa0   :  { %1866 = vmatpush1.bf16.msra.mxu1 %v7612_v3  ;;  %1826 = vmatprep.subr.bf16.mxu0 %v7617_v52  ;;  %v7696_v3 = vld [vmem:[#allocation2 + $0x6a8] ss:$16 sps:$4 sm:$0xff]   ;;  %v7701_v52 = vld [vmem:[#allocation2 + $0x48c] ss:$16 sps:$4 sm:$0xff]  }
  0xa1   :  { %1867 = vmatprep.subr.bf16.mxu1 %v7620_v54  ;;  %v7702_v54 = vld [vmem:[#allocation2 + $0x688] ss:$16 sps:$4 sm:$0xff]  }
  0xa3   :  { %1827 = vmatpush1.bf16.msra.mxu0 %v7615_v55  ;;  %v7707_v55 = vld [vmem:[#allocation2 + $0x46c] ss:$16 sps:$4 sm:$0xff]  }
  0xa4   :  { %1868 = vmatpush1.bf16.msra.mxu1 %v7618_v56  ;;  %1828 = vmatprep.subr.bf16.mxu0 %v7623_v58  ;;  %v7710_v56 = vld [vmem:[#allocation2 + $0x66c] ss:$16 sps:$4 sm:$0xff]   ;;  %v7705_v58 = vld [vmem:[#allocation2 + $0x468] ss:$16 sps:$4 sm:$0xff]  }
  0xa5   :  { %1869 = vmatprep.subr.bf16.mxu1 %v7626_v59  ;;  %v7716_v59 = vld [vmem:[#allocation2 + $0x64c] ss:$16 sps:$4 sm:$0xff]  }
  0xa7   :  { %1829 = vmatpush1.bf16.msra.mxu0 %v7621_v60  ;;  %v7711_v60 = vld [vmem:[#allocation2 + $0x448] ss:$16 sps:$4 sm:$0xff]  }
  0xa8   :  { %1870 = vmatpush1.bf16.msra.mxu1 %v7624_v61  ;;  %1830 = vmatprep.subr.bf16.mxu0 %v7629_v63  ;;  %v7714_v61 = vld [vmem:[#allocation2 + $0x648] ss:$16 sps:$4 sm:$0xff]   ;;  %v7719_v63 = vld [vmem:[#allocation2 + $0x42c] ss:$16 sps:$4 sm:$0xff]  }
  0xa9   :  { %1871 = vmatprep.subr.bf16.mxu1 %v7632_v0  ;;  %v7722_v0 = vld [vmem:[#allocation2 + $0x62c] ss:$16 sps:$4 sm:$0xff]  }
  0xab   :  { %1831 = vmatpush1.bf16.msra.mxu0 %v7627_v1  ;;  %v7717_v1 = vld [vmem:[#allocation2 + $0x428] ss:$16 sps:$4 sm:$0xff]  }
  0xac   :  { %1872 = vmatpush1.bf16.msra.mxu1 %v7630_v2  ;;  %1832 = vmatprep.subr.bf16.mxu0 %v7635_v4  ;;  %v7720_v2 = vld [vmem:[#allocation2 + $0x628] ss:$16 sps:$4 sm:$0xff]   ;;  %v7725_v4 = vld [vmem:[#allocation2 + $0x40c] ss:$16 sps:$4 sm:$0xff]  }
  0xad   :  { %1873 = vmatprep.subr.bf16.mxu1 %v7638_v5  ;;  %v7728_v5 = vld [vmem:[#allocation2 + $0x60c] ss:$16 sps:$4 sm:$0xff]  }
  0xaf   :  { %1833 = vmatpush2.bf16.msra.mxu0 %v7633_v6  ;;  %v7723_v6 = vld [vmem:[#allocation2 + $0x408] ss:$16 sps:$4 sm:$0xff]  }
  0xb0   :  { %1874 = vmatpush2.bf16.msra.mxu1 %v7636_v7  ;;  %1834 = vmatprep.subr.bf16.mxu0 %v7641_v8  ;;  %v7726_v7 = vld [vmem:[#allocation2 + $0x608] ss:$16 sps:$4 sm:$0xff]   ;;  %v7731_v8 = vld [vmem:[#allocation2 + $0x5ec] ss:$16 sps:$4 sm:$0xff]  }
  0xb1   :  { %1875 = vmatprep.subr.bf16.mxu1 %v7644_v9  ;;  %v7734_v9 = vld [vmem:[#allocation2 + $0x7ec] ss:$16 sps:$4 sm:$0xff]  }
  0xb3   :  { %1835 = vmatpush2.bf16.msra.mxu0 %v7639_v10  ;;  %v7729_v10 = vld [vmem:[#allocation2 + $0x5e8] ss:$16 sps:$4 sm:$0xff]  }
  0xb4   :  { %1876 = vmatpush2.bf16.msra.mxu1 %v7642_v11  ;;  %1836 = vmatprep.subr.bf16.mxu0 %v7647_v12  ;;  %v7732_v11 = vld [vmem:[#allocation2 + $0x7e8] ss:$16 sps:$4 sm:$0xff]   ;;  %v7737_v12 = vld [vmem:[#allocation2 + $0x5cc] ss:$16 sps:$4 sm:$0xff]  }
  0xb5   :  { %1877 = vmatprep.subr.bf16.mxu1 %v7650_v13  ;;  %v7740_v13 = vld [vmem:[#allocation2 + $0x7cc] ss:$16 sps:$4 sm:$0xff]  }
  0xb7   :  { %1837 = vmatpush2.bf16.msra.mxu0 %v7645_v14  ;;  %v7735_v14 = vld [vmem:[#allocation2 + $0x5c8] ss:$16 sps:$4 sm:$0xff]  }
  0xb8   :  { %1878 = vmatpush2.bf16.msra.mxu1 %v7648_v15  ;;  %1838 = vmatprep.subr.bf16.mxu0 %v7653_v18  ;;  %v7738_v15 = vld [vmem:[#allocation2 + $0x7c8] ss:$16 sps:$4 sm:$0xff]   ;;  %v7743_v18 = vld [vmem:[#allocation2 + $0x5ac] ss:$16 sps:$4 sm:$0xff]  }
  0xb9   :  { %1879 = vmatprep.subr.bf16.mxu1 %v7656_v19  ;;  %v7746_v19 = vld [vmem:[#allocation2 + $0x7ac] ss:$16 sps:$4 sm:$0xff]  }
  0xbb   :  { %1839 = vmatpush2.bf16.msra.mxu0 %v7651_v20  ;;  %v7741_v20 = vld [vmem:[#allocation2 + $0x5a8] ss:$16 sps:$4 sm:$0xff]  }
  0xbc   :  { %1880 = vmatpush2.bf16.msra.mxu1 %v7654_v21  ;;  %1840 = vmatprep.subr.bf16.mxu0 %v7659_v22  ;;  %v7744_v21 = vld [vmem:[#allocation2 + $0x7a8] ss:$16 sps:$4 sm:$0xff]   ;;  %v7749_v22 = vld [vmem:[#allocation2 + $0x58c] ss:$16 sps:$4 sm:$0xff]  }
  0xbd   :  { %1881 = vmatprep.subr.bf16.mxu1 %v7662_v23  ;;  %v7752_v23 = vld [vmem:[#allocation2 + $0x78c] ss:$16 sps:$4 sm:$0xff]  }
  0xbf   :  { %1841 = vmatpush2.bf16.msra.mxu0 %v7657_v24  ;;  %v7747_v24 = vld [vmem:[#allocation2 + $0x588] ss:$16 sps:$4 sm:$0xff]  }
  0xc0   :  { %1882 = vmatpush2.bf16.msra.mxu1 %v7660_v25  ;;  %1842 = vmatprep.subr.bf16.mxu0 %v7665_v26  ;;  %v7750_v25 = vld [vmem:[#allocation2 + $0x788] ss:$16 sps:$4 sm:$0xff]   ;;  %v7755_v26 = vld [vmem:[#allocation2 + $0x56c] ss:$16 sps:$4 sm:$0xff]  }
  0xc1   :  { %1883 = vmatprep.subr.bf16.mxu1 %v7668_v27  ;;  %v7758_v27 = vld [vmem:[#allocation2 + $0x76c] ss:$16 sps:$4 sm:$0xff]  }
  0xc3   :  { %1843 = vmatpush2.bf16.msra.mxu0 %v7663_v28  ;;  %v7753_v28 = vld [vmem:[#allocation2 + $0x568] ss:$16 sps:$4 sm:$0xff]  }
  0xc4   :  { %1884 = vmatpush2.bf16.msra.mxu1 %v7666_v29  ;;  %1844 = vmatprep.subr.bf16.mxu0 %v7671_v30  ;;  %v7756_v29 = vld [vmem:[#allocation2 + $0x768] ss:$16 sps:$4 sm:$0xff]   ;;  %v7761_v30 = vld [vmem:[#allocation2 + $0x54c] ss:$16 sps:$4 sm:$0xff]  }
  0xc5   :  { %1885 = vmatprep.subr.bf16.mxu1 %v7674_v31  ;;  %v7764_v31 = vld [vmem:[#allocation2 + $0x74c] ss:$16 sps:$4 sm:$0xff]  }
  0xc7   :  { %1845 = vmatpush2.bf16.msra.mxu0 %v7669_v34  ;;  %v7759_v34 = vld [vmem:[#allocation2 + $0x548] ss:$16 sps:$4 sm:$0xff]  }
  0xc8   :  { %1886 = vmatpush2.bf16.msra.mxu1 %v7672_v35  ;;  %1846 = vmatprep.subr.bf16.mxu0 %v7677_v36  ;;  %v7762_v35 = vld [vmem:[#allocation2 + $0x748] ss:$16 sps:$4 sm:$0xff]   ;;  %v7767_v36 = vld [vmem:[#allocation2 + $0x52c] ss:$16 sps:$4 sm:$0xff]  }
  0xc9   :  { %1887 = vmatprep.subr.bf16.mxu1 %v7680_v37  ;;  %v7770_v37 = vld [vmem:[#allocation2 + $0x72c] ss:$16 sps:$4 sm:$0xff]  }
  0xcb   :  { %1847 = vmatpush2.bf16.msra.mxu0 %v7675_v38  ;;  %v7765_v38 = vld [vmem:[#allocation2 + $0x528] ss:$16 sps:$4 sm:$0xff]  }
  0xcc   :  { %1888 = vmatpush2.bf16.msra.mxu1 %v7678_v39  ;;  %1898 = vmatprep.subr.bf16.mxu0 %v7683_v40  ;;  %v7768_v39 = vld [vmem:[#allocation2 + $0x728] ss:$16 sps:$4 sm:$0xff]   ;;  %v7773_v40 = vld [vmem:[#allocation2 + $0x50c] ss:$16 sps:$4 sm:$0xff]  }
  0xcd   :  { %1939 = vmatprep.subr.bf16.mxu1 %v7686_v41  ;;  %v7776_v41 = vld [vmem:[#allocation2 + $0x70c] ss:$16 sps:$4 sm:$0xff]  }
  0xce   :  { %1849 = vmatmul.mubr.bf16.vlgmr.msra.gmra.mxu0 %v7958_v16  ;;  %v7704_v16 = vld [vmem:[#allocation2 + $0x68c] ss:$16 sps:$4 sm:$0xff]  }
  0xcf   :  { %1890 = vmatmul.mubr.bf16.vlgmr.msra.gmra.mxu1 %v7960_v17  ;;  %1899 = vmatpush1.bf16.msra.mxu0 %v7681_v42  ;;  %v7699_v17 = vld [vmem:[#allocation2 + $0x488] ss:$16 sps:$4 sm:$0xff]  }
  0xd0   :  { %1940 = vmatpush1.bf16.msra.mxu1 %v7684_v44  ;;  %1900 = vmatprep.subr.bf16.mxu0 %v7689_v45  ;;  %v7771_v42 = vld [vmem:[#allocation2 + $0x508] ss:$16 sps:$4 sm:$0xff]   ;;  %v7779_v45 = vld [vmem:[%s9946_s3 + $0x74] ss:$8 sps:$4 sm:$0xff]  }
  0xd1   :  { %1941 = vmatprep.subr.bf16.mxu1 %v7692_v46  ;;  %1930 = vmatprep.mubr.bf16.mxu0 %v7975_v53  ;;  %v7708_v53 = vld [vmem:[#allocation2 + $0x668] ss:$16 sps:$4 sm:$0xff]  }
  0xd2   :  { %1971 = vmatprep.mubr.bf16.mxu1 %v7979_v57  ;;  %v7713_v57 = vld [vmem:[#allocation2 + $0x44c] ss:$16 sps:$4 sm:$0xff]   ;;  %v7774_v44 = vld [vmem:[#allocation2 + $0x708] ss:$16 sps:$4 sm:$0xff]  }
  0xd3   :  { %1901 = vmatpush1.bf16.msra.mxu0 %v7687_v47  ;;  %v7777_v46 = vld [vmem:[%s9946_s3 + $0x70] ss:$8 sps:$4 sm:$0xff]   ;;  %v7782_v47 = vld [vmem:[%s9946_s3 + $0x64] ss:$8 sps:$4 sm:$0xff]  }
  0xd4   :  { %1942 = vmatpush1.bf16.msra.mxu1 %v7690_v48  ;;  %1902 = vmatprep.subr.bf16.mxu0 %v7695_v50 }
  0xd5   :  { %1943 = vmatprep.subr.bf16.mxu1 %v7698_v51  ;;  %v7780_v51 = vld [vmem:[%s9946_s3 + $0x60] ss:$8 sps:$4 sm:$0xff]  }
  0xd7   :  { %1903 = vmatpush1.bf16.msra.mxu0 %v7693_v62 }
  0xd8   :  { %1944 = vmatpush1.bf16.msra.mxu1 %v7696_v3  ;;  %1904 = vmatprep.subr.bf16.mxu0 %v7701_v52  ;;  %v7785_v52 = vld [vmem:[%s9946_s3 + $0x54] ss:$8 sps:$4 sm:$0xff]  }
  0xd9   :  { %1945 = vmatprep.subr.bf16.mxu1 %v7704_v16 }
  0xdb   :  { %1905 = vmatpush1.bf16.msra.mxu0 %v7699_v17 }
  0xdc   :  { %1946 = vmatpush1.bf16.msra.mxu1 %v7702_v54  ;;  %1906 = vmatprep.subr.bf16.mxu0 %v7707_v55  ;;  %v7788_v55 = vld [vmem:[%s9946_s3 + $0x44] ss:$8 sps:$4 sm:$0xff]  }
  0xdd   :  { %1947 = vmatprep.subr.bf16.mxu1 %v7710_v56  ;;  %v7825_v56 = vld [vmem:[%s9946_s3 + $0x170] ss:$8 sps:$4 sm:$0xff]  }
  0xdf   :  { %1907 = vmatpush1.bf16.msra.mxu0 %v7705_v58  ;;  %v7827_v58 = vld [vmem:[%s9946_s3 + $0x174] ss:$8 sps:$4 sm:$0xff]  }
  0xe0   :  { %1948 = vmatpush1.bf16.msra.mxu1 %v7708_v53  ;;  %1908 = vmatprep.subr.bf16.mxu0 %v7713_v57  ;;  %v7830_v53 = vld [vmem:[%s9946_s3 + $0x164] ss:$8 sps:$4 sm:$0xff]   ;;  %v7786_v57 = vld [vmem:[%s9946_s3 + $0x40] ss:$8 sps:$4 sm:$0xff]  }
  0xe1   :  { %1949 = vmatprep.subr.bf16.mxu1 %v7716_v59  ;;  %v7828_v59 = vld [vmem:[%s9946_s3 + $0x160] ss:$8 sps:$4 sm:$0xff]  }
  0xe3   :  { %1909 = vmatpush1.bf16.msra.mxu0 %v7711_v60  ;;  %v7791_v60 = vld [vmem:[%s9946_s3 + $0x34] ss:$8 sps:$4 sm:$0xff]  }
  0xe4   :  { %1950 = vmatpush1.bf16.msra.mxu1 %v7714_v61  ;;  %1910 = vmatprep.subr.bf16.mxu0 %v7719_v63  ;;  %v7833_v61 = vld [vmem:[%s9946_s3 + $0x154] ss:$8 sps:$4 sm:$0xff]   ;;  %v7789_v63 = vld [vmem:[%s9946_s3 + $0x30] ss:$8 sps:$4 sm:$0xff]  }
  0xe5   :  { %1951 = vmatprep.subr.bf16.mxu1 %v7722_v0  ;;  %v7831_v0 = vld [vmem:[%s9946_s3 + $0x150] ss:$8 sps:$4 sm:$0xff]  }
  0xe7   :  { %1911 = vmatpush1.bf16.msra.mxu0 %v7717_v1  ;;  %v7794_v1 = vld [vmem:[%s9946_s3 + $0x24] ss:$8 sps:$4 sm:$0xff]  }
  0xe8   :  { %1952 = vmatpush1.bf16.msra.mxu1 %v7720_v2  ;;  %1912 = vmatprep.subr.bf16.mxu0 %v7725_v4  ;;  %v7836_v2 = vld [vmem:[%s9946_s3 + $0x144] ss:$8 sps:$4 sm:$0xff]   ;;  %v7792_v4 = vld [vmem:[%s9946_s3 + $0x20] ss:$8 sps:$4 sm:$0xff]  }
  0xe9   :  { %1953 = vmatprep.subr.bf16.mxu1 %v7728_v5  ;;  %v7834_v5 = vld [vmem:[%s9946_s3 + $0x140] ss:$8 sps:$4 sm:$0xff]  }
  0xeb   :  { %1913 = vmatpush1.bf16.msra.mxu0 %v7723_v6  ;;  %v7797_v6 = vld [vmem:[%s9946_s3 + $0x14] ss:$8 sps:$4 sm:$0xff]  }
  0xec   :  { %1954 = vmatpush1.bf16.msra.mxu1 %v7726_v7  ;;  %1914 = vmatprep.subr.bf16.mxu0 %v7731_v8  ;;  %v7839_v7 = vld [vmem:[%s9946_s3 + $0x134] ss:$8 sps:$4 sm:$0xff]   ;;  %v7795_v8 = vld [vmem:[%s9946_s3 + $0x10] ss:$8 sps:$4 sm:$0xff]  }
  0xed   :  { %1955 = vmatprep.subr.bf16.mxu1 %v7734_v9  ;;  %v7837_v9 = vld [vmem:[%s9946_s3 + $0x130] ss:$8 sps:$4 sm:$0xff]  }
  0xef   :  { %1915 = vmatpush2.bf16.msra.mxu0 %v7729_v10  ;;  %v7800_v10 = vld [vmem:[%s9946_s3 + $0x4] ss:$8 sps:$4 sm:$0xff]  }
  0xf0   :  { %1956 = vmatpush2.bf16.msra.mxu1 %v7732_v11  ;;  %1916 = vmatprep.subr.bf16.mxu0 %v7737_v12  ;;  %v7842_v11 = vld [vmem:[%s9946_s3 + $0x124] ss:$8 sps:$4 sm:$0xff]   ;;  %v7798_v12 = vld [vmem:[%s9946_s3] ss:$8 sps:$4 sm:$0xff]  }
  0xf1   :  { %1957 = vmatprep.subr.bf16.mxu1 %v7740_v13  ;;  %v7840_v13 = vld [vmem:[%s9946_s3 + $0x120] ss:$8 sps:$4 sm:$0xff]  }
  0xf3   :  { %1917 = vmatpush2.bf16.msra.mxu0 %v7735_v14  ;;  %v7803_v14 = vld [vmem:[%s9946_s3 + $0xf4] ss:$8 sps:$4 sm:$0xff]  }
  0xf4   :  { %1958 = vmatpush2.bf16.msra.mxu1 %v7738_v15  ;;  %1918 = vmatprep.subr.bf16.mxu0 %v7743_v18  ;;  %v7845_v15 = vld [vmem:[%s9946_s3 + $0x114] ss:$8 sps:$4 sm:$0xff]   ;;  %v7801_v18 = vld [vmem:[%s9946_s3 + $0xf0] ss:$8 sps:$4 sm:$0xff]  }
  0xf5   :  { %1959 = vmatprep.subr.bf16.mxu1 %v7746_v19  ;;  %v7843_v19 = vld [vmem:[%s9946_s3 + $0x110] ss:$8 sps:$4 sm:$0xff]  }
  0xf7   :  { %1919 = vmatpush2.bf16.msra.mxu0 %v7741_v20  ;;  %v7806_v20 = vld [vmem:[%s9946_s3 + $0xe4] ss:$8 sps:$4 sm:$0xff]  }
  0xf8   :  { %1960 = vmatpush2.bf16.msra.mxu1 %v7744_v21  ;;  %1920 = vmatprep.subr.bf16.mxu0 %v7749_v22  ;;  %v7848_v21 = vld [vmem:[%s9946_s3 + $0x104] ss:$8 sps:$4 sm:$0xff]   ;;  %v7804_v22 = vld [vmem:[%s9946_s3 + $0xe0] ss:$8 sps:$4 sm:$0xff]  }
  0xf9   :  { %1961 = vmatprep.subr.bf16.mxu1 %v7752_v23  ;;  %v7846_v23 = vld [vmem:[%s9946_s3 + $0x100] ss:$8 sps:$4 sm:$0xff]  }
  0xfb   :  { %1921 = vmatpush2.bf16.msra.mxu0 %v7747_v24  ;;  %v7809_v24 = vld [vmem:[%s9946_s3 + $0xd4] ss:$8 sps:$4 sm:$0xff]  }
  0xfc   :  { %1962 = vmatpush2.bf16.msra.mxu1 %v7750_v25  ;;  %1922 = vmatprep.subr.bf16.mxu0 %v7755_v26  ;;  %v7851_v25 = vld [vmem:[%s9946_s3 + $0x1f4] ss:$8 sps:$4 sm:$0xff]   ;;  %v7807_v26 = vld [vmem:[%s9946_s3 + $0xd0] ss:$8 sps:$4 sm:$0xff]  }
  0xfd   :  { %1963 = vmatprep.subr.bf16.mxu1 %v7758_v27  ;;  %v7849_v27 = vld [vmem:[%s9946_s3 + $0x1f0] ss:$8 sps:$4 sm:$0xff]  }
  0xff   :  { %1923 = vmatpush2.bf16.msra.mxu0 %v7753_v28  ;;  %v7812_v28 = vld [vmem:[%s9946_s3 + $0xc4] ss:$8 sps:$4 sm:$0xff]  }
 0x100   :  { %1964 = vmatpush2.bf16.msra.mxu1 %v7756_v29  ;;  %1924 = vmatprep.subr.bf16.mxu0 %v7761_v30  ;;  %v7854_v29 = vld [vmem:[%s9946_s3 + $0x1e4] ss:$8 sps:$4 sm:$0xff]   ;;  %v7810_v30 = vld [vmem:[%s9946_s3 + $0xc0] ss:$8 sps:$4 sm:$0xff]  }
 0x101   :  { %1965 = vmatprep.subr.bf16.mxu1 %v7764_v31  ;;  %v7852_v31 = vld [vmem:[%s9946_s3 + $0x1e0] ss:$8 sps:$4 sm:$0xff]  }
 0x103   :  { %1925 = vmatpush2.bf16.msra.mxu0 %v7759_v34  ;;  %v7815_v34 = vld [vmem:[%s9946_s3 + $0xb4] ss:$8 sps:$4 sm:$0xff]  }
 0x104   :  { %1966 = vmatpush2.bf16.msra.mxu1 %v7762_v35  ;;  %1926 = vmatprep.subr.bf16.mxu0 %v7767_v36  ;;  %v7857_v35 = vld [vmem:[%s9946_s3 + $0x1d4] ss:$8 sps:$4 sm:$0xff]   ;;  %v7813_v36 = vld [vmem:[%s9946_s3 + $0xb0] ss:$8 sps:$4 sm:$0xff]  }
 0x105   :  { %1967 = vmatprep.subr.bf16.mxu1 %v7770_v37  ;;  %v7855_v37 = vld [vmem:[%s9946_s3 + $0x1d0] ss:$8 sps:$4 sm:$0xff]  }
 0x107   :  { %1927 = vmatpush2.bf16.msra.mxu0 %v7765_v38  ;;  %v7818_v38 = vld [vmem:[%s9946_s3 + $0xa4] ss:$8 sps:$4 sm:$0xff]  }
 0x108   :  { %1968 = vmatpush2.bf16.msra.mxu1 %v7768_v39  ;;  %1928 = vmatprep.subr.bf16.mxu0 %v7773_v40  ;;  %v7860_v39 = vld [vmem:[%s9946_s3 + $0x1c4] ss:$8 sps:$4 sm:$0xff]   ;;  %v7816_v40 = vld [vmem:[%s9946_s3 + $0xa0] ss:$8 sps:$4 sm:$0xff]  }
 0x109   :  { %1969 = vmatprep.subr.bf16.mxu1 %v7776_v41  ;;  %v7858_v41 = vld [vmem:[%s9946_s3 + $0x1c0] ss:$8 sps:$4 sm:$0xff]  }
 0x10b   :  { %1929 = vmatpush2.bf16.msra.mxu0 %v7771_v42  ;;  %v7821_v42 = vld [vmem:[%s9946_s3 + $0x94] ss:$8 sps:$4 sm:$0xff]  }
 0x10c   :  { %1970 = vmatpush2.bf16.msra.mxu1 %v7774_v44  ;;  %2384 = vmatprep.subr.bf16.mxu0 %v7779_v45  ;;  %v7863_v44 = vld [vmem:[%s9946_s3 + $0x1b4] ss:$8 sps:$4 sm:$0xff]   ;;  %v8172_v45 = vsub.s32 0, %v7942_v43 }
 0x10d   :  { %2425 = vmatprep.subr.bf16.mxu1 %v7827_v58 }
 0x10e   :  { %v8008_v48 = vpop.f32.mrf.mxu0  ;;  %1931 = vmatmul.mubr.bf16.vlgmr.msra.gmra.mxu0 %v7985_v32  ;;  %v7783_v32 = vld [vmem:[%s9946_s3 + $0x50] ss:$8 sps:$4 sm:$0xff]  }
 0x10f   :  { %v8010_v50 = vpop.f32.mrf.mxu1  ;;  %1972 = vmatmul.mubr.bf16.vlgmr.msra.gmra.mxu1 %v7989_v33  ;;  %2385 = vmatpush1.bf16.msra.mxu0 %v7777_v46  ;;  %v8177_v46 = vld [vmem:[%s9945_s2] sm:$0xf] }
 0x110   :  { %v8017_v62 = vpop.f32.mrf.mxu0  ;;  %2386 = vmatprep.subr.bf16.mxu0 %v7782_v47  ;;  %2426 = vmatpush1.bf16.msra.mxu1 %v7825_v56  ;;  %v8180_v47 = vsub.s32 1, %v7942_v43  ;;  %v7866_v56 = vld [vmem:[%s9946_s3 + $0x1a4] ss:$8 sps:$4 sm:$0xff]  }
 0x111   :  { %v8019_v3 = vpop.f32.mrf.mxu1  ;;  %2427 = vmatprep.subr.bf16.mxu1 %v7830_v53  ;;  %v7864_v53 = vld [vmem:[%s9946_s3 + $0x1a0] ss:$8 sps:$4 sm:$0xff]  }
 0x112   :  { %v1690_v16 = vpop.f32.mrf.mxu0 }
 0x113   :  { %v1731_v17 = vpop.f32.mrf.mxu1  ;;  %2387 = vmatpush1.bf16.msra.mxu0 %v7780_v51  ;;  %v7819_v51 = vld [vmem:[%s9946_s3 + $0x90] ss:$8 sps:$4 sm:$0xff]   ;;  %v7824_v16 = vld [vmem:[%s9946_s3 + $0x84] ss:$8 sps:$4 sm:$0xff]  }
 0x114   :  { %v1691_v33 = vpop.f32.mrf.mxu0  ;;  %2388 = vmatprep.subr.bf16.mxu0 %v7785_v52  ;;  %2428 = vmatpush1.bf16.msra.mxu1 %v7828_v59  ;;  %v7861_v52 = vld [vmem:[%s9946_s3 + $0x1b0] ss:$8 sps:$4 sm:$0xff]   ;;  %v355_v17 = vrot.slane %v8177_v46, %v8172_v45 }
 0x115   :  { %v1732_v54 = vpop.f32.mrf.mxu1  ;;  %2429 = vmatprep.subr.bf16.mxu1 %v7833_v61  ;;  %v7822_v33 = vld [vmem:[%s9946_s3 + $0x80] ss:$8 sps:$4 sm:$0xff]  }
 0x116   :  { %v1687_v54 = vadd.f32 %v8008_v48, %v355_v17  ;;  %v2534_v17 = vld [vmem:[%s9948_s5 + $0x200] sm:$0xff] }
 0x117   :  { %2389 = vmatpush1.bf16.msra.mxu0 %v7783_v32  ;;  %v359_v32 = vrot.slane %v8177_v46, %v8180_v47 }
 0x118   :  { %2390 = vmatprep.subr.bf16.mxu0 %v7788_v55  ;;  %2430 = vmatpush1.bf16.msra.mxu1 %v7831_v0  ;;  %v1728_v58 = vadd.f32 %v8010_v50, %v1687_v54  ;;  %v7867_v50 = vld [vmem:[%s9946_s3 + $0x190] ss:$8 sps:$4 sm:$0xff]  }
 0x119   :  { %2431 = vmatprep.subr.bf16.mxu1 %v7836_v2  ;;  %v1689_v55 = vadd.f32 %v8017_v62, %v359_v32  ;;  %v2550_v32 = vld [vmem:[%s9948_s5 + $0x280] sm:$0xff] }
 0x11a   :  { %v6940_v54 = vcombine.high %v2534_v17, %v2550_v32 }
 0x11b   :  { %2391 = vmatpush1.bf16.msra.mxu0 %v7786_v57 }
 0x11c   :  { %2392 = vmatprep.subr.bf16.mxu0 %v7791_v60  ;;  %2432 = vmatpush1.bf16.msra.mxu1 %v7834_v5  ;;  %v1730_v60 = vadd.f32 %v8019_v3, %v1689_v55  ;;  %v2502_v55 = vld [vmem:[%s9948_s5 + $0x100] sm:$0xff] }
 0x11d   :  { %2433 = vmatprep.subr.bf16.mxu1 %v7839_v7 }
 0x11f   :  { %2393 = vmatpush1.bf16.msra.mxu0 %v7789_v63  ;;  %v7869_v63 = vld [vmem:[%s9946_s3 + $0x194] ss:$8 sps:$4 sm:$0xff]  }
 0x120   :  { %2394 = vmatprep.subr.bf16.mxu0 %v7794_v1  ;;  %2434 = vmatpush1.bf16.msra.mxu1 %v7837_v9 }
 0x121   :  { %2435 = vmatprep.subr.bf16.mxu1 %v7842_v11 }
 0x123   :  { %2395 = vmatpush1.bf16.msra.mxu0 %v7792_v4 }
 0x124   :  { %2396 = vmatprep.subr.bf16.mxu0 %v7797_v6  ;;  %2436 = vmatpush1.bf16.msra.mxu1 %v7840_v13 }
 0x125   :  { %2437 = vmatprep.subr.bf16.mxu1 %v7845_v15 }
 0x127   :  { %2397 = vmatpush1.bf16.msra.mxu0 %v7795_v8  ;;  %v7872_v8 = vld [vmem:[%s9946_s3 + $0x184] ss:$8 sps:$4 sm:$0xff]  }
 0x128   :  { %2398 = vmatprep.subr.bf16.mxu0 %v7800_v10  ;;  %2438 = vmatpush1.bf16.msra.mxu1 %v7843_v19  ;;  %v7870_v10 = vld [vmem:[%s9946_s3 + $0x180] ss:$8 sps:$4 sm:$0xff]  }
 0x129   :  { %2439 = vmatprep.subr.bf16.mxu1 %v7848_v21 }
 0x12b   :  { %2399 = vmatpush1.bf16.msra.mxu0 %v7798_v12 }
 0x12c   :  { %2400 = vmatprep.subr.bf16.mxu0 %v7803_v14  ;;  %2440 = vmatpush1.bf16.msra.mxu1 %v7846_v23  ;;  %v2694_v23 = vld [vmem:[%s9948_s5 + $0x700] sm:$0xff] }
 0x12d   :  { %2441 = vmatprep.subr.bf16.mxu1 %v7851_v25  ;;  %v8237_v25 = vld [vmem:[%s9948_s5 + $0x708] sm:$0xff] }
 0x12f   :  { %2401 = vmatpush2.bf16.msra.mxu0 %v7801_v18 }
 0x130   :  { %2402 = vmatprep.subr.bf16.mxu0 %v7806_v20  ;;  %2442 = vmatpush2.bf16.msra.mxu1 %v7849_v27 }
 0x131   :  { %2443 = vmatprep.subr.bf16.mxu1 %v7854_v29  ;;  %v2662_v29 = vld [vmem:[%s9948_s5 + $0x600] sm:$0xff] }
 0x133   :  { %2403 = vmatpush2.bf16.msra.mxu0 %v7804_v22 }
 0x134   :  { %2404 = vmatprep.subr.bf16.mxu0 %v7809_v24  ;;  %2444 = vmatpush2.bf16.msra.mxu1 %v7852_v31  ;;  %v2710_v24 = vld [vmem:[%s9948_s5 + $0x780] sm:$0xff] }
 0x135   :  { %2445 = vmatprep.subr.bf16.mxu1 %v7857_v35  ;;  %v7100_v27 = vcombine.high %v2694_v23, %v2710_v24  ;;  %v2630_v35 = vld [vmem:[%s9948_s5 + $0x500] sm:$0xff] }
 0x137   :  { %2405 = vmatpush2.bf16.msra.mxu0 %v7807_v26  ;;  %v7099_v26 = vcombine.low %v2694_v23, %v2710_v24  ;;  %v2822_v23 = vld [vmem:[%s9948_s5 + $0xb00] sm:$0xff] }
 0x138   :  { %2406 = vmatprep.subr.bf16.mxu0 %v7812_v28  ;;  %2446 = vmatpush2.bf16.msra.mxu1 %v7855_v37  ;;  %v8242_v28 = vld [vmem:[%s9948_s5 + $0x788] sm:$0xff]  ;;  %v2838_v24 = vld [vmem:[%s9948_s5 + $0xb80] sm:$0xff] }
 0x139   :  { %2447 = vmatprep.subr.bf16.mxu1 %v7860_v39  ;;  %v7102_v31 = vcombine.high %v8237_v25, %v8242_v28  ;;  %v2598_v39 = vld [vmem:[%s9948_s5 + $0x400] sm:$0xff] }
 0x13b   :  { %2407 = vmatpush2.bf16.msra.mxu0 %v7810_v30  ;;  %v2678_v30 = vld [vmem:[%s9948_s5 + $0x680] sm:$0xff] }
 0x13c   :  { %2408 = vmatprep.subr.bf16.mxu0 %v7815_v34  ;;  %2448 = vmatpush2.bf16.msra.mxu1 %v7858_v41  ;;  %v7068_v34 = vcombine.high %v2662_v29, %v2678_v30  ;;  %v7067_v37 = vcombine.low %v2662_v29, %v2678_v30  ;;  %v7228_v29 = vcombine.high %v2822_v23, %v2838_v24 }
 0x13d   :  { %2449 = vmatprep.subr.bf16.mxu1 %v7863_v44  ;;  %v2566_v44 = vld [vmem:[%s9948_s5 + $0x300] sm:$0xff] }
 0x13f   :  { %2409 = vmatpush2.bf16.msra.mxu0 %v7813_v36  ;;  %v2646_v36 = vld [vmem:[%s9948_s5 + $0x580] sm:$0xff] }
 0x140   :  { %2410 = vmatprep.subr.bf16.mxu0 %v7818_v38  ;;  %2450 = vmatpush2.bf16.msra.mxu1 %v7861_v52  ;;  %v7036_v38 = vcombine.high %v2630_v35, %v2646_v36  ;;  %v7035_v41 = vcombine.low %v2630_v35, %v2646_v36 }
 0x141   :  { %2451 = vmatprep.subr.bf16.mxu1 %v7866_v56  ;;  %v2518_v56 = vld [vmem:[%s9948_s5 + $0x180] sm:$0xff] }
 0x143   :  { %2411 = vmatpush2.bf16.msra.mxu0 %v7816_v40  ;;  %v2614_v40 = vld [vmem:[%s9948_s5 + $0x480] sm:$0xff] }
 0x144   :  { %2412 = vmatprep.subr.bf16.mxu0 %v7821_v42  ;;  %2452 = vmatpush2.bf16.msra.mxu1 %v7864_v53  ;;  %v7004_v42 = vcombine.high %v2598_v39, %v2614_v40  ;;  %v7003_v52 = vcombine.low %v2598_v39, %v2614_v40  ;;  %v6908_v53 = vcombine.high %v2502_v55, %v2518_v56 }
 0x145   :  { %2453 = vmatprep.subr.bf16.mxu1 %v7869_v63 }
 0x147   :  { %2413 = vmatpush2.bf16.msra.mxu0 %v7819_v51  ;;  %v2582_v51 = vld [vmem:[%s9948_s5 + $0x380] sm:$0xff] }
 0x148   :  { %2414 = vmatprep.subr.bf16.mxu0 %v7824_v16  ;;  %2454 = vmatpush2.bf16.msra.mxu1 %v7867_v50  ;;  %v6972_v16 = vcombine.high %v2566_v44, %v2582_v51  ;;  %v2934_v50 = vld [vmem:[%s9948_s5 + $0xe80] sm:$0xff] }
 0x149   :  { %2455 = vmatprep.subr.bf16.mxu1 %v7872_v8 }
 0x14b   :  { %2415 = vmatpush2.bf16.msra.mxu0 %v7822_v33  ;;  %v6971_v33 = vcombine.low %v2566_v44, %v2582_v51 }
 0x14c   :  { %2456 = vmatpush2.bf16.msra.mxu1 %v7870_v10  ;;  %5710 = vmatprep.subr.bf16.mxu0 %v7100_v27 }
 0x14d   :  { %5751 = vmatprep.subr.bf16.mxu1 %v7102_v31  ;;  %v2790_v31 = vld [vmem:[%s9948_s5 + $0xa00] sm:$0xff] }
 0x14e   :  { %v1768_v57 = vpop.f32.mrf.mxu0 }
 0x14f   :  { %v1809_v59 = vpop.f32.mrf.mxu1  ;;  %v1769_v61 = vadd.f32 %v1768_v57, %v1728_v58  ;;  %v6939_v58 = vcombine.low %v2534_v17, %v2550_v32  ;;  %v2470_v57 = vld [vmem:[%s9948_s5] sm:$0xff] }
 0x150   :  { %v1770_v48 = vpop.f32.mrf.mxu0 }
 0x151   :  { %v1811_v62 = vpop.f32.mrf.mxu1  ;;  %v1810_v0 = vadd.f32 %v1809_v59, %v1769_v61  ;;  %v1771_v1 = vadd.f32 %v1770_v48, %v1730_v60  ;;  %v2486_v59 = vld [vmem:[%s9948_s5 + $0x80] sm:$0xff]  ;;  %v6907_v60 = vcombine.low %v2502_v55, %v2518_v56  ;;  %v7101_v55 = vcombine.low %v8237_v25, %v8242_v28  ;;  %v2599_v25 = vld [vmem:[%s9948_s5 + $0x408] sm:$0xff] }
 0x152   :  { %v1772_v2 = vpop.f32.mrf.mxu0  ;;  %v6876_v61 = vcombine.high %v2470_v57, %v2486_v59  ;;  %v2950_v48 = vld [vmem:[%s9948_s5 + $0xf00] sm:$0xff]  ;;  %v6875_v63 = vcombine.low %v2470_v57, %v2486_v59  ;;  %v2647_v57 = vld [vmem:[%s9948_s5 + $0x588] sm:$0xff] }
 0x153   :  { %v1813_v4 = vpop.f32.mrf.mxu1  ;;  %v1812_v5 = vadd.f32 %v1811_v62, %v1771_v1  ;;  %v1980_v3 = vmax.f32 %v1810_v0, 0.0  ;;  %v2966_v62 = vld [vmem:[%s9948_s5 + $0xf80] sm:$0xff]  ;;  %v2615_v28 = vld [vmem:[%s9948_s5 + $0x488] sm:$0xff] }
 0x154   :  { %v1773_v6 = vpop.f32.mrf.mxu0  ;;  %v7356_v0 = vcombine.high %v2950_v48, %v2966_v62  ;;  %v2918_v1 = vld [vmem:[%s9948_s5 + $0xe00] sm:$0xff]  ;;  %v7355_v2 = vcombine.low %v2950_v48, %v2966_v62  ;;  %v8301_v4 = vsub.s32 2, %v7942_v43  ;;  %v7006_v48 = vcombine.high %v2599_v25, %v2615_v28  ;;  %v2567_v62 = vld [vmem:[%s9948_s5 + $0x308] sm:$0xff] }
 0x155   :  { %v1814_v7 = vpop.f32.mrf.mxu1  ;;  %v1981_v9 = vmax.f32 %v1812_v5, 0.0  ;;  %v1984_v12 = vpack.c.bf16 %v1980_v3, %v1980_v3  ;;  %v7324_v5 = vcombine.high %v2918_v1, %v2934_v50  ;;  %v2886_v3 = vld [vmem:[%s9948_s5 + $0xd00] sm:$0xff]  ;;  %v7323_v8 = vcombine.low %v2918_v1, %v2934_v50  ;;  %v2535_v50 = vld [vmem:[%s9948_s5 + $0x208] sm:$0xff] }
 0x156   :  { %v2902_v6 = vld [vmem:[%s9948_s5 + $0xd80] sm:$0xff]  ;;  %v8310_v7 = vsub.s32 3, %v7942_v43 }
 0x157   :  { %v1985_v11 = vpack.c.bf16 %v1981_v9, %v1981_v9  ;;  %v363_v9 = vrot.slane %v8177_v46, %v8301_v4  ;;  %v7292_v10 = vcombine.high %v2886_v3, %v2902_v6 }
 0x159   :  { %2416 = vmatprep.mubr.bf16.mxu0 %v1985_v11  ;;  %v2854_v11 = vld [vmem:[%s9948_s5 + $0xc00] sm:$0xff] }
 0x15a   :  { %2417 = vmatmul.mubr.bf16.vlgmr.msra.gmra.mxu0 %v1984_v12  ;;  %v2870_v12 = vld [vmem:[%s9948_s5 + $0xc80] sm:$0xff] }
 0x15b   :  { %5711 = vmatpush1.bf16.msra.mxu0 %v7099_v26  ;;  %v7259_v27 = vcombine.low %v2854_v11, %v2870_v12 }
 0x15c   :  { %5712 = vmatprep.subr.bf16.mxu0 %v7068_v34  ;;  %v2806_v34 = vld [vmem:[%s9948_s5 + $0xa80] sm:$0xff] }
 0x15d   :  { %v7196_v40 = vcombine.high %v2790_v31, %v2806_v34  ;;  %v7195_v17 = vcombine.low %v2790_v31, %v2806_v34 }
 0x15f   :  { %5713 = vmatpush1.bf16.msra.mxu0 %v7067_v37 }
 0x160   :  { %5714 = vmatprep.subr.bf16.mxu0 %v7036_v38  ;;  %v7227_v38 = vcombine.low %v2822_v23, %v2838_v24 }
 0x163   :  { %5715 = vmatpush1.bf16.msra.mxu0 %v7035_v41 }
 0x164   :  { %5716 = vmatprep.subr.bf16.mxu0 %v7004_v42 }
 0x167   :  { %5717 = vmatpush1.bf16.msra.mxu0 %v7003_v52 }
 0x168   :  { %5718 = vmatprep.subr.bf16.mxu0 %v6972_v16 }
 0x16b   :  { %5719 = vmatpush1.bf16.msra.mxu0 %v6971_v33  ;;  %v2679_v33 = vld [vmem:[%s9948_s5 + $0x688] sm:$0xff] }
 0x16c   :  { %5720 = vmatprep.subr.bf16.mxu0 %v6940_v54 }
 0x16f   :  { %5721 = vmatpush1.bf16.msra.mxu0 %v6939_v58 }
 0x170   :  { %5722 = vmatprep.subr.bf16.mxu0 %v6908_v53  ;;  %v2631_v53 = vld [vmem:[%s9948_s5 + $0x508] sm:$0xff] }
 0x173   :  { %5723 = vmatpush1.bf16.msra.mxu0 %v6907_v60  ;;  %v7038_v60 = vcombine.high %v2631_v53, %v2647_v57 }
 0x174   :  { %5724 = vmatprep.subr.bf16.mxu0 %v6876_v61  ;;  %v7037_v61 = vcombine.low %v2631_v53, %v2647_v57  ;;  %v2726_v57 = vld [vmem:[%s9948_s5 + $0x800] sm:$0xff] }
 0x177   :  { %5725 = vmatpush1.bf16.msra.mxu0 %v6875_v63  ;;  %v2583_v63 = vld [vmem:[%s9948_s5 + $0x388] sm:$0xff] }
 0x178   :  { %5726 = vmatprep.subr.bf16.mxu0 %v7356_v0  ;;  %v7005_v0 = vcombine.low %v2599_v25, %v2615_v28  ;;  %v6974_v1 = vcombine.high %v2567_v62, %v2583_v63  ;;  %v2743_v28 = vld [vmem:[%s9948_s5 + $0x888] sm:$0xff] }
 0x17b   :  { %5727 = vmatpush2.bf16.msra.mxu0 %v7355_v2  ;;  %v2551_v2 = vld [vmem:[%s9948_s5 + $0x288] sm:$0xff] }
 0x17c   :  { %5728 = vmatprep.subr.bf16.mxu0 %v7324_v5  ;;  %v6973_v5 = vcombine.low %v2567_v62, %v2583_v63 }
 0x17f   :  { %5729 = vmatpush2.bf16.msra.mxu0 %v7323_v8  ;;  %v2519_v8 = vld [vmem:[%s9948_s5 + $0x188] sm:$0xff] }
 0x180   :  { %5730 = vmatprep.subr.bf16.mxu0 %v7292_v10 }
 0x18e   :  { %v8220_v13 = vpop.f32.mrf.mxu0 }
 0x18f   :  { %v8222_v14 = vpop.f32.mrf.mxu1 }
 0x190   :  { %v8224_v15 = vpop.f32.mrf.mxu0 }
 0x191   :  { %v8226_v18 = vpop.f32.mrf.mxu1 }
 0x192   :  { %v1854_v19 = vpop.f32.mrf.mxu0 }
 0x193   :  { %v1895_v20 = vpop.f32.mrf.mxu1  ;;  %v367_v19 = vrot.slane %v8177_v46, %v8310_v7 }
 0x194   :  { %v1855_v21 = vpop.f32.mrf.mxu0  ;;  %v7291_v20 = vcombine.low %v2886_v3, %v2902_v6  ;;  %v6942_v3 = vcombine.high %v2535_v50, %v2551_v2  ;;  %v2503_v6 = vld [vmem:[%s9948_s5 + $0x108] sm:$0xff] }
 0x195   :  { %v1896_v22 = vpop.f32.mrf.mxu1  ;;  %v1851_v21 = vadd.f32 %v8220_v13, %v363_v9  ;;  %v1853_v26 = vadd.f32 %v8224_v15, %v367_v19  ;;  %v6941_v9 = vcombine.low %v2535_v50, %v2551_v2  ;;  %v6910_v10 = vcombine.high %v2503_v6, %v2519_v8  ;;  %v2712_v50 = vld [vmem:[%s9948_s5 + $0x790] sm:$0xff]  ;;  %v2697_v2 = vld [vmem:[%s9948_s5 + $0x718] sm:$0xff] }
 0x196   :  { %v7260_v22 = vcombine.high %v2854_v11, %v2870_v12  ;;  %5731 = vmatpush2.bf16.msra.mxu0 %v7291_v20  ;;  %v2471_v11 = vld [vmem:[%s9948_s5 + $0x8] sm:$0xff]  ;;  %v6909_v19 = vcombine.low %v2503_v6, %v2519_v8 }
 0x197   :  { %v1892_v46 = vadd.f32 %v8222_v14, %v1851_v21  ;;  %v1894_v35 = vadd.f32 %v8226_v18, %v1853_v26  ;;  %v2663_v18 = vld [vmem:[%s9948_s5 + $0x608] sm:$0xff] }
 0x198   :  { %5732 = vmatprep.subr.bf16.mxu0 %v7260_v22  ;;  %v7070_v58 = vcombine.high %v2663_v18, %v2679_v33  ;;  %v7069_v59 = vcombine.low %v2663_v18, %v2679_v33  ;;  %v2487_v12 = vld [vmem:[%s9948_s5 + $0x88] sm:$0xff] }
 0x199   :  { %v6878_v20 = vcombine.high %v2471_v11, %v2487_v12  ;;  %v2951_v21 = vld [vmem:[%s9948_s5 + $0xf08] sm:$0xff]  ;;  %v6877_v23 = vcombine.low %v2471_v11, %v2487_v12 }
 0x19a   :  { %5733 = vmatpush2.bf16.msra.mxu0 %v7259_v27  ;;  %v2967_v22 = vld [vmem:[%s9948_s5 + $0xf88] sm:$0xff] }
 0x19b   :  { %5734 = vmatprep.subr.bf16.mxu0 %v7228_v29  ;;  %v7358_v24 = vcombine.high %v2951_v21, %v2967_v22  ;;  %v2919_v26 = vld [vmem:[%s9948_s5 + $0xe08] sm:$0xff] }
 0x19c   :  { %v2935_v27 = vld [vmem:[%s9948_s5 + $0xe88] sm:$0xff] }
 0x19d   :  { %v7326_v29 = vcombine.high %v2919_v26, %v2935_v27  ;;  %v7325_v31 = vcombine.low %v2919_v26, %v2935_v27  ;;  %v2775_v33 = vld [vmem:[%s9948_s5 + $0x988] sm:$0xff] }
 0x19e   :  { %5735 = vmatpush2.bf16.msra.mxu0 %v7227_v38  ;;  %v2823_v38 = vld [vmem:[%s9948_s5 + $0xb08] sm:$0xff] }
 0x19f   :  { %5736 = vmatprep.subr.bf16.mxu0 %v7196_v40 }
 0x1a2   :  { %5737 = vmatpush2.bf16.msra.mxu0 %v7195_v17  ;;  %v2774_v17 = vld [vmem:[%s9948_s5 + $0x980] sm:$0xff] }
 0x1ce   :  { %v1932_v30 = vpop.f32.mrf.mxu0 }
 0x1cf   :  { %v1973_v13 = vpop.f32.mrf.mxu1  ;;  %v1933_v36 = vadd.f32 %v1932_v30, %v1892_v46  ;;  %v7357_v46 = vcombine.low %v2951_v21, %v2967_v22  ;;  %v2887_v30 = vld [vmem:[%s9948_s5 + $0xd08] sm:$0xff] }
 0x1d0   :  { %v1934_v15 = vpop.f32.mrf.mxu0 }
 0x1d1   :  { %v1975_v37 = vpop.f32.mrf.mxu1  ;;  %v1974_v14 = vadd.f32 %v1973_v13, %v1933_v36  ;;  %v1935_v39 = vadd.f32 %v1934_v15, %v1894_v35  ;;  %v2903_v13 = vld [vmem:[%s9948_s5 + $0xd88] sm:$0xff] }
 0x1d2   :  { %v1936_v41 = vpop.f32.mrf.mxu0  ;;  %v7294_v34 = vcombine.high %v2887_v30, %v2903_v13  ;;  %v2855_v35 = vld [vmem:[%s9948_s5 + $0xc08] sm:$0xff]  ;;  %v7293_v15 = vcombine.low %v2887_v30, %v2903_v13  ;;  %v2680_v13 = vld [vmem:[%s9948_s5 + $0x690] sm:$0xff] }
 0x1d3   :  { %v1977_v42 = vpop.f32.mrf.mxu1  ;;  %v1976_v44 = vadd.f32 %v1975_v37, %v1935_v39  ;;  %v1982_v51 = vmax.f32 %v1974_v14, 0.0  ;;  %v2871_v36 = vld [vmem:[%s9948_s5 + $0xc88] sm:$0xff] }
 0x1d4   :  { %v1937_v52 = vpop.f32.mrf.mxu0  ;;  %v7262_v37 = vcombine.high %v2855_v35, %v2871_v36  ;;  %v2839_v14 = vld [vmem:[%s9948_s5 + $0xb88] sm:$0xff]  ;;  %v7261_v39 = vcombine.low %v2855_v35, %v2871_v36 }
 0x1d5   :  { %v1978_v16 = vpop.f32.mrf.mxu1  ;;  %v1983_v32 = vmax.f32 %v1976_v44, 0.0  ;;  %v1986_v56 = vpack.c.bf16 %v1982_v51, %v1982_v51  ;;  %v7230_v40 = vcombine.high %v2823_v38, %v2839_v14  ;;  %v2791_v41 = vld [vmem:[%s9948_s5 + $0xa08] sm:$0xff]  ;;  %v7229_v44 = vcombine.low %v2823_v38, %v2839_v14  ;;  %v2648_v14 = vld [vmem:[%s9948_s5 + $0x590] sm:$0xff] }
 0x1d6   :  { %v2807_v42 = vld [vmem:[%s9948_s5 + $0xa88] sm:$0xff]  ;;  %v2758_v16 = vld [vmem:[%s9948_s5 + $0x900] sm:$0xff] }
 0x1d7   :  { %v1987_v54 = vpack.c.bf16 %v1983_v32, %v1983_v32  ;;  %v7198_v51 = vcombine.high %v2791_v41, %v2807_v42  ;;  %v7197_v52 = vcombine.low %v2791_v41, %v2807_v42  ;;  %v2759_v32 = vld [vmem:[%s9948_s5 + $0x908] sm:$0xff]  ;;  %v7164_v18 = vcombine.high %v2758_v16, %v2774_v17 }
 0x1d9   :  { %2457 = vmatprep.mubr.bf16.mxu1 %v1987_v54  ;;  %5738 = vmatprep.subr.bf16.mxu0 %v7164_v18 }
 0x1da   :  { %2458 = vmatmul.mubr.bf16.vlgmr.msra.gmra.mxu1 %v1986_v56  ;;  %v7165_v56 = vcombine.low %v2759_v32, %v2775_v33 }
 0x1db   :  { %5752 = vmatpush1.bf16.msra.mxu1 %v7101_v55  ;;  %v7163_v55 = vcombine.low %v2758_v16, %v2774_v17  ;;  %v2616_v16 = vld [vmem:[%s9948_s5 + $0x490] sm:$0xff]  ;;  %v2601_v17 = vld [vmem:[%s9948_s5 + $0x418] sm:$0xff] }
 0x1dc   :  { %5753 = vmatprep.subr.bf16.mxu1 %v7070_v58  ;;  %v7166_v58 = vcombine.high %v2759_v32, %v2775_v33  ;;  %v2617_v32 = vld [vmem:[%s9948_s5 + $0x498] sm:$0xff] }
 0x1dd   :  { %5739 = vmatpush2.bf16.msra.mxu0 %v7163_v55  ;;  %v7010_v55 = vcombine.high %v2601_v17, %v2617_v32 }
 0x1df   :  { %5754 = vmatpush1.bf16.msra.mxu1 %v7069_v59  ;;  %v2742_v59 = vld [vmem:[%s9948_s5 + $0x880] sm:$0xff] }
 0x1e0   :  { %5755 = vmatprep.subr.bf16.mxu1 %v7038_v60  ;;  %v2727_v60 = vld [vmem:[%s9948_s5 + $0x808] sm:$0xff]  ;;  %v7132_v25 = vcombine.high %v2726_v57, %v2742_v59 }
 0x1e1   :  { %v7133_v62 = vcombine.low %v2727_v60, %v2743_v28  ;;  %v7134_v63 = vcombine.high %v2727_v60, %v2743_v28  ;;  %v7009_v60 = vcombine.low %v2601_v17, %v2617_v32  ;;  %v2889_v17 = vld [vmem:[%s9948_s5 + $0xd18] sm:$0xff] }
 0x1e2   :  { %5740 = vmatprep.subr.bf16.mxu0 %v7132_v25  ;;  %v2905_v32 = vld [vmem:[%s9948_s5 + $0xd98] sm:$0xff] }
 0x1e3   :  { %5756 = vmatpush1.bf16.msra.mxu1 %v7037_v61 }
 0x1e4   :  { %5757 = vmatprep.subr.bf16.mxu1 %v7006_v48  ;;  %v7131_v48 = vcombine.low %v2726_v57, %v2742_v59  ;;  %v2585_v57 = vld [vmem:[%s9948_s5 + $0x398] sm:$0xff] }
 0x1e6   :  { %5741 = vmatpush2.bf16.msra.mxu0 %v7131_v48  ;;  %v2552_v48 = vld [vmem:[%s9948_s5 + $0x290] sm:$0xff] }
 0x1e7   :  { %5758 = vmatpush1.bf16.msra.mxu1 %v7005_v0 }
 0x1e8   :  { %5759 = vmatprep.subr.bf16.mxu1 %v6974_v1  ;;  %v2696_v1 = vld [vmem:[%s9948_s5 + $0x710] sm:$0xff] }
 0x1e9   :  { %v7103_v6 = vcombine.low %v2696_v1, %v2712_v50 }
 0x1eb   :  { %5760 = vmatpush1.bf16.msra.mxu1 %v6973_v5  ;;  %v7104_v5 = vcombine.high %v2696_v1, %v2712_v50 }
 0x1ec   :  { %5761 = vmatprep.subr.bf16.mxu1 %v6942_v3  ;;  %v2713_v3 = vld [vmem:[%s9948_s5 + $0x798] sm:$0xff] }
 0x1ed   :  { %v7105_v8 = vcombine.low %v2697_v2, %v2713_v3  ;;  %5792 = vmatprep.subr.bf16.mxu0 %v7104_v5  ;;  %v2504_v5 = vld [vmem:[%s9948_s5 + $0x110] sm:$0xff] }
 0x1ef   :  { %5762 = vmatpush1.bf16.msra.mxu1 %v6941_v9  ;;  %v7106_v9 = vcombine.high %v2697_v2, %v2713_v3  ;;  %v2520_v3 = vld [vmem:[%s9948_s5 + $0x190] sm:$0xff] }
 0x1f0   :  { %5763 = vmatprep.subr.bf16.mxu1 %v6910_v10  ;;  %v2052_v10 = vld [vmem:[%s9947_s4] sm:$0x3] }
 0x1f1   :  { %v2057_v11 = vrot.slane %v2052_v10, %v8172_v45  ;;  %v2061_v12 = vrot.slane %v2052_v10, %v8180_v47 }
 0x1f3   :  { %5764 = vmatpush1.bf16.msra.mxu1 %v6909_v19 }
 0x1f4   :  { %5765 = vmatprep.subr.bf16.mxu1 %v6878_v20 }
 0x1f7   :  { %5766 = vmatpush1.bf16.msra.mxu1 %v6877_v23 }
 0x1f8   :  { %5767 = vmatprep.subr.bf16.mxu1 %v7358_v24 }
 0x1fb   :  { %5768 = vmatpush2.bf16.msra.mxu1 %v7357_v46 }
 0x1fc   :  { %5769 = vmatprep.subr.bf16.mxu1 %v7326_v29  ;;  %v2664_v29 = vld [vmem:[%s9948_s5 + $0x610] sm:$0xff] }
 0x1fd   :  { %v7071_v41 = vcombine.low %v2664_v29, %v2680_v13 }
 0x1ff   :  { %5770 = vmatpush2.bf16.msra.mxu1 %v7325_v31  ;;  %v2665_v31 = vld [vmem:[%s9948_s5 + $0x618] sm:$0xff] }
 0x200   :  { %5771 = vmatprep.subr.bf16.mxu1 %v7294_v34  ;;  %v2681_v34 = vld [vmem:[%s9948_s5 + $0x698] sm:$0xff] }
 0x201   :  { %v7074_v38 = vcombine.high %v2665_v31, %v2681_v34  ;;  %v7073_v42 = vcombine.low %v2665_v31, %v2681_v34 }
 0x203   :  { %5772 = vmatpush2.bf16.msra.mxu1 %v7293_v15  ;;  %v2632_v15 = vld [vmem:[%s9948_s5 + $0x510] sm:$0xff] }
 0x204   :  { %5773 = vmatprep.subr.bf16.mxu1 %v7262_v37  ;;  %v7072_v37 = vcombine.high %v2664_v29, %v2680_v13  ;;  %v7039_v18 = vcombine.low %v2632_v15, %v2648_v14  ;;  %v2968_v29 = vld [vmem:[%s9948_s5 + $0xf90] sm:$0xff]  ;;  %v2969_v13 = vld [vmem:[%s9948_s5 + $0xf98] sm:$0xff] }
 0x207   :  { %5774 = vmatpush2.bf16.msra.mxu1 %v7261_v39  ;;  %v2633_v39 = vld [vmem:[%s9948_s5 + $0x518] sm:$0xff] }
 0x208   :  { %5775 = vmatprep.subr.bf16.mxu1 %v7230_v40  ;;  %v2649_v40 = vld [vmem:[%s9948_s5 + $0x598] sm:$0xff] }
 0x209   :  { %v7041_v33 = vcombine.low %v2633_v39, %v2649_v40 }
 0x20b   :  { %5776 = vmatpush2.bf16.msra.mxu1 %v7229_v44  ;;  %v7040_v44 = vcombine.high %v2632_v15, %v2648_v14  ;;  %v2936_v14 = vld [vmem:[%s9948_s5 + $0xe90] sm:$0xff] }
 0x20c   :  { %5777 = vmatprep.subr.bf16.mxu1 %v7198_v51  ;;  %v7042_v51 = vcombine.high %v2633_v39, %v2649_v40  ;;  %v2921_v39 = vld [vmem:[%s9948_s5 + $0xe18] sm:$0xff] }
 0x20d   :  { %v2937_v40 = vld [vmem:[%s9948_s5 + $0xe98] sm:$0xff] }
 0x20f   :  { %5778 = vmatpush2.bf16.msra.mxu1 %v7197_v52  ;;  %v2600_v52 = vld [vmem:[%s9948_s5 + $0x410] sm:$0xff] }
 0x210   :  { %5779 = vmatprep.subr.bf16.mxu1 %v7166_v58  ;;  %v2584_v58 = vld [vmem:[%s9948_s5 + $0x390] sm:$0xff]  ;;  %v7007_v59 = vcombine.low %v2600_v52, %v2616_v16 }
 0x213   :  { %5780 = vmatpush2.bf16.msra.mxu1 %v7165_v56  ;;  %v2568_v56 = vld [vmem:[%s9948_s5 + $0x310] sm:$0xff] }
 0x214   :  { %5781 = vmatprep.subr.bf16.mxu1 %v7134_v63  ;;  %v6976_v25 = vcombine.high %v2568_v56, %v2584_v58  ;;  %v2553_v63 = vld [vmem:[%s9948_s5 + $0x298] sm:$0xff] }
 0x217   :  { %5782 = vmatpush2.bf16.msra.mxu1 %v7133_v62  ;;  %v2537_v62 = vld [vmem:[%s9948_s5 + $0x218] sm:$0xff] }
 0x218   :  { %5833 = vmatprep.subr.bf16.mxu1 %v7106_v9  ;;  %v6946_v2 = vcombine.high %v2537_v62, %v2553_v63  ;;  %v6945_v10 = vcombine.low %v2537_v62, %v2553_v63  ;;  %v2825_v62 = vld [vmem:[%s9948_s5 + $0xb18] sm:$0xff] }
 0x219   :  { %v2841_v63 = vld [vmem:[%s9948_s5 + $0xb98] sm:$0xff] }
 0x21a   :  { %v2418_v54 = vpop.f32.mrf.mxu0 }
 0x21b   :  { %v2419_v19 = vadd.f32 %v2418_v54, %v2057_v11  ;;  %v7008_v54 = vcombine.high %v2600_v52, %v2616_v16  ;;  %v6912_v11 = vcombine.high %v2504_v5, %v2520_v3  ;;  %v2888_v52 = vld [vmem:[%s9948_s5 + $0xd10] sm:$0xff] }
 0x21c   :  { %v2420_v53 = vpop.f32.mrf.mxu0  ;;  %v2904_v16 = vld [vmem:[%s9948_s5 + $0xd90] sm:$0xff] }
 0x21d   :  { %v2421_v21 = vadd.f32 %v2420_v53, %v2061_v12  ;;  %v2569_v53 = vld [vmem:[%s9948_s5 + $0x318] sm:$0xff] }
 0x21e   :  { %v2422_v61 = vpop.f32.mrf.mxu0  ;;  %v6978_v28 = vcombine.high %v2569_v53, %v2585_v57  ;;  %v6977_v1 = vcombine.low %v2569_v53, %v2585_v57  ;;  %v2857_v53 = vld [vmem:[%s9948_s5 + $0xc18] sm:$0xff] }
 0x21f   :  { %v2536_v61 = vld [vmem:[%s9948_s5 + $0x210] sm:$0xff]  ;;  %v2873_v57 = vld [vmem:[%s9948_s5 + $0xc98] sm:$0xff] }
 0x220   :  { %v2423_v0 = vpop.f32.mrf.mxu0  ;;  %v6944_v50 = vcombine.high %v2536_v61, %v2552_v48  ;;  %v6943_v9 = vcombine.low %v2536_v61, %v2552_v48  ;;  %v2824_v61 = vld [vmem:[%s9948_s5 + $0xb10] sm:$0xff] }
 0x221   :  { %v6975_v0 = vcombine.low %v2568_v56, %v2584_v58  ;;  %v2856_v56 = vld [vmem:[%s9948_s5 + $0xc10] sm:$0xff] }
 0x222   :  { %v2872_v58 = vld [vmem:[%s9948_s5 + $0xc90] sm:$0xff] }
 0x223   :  { %v2840_v48 = vld [vmem:[%s9948_s5 + $0xb90] sm:$0xff] }
 0x29a   :  { %v2459_v20 = vpop.f32.mrf.mxu1 }
 0x29b   :  { %v2460_v22 = vadd.f32 %v2459_v20, %v2419_v19  ;;  %v2472_v19 = vld [vmem:[%s9948_s5 + $0x10] sm:$0xff] }
 0x29c   :  { %v2461_v23 = vpop.f32.mrf.mxu1  ;;  %v2488_v20 = vld [vmem:[%s9948_s5 + $0x90] sm:$0xff] }
 0x29d   :  { %v2462_v24 = vadd.f32 %v2461_v23, %v2421_v21  ;;  %v2466_v26 = vmax.f32 %v2460_v22, 0.0  ;;  %v2473_v21 = vld [vmem:[%s9948_s5 + $0x18] sm:$0xff]  ;;  %v6911_v23 = vcombine.low %v2504_v5, %v2520_v3  ;;  %v6879_v31 = vcombine.low %v2472_v19, %v2488_v20  ;;  %v2792_v5 = vld [vmem:[%s9948_s5 + $0xa10] sm:$0xff] }
 0x29e   :  { %v2463_v27 = vpop.f32.mrf.mxu1  ;;  %v2489_v22 = vld [vmem:[%s9948_s5 + $0x98] sm:$0xff]  ;;  %v2808_v3 = vld [vmem:[%s9948_s5 + $0xa90] sm:$0xff] }
 0x29f   :  { %v2467_v46 = vmax.f32 %v2462_v24, 0.0  ;;  %v8473_v36 = vpack.c.bf16 %v2466_v26, %v2466_v26  ;;  %v6880_v26 = vcombine.high %v2472_v19, %v2488_v20  ;;  %v6882_v27 = vcombine.high %v2473_v21, %v2489_v22  ;;  %v2760_v19 = vld [vmem:[%s9948_s5 + $0x910] sm:$0xff] }
 0x2a0   :  { %v2464_v30 = vpop.f32.mrf.mxu1  ;;  %v6881_v34 = vcombine.low %v2473_v21, %v2489_v22  ;;  %v2776_v20 = vld [vmem:[%s9948_s5 + $0x990] sm:$0xff]  ;;  %v2761_v21 = vld [vmem:[%s9948_s5 + $0x918] sm:$0xff] }
 0x2a1   :  { %v8471_v35 = vpack.c.bf16 %v2467_v46, %v2467_v46  ;;  %v2952_v46 = vld [vmem:[%s9948_s5 + $0xf10] sm:$0xff]  ;;  %v2953_v30 = vld [vmem:[%s9948_s5 + $0xf18] sm:$0xff] }
 0x2a2   :  { %v7360_v15 = vcombine.high %v2952_v46, %v2968_v29  ;;  %v2777_v22 = vld [vmem:[%s9948_s5 + $0x998] sm:$0xff] }
 0x2a3   :  { %5742 = vmatprep.mubr.bf16.mxu0 %v8471_v35  ;;  %5783 = vmatprep.mubr.bf16.mxu1 %v8471_v35 }
 0x2a4   :  { %5743 = vmatmul.mubr.bf16.vlgmr.msra.gmra.mxu0 %v8473_v36  ;;  %5784 = vmatmul.mubr.bf16.vlgmr.msra.gmra.mxu1 %v8473_v36 }
 0x2a5   :  { %5793 = vmatpush1.bf16.msra.mxu0 %v7103_v6  ;;  %5834 = vmatpush1.bf16.msra.mxu1 %v7105_v8  ;;  %v2505_v6 = vld [vmem:[%s9948_s5 + $0x118] sm:$0xff] }
 0x2a6   :  { %5824 = vmatprep.mubr.bf16.mxu0 %v8471_v35  ;;  %5865 = vmatprep.mubr.bf16.mxu1 %v8471_v35  ;;  %v2521_v8 = vld [vmem:[%s9948_s5 + $0x198] sm:$0xff] }
 0x2a7   :  { %5794 = vmatprep.subr.bf16.mxu0 %v7072_v37  ;;  %5835 = vmatprep.subr.bf16.mxu1 %v7074_v38  ;;  %v6914_v12 = vcombine.high %v2505_v6, %v2521_v8  ;;  %v6913_v24 = vcombine.low %v2505_v6, %v2521_v8  ;;  %v7362_v37 = vcombine.high %v2953_v30, %v2969_v13  ;;  %v2920_v38 = vld [vmem:[%s9948_s5 + $0xe10] sm:$0xff]  ;;  %v2793_v6 = vld [vmem:[%s9948_s5 + $0xa18] sm:$0xff] }
 0x2a8   :  { %v2809_v8 = vld [vmem:[%s9948_s5 + $0xa98] sm:$0xff] }
 0x2a9   :  { %5795 = vmatpush1.bf16.msra.mxu0 %v7071_v41  ;;  %5836 = vmatpush1.bf16.msra.mxu1 %v7073_v42  ;;  %v7359_v41 = vcombine.low %v2952_v46, %v2968_v29  ;;  %v7361_v42 = vcombine.low %v2953_v30, %v2969_v13  ;;  %v2728_v46 = vld [vmem:[%s9948_s5 + $0x810] sm:$0xff]  ;;  %v2729_v30 = vld [vmem:[%s9948_s5 + $0x818] sm:$0xff] }
 0x2aa   :  { %5796 = vmatprep.subr.bf16.mxu0 %v7040_v44  ;;  %5837 = vmatprep.subr.bf16.mxu1 %v7042_v51  ;;  %v7328_v44 = vcombine.high %v2920_v38, %v2936_v14  ;;  %v7330_v51 = vcombine.high %v2921_v39, %v2937_v40  ;;  %v2744_v29 = vld [vmem:[%s9948_s5 + $0x890] sm:$0xff]  ;;  %v2745_v13 = vld [vmem:[%s9948_s5 + $0x898] sm:$0xff] }
 0x2ad   :  { %5797 = vmatpush1.bf16.msra.mxu0 %v7039_v18  ;;  %5838 = vmatpush1.bf16.msra.mxu1 %v7041_v33  ;;  %v7327_v18 = vcombine.low %v2920_v38, %v2936_v14  ;;  %v7329_v33 = vcombine.low %v2921_v39, %v2937_v40  ;;  %v2698_v38 = vld [vmem:[%s9948_s5 + $0x720] sm:$0xff]  ;;  %v2699_v39 = vld [vmem:[%s9948_s5 + $0x728] sm:$0xff] }
 0x2ae   :  { %5798 = vmatprep.subr.bf16.mxu0 %v7008_v54  ;;  %5839 = vmatprep.subr.bf16.mxu1 %v7010_v55  ;;  %v7296_v54 = vcombine.high %v2888_v52, %v2904_v16  ;;  %v7298_v55 = vcombine.high %v2889_v17, %v2905_v32  ;;  %v2714_v14 = vld [vmem:[%s9948_s5 + $0x7a0] sm:$0xff]  ;;  %v2715_v40 = vld [vmem:[%s9948_s5 + $0x7a8] sm:$0xff] }
 0x2b1   :  { %5799 = vmatpush1.bf16.msra.mxu0 %v7007_v59  ;;  %5840 = vmatpush1.bf16.msra.mxu1 %v7009_v60  ;;  %v7295_v59 = vcombine.low %v2888_v52, %v2904_v16  ;;  %v7297_v60 = vcombine.low %v2889_v17, %v2905_v32  ;;  %v2666_v52 = vld [vmem:[%s9948_s5 + $0x620] sm:$0xff]  ;;  %v2667_v17 = vld [vmem:[%s9948_s5 + $0x628] sm:$0xff] }
 0x2b2   :  { %5800 = vmatprep.subr.bf16.mxu0 %v6976_v25  ;;  %5841 = vmatprep.subr.bf16.mxu1 %v6978_v28  ;;  %v7264_v25 = vcombine.high %v2856_v56, %v2872_v58  ;;  %v7266_v28 = vcombine.high %v2857_v53, %v2873_v57  ;;  %v2682_v16 = vld [vmem:[%s9948_s5 + $0x6a0] sm:$0xff]  ;;  %v2683_v32 = vld [vmem:[%s9948_s5 + $0x6a8] sm:$0xff] }
 0x2b5   :  { %5801 = vmatpush1.bf16.msra.mxu0 %v6975_v0  ;;  %5842 = vmatpush1.bf16.msra.mxu1 %v6977_v1  ;;  %v7263_v0 = vcombine.low %v2856_v56, %v2872_v58  ;;  %v7265_v1 = vcombine.low %v2857_v53, %v2873_v57  ;;  %v2634_v56 = vld [vmem:[%s9948_s5 + $0x520] sm:$0xff]  ;;  %v2635_v53 = vld [vmem:[%s9948_s5 + $0x528] sm:$0xff] }
 0x2b6   :  { %5802 = vmatprep.subr.bf16.mxu0 %v6944_v50  ;;  %5843 = vmatprep.subr.bf16.mxu1 %v6946_v2  ;;  %v7232_v50 = vcombine.high %v2824_v61, %v2840_v48  ;;  %v7234_v2 = vcombine.high %v2825_v62, %v2841_v63  ;;  %v2650_v58 = vld [vmem:[%s9948_s5 + $0x5a0] sm:$0xff]  ;;  %v2651_v57 = vld [vmem:[%s9948_s5 + $0x5a8] sm:$0xff] }
 0x2b9   :  { %5803 = vmatpush1.bf16.msra.mxu0 %v6943_v9  ;;  %5844 = vmatpush1.bf16.msra.mxu1 %v6945_v10  ;;  %v7231_v9 = vcombine.low %v2824_v61, %v2840_v48  ;;  %v7233_v10 = vcombine.low %v2825_v62, %v2841_v63  ;;  %v2602_v61 = vld [vmem:[%s9948_s5 + $0x420] sm:$0xff]  ;;  %v2603_v62 = vld [vmem:[%s9948_s5 + $0x428] sm:$0xff] }
 0x2ba   :  { %5804 = vmatprep.subr.bf16.mxu0 %v6912_v11  ;;  %5845 = vmatprep.subr.bf16.mxu1 %v6914_v12  ;;  %v7200_v11 = vcombine.high %v2792_v5, %v2808_v3  ;;  %v7202_v12 = vcombine.high %v2793_v6, %v2809_v8  ;;  %v2618_v48 = vld [vmem:[%s9948_s5 + $0x4a0] sm:$0xff]  ;;  %v2619_v63 = vld [vmem:[%s9948_s5 + $0x4a8] sm:$0xff] }
 0x2bd   :  { %5805 = vmatpush1.bf16.msra.mxu0 %v6911_v23  ;;  %5846 = vmatpush1.bf16.msra.mxu1 %v6913_v24  ;;  %v7199_v23 = vcombine.low %v2792_v5, %v2808_v3  ;;  %v7201_v24 = vcombine.low %v2793_v6, %v2809_v8  ;;  %v2570_v5 = vld [vmem:[%s9948_s5 + $0x320] sm:$0xff]  ;;  %v2571_v6 = vld [vmem:[%s9948_s5 + $0x328] sm:$0xff] }
 0x2be   :  { %5806 = vmatprep.subr.bf16.mxu0 %v6880_v26  ;;  %5847 = vmatprep.subr.bf16.mxu1 %v6882_v27  ;;  %v7168_v26 = vcombine.high %v2760_v19, %v2776_v20  ;;  %v7170_v27 = vcombine.high %v2761_v21, %v2777_v22  ;;  %v2586_v3 = vld [vmem:[%s9948_s5 + $0x3a0] sm:$0xff]  ;;  %v2587_v8 = vld [vmem:[%s9948_s5 + $0x3a8] sm:$0xff] }
 0x2c1   :  { %5807 = vmatpush1.bf16.msra.mxu0 %v6879_v31  ;;  %5848 = vmatpush1.bf16.msra.mxu1 %v6881_v34  ;;  %v7167_v31 = vcombine.low %v2760_v19, %v2776_v20  ;;  %v7169_v34 = vcombine.low %v2761_v21, %v2777_v22  ;;  %v2538_v19 = vld [vmem:[%s9948_s5 + $0x220] sm:$0xff]  ;;  %v2539_v21 = vld [vmem:[%s9948_s5 + $0x228] sm:$0xff] }
 0x2c2   :  { %5808 = vmatprep.subr.bf16.mxu0 %v7360_v15  ;;  %5849 = vmatprep.subr.bf16.mxu1 %v7362_v37  ;;  %v7136_v15 = vcombine.high %v2728_v46, %v2744_v29  ;;  %v7138_v37 = vcombine.high %v2729_v30, %v2745_v13  ;;  %v2554_v20 = vld [vmem:[%s9948_s5 + $0x2a0] sm:$0xff]  ;;  %v2555_v22 = vld [vmem:[%s9948_s5 + $0x2a8] sm:$0xff] }
 0x2c5   :  { %5809 = vmatpush2.bf16.msra.mxu0 %v7359_v41  ;;  %5850 = vmatpush2.bf16.msra.mxu1 %v7361_v42  ;;  %v7135_v41 = vcombine.low %v2728_v46, %v2744_v29  ;;  %v7137_v42 = vcombine.low %v2729_v30, %v2745_v13  ;;  %v2506_v46 = vld [vmem:[%s9948_s5 + $0x120] sm:$0xff]  ;;  %v2507_v30 = vld [vmem:[%s9948_s5 + $0x128] sm:$0xff] }
 0x2c6   :  { %5810 = vmatprep.subr.bf16.mxu0 %v7328_v44  ;;  %5851 = vmatprep.subr.bf16.mxu1 %v7330_v51  ;;  %v7108_v44 = vcombine.high %v2698_v38, %v2714_v14  ;;  %v7110_v51 = vcombine.high %v2699_v39, %v2715_v40  ;;  %v2522_v29 = vld [vmem:[%s9948_s5 + $0x1a0] sm:$0xff]  ;;  %v2523_v13 = vld [vmem:[%s9948_s5 + $0x1a8] sm:$0xff] }
 0x2c9   :  { %5811 = vmatpush2.bf16.msra.mxu0 %v7327_v18  ;;  %5852 = vmatpush2.bf16.msra.mxu1 %v7329_v33  ;;  %v7107_v18 = vcombine.low %v2698_v38, %v2714_v14  ;;  %v7109_v33 = vcombine.low %v2699_v39, %v2715_v40  ;;  %v2474_v38 = vld [vmem:[%s9948_s5 + $0x20] sm:$0xff]  ;;  %v2475_v39 = vld [vmem:[%s9948_s5 + $0x28] sm:$0xff] }
 0x2ca   :  { %5812 = vmatprep.subr.bf16.mxu0 %v7296_v54  ;;  %5853 = vmatprep.subr.bf16.mxu1 %v7298_v55  ;;  %v7076_v54 = vcombine.high %v2666_v52, %v2682_v16  ;;  %v7078_v55 = vcombine.high %v2667_v17, %v2683_v32  ;;  %v2490_v14 = vld [vmem:[%s9948_s5 + $0xa0] sm:$0xff]  ;;  %v2491_v40 = vld [vmem:[%s9948_s5 + $0xa8] sm:$0xff] }
 0x2cd   :  { %5813 = vmatpush2.bf16.msra.mxu0 %v7295_v59  ;;  %5854 = vmatpush2.bf16.msra.mxu1 %v7297_v60  ;;  %v7075_v59 = vcombine.low %v2666_v52, %v2682_v16  ;;  %v7077_v60 = vcombine.low %v2667_v17, %v2683_v32  ;;  %v2954_v52 = vld [vmem:[%s9948_s5 + $0xf20] sm:$0xff]  ;;  %v2955_v17 = vld [vmem:[%s9948_s5 + $0xf28] sm:$0xff] }
 0x2ce   :  { %5814 = vmatprep.subr.bf16.mxu0 %v7264_v25  ;;  %5855 = vmatprep.subr.bf16.mxu1 %v7266_v28  ;;  %v7044_v25 = vcombine.high %v2634_v56, %v2650_v58  ;;  %v7046_v28 = vcombine.high %v2635_v53, %v2651_v57  ;;  %v2970_v16 = vld [vmem:[%s9948_s5 + $0xfa0] sm:$0xff]  ;;  %v2971_v32 = vld [vmem:[%s9948_s5 + $0xfa8] sm:$0xff] }
 0x2d1   :  { %5815 = vmatpush2.bf16.msra.mxu0 %v7263_v0  ;;  %5856 = vmatpush2.bf16.msra.mxu1 %v7265_v1  ;;  %v7043_v0 = vcombine.low %v2634_v56, %v2650_v58  ;;  %v7045_v1 = vcombine.low %v2635_v53, %v2651_v57  ;;  %v2922_v56 = vld [vmem:[%s9948_s5 + $0xe20] sm:$0xff]  ;;  %v2923_v53 = vld [vmem:[%s9948_s5 + $0xe28] sm:$0xff] }
 0x2d2   :  { %5816 = vmatprep.subr.bf16.mxu0 %v7232_v50  ;;  %5857 = vmatprep.subr.bf16.mxu1 %v7234_v2  ;;  %v7012_v50 = vcombine.high %v2602_v61, %v2618_v48  ;;  %v7014_v2 = vcombine.high %v2603_v62, %v2619_v63  ;;  %v2938_v58 = vld [vmem:[%s9948_s5 + $0xea0] sm:$0xff]  ;;  %v2939_v57 = vld [vmem:[%s9948_s5 + $0xea8] sm:$0xff] }
 0x2d5   :  { %5817 = vmatpush2.bf16.msra.mxu0 %v7231_v9  ;;  %5858 = vmatpush2.bf16.msra.mxu1 %v7233_v10  ;;  %v7011_v9 = vcombine.low %v2602_v61, %v2618_v48  ;;  %v7013_v10 = vcombine.low %v2603_v62, %v2619_v63  ;;  %v2890_v61 = vld [vmem:[%s9948_s5 + $0xd20] sm:$0xff]  ;;  %v2891_v62 = vld [vmem:[%s9948_s5 + $0xd28] sm:$0xff] }
 0x2d6   :  { %5818 = vmatprep.subr.bf16.mxu0 %v7200_v11  ;;  %5859 = vmatprep.subr.bf16.mxu1 %v7202_v12  ;;  %v6980_v11 = vcombine.high %v2570_v5, %v2586_v3  ;;  %v6982_v12 = vcombine.high %v2571_v6, %v2587_v8  ;;  %v2906_v48 = vld [vmem:[%s9948_s5 + $0xda0] sm:$0xff]  ;;  %v2907_v63 = vld [vmem:[%s9948_s5 + $0xda8] sm:$0xff] }
 0x2d9   :  { %5819 = vmatpush2.bf16.msra.mxu0 %v7199_v23  ;;  %5860 = vmatpush2.bf16.msra.mxu1 %v7201_v24  ;;  %v6979_v23 = vcombine.low %v2570_v5, %v2586_v3  ;;  %v6981_v24 = vcombine.low %v2571_v6, %v2587_v8  ;;  %v2858_v5 = vld [vmem:[%s9948_s5 + $0xc20] sm:$0xff]  ;;  %v2859_v6 = vld [vmem:[%s9948_s5 + $0xc28] sm:$0xff] }
 0x2da   :  { %5820 = vmatprep.subr.bf16.mxu0 %v7168_v26  ;;  %5861 = vmatprep.subr.bf16.mxu1 %v7170_v27  ;;  %v6948_v26 = vcombine.high %v2538_v19, %v2554_v20  ;;  %v6950_v27 = vcombine.high %v2539_v21, %v2555_v22  ;;  %v2874_v3 = vld [vmem:[%s9948_s5 + $0xca0] sm:$0xff]  ;;  %v2875_v8 = vld [vmem:[%s9948_s5 + $0xca8] sm:$0xff] }
 0x2dd   :  { %5821 = vmatpush2.bf16.msra.mxu0 %v7167_v31  ;;  %5862 = vmatpush2.bf16.msra.mxu1 %v7169_v34  ;;  %v6947_v31 = vcombine.low %v2538_v19, %v2554_v20  ;;  %v6949_v34 = vcombine.low %v2539_v21, %v2555_v22  ;;  %v2826_v19 = vld [vmem:[%s9948_s5 + $0xb20] sm:$0xff]  ;;  %v2827_v21 = vld [vmem:[%s9948_s5 + $0xb28] sm:$0xff] }
 0x2de   :  { %5822 = vmatprep.subr.bf16.mxu0 %v7136_v15  ;;  %5863 = vmatprep.subr.bf16.mxu1 %v7138_v37  ;;  %v6916_v15 = vcombine.high %v2506_v46, %v2522_v29  ;;  %v6918_v37 = vcombine.high %v2507_v30, %v2523_v13  ;;  %v2842_v20 = vld [vmem:[%s9948_s5 + $0xba0] sm:$0xff]  ;;  %v2843_v22 = vld [vmem:[%s9948_s5 + $0xba8] sm:$0xff] }
 0x2e1   :  { %5823 = vmatpush2.bf16.msra.mxu0 %v7135_v41  ;;  %5864 = vmatpush2.bf16.msra.mxu1 %v7137_v42  ;;  %v6915_v41 = vcombine.low %v2506_v46, %v2522_v29  ;;  %v6917_v42 = vcombine.low %v2507_v30, %v2523_v13  ;;  %v2794_v46 = vld [vmem:[%s9948_s5 + $0xa20] sm:$0xff]  ;;  %v2795_v30 = vld [vmem:[%s9948_s5 + $0xa28] sm:$0xff] }
 0x2e2   :  { %5874 = vmatprep.subr.bf16.mxu0 %v7108_v44  ;;  %5915 = vmatprep.subr.bf16.mxu1 %v7110_v51  ;;  %v6884_v44 = vcombine.high %v2474_v38, %v2490_v14  ;;  %v6886_v51 = vcombine.high %v2475_v39, %v2491_v40  ;;  %v2810_v29 = vld [vmem:[%s9948_s5 + $0xaa0] sm:$0xff]  ;;  %v2811_v13 = vld [vmem:[%s9948_s5 + $0xaa8] sm:$0xff] }
 0x2e4   :  { %5825 = vmatmul.mubr.bf16.vlgmr.msra.gmra.mxu0 %v8473_v36  ;;  %5866 = vmatmul.mubr.bf16.vlgmr.msra.gmra.mxu1 %v8473_v36 }
 0x2e5   :  { %5875 = vmatpush1.bf16.msra.mxu0 %v7107_v18  ;;  %5906 = vmatprep.mubr.bf16.mxu0 %v8471_v35  ;;  %v6883_v18 = vcombine.low %v2474_v38, %v2490_v14  ;;  %v2762_v38 = vld [vmem:[%s9948_s5 + $0x920] sm:$0xff] }
 0x2e6   :  { %5916 = vmatpush1.bf16.msra.mxu1 %v7109_v33  ;;  %5947 = vmatprep.mubr.bf16.mxu1 %v8471_v35  ;;  %v6885_v33 = vcombine.low %v2475_v39, %v2491_v40  ;;  %v2778_v14 = vld [vmem:[%s9948_s5 + $0x9a0] sm:$0xff]  ;;  %v2763_v39 = vld [vmem:[%s9948_s5 + $0x928] sm:$0xff] }
 0x2e7   :  { %5876 = vmatprep.subr.bf16.mxu0 %v7076_v54  ;;  %5917 = vmatprep.subr.bf16.mxu1 %v7078_v55  ;;  %v7364_v54 = vcombine.high %v2954_v52, %v2970_v16  ;;  %v7366_v55 = vcombine.high %v2955_v17, %v2971_v32  ;;  %v2779_v40 = vld [vmem:[%s9948_s5 + $0x9a8] sm:$0xff] }
 0x2e9   :  { %5877 = vmatpush1.bf16.msra.mxu0 %v7075_v59  ;;  %v7363_v59 = vcombine.low %v2954_v52, %v2970_v16  ;;  %v2730_v52 = vld [vmem:[%s9948_s5 + $0x820] sm:$0xff] }
 0x2ea   :  { %5918 = vmatpush1.bf16.msra.mxu1 %v7077_v60  ;;  %5878 = vmatprep.subr.bf16.mxu0 %v7044_v25  ;;  %v7365_v60 = vcombine.low %v2955_v17, %v2971_v32  ;;  %v7332_v25 = vcombine.high %v2922_v56, %v2938_v58  ;;  %v2746_v16 = vld [vmem:[%s9948_s5 + $0x8a0] sm:$0xff]  ;;  %v2731_v17 = vld [vmem:[%s9948_s5 + $0x828] sm:$0xff] }
 0x2eb   :  { %5919 = vmatprep.subr.bf16.mxu1 %v7046_v28  ;;  %v7334_v28 = vcombine.high %v2923_v53, %v2939_v57  ;;  %v2747_v32 = vld [vmem:[%s9948_s5 + $0x8a8] sm:$0xff] }
 0x2ed   :  { %5879 = vmatpush1.bf16.msra.mxu0 %v7043_v0  ;;  %v7331_v0 = vcombine.low %v2922_v56, %v2938_v58  ;;  %v2700_v56 = vld [vmem:[%s9948_s5 + $0x730] sm:$0xff] }
 0x2ee   :  { %5920 = vmatpush1.bf16.msra.mxu1 %v7045_v1  ;;  %5880 = vmatprep.subr.bf16.mxu0 %v7012_v50  ;;  %v7333_v1 = vcombine.low %v2923_v53, %v2939_v57  ;;  %v7300_v50 = vcombine.high %v2890_v61, %v2906_v48  ;;  %v2716_v58 = vld [vmem:[%s9948_s5 + $0x7b0] sm:$0xff]  ;;  %v2701_v53 = vld [vmem:[%s9948_s5 + $0x738] sm:$0xff] }
 0x2ef   :  { %5921 = vmatprep.subr.bf16.mxu1 %v7014_v2  ;;  %v7302_v2 = vcombine.high %v2891_v62, %v2907_v63  ;;  %v2717_v57 = vld [vmem:[%s9948_s5 + $0x7b8] sm:$0xff] }
 0x2f1   :  { %5881 = vmatpush1.bf16.msra.mxu0 %v7011_v9  ;;  %v7299_v9 = vcombine.low %v2890_v61, %v2906_v48  ;;  %v2668_v61 = vld [vmem:[%s9948_s5 + $0x630] sm:$0xff] }
 0x2f2   :  { %5922 = vmatpush1.bf16.msra.mxu1 %v7013_v10  ;;  %5882 = vmatprep.subr.bf16.mxu0 %v6980_v11  ;;  %v7301_v10 = vcombine.low %v2891_v62, %v2907_v63  ;;  %v7268_v11 = vcombine.high %v2858_v5, %v2874_v3  ;;  %v2684_v48 = vld [vmem:[%s9948_s5 + $0x6b0] sm:$0xff]  ;;  %v7111_v62 = vcombine.low %v2700_v56, %v2716_v58  ;;  %v2669_v63 = vld [vmem:[%s9948_s5 + $0x638] sm:$0xff] }
 0x2f3   :  { %5923 = vmatprep.subr.bf16.mxu1 %v6982_v12  ;;  %v7270_v12 = vcombine.high %v2859_v6, %v2875_v8 }
 0x2f5   :  { %5883 = vmatpush1.bf16.msra.mxu0 %v6979_v23  ;;  %v7267_v23 = vcombine.low %v2858_v5, %v2874_v3  ;;  %v2652_v5 = vld [vmem:[%s9948_s5 + $0x5b0] sm:$0xff] }
 0x2f6   :  { %5924 = vmatpush1.bf16.msra.mxu1 %v6981_v24  ;;  %5884 = vmatprep.subr.bf16.mxu0 %v6948_v26  ;;  %v7269_v24 = vcombine.low %v2859_v6, %v2875_v8  ;;  %v7236_v26 = vcombine.high %v2826_v19, %v2842_v20  ;;  %v2637_v6 = vld [vmem:[%s9948_s5 + $0x538] sm:$0xff] }
 0x2f7   :  { %5925 = vmatprep.subr.bf16.mxu1 %v6950_v27  ;;  %v7238_v27 = vcombine.high %v2827_v21, %v2843_v22  ;;  %v2653_v8 = vld [vmem:[%s9948_s5 + $0x5b8] sm:$0xff] }
 0x2f9   :  { %5885 = vmatpush1.bf16.msra.mxu0 %v6947_v31  ;;  %v7235_v31 = vcombine.low %v2826_v19, %v2842_v20  ;;  %v2604_v19 = vld [vmem:[%s9948_s5 + $0x430] sm:$0xff] }
 0x2fa   :  { %5926 = vmatpush1.bf16.msra.mxu1 %v6949_v34  ;;  %5886 = vmatprep.subr.bf16.mxu0 %v6916_v15  ;;  %v7237_v34 = vcombine.low %v2827_v21, %v2843_v22  ;;  %v7204_v15 = vcombine.high %v2794_v46, %v2810_v29  ;;  %v2620_v20 = vld [vmem:[%s9948_s5 + $0x4b0] sm:$0xff]  ;;  %v2605_v21 = vld [vmem:[%s9948_s5 + $0x438] sm:$0xff] }
 0x2fb   :  { %5927 = vmatprep.subr.bf16.mxu1 %v6918_v37  ;;  %v7206_v37 = vcombine.high %v2795_v30, %v2811_v13  ;;  %v2621_v22 = vld [vmem:[%s9948_s5 + $0x4b8] sm:$0xff] }
 0x2fd   :  { %5887 = vmatpush1.bf16.msra.mxu0 %v6915_v41  ;;  %v7203_v41 = vcombine.low %v2794_v46, %v2810_v29  ;;  %v2572_v46 = vld [vmem:[%s9948_s5 + $0x330] sm:$0xff] }
 0x2fe   :  { %5928 = vmatpush1.bf16.msra.mxu1 %v6917_v42  ;;  %5888 = vmatprep.subr.bf16.mxu0 %v6884_v44  ;;  %v7205_v42 = vcombine.low %v2795_v30, %v2811_v13  ;;  %v7172_v44 = vcombine.high %v2762_v38, %v2778_v14  ;;  %v2588_v29 = vld [vmem:[%s9948_s5 + $0x3b0] sm:$0xff]  ;;  %v2573_v30 = vld [vmem:[%s9948_s5 + $0x338] sm:$0xff] }
 0x2ff   :  { %5929 = vmatprep.subr.bf16.mxu1 %v6886_v51  ;;  %v7174_v51 = vcombine.high %v2763_v39, %v2779_v40  ;;  %v2589_v13 = vld [vmem:[%s9948_s5 + $0x3b8] sm:$0xff] }
 0x301   :  { %5889 = vmatpush1.bf16.msra.mxu0 %v6883_v18  ;;  %v7171_v18 = vcombine.low %v2762_v38, %v2778_v14  ;;  %v2540_v38 = vld [vmem:[%s9948_s5 + $0x230] sm:$0xff] }
 0x302   :  { %5930 = vmatpush1.bf16.msra.mxu1 %v6885_v33  ;;  %5890 = vmatprep.subr.bf16.mxu0 %v7364_v54  ;;  %v7173_v33 = vcombine.low %v2763_v39, %v2779_v40  ;;  %v7140_v54 = vcombine.high %v2730_v52, %v2746_v16  ;;  %v2556_v14 = vld [vmem:[%s9948_s5 + $0x2b0] sm:$0xff]  ;;  %v2541_v39 = vld [vmem:[%s9948_s5 + $0x238] sm:$0xff] }
 0x303   :  { %5931 = vmatprep.subr.bf16.mxu1 %v7366_v55  ;;  %v7142_v55 = vcombine.high %v2731_v17, %v2747_v32  ;;  %v2557_v40 = vld [vmem:[%s9948_s5 + $0x2b8] sm:$0xff] }
 0x305   :  { %5891 = vmatpush2.bf16.msra.mxu0 %v7363_v59  ;;  %v7139_v59 = vcombine.low %v2730_v52, %v2746_v16  ;;  %v2508_v52 = vld [vmem:[%s9948_s5 + $0x130] sm:$0xff] }
 0x306   :  { %5932 = vmatpush2.bf16.msra.mxu1 %v7365_v60  ;;  %5892 = vmatprep.subr.bf16.mxu0 %v7332_v25  ;;  %v7141_v60 = vcombine.low %v2731_v17, %v2747_v32  ;;  %v7112_v25 = vcombine.high %v2700_v56, %v2716_v58  ;;  %v2524_v16 = vld [vmem:[%s9948_s5 + $0x1b0] sm:$0xff]  ;;  %v2509_v17 = vld [vmem:[%s9948_s5 + $0x138] sm:$0xff] }
 0x307   :  { %5933 = vmatprep.subr.bf16.mxu1 %v7334_v28  ;;  %v7114_v28 = vcombine.high %v2701_v53, %v2717_v57  ;;  %v2525_v32 = vld [vmem:[%s9948_s5 + $0x1b8] sm:$0xff]  ;;  %v2476_v56 = vld [vmem:[%s9948_s5 + $0x30] sm:$0xff] }
 0x308   :  { %v2492_v58 = vld [vmem:[%s9948_s5 + $0xb0] sm:$0xff] }
 0x309   :  { %5893 = vmatpush2.bf16.msra.mxu0 %v7331_v0  ;;  %v2685_v0 = vld [vmem:[%s9948_s5 + $0x6b8] sm:$0xff] }
 0x30a   :  { %5934 = vmatpush2.bf16.msra.mxu1 %v7333_v1  ;;  %5894 = vmatprep.subr.bf16.mxu0 %v7300_v50  ;;  %v7113_v1 = vcombine.low %v2701_v53, %v2717_v57  ;;  %v7080_v50 = vcombine.high %v2668_v61, %v2684_v48  ;;  %v7082_v3 = vcombine.high %v2669_v63, %v2685_v0  ;;  %v2477_v53 = vld [vmem:[%s9948_s5 + $0x38] sm:$0xff] }
 0x30b   :  { %5935 = vmatprep.subr.bf16.mxu1 %v7302_v2  ;;  %v2636_v2 = vld [vmem:[%s9948_s5 + $0x530] sm:$0xff]  ;;  %v2493_v57 = vld [vmem:[%s9948_s5 + $0xb8] sm:$0xff] }
 0x30d   :  { %5895 = vmatpush2.bf16.msra.mxu0 %v7299_v9  ;;  %v7079_v9 = vcombine.low %v2668_v61, %v2684_v48  ;;  %v2956_v61 = vld [vmem:[%s9948_s5 + $0xf30] sm:$0xff] }
 0x30e   :  { %5936 = vmatpush2.bf16.msra.mxu1 %v7301_v10  ;;  %5896 = vmatprep.subr.bf16.mxu0 %v7268_v11  ;;  %v7081_v10 = vcombine.low %v2669_v63, %v2685_v0  ;;  %v7048_v11 = vcombine.high %v2636_v2, %v2652_v5  ;;  %v2972_v48 = vld [vmem:[%s9948_s5 + $0xfb0] sm:$0xff]  ;;  %v2973_v63 = vld [vmem:[%s9948_s5 + $0xfb8] sm:$0xff]  ;;  %v6887_v0 = vcombine.low %v2476_v56, %v2492_v58 }
 0x30f   :  { %5937 = vmatprep.subr.bf16.mxu1 %v7270_v12  ;;  %v7050_v12 = vcombine.high %v2637_v6, %v2653_v8 }
 0x311   :  { %5897 = vmatpush2.bf16.msra.mxu0 %v7267_v23  ;;  %v7047_v23 = vcombine.low %v2636_v2, %v2652_v5  ;;  %v2924_v5 = vld [vmem:[%s9948_s5 + $0xe30] sm:$0xff] }
 0x312   :  { %5938 = vmatpush2.bf16.msra.mxu1 %v7269_v24  ;;  %5898 = vmatprep.subr.bf16.mxu0 %v7236_v26  ;;  %v7049_v24 = vcombine.low %v2637_v6, %v2653_v8  ;;  %v7016_v26 = vcombine.high %v2604_v19, %v2620_v20  ;;  %v2925_v6 = vld [vmem:[%s9948_s5 + $0xe38] sm:$0xff] }
 0x313   :  { %5939 = vmatprep.subr.bf16.mxu1 %v7238_v27  ;;  %v7018_v27 = vcombine.high %v2605_v21, %v2621_v22  ;;  %v2941_v8 = vld [vmem:[%s9948_s5 + $0xeb8] sm:$0xff] }
 0x315   :  { %5899 = vmatpush2.bf16.msra.mxu0 %v7235_v31  ;;  %v7015_v31 = vcombine.low %v2604_v19, %v2620_v20  ;;  %v2892_v19 = vld [vmem:[%s9948_s5 + $0xd30] sm:$0xff] }
 0x316   :  { %5940 = vmatpush2.bf16.msra.mxu1 %v7237_v34  ;;  %5900 = vmatprep.subr.bf16.mxu0 %v7204_v15  ;;  %v7017_v34 = vcombine.low %v2605_v21, %v2621_v22  ;;  %v6984_v15 = vcombine.high %v2572_v46, %v2588_v29  ;;  %v2908_v20 = vld [vmem:[%s9948_s5 + $0xdb0] sm:$0xff]  ;;  %v2893_v21 = vld [vmem:[%s9948_s5 + $0xd38] sm:$0xff] }
 0x317   :  { %5941 = vmatprep.subr.bf16.mxu1 %v7206_v37  ;;  %v6986_v37 = vcombine.high %v2573_v30, %v2589_v13  ;;  %v2909_v22 = vld [vmem:[%s9948_s5 + $0xdb8] sm:$0xff] }
 0x319   :  { %5901 = vmatpush2.bf16.msra.mxu0 %v7203_v41  ;;  %v6983_v41 = vcombine.low %v2572_v46, %v2588_v29  ;;  %v2860_v46 = vld [vmem:[%s9948_s5 + $0xc30] sm:$0xff] }
 0x31a   :  { %5942 = vmatpush2.bf16.msra.mxu1 %v7205_v42  ;;  %5902 = vmatprep.subr.bf16.mxu0 %v7172_v44  ;;  %v6985_v42 = vcombine.low %v2573_v30, %v2589_v13  ;;  %v6952_v44 = vcombine.high %v2540_v38, %v2556_v14  ;;  %v2876_v29 = vld [vmem:[%s9948_s5 + $0xcb0] sm:$0xff]  ;;  %v2861_v30 = vld [vmem:[%s9948_s5 + $0xc38] sm:$0xff] }
 0x31b   :  { %5943 = vmatprep.subr.bf16.mxu1 %v7174_v51  ;;  %v6954_v51 = vcombine.high %v2541_v39, %v2557_v40  ;;  %v2877_v13 = vld [vmem:[%s9948_s5 + $0xcb8] sm:$0xff] }
 0x31d   :  { %5903 = vmatpush2.bf16.msra.mxu0 %v7171_v18  ;;  %v6951_v18 = vcombine.low %v2540_v38, %v2556_v14  ;;  %v2828_v38 = vld [vmem:[%s9948_s5 + $0xb30] sm:$0xff] }
 0x31e   :  { %5944 = vmatpush2.bf16.msra.mxu1 %v7173_v33  ;;  %5904 = vmatprep.subr.bf16.mxu0 %v7140_v54  ;;  %v6953_v33 = vcombine.low %v2541_v39, %v2557_v40  ;;  %v6920_v54 = vcombine.high %v2508_v52, %v2524_v16  ;;  %v2844_v14 = vld [vmem:[%s9948_s5 + $0xbb0] sm:$0xff]  ;;  %v2829_v39 = vld [vmem:[%s9948_s5 + $0xb38] sm:$0xff] }
 0x31f   :  { %5945 = vmatprep.subr.bf16.mxu1 %v7142_v55  ;;  %v6922_v55 = vcombine.high %v2509_v17, %v2525_v32  ;;  %v2845_v40 = vld [vmem:[%s9948_s5 + $0xbb8] sm:$0xff] }
 0x321   :  { %5905 = vmatpush2.bf16.msra.mxu0 %v7139_v59  ;;  %v6919_v59 = vcombine.low %v2508_v52, %v2524_v16  ;;  %v2796_v52 = vld [vmem:[%s9948_s5 + $0xa30] sm:$0xff] }
 0x322   :  { %5946 = vmatpush2.bf16.msra.mxu1 %v7141_v60  ;;  %5956 = vmatprep.subr.bf16.mxu0 %v7112_v25  ;;  %v6921_v60 = vcombine.low %v2509_v17, %v2525_v32  ;;  %v6888_v25 = vcombine.high %v2476_v56, %v2492_v58  ;;  %v2812_v16 = vld [vmem:[%s9948_s5 + $0xab0] sm:$0xff]  ;;  %v2797_v17 = vld [vmem:[%s9948_s5 + $0xa38] sm:$0xff] }
 0x323   :  { %5997 = vmatprep.subr.bf16.mxu1 %v7114_v28  ;;  %v6890_v28 = vcombine.high %v2477_v53, %v2493_v57  ;;  %v2813_v32 = vld [vmem:[%s9948_s5 + $0xab8] sm:$0xff]  ;;  %v2764_v56 = vld [vmem:[%s9948_s5 + $0x930] sm:$0xff] }
 0x324   :  { %5907 = vmatmul.mubr.bf16.vlgmr.msra.gmra.mxu0 %v8473_v36  ;;  %v2780_v58 = vld [vmem:[%s9948_s5 + $0x9b0] sm:$0xff] }
 0x325   :  { %5948 = vmatmul.mubr.bf16.vlgmr.msra.gmra.mxu1 %v8473_v36  ;;  %5957 = vmatpush1.bf16.msra.mxu0 %v7111_v62  ;;  %v2957_v62 = vld [vmem:[%s9948_s5 + $0xf38] sm:$0xff] }
 0x326   :  { %5988 = vmatprep.mubr.bf16.mxu0 %v8471_v35  ;;  %5998 = vmatpush1.bf16.msra.mxu1 %v7113_v1  ;;  %v6889_v1 = vcombine.low %v2477_v53, %v2493_v57  ;;  %v7370_v2 = vcombine.high %v2957_v62, %v2973_v63  ;;  %v2765_v53 = vld [vmem:[%s9948_s5 + $0x938] sm:$0xff] }
 0x327   :  { %6029 = vmatprep.mubr.bf16.mxu1 %v8471_v35  ;;  %5958 = vmatprep.subr.bf16.mxu0 %v7080_v50  ;;  %v7368_v50 = vcombine.high %v2956_v61, %v2972_v48  ;;  %v2781_v57 = vld [vmem:[%s9948_s5 + $0x9b8] sm:$0xff] }
 0x328   :  { %5999 = vmatprep.subr.bf16.mxu1 %v7082_v3  ;;  %v2940_v3 = vld [vmem:[%s9948_s5 + $0xeb0] sm:$0xff] }
 0x329   :  { %5959 = vmatpush1.bf16.msra.mxu0 %v7079_v9  ;;  %v7367_v9 = vcombine.low %v2956_v61, %v2972_v48  ;;  %v2732_v61 = vld [vmem:[%s9948_s5 + $0x830] sm:$0xff] }
 0x32a   :  { %6000 = vmatpush1.bf16.msra.mxu1 %v7081_v10  ;;  %5960 = vmatprep.subr.bf16.mxu0 %v7048_v11  ;;  %v7369_v10 = vcombine.low %v2957_v62, %v2973_v63  ;;  %v7336_v11 = vcombine.high %v2924_v5, %v2940_v3  ;;  %v2748_v48 = vld [vmem:[%s9948_s5 + $0x8b0] sm:$0xff]  ;;  %v2733_v62 = vld [vmem:[%s9948_s5 + $0x838] sm:$0xff] }
 0x32b   :  { %6001 = vmatprep.subr.bf16.mxu1 %v7050_v12  ;;  %v7338_v12 = vcombine.high %v2925_v6, %v2941_v8  ;;  %v2749_v63 = vld [vmem:[%s9948_s5 + $0x8b8] sm:$0xff] }
 0x32d   :  { %5961 = vmatpush1.bf16.msra.mxu0 %v7047_v23  ;;  %v7335_v23 = vcombine.low %v2924_v5, %v2940_v3  ;;  %v2702_v5 = vld [vmem:[%s9948_s5 + $0x740] sm:$0xff] }
 0x32e   :  { %6002 = vmatpush1.bf16.msra.mxu1 %v7049_v24  ;;  %5962 = vmatprep.subr.bf16.mxu0 %v7016_v26  ;;  %v7337_v24 = vcombine.low %v2925_v6, %v2941_v8  ;;  %v7304_v26 = vcombine.high %v2892_v19, %v2908_v20  ;;  %v2718_v3 = vld [vmem:[%s9948_s5 + $0x7c0] sm:$0xff]  ;;  %v2703_v6 = vld [vmem:[%s9948_s5 + $0x748] sm:$0xff] }
 0x32f   :  { %6003 = vmatprep.subr.bf16.mxu1 %v7018_v27  ;;  %v7306_v27 = vcombine.high %v2893_v21, %v2909_v22  ;;  %v2719_v8 = vld [vmem:[%s9948_s5 + $0x7c8] sm:$0xff] }
 0x331   :  { %5963 = vmatpush1.bf16.msra.mxu0 %v7015_v31  ;;  %v7303_v31 = vcombine.low %v2892_v19, %v2908_v20  ;;  %v9056_v19 = vld [vmem:[%s9949_s6] sm:$0xff] }
 0x332   :  { %6004 = vmatpush1.bf16.msra.mxu1 %v7017_v34  ;;  %5964 = vmatprep.subr.bf16.mxu0 %v6984_v15  ;;  %v7305_v34 = vcombine.low %v2893_v21, %v2909_v22  ;;  %v7272_v15 = vcombine.high %v2860_v46, %v2876_v29  ;;  %v2670_v20 = vld [vmem:[%s9948_s5 + $0x640] sm:$0xff]  ;;  %v7115_v22 = vcombine.low %v2702_v5, %v2718_v3 }
 0x333   :  { %6005 = vmatprep.subr.bf16.mxu1 %v6986_v37  ;;  %v7274_v37 = vcombine.high %v2861_v30, %v2877_v13  ;;  %v2686_v21 = vld [vmem:[%s9948_s5 + $0x6c0] sm:$0xff] }
 0x335   :  { %5965 = vmatpush1.bf16.msra.mxu0 %v6983_v41  ;;  %v7271_v41 = vcombine.low %v2860_v46, %v2876_v29  ;;  %v2638_v46 = vld [vmem:[%s9948_s5 + $0x540] sm:$0xff]  ;;  %v3001_v29 = vrot.slane %v9056_v19, %v8301_v4 }
 0x336   :  { %6006 = vmatpush1.bf16.msra.mxu1 %v6985_v42  ;;  %5966 = vmatprep.subr.bf16.mxu0 %v6952_v44  ;;  %v7273_v42 = vcombine.low %v2861_v30, %v2877_v13  ;;  %v7240_v44 = vcombine.high %v2828_v38, %v2844_v14  ;;  %v2997_v30 = vrot.slane %v9056_v19, %v8180_v47 }
 0x337   :  { %6007 = vmatprep.subr.bf16.mxu1 %v6954_v51  ;;  %v7242_v51 = vcombine.high %v2829_v39, %v2845_v40  ;;  %v3005_v13 = vrot.slane %v9056_v19, %v8310_v7 }
 0x339   :  { %5967 = vmatpush1.bf16.msra.mxu0 %v6951_v18  ;;  %v7239_v18 = vcombine.low %v2828_v38, %v2844_v14 }
 0x33a   :  { %6008 = vmatpush1.bf16.msra.mxu1 %v6953_v33  ;;  %5968 = vmatprep.subr.bf16.mxu0 %v6920_v54  ;;  %v7241_v33 = vcombine.low %v2829_v39, %v2845_v40  ;;  %v7208_v54 = vcombine.high %v2796_v52, %v2812_v16  ;;  %v7083_v40 = vcombine.low %v2670_v20, %v2686_v21 }
 0x33b   :  { %6009 = vmatprep.subr.bf16.mxu1 %v6922_v55  ;;  %v7210_v55 = vcombine.high %v2797_v17, %v2813_v32 }
 0x33d   :  { %5969 = vmatpush1.bf16.msra.mxu0 %v6919_v59  ;;  %v7207_v59 = vcombine.low %v2796_v52, %v2812_v16 }
 0x33e   :  { %6010 = vmatpush1.bf16.msra.mxu1 %v6921_v60  ;;  %5970 = vmatprep.subr.bf16.mxu0 %v6888_v25  ;;  %v7209_v60 = vcombine.low %v2797_v17, %v2813_v32  ;;  %v7176_v25 = vcombine.high %v2764_v56, %v2780_v58 }
 0x33f   :  { %6011 = vmatprep.subr.bf16.mxu1 %v6890_v28  ;;  %v7178_v28 = vcombine.high %v2765_v53, %v2781_v57 }
 0x341   :  { %5971 = vmatpush1.bf16.msra.mxu0 %v6887_v0  ;;  %v7175_v0 = vcombine.low %v2764_v56, %v2780_v58  ;;  %v2607_v58 = vld [vmem:[%s9948_s5 + $0x448] sm:$0xff] }
 0x342   :  { %6012 = vmatpush1.bf16.msra.mxu1 %v6889_v1  ;;  %5972 = vmatprep.subr.bf16.mxu0 %v7368_v50  ;;  %v7177_v1 = vcombine.low %v2765_v53, %v2781_v57  ;;  %v7144_v50 = vcombine.high %v2732_v61, %v2748_v48  ;;  %v2623_v53 = vld [vmem:[%s9948_s5 + $0x4c8] sm:$0xff] }
 0x343   :  { %6013 = vmatprep.subr.bf16.mxu1 %v7370_v2  ;;  %v7146_v2 = vcombine.high %v2733_v62, %v2749_v63 }
 0x345   :  { %5973 = vmatpush2.bf16.msra.mxu0 %v7367_v9  ;;  %v7143_v9 = vcombine.low %v2732_v61, %v2748_v48 }
 0x346   :  { %6014 = vmatpush2.bf16.msra.mxu1 %v7369_v10  ;;  %5974 = vmatprep.subr.bf16.mxu0 %v7336_v11  ;;  %v7145_v10 = vcombine.low %v2733_v62, %v2749_v63  ;;  %v7116_v11 = vcombine.high %v2702_v5, %v2718_v3  ;;  %v2591_v5 = vld [vmem:[%s9948_s5 + $0x3c8] sm:$0xff] }
 0x347   :  { %6015 = vmatprep.subr.bf16.mxu1 %v7338_v12  ;;  %v7118_v12 = vcombine.high %v2703_v6, %v2719_v8 }
 0x349   :  { %5975 = vmatpush2.bf16.msra.mxu0 %v7335_v23  ;;  %v2671_v23 = vld [vmem:[%s9948_s5 + $0x648] sm:$0xff] }
 0x34a   :  { %6016 = vmatpush2.bf16.msra.mxu1 %v7337_v24  ;;  %5976 = vmatprep.subr.bf16.mxu0 %v7304_v26  ;;  %v2687_v24 = vld [vmem:[%s9948_s5 + $0x6c8] sm:$0xff]  ;;  %v7117_v26 = vcombine.low %v2703_v6, %v2719_v8  ;;  %v7021_v8 = vcombine.low %v2607_v58, %v2623_v53 }
 0x34b   :  { %6017 = vmatprep.subr.bf16.mxu1 %v7306_v27  ;;  %v2993_v27 = vrot.slane %v9056_v19, %v8172_v45  ;;  %v7086_v39 = vcombine.high %v2671_v23, %v2687_v24 }
 0x34d   :  { %5977 = vmatpush2.bf16.msra.mxu0 %v7303_v31  ;;  %v7084_v31 = vcombine.high %v2670_v20, %v2686_v21  ;;  %v2543_v20 = vld [vmem:[%s9948_s5 + $0x248] sm:$0xff] }
 0x34e   :  { %6018 = vmatpush2.bf16.msra.mxu1 %v7305_v34  ;;  %5978 = vmatprep.subr.bf16.mxu0 %v7272_v15  ;;  %v2654_v34 = vld [vmem:[%s9948_s5 + $0x5c0] sm:$0xff]  ;;  %v2639_v15 = vld [vmem:[%s9948_s5 + $0x548] sm:$0xff] }
 0x34f   :  { %6019 = vmatprep.subr.bf16.mxu1 %v7274_v37  ;;  %v2655_v37 = vld [vmem:[%s9948_s5 + $0x5c8] sm:$0xff]  ;;  %v7052_v52 = vcombine.high %v2638_v46, %v2654_v34 }
 0x350   :  { %v7054_v16 = vcombine.high %v2639_v15, %v2655_v37  ;;  %v7053_v61 = vcombine.low %v2639_v15, %v2655_v37  ;;  %v2559_v21 = vld [vmem:[%s9948_s5 + $0x2c8] sm:$0xff]  ;;  %v2478_v37 = vld [vmem:[%s9948_s5 + $0x40] sm:$0xff] }
 0x351   :  { %5979 = vmatpush2.bf16.msra.mxu0 %v7271_v41  ;;  %v7085_v41 = vcombine.low %v2671_v23, %v2687_v24 }
 0x352   :  { %6020 = vmatpush2.bf16.msra.mxu1 %v7273_v42  ;;  %5980 = vmatprep.subr.bf16.mxu0 %v7240_v44 }
 0x353   :  { %6021 = vmatprep.subr.bf16.mxu1 %v7242_v51 }
 0x355   :  { %5981 = vmatpush2.bf16.msra.mxu0 %v7239_v18 }
 0x356   :  { %6022 = vmatpush2.bf16.msra.mxu1 %v7241_v33  ;;  %5982 = vmatprep.subr.bf16.mxu0 %v7208_v54  ;;  %v2606_v33 = vld [vmem:[%s9948_s5 + $0x440] sm:$0xff] }
 0x357   :  { %6023 = vmatprep.subr.bf16.mxu1 %v7210_v55  ;;  %v2622_v54 = vld [vmem:[%s9948_s5 + $0x4c0] sm:$0xff] }
 0x358   :  { %v7020_v48 = vcombine.high %v2606_v33, %v2622_v54  ;;  %v7019_v6 = vcombine.low %v2606_v33, %v2622_v54 }
 0x359   :  { %5983 = vmatpush2.bf16.msra.mxu0 %v7207_v59 }
 0x35a   :  { %6024 = vmatpush2.bf16.msra.mxu1 %v7209_v60  ;;  %5984 = vmatprep.subr.bf16.mxu0 %v7176_v25  ;;  %v7051_v60 = vcombine.low %v2638_v46, %v2654_v34  ;;  %v2526_v46 = vld [vmem:[%s9948_s5 + $0x1c0] sm:$0xff] }
 0x35b   :  { %6025 = vmatprep.subr.bf16.mxu1 %v7178_v28 }
 0x35d   :  { %5985 = vmatpush2.bf16.msra.mxu0 %v7175_v0  ;;  %v7022_v0 = vcombine.high %v2607_v58, %v2623_v53  ;;  %v2927_v58 = vld [vmem:[%s9948_s5 + $0xe48] sm:$0xff] }
 0x35e   :  { %6026 = vmatpush2.bf16.msra.mxu1 %v7177_v1  ;;  %5986 = vmatprep.subr.bf16.mxu0 %v7144_v50  ;;  %v2574_v1 = vld [vmem:[%s9948_s5 + $0x340] sm:$0xff]  ;;  %v2943_v53 = vld [vmem:[%s9948_s5 + $0xec8] sm:$0xff] }
 0x35f   :  { %6027 = vmatprep.subr.bf16.mxu1 %v7146_v2  ;;  %v2590_v50 = vld [vmem:[%s9948_s5 + $0x3c0] sm:$0xff]  ;;  %v2575_v2 = vld [vmem:[%s9948_s5 + $0x348] sm:$0xff] }
 0x360   :  { %v6989_v23 = vcombine.low %v2575_v2, %v2591_v5 }
 0x361   :  { %5987 = vmatpush2.bf16.msra.mxu0 %v7143_v9  ;;  %v6988_v9 = vcombine.high %v2574_v1, %v2590_v50 }
 0x362   :  { %6028 = vmatpush2.bf16.msra.mxu1 %v7145_v10  ;;  %6038 = vmatprep.subr.bf16.mxu0 %v7116_v11  ;;  %v6990_v10 = vcombine.high %v2575_v2, %v2591_v5  ;;  %v2542_v11 = vld [vmem:[%s9948_s5 + $0x240] sm:$0xff] }
 0x363   :  { %6079 = vmatprep.subr.bf16.mxu1 %v7118_v12  ;;  %v2558_v12 = vld [vmem:[%s9948_s5 + $0x2c0] sm:$0xff] }
 0x364   :  { %5989 = vmatmul.mubr.bf16.vlgmr.msra.gmra.mxu0 %v8473_v36  ;;  %v5744_v38 = vpop.f32.mrf.mxu0  ;;  %v5785_v14 = vpop.f32.mrf.mxu1  ;;  %v6956_v24 = vcombine.high %v2542_v11, %v2558_v12  ;;  %v2862_v2 = vld [vmem:[%s9948_s5 + $0xc40] sm:$0xff] }
 0x365   :  { %6030 = vmatmul.mubr.bf16.vlgmr.msra.gmra.mxu1 %v8473_v36  ;;  %6039 = vmatpush1.bf16.msra.mxu0 %v7115_v22  ;;  %v5745_v42 = vadd.f32 %v5744_v38, %v2993_v27  ;;  %v5786_v17 = vadd.f32 %v5785_v14, %v3001_v29  ;;  %v6987_v22 = vcombine.low %v2574_v1, %v2590_v50  ;;  %v2510_v27 = vld [vmem:[%s9948_s5 + $0x140] sm:$0xff]  ;;  %v2511_v29 = vld [vmem:[%s9948_s5 + $0x148] sm:$0xff] }
 0x366   :  { %6070 = vmatprep.mubr.bf16.mxu0 %v8471_v35  ;;  %6080 = vmatpush1.bf16.msra.mxu1 %v7117_v26  ;;  %v5746_v44 = vpop.f32.mrf.mxu0  ;;  %v5787_v51 = vpop.f32.mrf.mxu1  ;;  %v6958_v26 = vcombine.high %v2543_v20, %v2559_v21  ;;  %v6924_v34 = vcombine.high %v2510_v27, %v2526_v46  ;;  %v2494_v38 = vld [vmem:[%s9948_s5 + $0xc0] sm:$0xff]  ;;  %v2479_v14 = vld [vmem:[%s9948_s5 + $0x48] sm:$0xff] }
 0x367   :  { %6111 = vmatprep.mubr.bf16.mxu1 %v8471_v35  ;;  %v5747_v32 = vadd.f32 %v5746_v44, %v2997_v30  ;;  %v5788_v18 = vadd.f32 %v5787_v51, %v3005_v13  ;;  %6040 = vmatprep.subr.bf16.mxu0 %v7084_v31  ;;  %v2527_v30 = vld [vmem:[%s9948_s5 + $0x1c8] sm:$0xff]  ;;  %v6955_v13 = vcombine.low %v2542_v11, %v2558_v12  ;;  %v2958_v51 = vld [vmem:[%s9948_s5 + $0xf40] sm:$0xff] }
 0x368   :  { %6081 = vmatprep.subr.bf16.mxu1 %v7086_v39  ;;  %v5748_v55 = vpop.f32.mrf.mxu0  ;;  %v5789_v56 = vpop.f32.mrf.mxu1  ;;  %v6957_v31 = vcombine.low %v2543_v20, %v2559_v21  ;;  %v6926_v15 = vcombine.high %v2511_v29, %v2527_v30  ;;  %v2495_v39 = vld [vmem:[%s9948_s5 + $0xc8] sm:$0xff]  ;;  %v2878_v5 = vld [vmem:[%s9948_s5 + $0xcc0] sm:$0xff] }
 0x369   :  { %v6398_v57 = vcombine.low %v5745_v42, %v5747_v32  ;;  %v6399_v59 = vcombine.low %v5786_v17, %v5788_v18  ;;  %6041 = vmatpush1.bf16.msra.mxu0 %v7083_v40  ;;  %v6923_v40 = vcombine.low %v2510_v27, %v2526_v46  ;;  %v6892_v42 = vcombine.high %v2478_v37, %v2494_v38  ;;  %v2975_v17 = vld [vmem:[%s9948_s5 + $0xfc8] sm:$0xff]  ;;  %v2926_v55 = vld [vmem:[%s9948_s5 + $0xe40] sm:$0xff] }
 0x36a   :  { %6082 = vmatpush1.bf16.msra.mxu1 %v7085_v41  ;;  %v5749_v25 = vpop.f32.mrf.mxu0  ;;  %v5790_v28 = vpop.f32.mrf.mxu1  ;;  %6042 = vmatprep.subr.bf16.mxu0 %v7052_v52  ;;  %v6925_v41 = vcombine.low %v2511_v29, %v2527_v30  ;;  %v6894_v44 = vcombine.high %v2479_v14, %v2495_v39  ;;  %v2974_v52 = vld [vmem:[%s9948_s5 + $0xfc0] sm:$0xff]  ;;  %v6891_v32 = vcombine.low %v2478_v37, %v2494_v38  ;;  %v2831_v21 = vld [vmem:[%s9948_s5 + $0xb48] sm:$0xff] }
 0x36b   :  { %v6406_v62 = vrot.slane %v6398_v57, %v7945_v49  ;;  %v6413_v63 = vrot.slane %v6399_v59, %v7945_v49  ;;  %6083 = vmatprep.subr.bf16.mxu1 %v7054_v16  ;;  %v2959_v16 = vld [vmem:[%s9948_s5 + $0xf48] sm:$0xff]  ;;  %v6893_v18 = vcombine.low %v2479_v14, %v2495_v39  ;;  %v7372_v33 = vcombine.high %v2958_v51, %v2974_v52  ;;  %v2942_v56 = vld [vmem:[%s9948_s5 + $0xec0] sm:$0xff] }
 0x36c   :  { %v7374_v54 = vcombine.high %v2959_v16, %v2975_v17  ;;  %v7371_v57 = vcombine.low %v2958_v51, %v2974_v52  ;;  %v7373_v59 = vcombine.low %v2959_v16, %v2975_v17  ;;  %v7342_v25 = vcombine.high %v2927_v58, %v2943_v53  ;;  %v2894_v28 = vld [vmem:[%s9948_s5 + $0xd40] sm:$0xff]  ;;  %v2799_v30 = vld [vmem:[%s9948_s5 + $0xa48] sm:$0xff] }
 0x36d   :  { %v6414_v3 = vcombine.low %v6406_v62, %v6413_v63  ;;  %6043 = vmatpush1.bf16.msra.mxu0 %v7051_v60  ;;  %v7340_v60 = vcombine.high %v2926_v55, %v2942_v56  ;;  %v2911_v62 = vld [vmem:[%s9948_s5 + $0xdc8] sm:$0xff]  ;;  %v7339_v63 = vcombine.low %v2926_v55, %v2942_v56  ;;  %v2830_v12 = vld [vmem:[%s9948_s5 + $0xb40] sm:$0xff]  ;;  %v2704_v56 = vld [vmem:[%s9948_s5 + $0x750] sm:$0xff] }
 0x36e   :  { %6084 = vmatpush1.bf16.msra.mxu1 %v7053_v61  ;;  %6044 = vmatprep.subr.bf16.mxu0 %v7020_v48  ;;  %v2910_v61 = vld [vmem:[%s9948_s5 + $0xdc0] sm:$0xff]  ;;  %v2895_v48 = vld [vmem:[%s9948_s5 + $0xd48] sm:$0xff] }
 0x36f   :  { %6542 = vst [vmem:[%s9950_s7] sm:$0xff] %v6414_v3  ;;  %6085 = vmatprep.subr.bf16.mxu1 %v7022_v0  ;;  %v7341_v0 = vcombine.low %v2927_v58, %v2943_v53  ;;  %v7308_v1 = vcombine.high %v2894_v28, %v2910_v61  ;;  %v7310_v50 = vcombine.high %v2895_v48, %v2911_v62  ;;  %v2863_v3 = vld [vmem:[%s9948_s5 + $0xc48] sm:$0xff]  ;;  %v2846_v20 = vld [vmem:[%s9948_s5 + $0xbc0] sm:$0xff]  ;;  %v2720_v58 = vld [vmem:[%s9948_s5 + $0x7d0] sm:$0xff] }
 0x370   :  { %v2798_v46 = vld [vmem:[%s9948_s5 + $0xa40] sm:$0xff]  ;;  %v2767_v39 = vld [vmem:[%s9948_s5 + $0x948] sm:$0xff]  ;;  %v2705_v53 = vld [vmem:[%s9948_s5 + $0x758] sm:$0xff] }
 0x371   :  { %6045 = vmatpush1.bf16.msra.mxu0 %v7019_v6  ;;  %v2879_v6 = vld [vmem:[%s9948_s5 + $0xcc8] sm:$0xff]  ;;  %v2814_v29 = vld [vmem:[%s9948_s5 + $0xac0] sm:$0xff] }
 0x372   :  { %6086 = vmatpush1.bf16.msra.mxu1 %v7021_v8  ;;  %6046 = vmatprep.subr.bf16.mxu0 %v6988_v9  ;;  %v7307_v8 = vcombine.low %v2894_v28, %v2910_v61  ;;  %v7309_v9 = vcombine.low %v2895_v48, %v2911_v62  ;;  %v7278_v11 = vcombine.high %v2863_v3, %v2879_v6  ;;  %v2766_v38 = vld [vmem:[%s9948_s5 + $0x940] sm:$0xff]  ;;  %v2735_v17 = vld [vmem:[%s9948_s5 + $0x848] sm:$0xff]  ;;  %v9271_v61 = vsub.s32 6, %v7942_v43 }
 0x373   :  { %6087 = vmatprep.subr.bf16.mxu1 %v6990_v10  ;;  %v7276_v10 = vcombine.high %v2862_v2, %v2878_v5  ;;  %v2782_v14 = vld [vmem:[%s9948_s5 + $0x9c0] sm:$0xff]  ;;  %v7120_v28 = vcombine.high %v2704_v56, %v2720_v58  ;;  %v9274_v62 = vsub.s32 5, %v7942_v43 }
 0x374   :  { %v2734_v52 = vld [vmem:[%s9948_s5 + $0x840] sm:$0xff] }
 0x375   :  { %6047 = vmatpush1.bf16.msra.mxu0 %v6987_v22  ;;  %v2847_v22 = vld [vmem:[%s9948_s5 + $0xbc8] sm:$0xff]  ;;  %v2750_v16 = vld [vmem:[%s9948_s5 + $0x8c0] sm:$0xff] }
 0x376   :  { %6088 = vmatpush1.bf16.msra.mxu1 %v6989_v23  ;;  %6048 = vmatprep.subr.bf16.mxu0 %v6956_v24  ;;  %v7275_v23 = vcombine.low %v2862_v2, %v2878_v5  ;;  %v7277_v24 = vcombine.low %v2863_v3, %v2879_v6  ;;  %v7246_v27 = vcombine.high %v2831_v21, %v2847_v22  ;;  %v2673_v2 = vld [vmem:[%s9948_s5 + $0x658] sm:$0xff]  ;;  %v2640_v6 = vld [vmem:[%s9948_s5 + $0x550] sm:$0xff] }
 0x377   :  { %6089 = vmatprep.subr.bf16.mxu1 %v6958_v26  ;;  %v7244_v26 = vcombine.high %v2830_v12, %v2846_v20  ;;  %v2689_v5 = vld [vmem:[%s9948_s5 + $0x6d8] sm:$0xff] }
 0x379   :  { %6049 = vmatpush1.bf16.msra.mxu0 %v6955_v13  ;;  %v2815_v13 = vld [vmem:[%s9948_s5 + $0xac8] sm:$0xff] }
 0x37a   :  { %6090 = vmatpush1.bf16.msra.mxu1 %v6957_v31  ;;  %6050 = vmatprep.subr.bf16.mxu0 %v6924_v34  ;;  %v7243_v31 = vcombine.low %v2830_v12, %v2846_v20  ;;  %v7245_v34 = vcombine.low %v2831_v21, %v2847_v22  ;;  %v7214_v37 = vcombine.high %v2799_v30, %v2815_v13  ;;  %v2656_v12 = vld [vmem:[%s9948_s5 + $0x5d0] sm:$0xff]  ;;  %v2641_v20 = vld [vmem:[%s9948_s5 + $0x558] sm:$0xff] }
 0x37b   :  { %6091 = vmatprep.subr.bf16.mxu1 %v6926_v15  ;;  %v7212_v15 = vcombine.high %v2798_v46, %v2814_v29  ;;  %v2657_v21 = vld [vmem:[%s9948_s5 + $0x5d8] sm:$0xff] }
 0x37d   :  { %6051 = vmatpush1.bf16.msra.mxu0 %v6923_v40  ;;  %v2783_v40 = vld [vmem:[%s9948_s5 + $0x9c8] sm:$0xff] }
 0x37e   :  { %6092 = vmatpush1.bf16.msra.mxu1 %v6925_v41  ;;  %6052 = vmatprep.subr.bf16.mxu0 %v6892_v42  ;;  %v7211_v41 = vcombine.low %v2798_v46, %v2814_v29  ;;  %v7213_v42 = vcombine.low %v2799_v30, %v2815_v13  ;;  %v7182_v51 = vcombine.high %v2767_v39, %v2783_v40 }
 0x37f   :  { %6093 = vmatprep.subr.bf16.mxu1 %v6894_v44  ;;  %v7180_v44 = vcombine.high %v2766_v38, %v2782_v14  ;;  %v7056_v30 = vcombine.high %v2640_v6, %v2656_v12  ;;  %v7058_v13 = vcombine.high %v2641_v20, %v2657_v21 }
 0x381   :  { %6053 = vmatpush1.bf16.msra.mxu0 %v6891_v32  ;;  %v2751_v32 = vld [vmem:[%s9948_s5 + $0x8c8] sm:$0xff] }
 0x382   :  { %6094 = vmatpush1.bf16.msra.mxu1 %v6893_v18  ;;  %6054 = vmatprep.subr.bf16.mxu0 %v7372_v33  ;;  %v7179_v18 = vcombine.low %v2766_v38, %v2782_v14  ;;  %v7181_v33 = vcombine.low %v2767_v39, %v2783_v40  ;;  %v7150_v55 = vcombine.high %v2735_v17, %v2751_v32  ;;  %v2624_v38 = vld [vmem:[%s9948_s5 + $0x4d0] sm:$0xff]  ;;  %v2609_v40 = vld [vmem:[%s9948_s5 + $0x458] sm:$0xff] }
 0x383   :  { %6095 = vmatprep.subr.bf16.mxu1 %v7374_v54  ;;  %v7148_v54 = vcombine.high %v2734_v52, %v2750_v16 }
 0x385   :  { %6055 = vmatpush2.bf16.msra.mxu0 %v7371_v57  ;;  %v2721_v57 = vld [vmem:[%s9948_s5 + $0x7d8] sm:$0xff] }
 0x386   :  { %6096 = vmatpush2.bf16.msra.mxu1 %v7373_v59  ;;  %6056 = vmatprep.subr.bf16.mxu0 %v7340_v60  ;;  %v7147_v59 = vcombine.low %v2734_v52, %v2750_v16  ;;  %v7149_v60 = vcombine.low %v2735_v17, %v2751_v32  ;;  %v7122_v48 = vcombine.high %v2705_v53, %v2721_v57 }
 0x387   :  { %6097 = vmatprep.subr.bf16.mxu1 %v7342_v25  ;;  %v9268_v25 = vsub.s32 4, %v7942_v43  ;;  %v7121_v3 = vcombine.low %v2705_v53, %v2721_v57  ;;  %v7057_v17 = vcombine.low %v2641_v20, %v2657_v21  ;;  %v2593_v53 = vld [vmem:[%s9948_s5 + $0x3d8] sm:$0xff] }
 0x389   :  { %6057 = vmatpush2.bf16.msra.mxu0 %v7339_v63  ;;  %v9277_v63 = vsub.s32 7, %v7942_v43  ;;  %v3009_v43 = vrot.slane %v9056_v19, %v9268_v25 }
 0x38a   :  { %6098 = vmatpush2.bf16.msra.mxu1 %v7341_v0  ;;  %6058 = vmatprep.subr.bf16.mxu0 %v7308_v1  ;;  %v2672_v0 = vld [vmem:[%s9948_s5 + $0x650] sm:$0xff] }
 0x38b   :  { %6099 = vmatprep.subr.bf16.mxu1 %v7310_v50  ;;  %v2688_v1 = vld [vmem:[%s9948_s5 + $0x6d0] sm:$0xff]  ;;  %v7119_v50 = vcombine.low %v2704_v56, %v2720_v58  ;;  %v2577_v58 = vld [vmem:[%s9948_s5 + $0x358] sm:$0xff] }
 0x38c   :  { %v2592_v56 = vld [vmem:[%s9948_s5 + $0x3d0] sm:$0xff] }
 0x38d   :  { %6059 = vmatpush2.bf16.msra.mxu0 %v7307_v8  ;;  %v3017_v8 = vrot.slane %v9056_v19, %v9271_v61 }
 0x38e   :  { %6100 = vmatpush2.bf16.msra.mxu1 %v7309_v9  ;;  %6060 = vmatprep.subr.bf16.mxu0 %v7276_v10  ;;  %v3013_v9 = vrot.slane %v9056_v19, %v9274_v62  ;;  %v3021_v10 = vrot.slane %v9056_v19, %v9277_v63  ;;  %v7087_v19 = vcombine.low %v2672_v0, %v2688_v1 }
 0x38f   :  { %6101 = vmatprep.subr.bf16.mxu1 %v7278_v11  ;;  %v7088_v11 = vcombine.high %v2672_v0, %v2688_v1  ;;  %v2544_v0 = vld [vmem:[%s9948_s5 + $0x250] sm:$0xff] }
 0x390   :  { %v2560_v1 = vld [vmem:[%s9948_s5 + $0x2d0] sm:$0xff] }
 0x391   :  { %6061 = vmatpush2.bf16.msra.mxu0 %v7275_v23 }
 0x392   :  { %6102 = vmatpush2.bf16.msra.mxu1 %v7277_v24  ;;  %6062 = vmatprep.subr.bf16.mxu0 %v7244_v26  ;;  %v7090_v24 = vcombine.high %v2673_v2, %v2689_v5  ;;  %v7089_v26 = vcombine.low %v2673_v2, %v2689_v5  ;;  %v2561_v2 = vld [vmem:[%s9948_s5 + $0x2d8] sm:$0xff] }
 0x393   :  { %6103 = vmatprep.subr.bf16.mxu1 %v7246_v27 }
 0x395   :  { %6063 = vmatpush2.bf16.msra.mxu0 %v7243_v31 }
 0x396   :  { %6104 = vmatpush2.bf16.msra.mxu1 %v7245_v34  ;;  %6064 = vmatprep.subr.bf16.mxu0 %v7212_v15 }
 0x397   :  { %6105 = vmatprep.subr.bf16.mxu1 %v7214_v37  ;;  %v2608_v37 = vld [vmem:[%s9948_s5 + $0x450] sm:$0xff] }
 0x398   :  { %v7024_v32 = vcombine.high %v2608_v37, %v2624_v38 }
 0x399   :  { %6065 = vmatpush2.bf16.msra.mxu0 %v7211_v41  ;;  %v2625_v41 = vld [vmem:[%s9948_s5 + $0x4d8] sm:$0xff] }
 0x39a   :  { %6106 = vmatpush2.bf16.msra.mxu1 %v7213_v42  ;;  %6066 = vmatprep.subr.bf16.mxu0 %v7180_v44 }
 0x39b   :  { %6107 = vmatprep.subr.bf16.mxu1 %v7182_v51  ;;  %v7055_v51 = vcombine.low %v2640_v6, %v2656_v12  ;;  %v6959_v12 = vcombine.low %v2544_v0, %v2560_v1 }
 0x39d   :  { %6067 = vmatpush2.bf16.msra.mxu0 %v7179_v18 }
 0x39e   :  { %6108 = vmatpush2.bf16.msra.mxu1 %v7181_v33  ;;  %6068 = vmatprep.subr.bf16.mxu0 %v7148_v54  ;;  %v7026_v54 = vcombine.high %v2609_v40, %v2625_v41 }
 0x39f   :  { %6109 = vmatprep.subr.bf16.mxu1 %v7150_v55  ;;  %v2576_v55 = vld [vmem:[%s9948_s5 + $0x350] sm:$0xff] }
 0x3a0   :  { %v6991_v5 = vcombine.low %v2576_v55, %v2592_v56 }
 0x3a1   :  { %6069 = vmatpush2.bf16.msra.mxu0 %v7147_v59  ;;  %v7023_v59 = vcombine.low %v2608_v37, %v2624_v38 }
 0x3a2   :  { %6110 = vmatpush2.bf16.msra.mxu1 %v7149_v60  ;;  %6120 = vmatprep.subr.bf16.mxu0 %v7120_v28  ;;  %v7025_v60 = vcombine.low %v2609_v40, %v2625_v41  ;;  %v6992_v28 = vcombine.high %v2576_v55, %v2592_v56  ;;  %v2928_v40 = vld [vmem:[%s9948_s5 + $0xe50] sm:$0xff] }
 0x3a3   :  { %6161 = vmatprep.subr.bf16.mxu1 %v7122_v48  ;;  %v6994_v48 = vcombine.high %v2577_v58, %v2593_v53  ;;  %v2944_v41 = vld [vmem:[%s9948_s5 + $0xed0] sm:$0xff] }
 0x3a4   :  { %v5826_v22 = vpop.f32.mrf.mxu0  ;;  %v5867_v23 = vpop.f32.mrf.mxu1  ;;  %6071 = vmatmul.mubr.bf16.vlgmr.msra.gmra.mxu0 %v8473_v36  ;;  %v7343_v55 = vcombine.low %v2928_v40, %v2944_v41 }
 0x3a5   :  { %6112 = vmatmul.mubr.bf16.vlgmr.msra.gmra.mxu1 %v8473_v36  ;;  %6121 = vmatpush1.bf16.msra.mxu0 %v7119_v50  ;;  %v5827_v27 = vadd.f32 %v5826_v22, %v3009_v43  ;;  %v5868_v31 = vadd.f32 %v5867_v23, %v3017_v8  ;;  %v2545_v50 = vld [vmem:[%s9948_s5 + $0x258] sm:$0xff]  ;;  %v6993_v43 = vcombine.low %v2577_v58, %v2593_v53  ;;  %v2512_v8 = vld [vmem:[%s9948_s5 + $0x150] sm:$0xff] }
 0x3a6   :  { %6152 = vmatprep.mubr.bf16.mxu0 %v8471_v35  ;;  %6162 = vmatpush1.bf16.msra.mxu1 %v7121_v3  ;;  %v5828_v46 = vpop.f32.mrf.mxu0  ;;  %v5869_v29 = vpop.f32.mrf.mxu1  ;;  %v6960_v3 = vcombine.high %v2544_v0, %v2560_v1  ;;  %v6962_v6 = vcombine.high %v2545_v50, %v2561_v2  ;;  %v6961_v20 = vcombine.low %v2545_v50, %v2561_v2  ;;  %v2480_v23 = vld [vmem:[%s9948_s5 + $0x50] sm:$0xff] }
 0x3a7   :  { %6193 = vmatprep.mubr.bf16.mxu1 %v8471_v35  ;;  %v5829_v34 = vadd.f32 %v5828_v46, %v3013_v9  ;;  %v5870_v15 = vadd.f32 %v5869_v29, %v3021_v10  ;;  %6122 = vmatprep.subr.bf16.mxu0 %v7088_v11  ;;  %v2528_v9 = vld [vmem:[%s9948_s5 + $0x1d0] sm:$0xff]  ;;  %v2513_v10 = vld [vmem:[%s9948_s5 + $0x158] sm:$0xff] }
 0x3a8   :  { %v5830_v14 = vpop.f32.mrf.mxu0  ;;  %v5871_v39 = vpop.f32.mrf.mxu1  ;;  %6163 = vmatprep.subr.bf16.mxu1 %v7090_v24  ;;  %v2529_v11 = vld [vmem:[%s9948_s5 + $0x1d8] sm:$0xff]  ;;  %v6928_v21 = vcombine.high %v2512_v8, %v2528_v9  ;;  %v2496_v24 = vld [vmem:[%s9948_s5 + $0xd0] sm:$0xff] }
 0x3a9   :  { %v6415_v42 = vcombine.low %v5827_v27, %v5829_v34  ;;  %v6416_v44 = vcombine.low %v5868_v31, %v5870_v15  ;;  %6123 = vmatpush1.bf16.msra.mxu0 %v7087_v19  ;;  %v6930_v22 = vcombine.high %v2513_v10, %v2529_v11  ;;  %v2481_v19 = vld [vmem:[%s9948_s5 + $0x58] sm:$0xff]  ;;  %v6927_v27 = vcombine.low %v2512_v8, %v2528_v9  ;;  %v2976_v31 = vld [vmem:[%s9948_s5 + $0xfd0] sm:$0xff] }
 0x3aa   :  { %6164 = vmatpush1.bf16.msra.mxu1 %v7089_v26  ;;  %v5831_v52 = vpop.f32.mrf.mxu0  ;;  %v5872_v16 = vpop.f32.mrf.mxu1  ;;  %6124 = vmatprep.subr.bf16.mxu0 %v7056_v30  ;;  %v2497_v26 = vld [vmem:[%s9948_s5 + $0xd8] sm:$0xff]  ;;  %v6929_v46 = vcombine.low %v2513_v10, %v2529_v11  ;;  %v6896_v29 = vcombine.high %v2480_v23, %v2496_v24  ;;  %v6895_v37 = vcombine.low %v2480_v23, %v2496_v24  ;;  %v2832_v2 = vld [vmem:[%s9948_s5 + $0xb50] sm:$0xff] }
 0x3ab   :  { %v6423_v18 = vrot.slane %v6415_v42, %v7945_v49  ;;  %v6430_v33 = vrot.slane %v6416_v44, %v7945_v49  ;;  %6165 = vmatprep.subr.bf16.mxu1 %v7058_v13  ;;  %v6898_v30 = vcombine.high %v2481_v19, %v2497_v26  ;;  %v2960_v13 = vld [vmem:[%s9948_s5 + $0xf50] sm:$0xff]  ;;  %v2961_v34 = vld [vmem:[%s9948_s5 + $0xf58] sm:$0xff]  ;;  %v6897_v38 = vcombine.low %v2481_v19, %v2497_v26 }
 0x3ac   :  { %v2977_v15 = vld [vmem:[%s9948_s5 + $0xfd8] sm:$0xff]  ;;  %v7376_v14 = vcombine.high %v2960_v13, %v2976_v31  ;;  %v7344_v16 = vcombine.high %v2928_v40, %v2944_v41  ;;  %v2800_v11 = vld [vmem:[%s9948_s5 + $0xa50] sm:$0xff] }
 0x3ad   :  { %v6431_v57 = vcombine.low %v6423_v18, %v6430_v33  ;;  %6125 = vmatpush1.bf16.msra.mxu0 %v7055_v51  ;;  %v7378_v39 = vcombine.high %v2961_v34, %v2977_v15  ;;  %v2929_v42 = vld [vmem:[%s9948_s5 + $0xe58] sm:$0xff]  ;;  %v7375_v51 = vcombine.low %v2960_v13, %v2976_v31  ;;  %v7377_v52 = vcombine.low %v2961_v34, %v2977_v15  ;;  %v2912_v18 = vld [vmem:[%s9948_s5 + $0xdd0] sm:$0xff] }
 0x3ae   :  { %6166 = vmatpush1.bf16.msra.mxu1 %v7057_v17  ;;  %6126 = vmatprep.subr.bf16.mxu0 %v7024_v32  ;;  %v2945_v44 = vld [vmem:[%s9948_s5 + $0xed8] sm:$0xff]  ;;  %v2896_v32 = vld [vmem:[%s9948_s5 + $0xd50] sm:$0xff] }
 0x3af   :  { %6543 = vst [vmem:[%s9950_s7 + $0x8] sm:$0xff] %v6431_v57  ;;  %6167 = vmatprep.subr.bf16.mxu1 %v7026_v54  ;;  %v7346_v17 = vcombine.high %v2929_v42, %v2945_v44  ;;  %v2897_v33 = vld [vmem:[%s9948_s5 + $0xd58] sm:$0xff]  ;;  %v7345_v56 = vcombine.low %v2929_v42, %v2945_v44  ;;  %v7312_v58 = vcombine.high %v2896_v32, %v2912_v18  ;;  %v2864_v57 = vld [vmem:[%s9948_s5 + $0xc50] sm:$0xff]  ;;  %v2706_v44 = vld [vmem:[%s9948_s5 + $0x760] sm:$0xff] }
 0x3b0   :  { %v2913_v54 = vld [vmem:[%s9948_s5 + $0xdd8] sm:$0xff]  ;;  %v2768_v26 = vld [vmem:[%s9948_s5 + $0x950] sm:$0xff] }
 0x3b1   :  { %6127 = vmatpush1.bf16.msra.mxu0 %v7023_v59  ;;  %v7314_v53 = vcombine.high %v2897_v33, %v2913_v54  ;;  %v2880_v59 = vld [vmem:[%s9948_s5 + $0xcd0] sm:$0xff]  ;;  %v7313_v0 = vcombine.low %v2897_v33, %v2913_v54  ;;  %v9491_v54 = vld [vmem:[%s9949_s6 + $0x8] sm:$0xff] }
 0x3b2   :  { %6168 = vmatpush1.bf16.msra.mxu1 %v7025_v60  ;;  %6128 = vmatprep.subr.bf16.mxu0 %v6992_v28  ;;  %v2865_v60 = vld [vmem:[%s9948_s5 + $0xc58] sm:$0xff]  ;;  %v7280_v1 = vcombine.high %v2864_v57, %v2880_v59  ;;  %v2736_v15 = vld [vmem:[%s9948_s5 + $0x850] sm:$0xff] }
 0x3b3   :  { %6169 = vmatprep.subr.bf16.mxu1 %v6994_v48  ;;  %v2881_v28 = vld [vmem:[%s9948_s5 + $0xcd8] sm:$0xff]  ;;  %v7311_v48 = vcombine.low %v2896_v32, %v2912_v18 }
 0x3b4   :  { %v7282_v50 = vcombine.high %v2865_v60, %v2881_v28  ;;  %v7281_v8 = vcombine.low %v2865_v60, %v2881_v28  ;;  %v3025_v60 = vrot.slane %v9491_v54, %v8172_v45  ;;  %v3029_v28 = vrot.slane %v9491_v54, %v8180_v47 }
 0x3b5   :  { %6129 = vmatpush1.bf16.msra.mxu0 %v6991_v5  ;;  %v2848_v5 = vld [vmem:[%s9948_s5 + $0xbd0] sm:$0xff] }
 0x3b6   :  { %6170 = vmatpush1.bf16.msra.mxu1 %v6993_v43  ;;  %6130 = vmatprep.subr.bf16.mxu0 %v6960_v3  ;;  %v2833_v43 = vld [vmem:[%s9948_s5 + $0xb58] sm:$0xff]  ;;  %v7248_v9 = vcombine.high %v2832_v2, %v2848_v5 }
 0x3b7   :  { %6171 = vmatprep.subr.bf16.mxu1 %v6962_v6  ;;  %v2849_v3 = vld [vmem:[%s9948_s5 + $0xbd8] sm:$0xff]  ;;  %v7279_v6 = vcombine.low %v2864_v57, %v2880_v59  ;;  %v2691_v57 = vld [vmem:[%s9948_s5 + $0x6e8] sm:$0xff] }
 0x3b8   :  { %v7250_v10 = vcombine.high %v2833_v43, %v2849_v3  ;;  %v7249_v23 = vcombine.low %v2833_v43, %v2849_v3  ;;  %v2643_v3 = vld [vmem:[%s9948_s5 + $0x568] sm:$0xff] }
 0x3b9   :  { %6131 = vmatpush1.bf16.msra.mxu0 %v6959_v12  ;;  %v2816_v12 = vld [vmem:[%s9948_s5 + $0xad0] sm:$0xff] }
 0x3ba   :  { %6172 = vmatpush1.bf16.msra.mxu1 %v6961_v20  ;;  %6132 = vmatprep.subr.bf16.mxu0 %v6928_v21  ;;  %v2801_v20 = vld [vmem:[%s9948_s5 + $0xa58] sm:$0xff]  ;;  %v7216_v24 = vcombine.high %v2800_v11, %v2816_v12 }
 0x3bb   :  { %6173 = vmatprep.subr.bf16.mxu1 %v6930_v22  ;;  %v2817_v21 = vld [vmem:[%s9948_s5 + $0xad8] sm:$0xff]  ;;  %v7247_v22 = vcombine.low %v2832_v2, %v2848_v5  ;;  %v3033_v2 = vrot.slane %v9491_v54, %v8301_v4  ;;  %v3037_v5 = vrot.slane %v9491_v54, %v8310_v7 }
 0x3bc   :  { %v7218_v19 = vcombine.high %v2801_v20, %v2817_v21  ;;  %v7217_v13 = vcombine.low %v2801_v20, %v2817_v21 }
 0x3bd   :  { %6133 = vmatpush1.bf16.msra.mxu0 %v6927_v27  ;;  %v2784_v27 = vld [vmem:[%s9948_s5 + $0x9d0] sm:$0xff] }
 0x3be   :  { %6174 = vmatpush1.bf16.msra.mxu1 %v6929_v46  ;;  %6134 = vmatprep.subr.bf16.mxu0 %v6896_v29  ;;  %v2769_v46 = vld [vmem:[%s9948_s5 + $0x958] sm:$0xff]  ;;  %v7184_v31 = vcombine.high %v2768_v26, %v2784_v27 }
 0x3bf   :  { %6175 = vmatprep.subr.bf16.mxu1 %v6898_v30  ;;  %v2785_v29 = vld [vmem:[%s9948_s5 + $0x9d8] sm:$0xff]  ;;  %v7215_v30 = vcombine.low %v2800_v11, %v2816_v12 }
 0x3c0   :  { %v7186_v34 = vcombine.high %v2769_v46, %v2785_v29  ;;  %v7185_v40 = vcombine.low %v2769_v46, %v2785_v29  ;;  %v2611_v29 = vld [vmem:[%s9948_s5 + $0x468] sm:$0xff] }
 0x3c1   :  { %6135 = vmatpush1.bf16.msra.mxu0 %v6895_v37  ;;  %v2752_v37 = vld [vmem:[%s9948_s5 + $0x8d0] sm:$0xff] }
 0x3c2   :  { %6176 = vmatpush1.bf16.msra.mxu1 %v6897_v38  ;;  %6136 = vmatprep.subr.bf16.mxu0 %v7376_v14  ;;  %v2737_v38 = vld [vmem:[%s9948_s5 + $0x858] sm:$0xff]  ;;  %v7152_v41 = vcombine.high %v2736_v15, %v2752_v37 }
 0x3c3   :  { %6177 = vmatprep.subr.bf16.mxu1 %v7378_v39  ;;  %v2753_v14 = vld [vmem:[%s9948_s5 + $0x8d8] sm:$0xff]  ;;  %v7183_v39 = vcombine.low %v2768_v26, %v2784_v27 }
 0x3c4   :  { %v7154_v42 = vcombine.high %v2737_v38, %v2753_v14  ;;  %v7153_v32 = vcombine.low %v2737_v38, %v2753_v14 }
 0x3c5   :  { %6137 = vmatpush2.bf16.msra.mxu0 %v7375_v51  ;;  %v2722_v51 = vld [vmem:[%s9948_s5 + $0x7e0] sm:$0xff] }
 0x3c6   :  { %6178 = vmatpush2.bf16.msra.mxu1 %v7377_v52  ;;  %6138 = vmatprep.subr.bf16.mxu0 %v7344_v16  ;;  %v2707_v52 = vld [vmem:[%s9948_s5 + $0x768] sm:$0xff]  ;;  %v7124_v18 = vcombine.high %v2706_v44, %v2722_v51 }
 0x3c7   :  { %6179 = vmatprep.subr.bf16.mxu1 %v7346_v17  ;;  %v2723_v16 = vld [vmem:[%s9948_s5 + $0x7e8] sm:$0xff]  ;;  %v7151_v17 = vcombine.low %v2736_v15, %v2752_v37 }
 0x3c8   :  { %v7126_v33 = vcombine.high %v2707_v52, %v2723_v16  ;;  %v7125_v59 = vcombine.low %v2707_v52, %v2723_v16  ;;  %v2579_v52 = vld [vmem:[%s9948_s5 + $0x368] sm:$0xff] }
 0x3c9   :  { %6139 = vmatpush2.bf16.msra.mxu0 %v7343_v55  ;;  %v2674_v55 = vld [vmem:[%s9948_s5 + $0x660] sm:$0xff]  ;;  %v2595_v16 = vld [vmem:[%s9948_s5 + $0x3e8] sm:$0xff] }
 0x3ca   :  { %6180 = vmatpush2.bf16.msra.mxu1 %v7345_v56  ;;  %6140 = vmatprep.subr.bf16.mxu0 %v7312_v58  ;;  %v2690_v56 = vld [vmem:[%s9948_s5 + $0x6e0] sm:$0xff]  ;;  %v7123_v58 = vcombine.low %v2706_v44, %v2722_v51 }
 0x3cb   :  { %6181 = vmatprep.subr.bf16.mxu1 %v7314_v53  ;;  %v2675_v53 = vld [vmem:[%s9948_s5 + $0x668] sm:$0xff]  ;;  %v2594_v44 = vld [vmem:[%s9948_s5 + $0x3e0] sm:$0xff] }
 0x3cc   :  { %v7094_v43 = vcombine.high %v2675_v53, %v2691_v57  ;;  %v7093_v11 = vcombine.low %v2675_v53, %v2691_v57  ;;  %v2547_v53 = vld [vmem:[%s9948_s5 + $0x268] sm:$0xff] }
 0x3cd   :  { %6141 = vmatpush2.bf16.msra.mxu0 %v7311_v48  ;;  %v7092_v48 = vcombine.high %v2674_v55, %v2690_v56  ;;  %v2563_v57 = vld [vmem:[%s9948_s5 + $0x2e8] sm:$0xff] }
 0x3ce   :  { %6182 = vmatpush2.bf16.msra.mxu1 %v7313_v0  ;;  %6142 = vmatprep.subr.bf16.mxu0 %v7280_v1  ;;  %v2642_v0 = vld [vmem:[%s9948_s5 + $0x560] sm:$0xff] }
 0x3cf   :  { %6183 = vmatprep.subr.bf16.mxu1 %v7282_v50  ;;  %v2658_v1 = vld [vmem:[%s9948_s5 + $0x5e0] sm:$0xff] }
 0x3d0   :  { %v7060_v12 = vcombine.high %v2642_v0, %v2658_v1 }
 0x3d1   :  { %6143 = vmatpush2.bf16.msra.mxu0 %v7279_v6  ;;  %v2659_v6 = vld [vmem:[%s9948_s5 + $0x5e8] sm:$0xff] }
 0x3d2   :  { %6184 = vmatpush2.bf16.msra.mxu1 %v7281_v8  ;;  %6144 = vmatprep.subr.bf16.mxu0 %v7248_v9  ;;  %v7091_v9 = vcombine.low %v2674_v55, %v2690_v56  ;;  %v7061_v38 = vcombine.low %v2643_v3, %v2659_v6  ;;  %v6998_v55 = vcombine.high %v2579_v52, %v2595_v16  ;;  %v2546_v56 = vld [vmem:[%s9948_s5 + $0x260] sm:$0xff] }
 0x3d3   :  { %6185 = vmatprep.subr.bf16.mxu1 %v7250_v10 }
 0x3d5   :  { %6145 = vmatpush2.bf16.msra.mxu0 %v7247_v22 }
 0x3d6   :  { %6186 = vmatpush2.bf16.msra.mxu1 %v7249_v23  ;;  %6146 = vmatprep.subr.bf16.mxu0 %v7216_v24  ;;  %v7062_v23 = vcombine.high %v2643_v3, %v2659_v6  ;;  %v2610_v24 = vld [vmem:[%s9948_s5 + $0x460] sm:$0xff] }
 0x3d7   :  { %6187 = vmatprep.subr.bf16.mxu1 %v7218_v19  ;;  %v2626_v19 = vld [vmem:[%s9948_s5 + $0x4e0] sm:$0xff] }
 0x3d8   :  { %v7028_v14 = vcombine.high %v2610_v24, %v2626_v19 }
 0x3d9   :  { %6147 = vmatpush2.bf16.msra.mxu0 %v7215_v30  ;;  %v2627_v30 = vld [vmem:[%s9948_s5 + $0x4e8] sm:$0xff] }
 0x3da   :  { %6188 = vmatpush2.bf16.msra.mxu1 %v7217_v13  ;;  %6148 = vmatprep.subr.bf16.mxu0 %v7184_v31 }
 0x3db   :  { %6189 = vmatprep.subr.bf16.mxu1 %v7186_v34  ;;  %v7059_v34 = vcombine.low %v2642_v0, %v2658_v1  ;;  %v2514_v0 = vld [vmem:[%s9948_s5 + $0x160] sm:$0xff] }
 0x3dc   :  { %v2530_v1 = vld [vmem:[%s9948_s5 + $0x1e0] sm:$0xff] }
 0x3dd   :  { %6149 = vmatpush2.bf16.msra.mxu0 %v7183_v39  ;;  %v6932_v3 = vcombine.high %v2514_v0, %v2530_v1 }
 0x3de   :  { %6190 = vmatpush2.bf16.msra.mxu1 %v7185_v40  ;;  %6150 = vmatprep.subr.bf16.mxu0 %v7152_v41  ;;  %v7030_v41 = vcombine.high %v2611_v29, %v2627_v30 }
 0x3df   :  { %6191 = vmatprep.subr.bf16.mxu1 %v7154_v42  ;;  %v2578_v42 = vld [vmem:[%s9948_s5 + $0x360] sm:$0xff] }
 0x3e1   :  { %6151 = vmatpush2.bf16.msra.mxu0 %v7151_v17  ;;  %v7027_v17 = vcombine.low %v2610_v24, %v2626_v19  ;;  %v2978_v24 = vld [vmem:[%s9948_s5 + $0xfe0] sm:$0xff]  ;;  %v2963_v19 = vld [vmem:[%s9948_s5 + $0xf68] sm:$0xff] }
 0x3e2   :  { %6192 = vmatpush2.bf16.msra.mxu1 %v7153_v32  ;;  %6202 = vmatprep.subr.bf16.mxu0 %v7124_v18  ;;  %v7029_v18 = vcombine.low %v2611_v29, %v2627_v30 }
 0x3e3   :  { %6243 = vmatprep.subr.bf16.mxu1 %v7126_v33  ;;  %v6996_v33 = vcombine.high %v2578_v42, %v2594_v44 }
 0x3e4   :  { %v5908_v50 = vpop.f32.mrf.mxu0  ;;  %6153 = vmatmul.mubr.bf16.vlgmr.msra.gmra.mxu0 %v8473_v36 }
 0x3e5   :  { %v5949_v8 = vpop.f32.mrf.mxu1  ;;  %6194 = vmatmul.mubr.bf16.vlgmr.msra.gmra.mxu1 %v8473_v36  ;;  %6203 = vmatpush1.bf16.msra.mxu0 %v7123_v58  ;;  %v5909_v20 = vadd.f32 %v5908_v50, %v3025_v60  ;;  %v2562_v58 = vld [vmem:[%s9948_s5 + $0x2e0] sm:$0xff]  ;;  %v6997_v60 = vcombine.low %v2579_v52, %v2595_v16  ;;  %v2515_v50 = vld [vmem:[%s9948_s5 + $0x168] sm:$0xff] }
 0x3e6   :  { %6234 = vmatprep.mubr.bf16.mxu0 %v8471_v35  ;;  %6244 = vmatpush1.bf16.msra.mxu1 %v7125_v59  ;;  %v5910_v10 = vpop.f32.mrf.mxu0  ;;  %v5950_v26 = vadd.f32 %v5949_v8, %v3033_v2  ;;  %v6995_v59 = vcombine.low %v2578_v42, %v2594_v44  ;;  %v2531_v2 = vld [vmem:[%s9948_s5 + $0x1e8] sm:$0xff]  ;;  %v2482_v8 = vld [vmem:[%s9948_s5 + $0x60] sm:$0xff] }
 0x3e7   :  { %6275 = vmatprep.mubr.bf16.mxu1 %v8471_v35  ;;  %v5911_v21 = vadd.f32 %v5910_v10, %v3029_v28  ;;  %v5951_v22 = vpop.f32.mrf.mxu1  ;;  %6204 = vmatprep.subr.bf16.mxu0 %v7092_v48  ;;  %v6964_v28 = vcombine.high %v2546_v56, %v2562_v58  ;;  %v6966_v48 = vcombine.high %v2547_v53, %v2563_v57  ;;  %v2483_v10 = vld [vmem:[%s9948_s5 + $0x68] sm:$0xff] }
 0x3e8   :  { %v5952_v27 = vadd.f32 %v5951_v22, %v3037_v5  ;;  %v5912_v46 = vpop.f32.mrf.mxu0  ;;  %6245 = vmatprep.subr.bf16.mxu1 %v7094_v43  ;;  %v6963_v5 = vcombine.low %v2546_v56, %v2562_v58  ;;  %v6965_v43 = vcombine.low %v2547_v53, %v2563_v57  ;;  %v6934_v6 = vcombine.high %v2515_v50, %v2531_v2  ;;  %v2899_v42 = vld [vmem:[%s9948_s5 + $0xd68] sm:$0xff] }
 0x3e9   :  { %v6432_v13 = vcombine.low %v5909_v20, %v5911_v21  ;;  %v5953_v31 = vpop.f32.mrf.mxu1  ;;  %6205 = vmatpush1.bf16.msra.mxu0 %v7091_v9  ;;  %v2498_v9 = vld [vmem:[%s9948_s5 + $0xe0] sm:$0xff]  ;;  %v6933_v20 = vcombine.low %v2515_v50, %v2531_v2  ;;  %v2915_v44 = vld [vmem:[%s9948_s5 + $0xde8] sm:$0xff] }
 0x3ea   :  { %v6433_v15 = vcombine.low %v5950_v26, %v5952_v27  ;;  %6246 = vmatpush1.bf16.msra.mxu1 %v7093_v11  ;;  %v5913_v37 = vpop.f32.mrf.mxu0  ;;  %6206 = vmatprep.subr.bf16.mxu0 %v7060_v12  ;;  %v2499_v11 = vld [vmem:[%s9948_s5 + $0xe8] sm:$0xff]  ;;  %v6931_v12 = vcombine.low %v2514_v0, %v2530_v1  ;;  %v6900_v21 = vcombine.high %v2482_v8, %v2498_v9  ;;  %v2946_v31 = vld [vmem:[%s9948_s5 + $0xee0] sm:$0xff] }
 0x3eb   :  { %v6440_v39 = vrot.slane %v6432_v13, %v7945_v49  ;;  %v5954_v40 = vpop.f32.mrf.mxu1  ;;  %6247 = vmatprep.subr.bf16.mxu1 %v7062_v23  ;;  %v6902_v22 = vcombine.high %v2483_v10, %v2499_v11  ;;  %v2962_v23 = vld [vmem:[%s9948_s5 + $0xf60] sm:$0xff]  ;;  %v2979_v26 = vld [vmem:[%s9948_s5 + $0xfe8] sm:$0xff]  ;;  %v6899_v27 = vcombine.low %v2482_v8, %v2498_v9  ;;  %v6901_v46 = vcombine.low %v2483_v10, %v2499_v11 }
 0x3ec   :  { %v6447_v51 = vrot.slane %v6433_v15, %v7945_v49  ;;  %v7380_v29 = vcombine.high %v2962_v23, %v2978_v24  ;;  %v7382_v30 = vcombine.high %v2963_v19, %v2979_v26  ;;  %v2930_v13 = vld [vmem:[%s9948_s5 + $0xe60] sm:$0xff]  ;;  %v2947_v15 = vld [vmem:[%s9948_s5 + $0xee8] sm:$0xff]  ;;  %v7379_v37 = vcombine.low %v2962_v23, %v2978_v24 }
 0x3ed   :  { %6207 = vmatpush1.bf16.msra.mxu0 %v7059_v34  ;;  %v2931_v34 = vld [vmem:[%s9948_s5 + $0xe68] sm:$0xff]  ;;  %v2898_v40 = vld [vmem:[%s9948_s5 + $0xd60] sm:$0xff]  ;;  %v7317_v58 = vcombine.low %v2899_v42, %v2915_v44 }
 0x3ee   :  { %v6448_v32 = vcombine.low %v6440_v39, %v6447_v51  ;;  %6248 = vmatpush1.bf16.msra.mxu1 %v7061_v38  ;;  %6208 = vmatprep.subr.bf16.mxu0 %v7028_v14  ;;  %v7381_v38 = vcombine.low %v2963_v19, %v2979_v26  ;;  %v7348_v14 = vcombine.high %v2930_v13, %v2946_v31 }
 0x3ef   :  { %6249 = vmatprep.subr.bf16.mxu1 %v7030_v41  ;;  %v7350_v39 = vcombine.high %v2931_v34, %v2947_v15  ;;  %v2914_v41 = vld [vmem:[%s9948_s5 + $0xde0] sm:$0xff]  ;;  %v7347_v51 = vcombine.low %v2930_v13, %v2946_v31  ;;  %v7349_v52 = vcombine.low %v2931_v34, %v2947_v15 }
 0x3f0   :  { %6544 = vst [vmem:[%s9950_s7 + $0x10] sm:$0xff] %v6448_v32  ;;  %v7316_v16 = vcombine.high %v2898_v40, %v2914_v41  ;;  %v2866_v32 = vld [vmem:[%s9948_s5 + $0xc60] sm:$0xff]  ;;  %v7315_v56 = vcombine.low %v2898_v40, %v2914_v41 }
 0x3f1   :  { %6209 = vmatpush1.bf16.msra.mxu0 %v7027_v17  ;;  %v7318_v17 = vcombine.high %v2899_v42, %v2915_v44 }
 0x3f2   :  { %6250 = vmatpush1.bf16.msra.mxu1 %v7029_v18  ;;  %6210 = vmatprep.subr.bf16.mxu0 %v6996_v33  ;;  %v2882_v18 = vld [vmem:[%s9948_s5 + $0xce0] sm:$0xff]  ;;  %v2867_v33 = vld [vmem:[%s9948_s5 + $0xc68] sm:$0xff] }
 0x3f3   :  { %6251 = vmatprep.subr.bf16.mxu1 %v6998_v55  ;;  %v2883_v55 = vld [vmem:[%s9948_s5 + $0xce8] sm:$0xff]  ;;  %v7284_v53 = vcombine.high %v2866_v32, %v2882_v18  ;;  %v7283_v0 = vcombine.low %v2866_v32, %v2882_v18  ;;  %v2693_v32 = vld [vmem:[%s9948_s5 + $0x6f8] sm:$0xff] }
 0x3f4   :  { %v7286_v57 = vcombine.high %v2867_v33, %v2883_v55  ;;  %v7285_v1 = vcombine.low %v2867_v33, %v2883_v55  ;;  %v3041_v33 = vrot.slane %v9491_v54, %v9268_v25  ;;  %v3045_v55 = vrot.slane %v9491_v54, %v9274_v62 }
 0x3f5   :  { %6211 = vmatpush1.bf16.msra.mxu0 %v6995_v59  ;;  %v2834_v59 = vld [vmem:[%s9948_s5 + $0xb60] sm:$0xff] }
 0x3f6   :  { %6252 = vmatpush1.bf16.msra.mxu1 %v6997_v60  ;;  %6212 = vmatprep.subr.bf16.mxu0 %v6964_v28  ;;  %v2850_v60 = vld [vmem:[%s9948_s5 + $0xbe0] sm:$0xff]  ;;  %v2835_v28 = vld [vmem:[%s9948_s5 + $0xb68] sm:$0xff] }
 0x3f7   :  { %6253 = vmatprep.subr.bf16.mxu1 %v6966_v48  ;;  %v2851_v48 = vld [vmem:[%s9948_s5 + $0xbe8] sm:$0xff]  ;;  %v7252_v50 = vcombine.high %v2834_v59, %v2850_v60  ;;  %v7251_v8 = vcombine.low %v2834_v59, %v2850_v60  ;;  %v3049_v59 = vrot.slane %v9491_v54, %v9271_v61  ;;  %v3053_v60 = vrot.slane %v9491_v54, %v9277_v63 }
 0x3f8   :  { %v7254_v2 = vcombine.high %v2835_v28, %v2851_v48  ;;  %v7253_v9 = vcombine.low %v2835_v28, %v2851_v48  ;;  %v2645_v48 = vld [vmem:[%s9948_s5 + $0x578] sm:$0xff] }
 0x3f9   :  { %6213 = vmatpush1.bf16.msra.mxu0 %v6963_v5  ;;  %v2802_v5 = vld [vmem:[%s9948_s5 + $0xa60] sm:$0xff] }
 0x3fa   :  { %6254 = vmatpush1.bf16.msra.mxu1 %v6965_v43  ;;  %6214 = vmatprep.subr.bf16.mxu0 %v6932_v3  ;;  %v2818_v43 = vld [vmem:[%s9948_s5 + $0xae0] sm:$0xff]  ;;  %v2803_v3 = vld [vmem:[%s9948_s5 + $0xa68] sm:$0xff] }
 0x3fb   :  { %6255 = vmatprep.subr.bf16.mxu1 %v6934_v6  ;;  %v2819_v6 = vld [vmem:[%s9948_s5 + $0xae8] sm:$0xff]  ;;  %v7220_v10 = vcombine.high %v2802_v5, %v2818_v43  ;;  %v7219_v23 = vcombine.low %v2802_v5, %v2818_v43 }
 0x3fc   :  { %v7222_v11 = vcombine.high %v2803_v3, %v2819_v6  ;;  %v7221_v24 = vcombine.low %v2803_v3, %v2819_v6 }
 0x3fd   :  { %6215 = vmatpush1.bf16.msra.mxu0 %v6931_v12  ;;  %v2770_v12 = vld [vmem:[%s9948_s5 + $0x960] sm:$0xff] }
 0x3fe   :  { %6256 = vmatpush1.bf16.msra.mxu1 %v6933_v20  ;;  %6216 = vmatprep.subr.bf16.mxu0 %v6900_v21  ;;  %v2786_v20 = vld [vmem:[%s9948_s5 + $0x9e0] sm:$0xff]  ;;  %v2771_v21 = vld [vmem:[%s9948_s5 + $0x968] sm:$0xff] }
 0x3ff   :  { %6257 = vmatprep.subr.bf16.mxu1 %v6902_v22  ;;  %v2787_v22 = vld [vmem:[%s9948_s5 + $0x9e8] sm:$0xff]  ;;  %v7188_v19 = vcombine.high %v2770_v12, %v2786_v20  ;;  %v7187_v13 = vcombine.low %v2770_v12, %v2786_v20 }
 0x400   :  { %v7190_v26 = vcombine.high %v2771_v21, %v2787_v22  ;;  %v7189_v31 = vcombine.low %v2771_v21, %v2787_v22  ;;  %v2629_v21 = vld [vmem:[%s9948_s5 + $0x4f8] sm:$0xff] }
 0x401   :  { %6217 = vmatpush1.bf16.msra.mxu0 %v6899_v27  ;;  %v2738_v27 = vld [vmem:[%s9948_s5 + $0x860] sm:$0xff] }
 0x402   :  { %6258 = vmatpush1.bf16.msra.mxu1 %v6901_v46  ;;  %6218 = vmatprep.subr.bf16.mxu0 %v7380_v29  ;;  %v2754_v46 = vld [vmem:[%s9948_s5 + $0x8e0] sm:$0xff]  ;;  %v2739_v29 = vld [vmem:[%s9948_s5 + $0x868] sm:$0xff] }
 0x403   :  { %6259 = vmatprep.subr.bf16.mxu1 %v7382_v30  ;;  %v2755_v30 = vld [vmem:[%s9948_s5 + $0x8e8] sm:$0xff]  ;;  %v7156_v34 = vcombine.high %v2738_v27, %v2754_v46  ;;  %v7155_v40 = vcombine.low %v2738_v27, %v2754_v46 }
 0x404   :  { %v7158_v15 = vcombine.high %v2739_v29, %v2755_v30  ;;  %v7157_v41 = vcombine.low %v2739_v29, %v2755_v30 }
 0x405   :  { %6219 = vmatpush2.bf16.msra.mxu0 %v7379_v37  ;;  %v2708_v37 = vld [vmem:[%s9948_s5 + $0x770] sm:$0xff] }
 0x406   :  { %6260 = vmatpush2.bf16.msra.mxu1 %v7381_v38  ;;  %6220 = vmatprep.subr.bf16.mxu0 %v7348_v14  ;;  %v2724_v38 = vld [vmem:[%s9948_s5 + $0x7f0] sm:$0xff]  ;;  %v2709_v14 = vld [vmem:[%s9948_s5 + $0x778] sm:$0xff] }
 0x407   :  { %6261 = vmatprep.subr.bf16.mxu1 %v7350_v39  ;;  %v2725_v39 = vld [vmem:[%s9948_s5 + $0x7f8] sm:$0xff]  ;;  %v7128_v42 = vcombine.high %v2708_v37, %v2724_v38 }
 0x408   :  { %v7130_v44 = vcombine.high %v2709_v14, %v2725_v39  ;;  %v7129_v18 = vcombine.low %v2709_v14, %v2725_v39 }
 0x409   :  { %6221 = vmatpush2.bf16.msra.mxu0 %v7347_v51  ;;  %v2676_v51 = vld [vmem:[%s9948_s5 + $0x670] sm:$0xff] }
 0x40a   :  { %6262 = vmatpush2.bf16.msra.mxu1 %v7349_v52  ;;  %6222 = vmatprep.subr.bf16.mxu0 %v7316_v16  ;;  %v2692_v52 = vld [vmem:[%s9948_s5 + $0x6f0] sm:$0xff]  ;;  %v7127_v16 = vcombine.low %v2708_v37, %v2724_v38  ;;  %v2581_v37 = vld [vmem:[%s9948_s5 + $0x378] sm:$0xff] }
 0x40b   :  { %6263 = vmatprep.subr.bf16.mxu1 %v7318_v17  ;;  %v2677_v17 = vld [vmem:[%s9948_s5 + $0x678] sm:$0xff] }
 0x40c   :  { %v7098_v28 = vcombine.high %v2677_v17, %v2693_v32  ;;  %v7097_v5 = vcombine.low %v2677_v17, %v2693_v32  ;;  %v2597_v38 = vld [vmem:[%s9948_s5 + $0x3f8] sm:$0xff] }
 0x40d   :  { %6223 = vmatpush2.bf16.msra.mxu0 %v7315_v56  ;;  %v7096_v56 = vcombine.high %v2676_v51, %v2692_v52  ;;  %v7001_v32 = vcombine.low %v2581_v37, %v2597_v38 }
 0x40e   :  { %6264 = vmatpush2.bf16.msra.mxu1 %v7317_v58  ;;  %6224 = vmatprep.subr.bf16.mxu0 %v7284_v53  ;;  %v2644_v58 = vld [vmem:[%s9948_s5 + $0x570] sm:$0xff] }
 0x40f   :  { %6265 = vmatprep.subr.bf16.mxu1 %v7286_v57  ;;  %v2660_v53 = vld [vmem:[%s9948_s5 + $0x5f0] sm:$0xff] }
 0x410   :  { %v7064_v54 = vcombine.high %v2644_v58, %v2660_v53 }
 0x411   :  { %6225 = vmatpush2.bf16.msra.mxu0 %v7283_v0  ;;  %v2661_v0 = vld [vmem:[%s9948_s5 + $0x5f8] sm:$0xff] }
 0x412   :  { %6266 = vmatpush2.bf16.msra.mxu1 %v7285_v1  ;;  %6226 = vmatprep.subr.bf16.mxu0 %v7252_v50  ;;  %v7095_v50 = vcombine.low %v2676_v51, %v2692_v52  ;;  %v7065_v27 = vcombine.low %v2645_v48, %v2661_v0  ;;  %v2564_v51 = vld [vmem:[%s9948_s5 + $0x2f0] sm:$0xff]  ;;  %v2549_v52 = vld [vmem:[%s9948_s5 + $0x278] sm:$0xff] }
 0x413   :  { %6267 = vmatprep.subr.bf16.mxu1 %v7254_v2 }
 0x415   :  { %6227 = vmatpush2.bf16.msra.mxu0 %v7251_v8  ;;  %v7066_v8 = vcombine.high %v2645_v48, %v2661_v0  ;;  %v2484_v48 = vld [vmem:[%s9948_s5 + $0x70] sm:$0xff] }
 0x416   :  { %6268 = vmatpush2.bf16.msra.mxu1 %v7253_v9  ;;  %6228 = vmatprep.subr.bf16.mxu0 %v7220_v10  ;;  %v2612_v9 = vld [vmem:[%s9948_s5 + $0x470] sm:$0xff] }
 0x417   :  { %6269 = vmatprep.subr.bf16.mxu1 %v7222_v11  ;;  %v2628_v10 = vld [vmem:[%s9948_s5 + $0x4f0] sm:$0xff] }
 0x418   :  { %v7032_v46 = vcombine.high %v2612_v9, %v2628_v10  ;;  %v7031_v14 = vcombine.low %v2612_v9, %v2628_v10  ;;  %v2500_v0 = vld [vmem:[%s9948_s5 + $0xf0] sm:$0xff]  ;;  %v2981_v9 = vld [vmem:[%s9948_s5 + $0xff8] sm:$0xff] }
 0x419   :  { %6229 = vmatpush2.bf16.msra.mxu0 %v7219_v23  ;;  %v6903_v10 = vcombine.low %v2484_v48, %v2500_v0 }
 0x41a   :  { %6270 = vmatpush2.bf16.msra.mxu1 %v7221_v24  ;;  %6230 = vmatprep.subr.bf16.mxu0 %v7188_v19  ;;  %v7063_v24 = vcombine.low %v2644_v58, %v2660_v53  ;;  %v2517_v58 = vld [vmem:[%s9948_s5 + $0x178] sm:$0xff] }
 0x41b   :  { %6271 = vmatprep.subr.bf16.mxu1 %v7190_v26  ;;  %v2533_v53 = vld [vmem:[%s9948_s5 + $0x1f8] sm:$0xff] }
 0x41d   :  { %6231 = vmatpush2.bf16.msra.mxu0 %v7187_v13 }
 0x41e   :  { %6272 = vmatpush2.bf16.msra.mxu1 %v7189_v31  ;;  %6232 = vmatprep.subr.bf16.mxu0 %v7156_v34  ;;  %v2580_v31 = vld [vmem:[%s9948_s5 + $0x370] sm:$0xff] }
 0x41f   :  { %6273 = vmatprep.subr.bf16.mxu1 %v7158_v15  ;;  %v2596_v34 = vld [vmem:[%s9948_s5 + $0x3f0] sm:$0xff] }
 0x420   :  { %v6999_v17 = vcombine.low %v2580_v31, %v2596_v34 }
 0x421   :  { %6233 = vmatpush2.bf16.msra.mxu0 %v7155_v40 }
 0x422   :  { %6274 = vmatpush2.bf16.msra.mxu1 %v7157_v41  ;;  %6284 = vmatprep.subr.bf16.mxu0 %v7128_v42  ;;  %v7000_v41 = vcombine.high %v2580_v31, %v2596_v34  ;;  %v7002_v42 = vcombine.high %v2581_v37, %v2597_v38  ;;  %v2868_v38 = vld [vmem:[%s9948_s5 + $0xc70] sm:$0xff] }
 0x423   :  { %6325 = vmatprep.subr.bf16.mxu1 %v7130_v44  ;;  %v2548_v44 = vld [vmem:[%s9948_s5 + $0x270] sm:$0xff] }
 0x424   :  { %v5990_v57 = vpop.f32.mrf.mxu0  ;;  %6235 = vmatmul.mubr.bf16.vlgmr.msra.gmra.mxu0 %v8473_v36 }
 0x425   :  { %v6031_v1 = vpop.f32.mrf.mxu1  ;;  %6276 = vmatmul.mubr.bf16.vlgmr.msra.gmra.mxu1 %v8473_v36  ;;  %6285 = vmatpush1.bf16.msra.mxu0 %v7127_v16  ;;  %v5991_v43 = vadd.f32 %v5990_v57, %v3041_v33  ;;  %v2565_v16 = vld [vmem:[%s9948_s5 + $0x2f8] sm:$0xff]  ;;  %v6967_v57 = vcombine.low %v2548_v44, %v2564_v51 }
 0x426   :  { %6316 = vmatprep.mubr.bf16.mxu0 %v8471_v35  ;;  %6326 = vmatpush1.bf16.msra.mxu1 %v7129_v18  ;;  %v5992_v2 = vpop.f32.mrf.mxu0  ;;  %v6032_v11 = vadd.f32 %v6031_v1, %v3049_v59  ;;  %v6968_v18 = vcombine.high %v2548_v44, %v2564_v51  ;;  %v6970_v33 = vcombine.high %v2549_v52, %v2565_v16  ;;  %v2485_v1 = vld [vmem:[%s9948_s5 + $0x78] sm:$0xff] }
 0x427   :  { %6357 = vmatprep.mubr.bf16.mxu1 %v8471_v35  ;;  %v5993_v3 = vadd.f32 %v5992_v2, %v3045_v55  ;;  %v6033_v6 = vpop.f32.mrf.mxu1  ;;  %6286 = vmatprep.subr.bf16.mxu0 %v7096_v56  ;;  %v2613_v35 = vld [vmem:[%s9948_s5 + $0x478] sm:$0xff]  ;;  %v2516_v55 = vld [vmem:[%s9948_s5 + $0x170] sm:$0xff]  ;;  %v6969_v59 = vcombine.low %v2549_v52, %v2565_v16 }
 0x428   :  { %v6034_v12 = vadd.f32 %v6033_v6, %v3053_v60  ;;  %v5994_v20 = vpop.f32.mrf.mxu0  ;;  %6327 = vmatprep.subr.bf16.mxu1 %v7098_v28  ;;  %v7034_v13 = vcombine.high %v2613_v35, %v2629_v21  ;;  %v7033_v40 = vcombine.low %v2613_v35, %v2629_v21  ;;  %v2532_v56 = vld [vmem:[%s9948_s5 + $0x1f0] sm:$0xff]  ;;  %v6938_v28 = vcombine.high %v2517_v58, %v2533_v53 }
 0x429   :  { %v6449_v22 = vcombine.low %v5991_v43, %v5993_v3  ;;  %v6035_v23 = vpop.f32.mrf.mxu1  ;;  %6287 = vmatpush1.bf16.msra.mxu0 %v7095_v50  ;;  %v6936_v60 = vcombine.high %v2516_v55, %v2532_v56  ;;  %v2501_v50 = vld [vmem:[%s9948_s5 + $0xf8] sm:$0xff]  ;;  %v6935_v2 = vcombine.low %v2516_v55, %v2532_v56  ;;  %v2964_v3 = vld [vmem:[%s9948_s5 + $0xf70] sm:$0xff] }
 0x42a   :  { %v6450_v19 = vcombine.low %v6032_v11, %v6034_v12  ;;  %6328 = vmatpush1.bf16.msra.mxu1 %v7097_v5  ;;  %v5995_v26 = vpop.f32.mrf.mxu0  ;;  %6288 = vmatprep.subr.bf16.mxu0 %v7064_v54  ;;  %v6937_v5 = vcombine.low %v2517_v58, %v2533_v53  ;;  %v6904_v54 = vcombine.high %v2484_v48, %v2500_v0  ;;  %v2980_v6 = vld [vmem:[%s9948_s5 + $0xff0] sm:$0xff]  ;;  %v2949_v23 = vld [vmem:[%s9948_s5 + $0xef8] sm:$0xff] }
 0x42b   :  { %v6457_v29 = vrot.slane %v6449_v22, %v7945_v49  ;;  %v6036_v30 = vpop.f32.mrf.mxu1  ;;  %6329 = vmatprep.subr.bf16.mxu1 %v7066_v8  ;;  %v6906_v43 = vcombine.high %v2485_v1, %v2501_v50  ;;  %v2965_v8 = vld [vmem:[%s9948_s5 + $0xf78] sm:$0xff]  ;;  %v6905_v11 = vcombine.low %v2485_v1, %v2501_v50  ;;  %v7384_v12 = vcombine.high %v2964_v3, %v2980_v6  ;;  %v2932_v35 = vld [vmem:[%s9948_s5 + $0xe70] sm:$0xff] }
 0x42c   :  { %v6464_v15 = vrot.slane %v6450_v19, %v7945_v49  ;;  %v7386_v20 = vcombine.high %v2965_v8, %v2981_v9  ;;  %v2948_v21 = vld [vmem:[%s9948_s5 + $0xef0] sm:$0xff]  ;;  %v2933_v22 = vld [vmem:[%s9948_s5 + $0xe78] sm:$0xff]  ;;  %v7385_v19 = vcombine.low %v2965_v8, %v2981_v9 }
 0x42d   :  { %6289 = vmatpush1.bf16.msra.mxu0 %v7063_v24  ;;  %v7383_v24 = vcombine.low %v2964_v3, %v2980_v6  ;;  %v7352_v26 = vcombine.high %v2932_v35, %v2948_v21  ;;  %v2901_v30 = vld [vmem:[%s9948_s5 + $0xd78] sm:$0xff]  ;;  %v7351_v31 = vcombine.low %v2932_v35, %v2948_v21  ;;  %v7353_v34 = vcombine.low %v2933_v22, %v2949_v23  ;;  %v2836_v52 = vld [vmem:[%s9948_s5 + $0xb70] sm:$0xff] }
 0x42e   :  { %v6465_v39 = vcombine.low %v6457_v29, %v6464_v15  ;;  %6330 = vmatpush1.bf16.msra.mxu1 %v7065_v27  ;;  %6290 = vmatprep.subr.bf16.mxu0 %v7032_v46  ;;  %v7354_v27 = vcombine.high %v2933_v22, %v2949_v23  ;;  %v2900_v46 = vld [vmem:[%s9948_s5 + $0xd70] sm:$0xff] }
 0x42f   :  { %6331 = vmatprep.subr.bf16.mxu1 %v7034_v13  ;;  %v2916_v29 = vld [vmem:[%s9948_s5 + $0xdf0] sm:$0xff]  ;;  %v2917_v13 = vld [vmem:[%s9948_s5 + $0xdf8] sm:$0xff] }
 0x430   :  { %6545 = vst [vmem:[%s9950_s7 + $0x18] sm:$0xff] %v6465_v39  ;;  %v7320_v15 = vcombine.high %v2900_v46, %v2916_v29  ;;  %v7322_v37 = vcombine.high %v2901_v30, %v2917_v13  ;;  %v2869_v39 = vld [vmem:[%s9948_s5 + $0xc78] sm:$0xff]  ;;  %v2852_v16 = vld [vmem:[%s9948_s5 + $0xbf0] sm:$0xff] }
 0x431   :  { %6291 = vmatpush1.bf16.msra.mxu0 %v7031_v14  ;;  %v2884_v14 = vld [vmem:[%s9948_s5 + $0xcf0] sm:$0xff]  ;;  %v7256_v55 = vcombine.high %v2836_v52, %v2852_v16 }
 0x432   :  { %6332 = vmatpush1.bf16.msra.mxu1 %v7033_v40  ;;  %6292 = vmatprep.subr.bf16.mxu0 %v7000_v41  ;;  %v2885_v40 = vld [vmem:[%s9948_s5 + $0xcf8] sm:$0xff]  ;;  %v7319_v41 = vcombine.low %v2900_v46, %v2916_v29  ;;  %v7288_v44 = vcombine.high %v2868_v38, %v2884_v14  ;;  %v2804_v58 = vld [vmem:[%s9948_s5 + $0xa70] sm:$0xff] }
 0x433   :  { %6333 = vmatprep.subr.bf16.mxu1 %v7002_v42  ;;  %v7321_v42 = vcombine.low %v2901_v30, %v2917_v13  ;;  %v7290_v51 = vcombine.high %v2869_v39, %v2885_v40  ;;  %v2820_v53 = vld [vmem:[%s9948_s5 + $0xaf0] sm:$0xff] }
 0x434   :  { %v7224_v48 = vcombine.high %v2804_v58, %v2820_v53  ;;  %v2772_v1 = vld [vmem:[%s9948_s5 + $0x970] sm:$0xff] }
 0x435   :  { %6293 = vmatpush1.bf16.msra.mxu0 %v6999_v17  ;;  %v2837_v17 = vld [vmem:[%s9948_s5 + $0xb78] sm:$0xff]  ;;  %v2788_v50 = vld [vmem:[%s9948_s5 + $0x9f0] sm:$0xff] }
 0x436   :  { %6334 = vmatpush1.bf16.msra.mxu1 %v7001_v32  ;;  %6294 = vmatprep.subr.bf16.mxu0 %v6968_v18  ;;  %v2853_v32 = vld [vmem:[%s9948_s5 + $0xbf8] sm:$0xff]  ;;  %v7287_v18 = vcombine.low %v2868_v38, %v2884_v14  ;;  %v7192_v3 = vcombine.high %v2772_v1, %v2788_v50  ;;  %v2740_v8 = vld [vmem:[%s9948_s5 + $0x870] sm:$0xff] }
 0x437   :  { %6335 = vmatprep.subr.bf16.mxu1 %v6970_v33  ;;  %v7289_v33 = vcombine.low %v2869_v39, %v2885_v40  ;;  %v7258_v56 = vcombine.high %v2837_v17, %v2853_v32  ;;  %v2756_v9 = vld [vmem:[%s9948_s5 + $0x8f0] sm:$0xff] }
 0x438   :  { %v7160_v35 = vcombine.high %v2740_v8, %v2756_v9  ;;  %v7159_v22 = vcombine.low %v2740_v8, %v2756_v9 }
 0x439   :  { %6295 = vmatpush1.bf16.msra.mxu0 %v6967_v57  ;;  %v2805_v57 = vld [vmem:[%s9948_s5 + $0xa78] sm:$0xff] }
 0x43a   :  { %6336 = vmatpush1.bf16.msra.mxu1 %v6969_v59  ;;  %6296 = vmatprep.subr.bf16.mxu0 %v6936_v60  ;;  %v2821_v59 = vld [vmem:[%s9948_s5 + $0xaf8] sm:$0xff]  ;;  %v7255_v60 = vcombine.low %v2836_v52, %v2852_v16 }
 0x43b   :  { %6337 = vmatprep.subr.bf16.mxu1 %v6938_v28  ;;  %v7257_v28 = vcombine.low %v2837_v17, %v2853_v32  ;;  %v7226_v0 = vcombine.high %v2805_v57, %v2821_v59 }
 0x43d   :  { %6297 = vmatpush1.bf16.msra.mxu0 %v6935_v2  ;;  %v2773_v2 = vld [vmem:[%s9948_s5 + $0x978] sm:$0xff] }
 0x43e   :  { %6338 = vmatpush1.bf16.msra.mxu1 %v6937_v5  ;;  %6298 = vmatprep.subr.bf16.mxu0 %v6904_v54  ;;  %v2789_v5 = vld [vmem:[%s9948_s5 + $0x9f8] sm:$0xff]  ;;  %v7223_v54 = vcombine.low %v2804_v58, %v2820_v53 }
 0x43f   :  { %6339 = vmatprep.subr.bf16.mxu1 %v6906_v43  ;;  %v7225_v43 = vcombine.low %v2805_v57, %v2821_v59  ;;  %v7194_v6 = vcombine.high %v2773_v2, %v2789_v5 }
 0x441   :  { %6299 = vmatpush1.bf16.msra.mxu0 %v6903_v10  ;;  %v2741_v10 = vld [vmem:[%s9948_s5 + $0x878] sm:$0xff] }
 0x442   :  { %6340 = vmatpush1.bf16.msra.mxu1 %v6905_v11  ;;  %6300 = vmatprep.subr.bf16.mxu0 %v7384_v12  ;;  %v2757_v11 = vld [vmem:[%s9948_s5 + $0x8f8] sm:$0xff]  ;;  %v7191_v12 = vcombine.low %v2772_v1, %v2788_v50 }
 0x443   :  { %6341 = vmatprep.subr.bf16.mxu1 %v7386_v20  ;;  %v7193_v20 = vcombine.low %v2773_v2, %v2789_v5  ;;  %v7162_v21 = vcombine.high %v2741_v10, %v2757_v11  ;;  %v7161_v23 = vcombine.low %v2741_v10, %v2757_v11 }
 0x445   :  { %6301 = vmatpush2.bf16.msra.mxu0 %v7383_v24  ;;  %v2984_v24 = vld [vmem:[%s9949_s6 + $0x10] sm:$0xff] }
 0x446   :  { %6342 = vmatpush2.bf16.msra.mxu1 %v7385_v19  ;;  %6302 = vmatprep.subr.bf16.mxu0 %v7352_v26  ;;  %v3057_v19 = vrot.slane %v2984_v24, %v8172_v45  ;;  %v3061_v26 = vrot.slane %v2984_v24, %v8180_v47  ;;  %v3065_v46 = vrot.slane %v2984_v24, %v8301_v4 }
 0x447   :  { %6343 = vmatprep.subr.bf16.mxu1 %v7354_v27  ;;  %v3069_v29 = vrot.slane %v2984_v24, %v8310_v7  ;;  %v3077_v17 = vrot.slane %v2984_v24, %v9274_v62 }
 0x449   :  { %6303 = vmatpush2.bf16.msra.mxu0 %v7351_v31 }
 0x44a   :  { %6344 = vmatpush2.bf16.msra.mxu1 %v7353_v34  ;;  %6304 = vmatprep.subr.bf16.mxu0 %v7320_v15 }
 0x44b   :  { %6345 = vmatprep.subr.bf16.mxu1 %v7322_v37 }
 0x44d   :  { %6305 = vmatpush2.bf16.msra.mxu0 %v7319_v41 }
 0x44e   :  { %6346 = vmatpush2.bf16.msra.mxu1 %v7321_v42  ;;  %6306 = vmatprep.subr.bf16.mxu0 %v7288_v44 }
 0x44f   :  { %6347 = vmatprep.subr.bf16.mxu1 %v7290_v51 }
 0x451   :  { %6307 = vmatpush2.bf16.msra.mxu0 %v7287_v18  ;;  %v3081_v18 = vrot.slane %v2984_v24, %v9271_v61 }
 0x452   :  { %6348 = vmatpush2.bf16.msra.mxu1 %v7289_v33  ;;  %6308 = vmatprep.subr.bf16.mxu0 %v7256_v55  ;;  %v3085_v33 = vrot.slane %v2984_v24, %v9277_v63 }
 0x453   :  { %6349 = vmatprep.subr.bf16.mxu1 %v7258_v56 }
 0x455   :  { %6309 = vmatpush2.bf16.msra.mxu0 %v7255_v60 }
 0x456   :  { %6350 = vmatpush2.bf16.msra.mxu1 %v7257_v28  ;;  %6310 = vmatprep.subr.bf16.mxu0 %v7224_v48 }
 0x457   :  { %6351 = vmatprep.subr.bf16.mxu1 %v7226_v0 }
 0x459   :  { %6311 = vmatpush2.bf16.msra.mxu0 %v7223_v54 }
 0x45a   :  { %6352 = vmatpush2.bf16.msra.mxu1 %v7225_v43  ;;  %6312 = vmatprep.subr.bf16.mxu0 %v7192_v3  ;;  %v2985_v3 = vld [vmem:[%s9949_s6 + $0x18] sm:$0xff] }
 0x45b   :  { %6353 = vmatprep.subr.bf16.mxu1 %v7194_v6  ;;  %v3089_v6 = vrot.slane %v2985_v3, %v8172_v45  ;;  %v3093_v8 = vrot.slane %v2985_v3, %v8180_v47  ;;  %v3097_v10 = vrot.slane %v2985_v3, %v8301_v4  ;;  %v3101_v11 = vrot.slane %v2985_v3, %v8310_v7 }
 0x45c   :  { %v3105_v7 = vrot.slane %v2985_v3, %v9268_v25 }
 0x45d   :  { %6313 = vmatpush2.bf16.msra.mxu0 %v7191_v12 }
 0x45e   :  { %6354 = vmatpush2.bf16.msra.mxu1 %v7193_v20  ;;  %6314 = vmatprep.subr.bf16.mxu0 %v7160_v35 }
 0x45f   :  { %6355 = vmatprep.subr.bf16.mxu1 %v7162_v21 }
 0x461   :  { %6315 = vmatpush2.bf16.msra.mxu0 %v7159_v22 }
 0x462   :  { %6356 = vmatpush2.bf16.msra.mxu1 %v7161_v23 }
 0x464   :  { %v6072_v27 = vpop.f32.mrf.mxu0  ;;  %6317 = vmatmul.mubr.bf16.vlgmr.msra.gmra.mxu0 %v8473_v36 }
 0x465   :  { %v6113_v30 = vpop.f32.mrf.mxu1  ;;  %6358 = vmatmul.mubr.bf16.vlgmr.msra.gmra.mxu1 %v8473_v36  ;;  %v6073_v31 = vadd.f32 %v6072_v27, %v3057_v19  ;;  %v3073_v36 = vrot.slane %v2984_v24, %v9268_v25 }
 0x466   :  { %v6074_v13 = vpop.f32.mrf.mxu0  ;;  %v6114_v37 = vadd.f32 %v6113_v30, %v3065_v46 }
 0x467   :  { %v6075_v34 = vadd.f32 %v6074_v13, %v3061_v26  ;;  %v6115_v15 = vpop.f32.mrf.mxu1  ;;  %v3109_v13 = vrot.slane %v2985_v3, %v9274_v62 }
 0x468   :  { %v6116_v38 = vadd.f32 %v6115_v15, %v3069_v29  ;;  %v6076_v14 = vpop.f32.mrf.mxu0  ;;  %v3117_v15 = vrot.slane %v2985_v3, %v9277_v63 }
 0x469   :  { %v6466_v39 = vcombine.low %v6073_v31, %v6075_v34  ;;  %v6117_v40 = vpop.f32.mrf.mxu1  ;;  %v3113_v34 = vrot.slane %v2985_v3, %v9271_v61 }
 0x46a   :  { %v6467_v41 = vcombine.low %v6114_v37, %v6116_v38  ;;  %v6077_v42 = vpop.f32.mrf.mxu0 }
 0x46b   :  { %v6474_v44 = vrot.slane %v6466_v39, %v7945_v49  ;;  %v6118_v51 = vpop.f32.mrf.mxu1 }
 0x46c   :  { %v6481_v52 = vrot.slane %v6467_v41, %v7945_v49 }
 0x46e   :  { %v6482_v16 = vcombine.low %v6474_v44, %v6481_v52 }
 0x470   :  { %6546 = vst [vmem:[%s9950_s7 + $0x20] sm:$0xff] %v6482_v16 }
 0x4a4   :  { %v6154_v32 = vpop.f32.mrf.mxu0 }
 0x4a5   :  { %v6195_v55 = vpop.f32.mrf.mxu1  ;;  %v6155_v58 = vadd.f32 %v6154_v32, %v3073_v36 }
 0x4a6   :  { %v6156_v56 = vpop.f32.mrf.mxu0  ;;  %v6196_v59 = vadd.f32 %v6195_v55, %v3081_v18 }
 0x4a7   :  { %v6157_v53 = vadd.f32 %v6156_v56, %v3077_v17  ;;  %v6197_v57 = vpop.f32.mrf.mxu1 }
 0x4a8   :  { %v6198_v60 = vadd.f32 %v6197_v57, %v3085_v33  ;;  %v6158_v28 = vpop.f32.mrf.mxu0 }
 0x4a9   :  { %v6483_v48 = vcombine.low %v6155_v58, %v6157_v53  ;;  %v6199_v0 = vpop.f32.mrf.mxu1 }
 0x4aa   :  { %v6484_v1 = vcombine.low %v6196_v59, %v6198_v60  ;;  %v6159_v50 = vpop.f32.mrf.mxu0 }
 0x4ab   :  { %v6491_v2 = vrot.slane %v6483_v48, %v7945_v49  ;;  %v6200_v5 = vpop.f32.mrf.mxu1 }
 0x4ac   :  { %v6498_v54 = vrot.slane %v6484_v1, %v7945_v49 }
 0x4ae   :  { %v6499_v43 = vcombine.low %v6491_v2, %v6498_v54 }
 0x4b0   :  { %6547 = vst [vmem:[%s9950_s7 + $0x28] sm:$0xff] %v6499_v43 }
 0x4e4   :  { %v6236_v9 = vpop.f32.mrf.mxu0 }
 0x4e5   :  { %v6277_v12 = vpop.f32.mrf.mxu1  ;;  %v6237_v35 = vadd.f32 %v6236_v9, %v3089_v6 }
 0x4e6   :  { %v6238_v20 = vpop.f32.mrf.mxu0  ;;  %v6278_v23 = vadd.f32 %v6277_v12, %v3097_v10 }
 0x4e7   :  { %v6239_v21 = vadd.f32 %v6238_v20, %v3093_v8  ;;  %v6279_v22 = vpop.f32.mrf.mxu1 }
 0x4e8   :  { %v6280_v24 = vadd.f32 %v6279_v22, %v3101_v11  ;;  %v6240_v19 = vpop.f32.mrf.mxu0 }
 0x4e9   :  { %v6500_v26 = vcombine.low %v6237_v35, %v6239_v21  ;;  %v6281_v27 = vpop.f32.mrf.mxu1 }
 0x4ea   :  { %v6501_v46 = vcombine.low %v6278_v23, %v6280_v24  ;;  %v6241_v29 = vpop.f32.mrf.mxu0 }
 0x4eb   :  { %v6508_v45 = vrot.slane %v6500_v26, %v7945_v49  ;;  %v6282_v47 = vpop.f32.mrf.mxu1 }
 0x4ec   :  { %v6515_v30 = vrot.slane %v6501_v46, %v7945_v49 }
 0x4ee   :  { %v6516_v4 = vcombine.low %v6508_v45, %v6515_v30 }
 0x4f0   :  { %6548 = vst [vmem:[%s9950_s7 + $0x30] sm:$0xff] %v6516_v4 }
 0x524   :  { %v6318_v31 = vpop.f32.mrf.mxu0 }
 0x525   :  { %v6359_v37 = vpop.f32.mrf.mxu1  ;;  %v6319_v14 = vadd.f32 %v6318_v31, %v3105_v7 }
 0x526   :  { %v6320_v38 = vpop.f32.mrf.mxu0  ;;  %v6360_v41 = vadd.f32 %v6359_v37, %v3113_v34 }
 0x527   :  { %v6321_v39 = vadd.f32 %v6320_v38, %v3109_v13  ;;  %v6361_v40 = vpop.f32.mrf.mxu1 }
 0x528   :  { %v6362_v42 = vadd.f32 %v6361_v40, %v3117_v15  ;;  %v6322_v44 = vpop.f32.mrf.mxu0 }
 0x529   :  { %v6517_v51 = vcombine.low %v6319_v14, %v6321_v39  ;;  %v6363_v52 = vpop.f32.mrf.mxu1 }
 0x52a   :  { %v6518_v16 = vcombine.low %v6360_v41, %v6362_v42  ;;  %v6323_v36 = vpop.f32.mrf.mxu0 }
 0x52b   :  { %v6525_v25 = vrot.slane %v6517_v51, %v7945_v49  ;;  %v6364_v62 = vpop.f32.mrf.mxu1 }
 0x52c   :  { %v6532_v17 = vrot.slane %v6518_v16, %v7945_v49 }
 0x52e   :  { %v6533_v61 = vcombine.low %v6525_v25, %v6532_v17 }
 0x530   :  { %6549 = vst [vmem:[%s9950_s7 + $0x38] sm:$0xff] %v6533_v61 }
 0x531   :  { %6554 = vsyncpa [#allocation3], 1 }

</bundles_post_ra>
